<compile_context>
chip_gen: v5e
topology: v5e:2x2
jax: 0.10.0
libtpu: 0.0.40
codegen_flags: <defaults>
</compile_context>

<pallas_src>
import math
from functools import partial

import numpy as np
import jax
import jax.numpy as jnp
from jax import lax
from jax.experimental import pallas as pl
from jax.experimental.pallas import tpu as pltpu

LN_EPS = 1e-5


def _round_up(n, m):
    return ((n + m - 1) // m) * m


# --------------------------- fully fused kernel -----------------------------

def _decoder_kernel(n_layers, with_loss, inv_count, *refs):
    # refs: latent, (W, bias, gamma, beta) * n_layers, Wf, bf, [trg], gen, [l1]
    it = iter(refs)
    latent_ref = next(it)
    layer_refs = [(next(it), next(it), next(it), next(it)) for _ in range(n_layers)]
    wf_ref, bf_ref = next(it), next(it)
    trg_ref = next(it) if with_loss else None
    gen_ref = next(it)
    l1_ref = next(it) if with_loss else None

    x = latent_ref[...]                                     # (B, K0p) bf16
    for w_ref, b_ref, g_ref, be_ref in layer_refs:
        # ConvTranspose2d lowered at init time to a dense matmul (bf16 x bf16,
        # f32 accumulation).  Output is the flattened NCHW slab (B, Cout*H*W).
        y = jnp.dot(x, w_ref[...], preferred_element_type=jnp.float32)
        y = y + b_ref[...]                                   # (B, N) + (1, N)
        # LayerNorm over the whole (Cout, H, W) slab of each sample (two-pass)
        mu = jnp.mean(y, axis=-1, keepdims=True)
        d = y - mu
        var = jnp.mean(d * d, axis=-1, keepdims=True)
        z = d * lax.rsqrt(var + LN_EPS) * g_ref[...] + be_ref[...]
        x = jnp.maximum(z, 0.0).astype(jnp.bfloat16)         # ReLU; bf16 to next MXU

    # final Conv2d(k=7, pad=3) as a dense matmul + Sigmoid
    y = jnp.dot(x, wf_ref[...], preferred_element_type=jnp.float32) + bf_ref[...]
    gen = jax.nn.sigmoid(y)
    gen_ref[...] = gen                                       # lane-dense (B, C*H*W)
    if with_loss:
        l1_ref[0, 0] = jnp.sum(jnp.abs(gen - trg_ref[...])) * inv_count


def _vmem():
    return pl.BlockSpec(memory_space=pltpu.MemorySpace.VMEM)


def image_decoder_forward(latent_feat, prep, trg_img=None):
    B, C = latent_feat.shape
    n_out = prep["out_nc"] * prep["img_size"] * prep["img_size"]
    with_loss = trg_img is not None

    # zero-pad latent features so the first contraction dim is a multiple of 128
    x0 = jnp.pad(latent_feat, ((0, 0), (0, prep["k0_pad"] - C))).astype(jnp.bfloat16)

    args = [x0]
    for lp in prep["layers"]:
        args += [lp["w"], lp["bias"], lp["gamma"], lp["beta"]]
    args += [prep["wf"], prep["bf"]]
    if with_loss:
        args.append(trg_img.reshape(B, n_out).astype(jnp.float32))

    out_shape = [jax.ShapeDtypeStruct((B, n_out), jnp.float32)]
    out_specs = [_vmem()]
    if with_loss:
        out_shape.append(jax.ShapeDtypeStruct((1, 1), jnp.float32))
        out_specs.append(pl.BlockSpec(memory_space=pltpu.MemorySpace.SMEM))

    inv_count = 1.0 / float(B * n_out)
    w_sizes = [int(lp["w"].shape[0]) * int(lp["w"].shape[1]) for lp in prep["layers"]]
    w_sizes.append(int(prep["wf"].shape[0]) * int(prep["wf"].shape[1]))
    cost = pl.CostEstimate(
        flops=int(2 * B * sum(w_sizes) + 12 * B * n_out),
        transcendentals=int(B * n_out),
        bytes_accessed=int(sum(int(np.prod(a.shape)) * a.dtype.itemsize for a in args)
                           + B * n_out * 4 + 4))

    outs = pl.pallas_call(
        partial(_decoder_kernel, len(prep["layers"]), with_loss, inv_count),
        out_shape=tuple(out_shape),
        in_specs=[_vmem() for _ in args],
        out_specs=tuple(out_specs),
        cost_estimate=cost,
    )(*args)

    gen = outs[0].reshape(B, prep["out_nc"], prep["img_size"], prep["img_size"])
    output = {"gen_imgs": gen}
    if with_loss:
        output["img_l1loss"] = outs[1][0, 0]
    return output


# ------------------- one-time parameter re-layout (host) --------------------

def prepare_params(layers, final):
    """Lower every (transposed-)conv to a dense matmul matrix, once, on host."""
    hin = win = 1
    input_nc = int(layers[0]["w"].shape[0])
    k0_pad = _round_up(input_nc * hin * win, 128)

    prep_layers = []
    first = True
    for lp in layers:
        w = np.asarray(lp["w"], np.float32)            # (Cin, Cout, k, k)
        cin, cout, k, _ = w.shape
        s, p, op = lp["stride"], lp["pad"], lp["out_pad"]
        hout = (hin - 1) * s - 2 * p + k + op
        wout = (win - 1) * s - 2 * p + k + op
        K, N = cin * hin * win, cout * hout * wout
        # W_eff[ci,iy,ix, co,oy,ox] = w[ci,co,ky,kx] with oy=iy*s+ky-p, ox=ix*s+kx-p
        m = np.zeros((cin, hin, win, cout, hout, wout), np.float32)
        for iy in range(hin):
            for ky in range(k):
                oy = iy * s + ky - p
                if not (0 <= oy < hout):
                    continue
                for ix in range(win):
                    for kx in range(k):
                        ox = ix * s + kx - p
                        if not (0 <= ox < wout):
                            continue
                        m[:, iy, ix, :, oy, ox] += w[:, :, ky, kx]
        m = m.reshape(K, N)
        if first and k0_pad != K:                       # pad contraction dim to 128
            m = np.pad(m, ((0, k0_pad - K), (0, 0)))
        prep_layers.append(dict(
            w=jnp.asarray(m, jnp.bfloat16),
            bias=jnp.asarray(np.repeat(np.asarray(lp["b"], np.float32),
                                       hout * wout).reshape(1, N)),
            gamma=jnp.asarray(np.asarray(lp["gamma"], np.float32).reshape(1, N)),
            beta=jnp.asarray(np.asarray(lp["beta"], np.float32).reshape(1, N)),
        ))
        hin, win = hout, wout
        first = False

    # final Conv2d (stride 1, pad k//2)
    wf = np.asarray(final["w"], np.float32)             # (Cout, Cin, k, k)
    cout, cin, k, _ = wf.shape
    p = final["pad"]
    hout, wout = hin, win
    K, N = cin * hin * win, cout * hout * wout
    m = np.zeros((cin, hin, win, cout, hout, wout), np.float32)
    for ky in range(k):
        for kx in range(k):
            wk = wf[:, :, ky, kx].T                      # (Cin, Cout)
            for oy in range(hout):
                iy = oy + ky - p
                if not (0 <= iy < hin):
                    continue
                for ox in range(wout):
                    ix = ox + kx - p
                    if not (0 <= ix < win):
                        continue
                    m[:, iy, ix, :, oy, ox] += wk
    m = m.reshape(K, N)
    return dict(
        layers=prep_layers,
        wf=jnp.asarray(m, jnp.bfloat16),
        bf=jnp.asarray(np.repeat(np.asarray(final["b"], np.float32),
                                 hout * wout).reshape(1, N)),
        k0_pad=k0_pad, out_nc=cout, img_size=hout)


# --------------------------- parameter construction -------------------------

def init_params(key, img_size, input_nc, output_nc, ngf):
    # Raw parameters in PyTorch layout (ConvTranspose2d weight: (Cin,Cout,k,k)).
    n_up = int(round(math.log(img_size, 2)))
    ks_list = [3] * (n_up // 3) + [5] * (n_up - n_up // 3)
    chn = [2 ** (n_up - i - 1) * ngf for i in range(n_up)]
    cins = [input_nc] + chn[:-1]
    layers = []
    for i in range(n_up):
        k = ks_list[i]
        cin, cout = cins[i], chn[i]
        sp = 2 ** (i + 1)
        key, k1, k2, k3, k4 = jax.random.split(key, 5)
        layers.append(dict(
            w=0.05 * jax.random.normal(k1, (cin, cout, k, k), jnp.float32),
            b=0.05 * jax.random.normal(k2, (cout,), jnp.float32),
            gamma=1.0 + 0.1 * jax.random.normal(k3, (cout, sp, sp), jnp.float32),
            beta=0.1 * jax.random.normal(k4, (cout, sp, sp), jnp.float32),
            k=k, stride=2, pad=k // 2, out_pad=1,
        ))
    key, k1, k2 = jax.random.split(key, 3)
    final = dict(
        w=0.05 * jax.random.normal(k1, (output_nc, chn[-1], 7, 7), jnp.float32),
        b=0.05 * jax.random.normal(k2, (output_nc,), jnp.float32),
        k=7, pad=3,
    )
    return layers, final


# ------------------------- pure-JAX reference (check) -----------------------

def reference_forward(latent_feat, layers, final, trg_img=None):
    B, C = latent_feat.shape
    x = latent_feat.reshape(B, C, 1, 1)
    for lp in layers:
        k, s, p, op = lp["k"], lp["stride"], lp["pad"], lp["out_pad"]
        w_conv = jnp.transpose(lp["w"], (1, 0, 2, 3))[:, :, ::-1, ::-1]
        pad_lo, pad_hi = k - 1 - p, k - 1 - p + op
        y = lax.conv_general_dilated(
            x, w_conv, window_strides=(1, 1),
            padding=[(pad_lo, pad_hi), (pad_lo, pad_hi)],
            lhs_dilation=(s, s),
            dimension_numbers=("NCHW", "OIHW", "NCHW"))
        y = y + lp["b"][None, :, None, None]
        mu = jnp.mean(y, axis=(1, 2, 3), keepdims=True)
        var = jnp.mean((y - mu) ** 2, axis=(1, 2, 3), keepdims=True)
        y = (y - mu) * lax.rsqrt(var + LN_EPS)
        y = y * lp["gamma"][None] + lp["beta"][None]
        x = jnp.maximum(y, 0.0)
    y = lax.conv_general_dilated(
        x, final["w"], (1, 1), padding=[(3, 3), (3, 3)],
        dimension_numbers=("NCHW", "OIHW", "NCHW"))
    y = y + final["b"][None, :, None, None]
    gen = jax.nn.sigmoid(y)
    out = {"gen_imgs": gen}
    if trg_img is not None:
        out["img_l1loss"] = jnp.mean(jnp.abs(gen - trg_img))
    return out


# ---------------------------------- main -------------------------------------

if __name__ == "__main__":
    img_size, input_nc, output_nc, ngf = 16, 32, 3, 4
    B = 2

    key = jax.random.PRNGKey(0)
    key, kp, kx, kt = jax.random.split(key, 4)
    layers, final = init_params(kp, img_size, input_nc, output_nc, ngf)
    prep = prepare_params(layers, final)
    latent_feat = jax.random.normal(kx, (B, input_nc), jnp.float32)
    trg_img = jax.random.uniform(kt, (B, output_nc, img_size, img_size), jnp.float32)

    fwd = jax.jit(lambda lf, ti: image_decoder_forward(lf, prep, ti))
    out = jax.block_until_ready(fwd(latent_feat, trg_img))

    ref = reference_forward(latent_feat, layers, final, trg_img=trg_img)
    # bf16 MXU operands (f32 accumulation) vs f32 XLA reference -> bf16 tolerances.
    np.testing.assert_allclose(np.asarray(out["gen_imgs"]),
                               np.asarray(ref["gen_imgs"]),
                               rtol=2e-2, atol=2e-2)
    np.testing.assert_allclose(float(out["img_l1loss"]),
                               float(ref["img_l1loss"]),
                               rtol=2e-2, atol=2e-2)

    print("KERNEL_OK")
</pallas_src>

<mosaic_0001>
module attributes {stable_mosaic.version = 11 : i64} {
  func.func @_decoder_kernel(%arg0: memref<2x128xbf16, #tpu.memory_space<vmem>>, %arg1: memref<128x128xbf16, #tpu.memory_space<vmem>>, %arg2: memref<1x128xf32, #tpu.memory_space<vmem>>, %arg3: memref<1x128xf32, #tpu.memory_space<vmem>>, %arg4: memref<1x128xf32, #tpu.memory_space<vmem>>, %arg5: memref<128x256xbf16, #tpu.memory_space<vmem>>, %arg6: memref<1x256xf32, #tpu.memory_space<vmem>>, %arg7: memref<1x256xf32, #tpu.memory_space<vmem>>, %arg8: memref<1x256xf32, #tpu.memory_space<vmem>>, %arg9: memref<256x512xbf16, #tpu.memory_space<vmem>>, %arg10: memref<1x512xf32, #tpu.memory_space<vmem>>, %arg11: memref<1x512xf32, #tpu.memory_space<vmem>>, %arg12: memref<1x512xf32, #tpu.memory_space<vmem>>, %arg13: memref<512x1024xbf16, #tpu.memory_space<vmem>>, %arg14: memref<1x1024xf32, #tpu.memory_space<vmem>>, %arg15: memref<1x1024xf32, #tpu.memory_space<vmem>>, %arg16: memref<1x1024xf32, #tpu.memory_space<vmem>>, %arg17: memref<1024x768xbf16, #tpu.memory_space<vmem>>, %arg18: memref<1x768xf32, #tpu.memory_space<vmem>>, %arg19: memref<2x768xf32, #tpu.memory_space<vmem>>, %arg20: memref<2x768xf32, #tpu.memory_space<vmem>>, %arg21: memref<1x1xf32, #tpu.memory_space<smem>>) attributes {dimension_semantics = [], scalar_prefetch = 0 : i64, scratch_operands = 0 : i64, tpu.core_type = #tpu.core_type<tc>} {
    %c0 = arith.constant 0 : index
    %c0_0 = arith.constant 0 : index
    %0 = vector.load %arg0[%c0, %c0_0] : memref<2x128xbf16, #tpu.memory_space<vmem>>, vector<2x128xbf16>
    %c0_1 = arith.constant 0 : index
    %c0_2 = arith.constant 0 : index
    %1 = vector.load %arg1[%c0_1, %c0_2] : memref<128x128xbf16, #tpu.memory_space<vmem>>, vector<128x128xbf16>
    %cst = arith.constant dense<0.000000e+00> : vector<2x128xf32>
    %2 = tpu.matmul %0, %1, %cst {dimension_numbers = #tpu.dot_dimension_numbers<[1], [0], [0], [1], [0, 0, 1, 1], [], []>} : vector<2x128xbf16>, vector<128x128xbf16>, vector<2x128xf32> -> vector<2x128xf32>
    %c0_3 = arith.constant 0 : index
    %c0_4 = arith.constant 0 : index
    %3 = vector.load %arg2[%c0_3, %c0_4] : memref<1x128xf32, #tpu.memory_space<vmem>>, vector<1x128xf32>
    %4 = vector.broadcast %3 : vector<1x128xf32> to vector<2x128xf32>
    %5 = arith.addf %2, %4 : vector<2x128xf32>
    %cst_5 = arith.constant dense<0.000000e+00> : vector<2xf32>
    %6 = vector.multi_reduction <add>, %5, %cst_5 [1] : vector<2x128xf32> to vector<2xf32>
    %7 = vector.shape_cast %6 : vector<2xf32> to vector<2x1xf32>
    %cst_6 = arith.constant 1.280000e+02 : f32
    %8 = vector.broadcast %cst_6 : f32 to vector<2x1xf32>
    %9 = arith.divf %7, %8 : vector<2x1xf32>
    %10 = vector.broadcast %9 : vector<2x1xf32> to vector<2x128xf32>
    %11 = arith.subf %5, %10 : vector<2x128xf32>
    %12 = arith.mulf %11, %11 : vector<2x128xf32>
    %cst_7 = arith.constant dense<0.000000e+00> : vector<2xf32>
    %13 = vector.multi_reduction <add>, %12, %cst_7 [1] : vector<2x128xf32> to vector<2xf32>
    %14 = vector.shape_cast %13 : vector<2xf32> to vector<2x1xf32>
    %cst_8 = arith.constant 1.280000e+02 : f32
    %15 = vector.broadcast %cst_8 : f32 to vector<2x1xf32>
    %16 = arith.divf %14, %15 : vector<2x1xf32>
    %cst_9 = arith.constant 9.99999974E-6 : f32
    %17 = vector.broadcast %cst_9 : f32 to vector<2x1xf32>
    %18 = arith.addf %16, %17 : vector<2x1xf32>
    %19 = math.rsqrt %18 : vector<2x1xf32>
    %20 = vector.broadcast %19 : vector<2x1xf32> to vector<2x128xf32>
    %21 = arith.mulf %11, %20 : vector<2x128xf32>
    %c0_10 = arith.constant 0 : index
    %c0_11 = arith.constant 0 : index
    %22 = vector.load %arg3[%c0_10, %c0_11] : memref<1x128xf32, #tpu.memory_space<vmem>>, vector<1x128xf32>
    %23 = vector.broadcast %22 : vector<1x128xf32> to vector<2x128xf32>
    %24 = arith.mulf %21, %23 : vector<2x128xf32>
    %c0_12 = arith.constant 0 : index
    %c0_13 = arith.constant 0 : index
    %25 = vector.load %arg4[%c0_12, %c0_13] : memref<1x128xf32, #tpu.memory_space<vmem>>, vector<1x128xf32>
    %26 = vector.broadcast %25 : vector<1x128xf32> to vector<2x128xf32>
    %27 = arith.addf %24, %26 : vector<2x128xf32>
    %cst_14 = arith.constant 0.000000e+00 : f32
    %28 = vector.broadcast %cst_14 : f32 to vector<2x128xf32>
    %29 = arith.maximumf %27, %28 : vector<2x128xf32>
    %30 = arith.truncf %29 : vector<2x128xf32> to vector<2x128xbf16>
    %c0_15 = arith.constant 0 : index
    %c0_16 = arith.constant 0 : index
    %31 = vector.load %arg5[%c0_15, %c0_16] : memref<128x256xbf16, #tpu.memory_space<vmem>>, vector<128x256xbf16>
    %cst_17 = arith.constant dense<0.000000e+00> : vector<2x256xf32>
    %32 = tpu.matmul %30, %31, %cst_17 {dimension_numbers = #tpu.dot_dimension_numbers<[1], [0], [0], [1], [0, 0, 1, 1], [], []>} : vector<2x128xbf16>, vector<128x256xbf16>, vector<2x256xf32> -> vector<2x256xf32>
    %c0_18 = arith.constant 0 : index
    %c0_19 = arith.constant 0 : index
    %33 = vector.load %arg6[%c0_18, %c0_19] : memref<1x256xf32, #tpu.memory_space<vmem>>, vector<1x256xf32>
    %34 = vector.broadcast %33 : vector<1x256xf32> to vector<2x256xf32>
    %35 = arith.addf %32, %34 : vector<2x256xf32>
    %cst_20 = arith.constant dense<0.000000e+00> : vector<2xf32>
    %36 = vector.multi_reduction <add>, %35, %cst_20 [1] : vector<2x256xf32> to vector<2xf32>
    %37 = vector.shape_cast %36 : vector<2xf32> to vector<2x1xf32>
    %cst_21 = arith.constant 2.560000e+02 : f32
    %38 = vector.broadcast %cst_21 : f32 to vector<2x1xf32>
    %39 = arith.divf %37, %38 : vector<2x1xf32>
    %40 = vector.broadcast %39 : vector<2x1xf32> to vector<2x256xf32>
    %41 = arith.subf %35, %40 : vector<2x256xf32>
    %42 = arith.mulf %41, %41 : vector<2x256xf32>
    %cst_22 = arith.constant dense<0.000000e+00> : vector<2xf32>
    %43 = vector.multi_reduction <add>, %42, %cst_22 [1] : vector<2x256xf32> to vector<2xf32>
    %44 = vector.shape_cast %43 : vector<2xf32> to vector<2x1xf32>
    %cst_23 = arith.constant 2.560000e+02 : f32
    %45 = vector.broadcast %cst_23 : f32 to vector<2x1xf32>
    %46 = arith.divf %44, %45 : vector<2x1xf32>
    %cst_24 = arith.constant 9.99999974E-6 : f32
    %47 = vector.broadcast %cst_24 : f32 to vector<2x1xf32>
    %48 = arith.addf %46, %47 : vector<2x1xf32>
    %49 = math.rsqrt %48 : vector<2x1xf32>
    %50 = vector.broadcast %49 : vector<2x1xf32> to vector<2x256xf32>
    %51 = arith.mulf %41, %50 : vector<2x256xf32>
    %c0_25 = arith.constant 0 : index
    %c0_26 = arith.constant 0 : index
    %52 = vector.load %arg7[%c0_25, %c0_26] : memref<1x256xf32, #tpu.memory_space<vmem>>, vector<1x256xf32>
    %53 = vector.broadcast %52 : vector<1x256xf32> to vector<2x256xf32>
    %54 = arith.mulf %51, %53 : vector<2x256xf32>
    %c0_27 = arith.constant 0 : index
    %c0_28 = arith.constant 0 : index
    %55 = vector.load %arg8[%c0_27, %c0_28] : memref<1x256xf32, #tpu.memory_space<vmem>>, vector<1x256xf32>
    %56 = vector.broadcast %55 : vector<1x256xf32> to vector<2x256xf32>
    %57 = arith.addf %54, %56 : vector<2x256xf32>
    %cst_29 = arith.constant 0.000000e+00 : f32
    %58 = vector.broadcast %cst_29 : f32 to vector<2x256xf32>
    %59 = arith.maximumf %57, %58 : vector<2x256xf32>
    %60 = arith.truncf %59 : vector<2x256xf32> to vector<2x256xbf16>
    %c0_30 = arith.constant 0 : index
    %c0_31 = arith.constant 0 : index
    %61 = vector.load %arg9[%c0_30, %c0_31] : memref<256x512xbf16, #tpu.memory_space<vmem>>, vector<256x512xbf16>
    %cst_32 = arith.constant dense<0.000000e+00> : vector<2x512xf32>
    %62 = tpu.matmul %60, %61, %cst_32 {dimension_numbers = #tpu.dot_dimension_numbers<[1], [0], [0], [1], [0, 0, 1, 1], [], []>} : vector<2x256xbf16>, vector<256x512xbf16>, vector<2x512xf32> -> vector<2x512xf32>
    %c0_33 = arith.constant 0 : index
    %c0_34 = arith.constant 0 : index
    %63 = vector.load %arg10[%c0_33, %c0_34] : memref<1x512xf32, #tpu.memory_space<vmem>>, vector<1x512xf32>
    %64 = vector.broadcast %63 : vector<1x512xf32> to vector<2x512xf32>
    %65 = arith.addf %62, %64 : vector<2x512xf32>
    %cst_35 = arith.constant dense<0.000000e+00> : vector<2xf32>
    %66 = vector.multi_reduction <add>, %65, %cst_35 [1] : vector<2x512xf32> to vector<2xf32>
    %67 = vector.shape_cast %66 : vector<2xf32> to vector<2x1xf32>
    %cst_36 = arith.constant 5.120000e+02 : f32
    %68 = vector.broadcast %cst_36 : f32 to vector<2x1xf32>
    %69 = arith.divf %67, %68 : vector<2x1xf32>
    %70 = vector.broadcast %69 : vector<2x1xf32> to vector<2x512xf32>
    %71 = arith.subf %65, %70 : vector<2x512xf32>
    %72 = arith.mulf %71, %71 : vector<2x512xf32>
    %cst_37 = arith.constant dense<0.000000e+00> : vector<2xf32>
    %73 = vector.multi_reduction <add>, %72, %cst_37 [1] : vector<2x512xf32> to vector<2xf32>
    %74 = vector.shape_cast %73 : vector<2xf32> to vector<2x1xf32>
    %cst_38 = arith.constant 5.120000e+02 : f32
    %75 = vector.broadcast %cst_38 : f32 to vector<2x1xf32>
    %76 = arith.divf %74, %75 : vector<2x1xf32>
    %cst_39 = arith.constant 9.99999974E-6 : f32
    %77 = vector.broadcast %cst_39 : f32 to vector<2x1xf32>
    %78 = arith.addf %76, %77 : vector<2x1xf32>
    %79 = math.rsqrt %78 : vector<2x1xf32>
    %80 = vector.broadcast %79 : vector<2x1xf32> to vector<2x512xf32>
    %81 = arith.mulf %71, %80 : vector<2x512xf32>
    %c0_40 = arith.constant 0 : index
    %c0_41 = arith.constant 0 : index
    %82 = vector.load %arg11[%c0_40, %c0_41] : memref<1x512xf32, #tpu.memory_space<vmem>>, vector<1x512xf32>
    %83 = vector.broadcast %82 : vector<1x512xf32> to vector<2x512xf32>
    %84 = arith.mulf %81, %83 : vector<2x512xf32>
    %c0_42 = arith.constant 0 : index
    %c0_43 = arith.constant 0 : index
    %85 = vector.load %arg12[%c0_42, %c0_43] : memref<1x512xf32, #tpu.memory_space<vmem>>, vector<1x512xf32>
    %86 = vector.broadcast %85 : vector<1x512xf32> to vector<2x512xf32>
    %87 = arith.addf %84, %86 : vector<2x512xf32>
    %cst_44 = arith.constant 0.000000e+00 : f32
    %88 = vector.broadcast %cst_44 : f32 to vector<2x512xf32>
    %89 = arith.maximumf %87, %88 : vector<2x512xf32>
    %90 = arith.truncf %89 : vector<2x512xf32> to vector<2x512xbf16>
    %c0_45 = arith.constant 0 : index
    %c0_46 = arith.constant 0 : index
    %91 = vector.load %arg13[%c0_45, %c0_46] : memref<512x1024xbf16, #tpu.memory_space<vmem>>, vector<512x1024xbf16>
    %cst_47 = arith.constant dense<0.000000e+00> : vector<2x1024xf32>
    %92 = tpu.matmul %90, %91, %cst_47 {dimension_numbers = #tpu.dot_dimension_numbers<[1], [0], [0], [1], [0, 0, 1, 1], [], []>} : vector<2x512xbf16>, vector<512x1024xbf16>, vector<2x1024xf32> -> vector<2x1024xf32>
    %c0_48 = arith.constant 0 : index
    %c0_49 = arith.constant 0 : index
    %93 = vector.load %arg14[%c0_48, %c0_49] : memref<1x1024xf32, #tpu.memory_space<vmem>>, vector<1x1024xf32>
    %94 = vector.broadcast %93 : vector<1x1024xf32> to vector<2x1024xf32>
    %95 = arith.addf %92, %94 : vector<2x1024xf32>
    %cst_50 = arith.constant dense<0.000000e+00> : vector<2xf32>
    %96 = vector.multi_reduction <add>, %95, %cst_50 [1] : vector<2x1024xf32> to vector<2xf32>
    %97 = vector.shape_cast %96 : vector<2xf32> to vector<2x1xf32>
    %cst_51 = arith.constant 1.024000e+03 : f32
    %98 = vector.broadcast %cst_51 : f32 to vector<2x1xf32>
    %99 = arith.divf %97, %98 : vector<2x1xf32>
    %100 = vector.broadcast %99 : vector<2x1xf32> to vector<2x1024xf32>
    %101 = arith.subf %95, %100 : vector<2x1024xf32>
    %102 = arith.mulf %101, %101 : vector<2x1024xf32>
    %cst_52 = arith.constant dense<0.000000e+00> : vector<2xf32>
    %103 = vector.multi_reduction <add>, %102, %cst_52 [1] : vector<2x1024xf32> to vector<2xf32>
    %104 = vector.shape_cast %103 : vector<2xf32> to vector<2x1xf32>
    %cst_53 = arith.constant 1.024000e+03 : f32
    %105 = vector.broadcast %cst_53 : f32 to vector<2x1xf32>
    %106 = arith.divf %104, %105 : vector<2x1xf32>
    %cst_54 = arith.constant 9.99999974E-6 : f32
    %107 = vector.broadcast %cst_54 : f32 to vector<2x1xf32>
    %108 = arith.addf %106, %107 : vector<2x1xf32>
    %109 = math.rsqrt %108 : vector<2x1xf32>
    %110 = vector.broadcast %109 : vector<2x1xf32> to vector<2x1024xf32>
    %111 = arith.mulf %101, %110 : vector<2x1024xf32>
    %c0_55 = arith.constant 0 : index
    %c0_56 = arith.constant 0 : index
    %112 = vector.load %arg15[%c0_55, %c0_56] : memref<1x1024xf32, #tpu.memory_space<vmem>>, vector<1x1024xf32>
    %113 = vector.broadcast %112 : vector<1x1024xf32> to vector<2x1024xf32>
    %114 = arith.mulf %111, %113 : vector<2x1024xf32>
    %c0_57 = arith.constant 0 : index
    %c0_58 = arith.constant 0 : index
    %115 = vector.load %arg16[%c0_57, %c0_58] : memref<1x1024xf32, #tpu.memory_space<vmem>>, vector<1x1024xf32>
    %116 = vector.broadcast %115 : vector<1x1024xf32> to vector<2x1024xf32>
    %117 = arith.addf %114, %116 : vector<2x1024xf32>
    %cst_59 = arith.constant 0.000000e+00 : f32
    %118 = vector.broadcast %cst_59 : f32 to vector<2x1024xf32>
    %119 = arith.maximumf %117, %118 : vector<2x1024xf32>
    %120 = arith.truncf %119 : vector<2x1024xf32> to vector<2x1024xbf16>
    %c0_60 = arith.constant 0 : index
    %c0_61 = arith.constant 0 : index
    %121 = vector.load %arg17[%c0_60, %c0_61] : memref<1024x768xbf16, #tpu.memory_space<vmem>>, vector<1024x768xbf16>
    %cst_62 = arith.constant dense<0.000000e+00> : vector<2x768xf32>
    %122 = tpu.matmul %120, %121, %cst_62 {dimension_numbers = #tpu.dot_dimension_numbers<[1], [0], [0], [1], [0, 0, 1, 1], [], []>} : vector<2x1024xbf16>, vector<1024x768xbf16>, vector<2x768xf32> -> vector<2x768xf32>
    %c0_63 = arith.constant 0 : index
    %c0_64 = arith.constant 0 : index
    %123 = vector.load %arg18[%c0_63, %c0_64] : memref<1x768xf32, #tpu.memory_space<vmem>>, vector<1x768xf32>
    %124 = vector.broadcast %123 : vector<1x768xf32> to vector<2x768xf32>
    %125 = arith.addf %122, %124 : vector<2x768xf32>
    %126 = arith.negf %125 : vector<2x768xf32>
    %127 = math.exp %126 : vector<2x768xf32>
    %cst_65 = arith.constant 1.000000e+00 : f32
    %128 = vector.broadcast %cst_65 : f32 to vector<2x768xf32>
    %129 = arith.addf %128, %127 : vector<2x768xf32>
    %130 = arith.divf %128, %129 : vector<2x768xf32>
    %c0_66 = arith.constant 0 : index
    %c0_67 = arith.constant 0 : index
    %131 = vector.load %arg20[%c0_66, %c0_67] : memref<2x768xf32, #tpu.memory_space<vmem>>, vector<2x768xf32>
    tpu.vector_store %arg20[%c0_66, %c0_67], %130 {strides = array<i32>} : memref<2x768xf32, #tpu.memory_space<vmem>>, vector<2x768xf32>,
    %c0_68 = arith.constant 0 : index
    %c0_69 = arith.constant 0 : index
    %132 = vector.load %arg19[%c0_68, %c0_69] : memref<2x768xf32, #tpu.memory_space<vmem>>, vector<2x768xf32>
    %133 = arith.subf %130, %132 : vector<2x768xf32>
    %134 = math.absf %133 : vector<2x768xf32>
    %135 = vector.shape_cast %134 : vector<2x768xf32> to vector<1x2x768xf32>
    %cst_70 = arith.constant dense<0.000000e+00> : vector<1xf32>
    %136 = vector.multi_reduction <add>, %135, %cst_70 [1, 2] : vector<1x2x768xf32> to vector<1xf32>
    %137 = vector.shape_cast %136 : vector<1xf32> to vector<1x1x1xf32>
    %138 = vector.extract %137[0, 0, 0] : f32 from vector<1x1x1xf32>
    %cst_71 = arith.constant 6.51041686E-4 : f32
    %139 = arith.mulf %138, %cst_71 : f32
    %c0_72 = arith.constant 0 : index
    %c0_73 = arith.constant 0 : index
    %140 = memref.load %arg21[%c0_72, %c0_73] : memref<1x1xf32, #tpu.memory_space<smem>>
    memref.store %139, %arg21[%c0_72, %c0_73] : memref<1x1xf32, #tpu.memory_space<smem>>
    return
  }
}

</mosaic_0001>

<bundles_post_ra>
// kernel: _lambda_.1
= control target key start
LH: loop header
LB: loop body
LE: loop exit
PB: predicated region body
PF: predicated region fallthrough
CT: control target
= control target key end

     0   :  { %s11334_s0 = inlined_call_operand.vmem [shape: bf16[2,128], index: 0, kind: input, shape index: {}]   ;;  %s11335_s1 = inlined_call_operand.hbm [shape: bf16[128,128], index: 1, kind: input, shape index: {}]   ;;  %s11336_s2 = inlined_call_operand.hbm [shape: f32[1,128], index: 2, kind: input, shape index: {}]   ;;  %s11337_s3 = inlined_call_operand.hbm [shape: f32[1,128], index: 3, kind: input, shape index: {}]   ;;  %s11338_s4 = inlined_call_operand.hbm [shape: f32[1,128], index: 4, kind: input, shape index: {}]   ;;  %s11339_s5 = inlined_call_operand.hbm [shape: bf16[128,256], index: 5, kind: input, shape index: {}]   ;;  %s11340_s6 = inlined_call_operand.hbm [shape: f32[1,256], index: 6, kind: input, shape index: {}]   ;;  %s11341_s7 = inlined_call_operand.hbm [shape: f32[1,256], index: 7, kind: input, shape index: {}]   ;;  %s11342_s8 = inlined_call_operand.hbm [shape: f32[1,256], index: 8, kind: input, shape index: {}]   ;;  %s11343_s9 = inlined_call_operand.hbm [shape: bf16[256,512], index: 9, kind: input, shape index: {}]   ;;  %s11344_s10 = inlined_call_operand.hbm [shape: f32[1,512], index: 10, kind: input, shape index: {}]   ;;  %s11345_s11 = inlined_call_operand.hbm [shape: f32[1,512], index: 11, kind: input, shape index: {}]   ;;  %s11346_s12 = inlined_call_operand.hbm [shape: f32[1,512], index: 12, kind: input, shape index: {}]   ;;  %s11347_s13 = inlined_call_operand.hbm [shape: bf16[512,1024], index: 13, kind: input, shape index: {}]   ;;  %s11348_s14 = inlined_call_operand.hbm [shape: f32[1,1024], index: 14, kind: input, shape index: {}]   ;;  %s11349_s15 = inlined_call_operand.hbm [shape: f32[1,1024], index: 15, kind: input, shape index: {}]   ;;  %s11350_s16 = inlined_call_operand.hbm [shape: f32[1,1024], index: 16, kind: input, shape index: {}]   ;;  %s11351_s17 = inlined_call_operand.hbm [shape: bf16[1024,768], index: 17, kind: input, shape index: {}]   ;;  %s11352_s18 = inlined_call_operand.hbm [shape: f32[1,768], index: 18, kind: input, shape index: {}]   ;;  %s11353_s19 = inlined_call_operand.vmem [shape: f32[2,768], index: 19, kind: input, shape index: {}]   ;;  %s11354_s20 = inlined_call_operand.vmem [shape: f32[2,768], index: 20, kind: output, shape index: {0}]   ;;  %s11355_s21 = inlined_call_operand.hbm [shape: f32[1,1], index: 21, kind: output, shape index: {1}]  }
   0x1   :  { %11356 = sst [smem:[#allocation43_spill]] %s11334_s0 }
   0x2   :  { %11357 = sst [smem:[#allocation44_spill]] %s11335_s1 }
   0x3   :  { %11358 = sst [smem:[#allocation45_spill]] %s11336_s2 }
   0x4   :  { %11359 = sst [smem:[#allocation46_spill]] %s11337_s3 }
   0x5   :  { %11360 = sst [smem:[#allocation47_spill]] %s11338_s4 }
   0x6   :  { %11361 = sst [smem:[#allocation48_spill]] %s11339_s5 }
   0x7   :  { %11362 = sst [smem:[#allocation49_spill]] %s11355_s21 }
   0x8   :  { %27 = vsyncpa [#allocation3], 0 }
   0x9   :  { %28 = vsyncpa [#allocation6], 0 }
   0xa   :  { %29 = vsyncpa [#allocation9], 0 }
   0xb   :  { %30 = vsyncpa [#allocation12], 0 }
   0xc   :  { %31 = vsyncpa [#allocation15], 0 }
   0xd   :  { %32 = vsyncpa [#allocation18], 0 }
   0xe   :  { %33 = vsyncpa [#allocation21], 0 }
   0xf   :  { %34 = vsyncpa [#allocation24], 0 }
  0x10   :  { %35 = vsyncpa [#allocation27], 0 }
  0x11   :  { %36 = vsyncpa [#allocation30], 0  ;;  %s11363_s26 = sld [smem:[#allocation45_spill]] }
  0x17   :  { %s58_s27 = sshll.u32 %s11363_s26, 4  ;;  %s59_s27 = int_to_ptr.hbm [resolvable:$true] %s58_s27 }
  0x18   :  { %37 = vsyncpa [#allocation4], 0  ;;  %s10680_s3 = smov [#allocation5]   ;;  %s11364_s4 = sld [smem:[#allocation47_spill]] }
  0x19   :  { %s60_s28 = sshll.u32 %s10680_s3, 4  ;;  %s10681_s5 = smov [#allocation8]   ;;  %s61_s28 = int_to_ptr.vmem [resolvable:$true] %s60_s28 }
  0x1a   :  { %63 = dma.hbm_to_vmem [thread:$0]  %s59_s27, 16, %s61_s28, [#allocation6]  }
  0x1b   :  { %s82_s22 = sshll.u32 %s10681_s5, 4  ;;  %s104_s24 = sshll.u32 %s11340_s6, 4  ;;  %s83_s22 = int_to_ptr.vmem [resolvable:$true] %s82_s22  ;;  %s105_s24 = int_to_ptr.hbm [resolvable:$true] %s104_s24 }
  0x1c   :  { %s126_s26 = sshll.u32 %s11342_s8, 4  ;;  %s10682_s3 = smov [#allocation11]   ;;  %s127_s26 = int_to_ptr.hbm [resolvable:$true] %s126_s26 }
  0x1d   :  { %s106_s21 = sshll.u32 %s10682_s3, 4  ;;  %s10683_s27 = smov [#allocation14]   ;;  %s107_s21 = int_to_ptr.vmem [resolvable:$true] %s106_s21 }
  0x1e   :  { %s80_s30 = sshll.u32 %s11364_s4, 4  ;;  %s128_s28 = sshll.u32 %s10683_s27, 4  ;;  %s81_s30 = int_to_ptr.hbm [resolvable:$true] %s80_s30  ;;  %s129_s28 = int_to_ptr.vmem [resolvable:$true] %s128_s28 }
  0x1f   :  { %85 = dma.hbm_to_vmem [thread:$0]  %s81_s30, 16, %s83_s22, [#allocation9]  }
  0x20   :  { %109 = dma.hbm_to_vmem [thread:$0]  %s105_s24, 32, %s107_s21, [#allocation12]  }
  0x21   :  { %s150_s4 = sshll.u32 %s11344_s10, 4  ;;  %s172_s5 = sshll.u32 %s11346_s12, 4  ;;  %s151_s4 = int_to_ptr.hbm [resolvable:$true] %s150_s4  ;;  %s173_s5 = int_to_ptr.hbm [resolvable:$true] %s172_s5 }
  0x22   :  { %131 = dma.hbm_to_vmem [thread:$0]  %s127_s26, 32, %s129_s28, [#allocation15]  }
  0x23   :  { %s10684_s22 = smov [#allocation17]   ;;  %s10685_s23 = smov [#allocation20]  }
  0x24   :  { %s152_s8 = sshll.u32 %s10684_s22, 4  ;;  %s174_s21 = sshll.u32 %s10685_s23, 4  ;;  %s153_s8 = int_to_ptr.vmem [resolvable:$true] %s152_s8  ;;  %s175_s21 = int_to_ptr.vmem [resolvable:$true] %s174_s21 }
  0x25   :  { %155 = dma.hbm_to_vmem [thread:$0]  %s151_s4, 64, %s153_s8, [#allocation18]  }
  0x26   :  { %s196_s2 = sshll.u32 %s11348_s14, 4  ;;  %s218_s26 = sshll.u32 %s11350_s16, 4  ;;  %s197_s2 = int_to_ptr.hbm [resolvable:$true] %s196_s2  ;;  %s219_s26 = int_to_ptr.hbm [resolvable:$true] %s218_s26 }
  0x27   :  { %177 = dma.hbm_to_vmem [thread:$0]  %s173_s5, 64, %s175_s21, [#allocation21]  }
  0x28   :  { %s10686_s3 = smov [#allocation23]   ;;  %s10687_s27 = smov [#allocation26]  }
  0x29   :  { %s198_s12 = sshll.u32 %s10686_s3, 4  ;;  %s220_s28 = sshll.u32 %s10687_s27, 4  ;;  %s199_s12 = int_to_ptr.vmem [resolvable:$true] %s198_s12  ;;  %s221_s28 = int_to_ptr.vmem [resolvable:$true] %s220_s28 }
  0x2a   :  { %201 = dma.hbm_to_vmem [thread:$0]  %s197_s2, 128, %s199_s12, [#allocation24]  }
  0x2b   :  { %s11365_s4 = sld [smem:[#allocation44_spill]]  ;;  %s10688_s14 = smov [#allocation2]  }
  0x2c   :  { %223 = dma.hbm_to_vmem [thread:$0]  %s219_s26, 128, %s221_s28, [#allocation27]  }
  0x2d   :  { %s46_s30 = sshll.u32 %s10688_s14, 4  ;;  %s11366_s16 = sld [smem:[#allocation46_spill]]  ;;  %s47_s30 = int_to_ptr.vmem [resolvable:$true] %s46_s30 }
  0x2e   :  { %s10689_s23 = smov 64   ;;  %s10690_s21 = smov 4  }
  0x2f   :  { %s10691_s1 = smov [#allocation7]   ;;  %s11367_s25 = sld [smem:[#allocation48_spill]] }
  0x30   :  { %s71_s24 = sshll.u32 %s10691_s1, 4  ;;  %s10692_s26 = smov [#allocation10]   ;;  %s72_s24 = int_to_ptr.vmem [resolvable:$true] %s71_s24 }
  0x31   :  { %s44_s6 = sshll.u32 %s11365_s4, 4  ;;  %s92_s12 = sshll.u32 %s10692_s26, 4  ;;  %s45_s6 = int_to_ptr.hbm [resolvable:$true] %s44_s6  ;;  %s93_s12 = int_to_ptr.vmem [resolvable:$true] %s92_s12 }
  0x32   :  { %52 = dma.hbm_to_vmem [thread:$0]  %s45_s6, 1024, %s47_s30, [#allocation3], %s10689_s23, %s10689_s23, %s10690_s21  }
  0x33   :  { %s69_s8 = sshll.u32 %s11366_s16, 4  ;;  %s115_s29 = sshll.u32 %s11341_s7, 4  ;;  %s70_s8 = int_to_ptr.hbm [resolvable:$true] %s69_s8  ;;  %s116_s29 = int_to_ptr.hbm [resolvable:$true] %s115_s29 }
  0x34   :  { %74 = dma.hbm_to_vmem [thread:$0]  %s70_s8, 16, %s72_s24, [#allocation6]  }
  0x35   :  { %s90_s3 = sshll.u32 %s11367_s25, 4  ;;  %s10693_s0 = smov 128   ;;  %s91_s3 = int_to_ptr.hbm [resolvable:$true] %s90_s3 }
  0x36   :  { %s10694_s4 = smov 8   ;;  %s10695_s6 = smov [#allocation13]  }
  0x37   :  { %98 = dma.hbm_to_vmem [thread:$0]  %s91_s3, 2048, %s93_s12, [#allocation9], %s10693_s0, %s10693_s0, %s10694_s4  }
  0x38   :  { %s117_s14 = sshll.u32 %s10695_s6, 4  ;;  %s136_s22 = sshll.u32 %s11343_s9, 4  ;;  %s118_s14 = int_to_ptr.vmem [resolvable:$true] %s117_s14  ;;  %s137_s22 = int_to_ptr.hbm [resolvable:$true] %s136_s22 }
  0x39   :  { %120 = dma.hbm_to_vmem [thread:$0]  %s116_s29, 32, %s118_s14, [#allocation12]  }
  0x3a   :  { %s10696_s16 = smov [#allocation16]   ;;  %s161_s7 = sshll.u32 %s11345_s11, 4  ;;  %s162_s7 = int_to_ptr.hbm [resolvable:$true] %s161_s7 }
  0x3b   :  { %s138_s8 = sshll.u32 %s10696_s16, 4  ;;  %s10697_s1 = smov 256   ;;  %s139_s8 = int_to_ptr.vmem [resolvable:$true] %s138_s8 }
  0x3c   :  { %s10698_s24 = smov 16   ;;  %s10699_s2 = smov [#allocation19]  }
  0x3d   :  { %144 = dma.hbm_to_vmem [thread:$0]  %s137_s22, 8192, %s139_s8, [#allocation15], %s10697_s1, %s10697_s1, %s10698_s24  }
  0x3e   :  { %s163_s10 = sshll.u32 %s10699_s2, 4  ;;  %s182_s9 = sshll.u32 %s11347_s13, 4  ;;  %s164_s10 = int_to_ptr.vmem [resolvable:$true] %s163_s10  ;;  %s183_s9 = int_to_ptr.hbm [resolvable:$true] %s182_s9 }
  0x3f   :  { %166 = dma.hbm_to_vmem [thread:$0]  %s162_s7, 64, %s164_s10, [#allocation18]  }
  0x40   :  { %s10700_s26 = smov [#allocation22]   ;;  %s207_s11 = sshll.u32 %s11349_s15, 4  ;;  %s208_s11 = int_to_ptr.hbm [resolvable:$true] %s207_s11 }
  0x41   :  { %s184_s12 = sshll.u32 %s10700_s26, 4  ;;  %s10701_s29 = smov 512   ;;  %s185_s12 = int_to_ptr.vmem [resolvable:$true] %s184_s12 }
  0x42   :  { %s10702_s0 = smov 32   ;;  %s10703_s4 = smov [#allocation25]  }
  0x43   :  { %190 = dma.hbm_to_vmem [thread:$0]  %s183_s9, 32768, %s185_s12, [#allocation21], %s10701_s29, %s10701_s29, %s10702_s0  }
  0x44   :  { %s209_s6 = sshll.u32 %s10703_s4, 4  ;;  %s228_s13 = sshll.u32 %s11351_s17, 4  ;;  %s210_s6 = int_to_ptr.vmem [resolvable:$true] %s209_s6  ;;  %s229_s13 = int_to_ptr.hbm [resolvable:$true] %s228_s13 }
  0x45   :  { %212 = dma.hbm_to_vmem [thread:$0]  %s208_s11, 128, %s210_s6, [#allocation24]  }
  0x46   :  { %s10704_s5 = smov [#allocation28]   ;;  %s242_s15 = sshll.u32 %s11352_s18, 4  ;;  %s243_s15 = int_to_ptr.hbm [resolvable:$true] %s242_s15 }
  0x47   :  { %s230_s22 = sshll.u32 %s10704_s5, 4  ;;  %s10705_s23 = smov 384   ;;  %s231_s22 = int_to_ptr.vmem [resolvable:$true] %s230_s22 }
  0x48   :  { %s10706_s21 = smov 24   ;;  %s10707_s7 = smov [#allocation29]  }
  0x49   :  { %236 = dma.hbm_to_vmem [thread:$0]  %s229_s13, 49152, %s231_s22, [#allocation27], %s10705_s23, %s10705_s23, %s10706_s21  }
  0x4a   :  { %s244_s1 = sshll.u32 %s10707_s7, 4  ;;  %s245_s1 = int_to_ptr.vmem [resolvable:$true] %s244_s1 }
  0x4b   :  { %247 = dma.hbm_to_vmem [thread:$0]  %s243_s15, 96, %s245_s1, [#allocation30]  }
  0x4c   :  { %10658 = dma.done.wait [#allocation3], 1024  }
  0x4d   :  { %10659 = vsyncadd [#allocation3], 4294966272 }
  0x4e   :  { %10660 = dma.done.wait [#allocation6], 32  }
  0x4f   :  { %10661 = vsyncadd [#allocation6], 4294967264 }
  0x50   :  { %10662 = dma.done.wait [#allocation9], 2064  }
  0x51   :  { %10663 = vsyncadd [#allocation9], 4294965232 }
  0x52   :  { %10664 = dma.done.wait [#allocation12], 64  }
  0x53   :  { %10665 = vsyncadd [#allocation12], 4294967232 }
  0x54   :  { %10666 = dma.done.wait [#allocation15], 8224  }
  0x55   :  { %10667 = vsyncadd [#allocation15], 4294959072 }
  0x56   :  { %10668 = dma.done.wait [#allocation18], 128  }
  0x57   :  { %10669 = vsyncadd [#allocation18], 4294967168 }
  0x58   :  { %10670 = dma.done.wait [#allocation21], 32832  }
  0x59   :  { %10671 = vsyncadd [#allocation21], 4294934464 }
  0x5a   :  { %10672 = dma.done.wait [#allocation24], 256  }
  0x5b   :  { %10673 = vsyncadd [#allocation24], 4294967040 }
  0x5c   :  { %10674 = dma.done.wait [#allocation27], 49280  }
  0x5d   :  { %10675 = vsyncadd [#allocation27], 4294918016 }
  0x5e   :  { %10676 = dma.done.wait [#allocation30], 96  }
  0x5f   :  { %10677 = vsyncadd [#allocation30], 4294967200  ;;  %v9414_v0 = vld [vmem:[#allocation2 + $0x38] sm:$0xff]  ;;  %v9413_v1 = vld [vmem:[#allocation2 + $0x30] sm:$0xff]  ;;  %s11368_s24 = sld [smem:[#allocation43_spill]]  ;;  %vm404_vm0 = vcmask 1041408  }
  0x60   :  { %391 = vmatpush.bf16.msra.mxu0 %v9414_v0  ;;  %v9412_v2 = vld [vmem:[#allocation2 + $0x28] sm:$0xff]  ;;  %v9411_v3 = vld [vmem:[#allocation2 + $0x20] sm:$0xff]  ;;  %v9410_v4 = vld [vmem:[#allocation2 + $0x18] sm:$0xff]  ;;  %v10708_v14 = vmov 128.0   ;;  %s11373_s11 = sld [smem:[#allocation49_spill]] }
  0x61   :  { %v9409_v5 = vld [vmem:[#allocation2 + $0x10] sm:$0xff]  ;;  %v9408_v6 = vld [vmem:[#allocation2 + $0x8] sm:$0xff]  ;;  %v9407_v7 = vld [vmem:[#allocation2] sm:$0xff]  ;;  %10173 = vrcp.f32 %v10708_v14 }
  0x62   :  { %v10170_v9 = vld [vmem:[#allocation5] ss:$0 sm:$0xff]  ;;  %v6579_v26 = vld [vmem:[#allocation10 + $0x70] sm:$0xf]  ;;  %v9429_v28 = vld [vmem:[#allocation10 + $0x74] sm:$0xf] }
  0x63   :  { %v9430_v27 = vld [vmem:[#allocation10 + $0x74] sm:$0xf0]  ;;  %v6581_v30 = vld [vmem:[#allocation10 + $0x78] sm:$0xf0]  ;;  %v6571_v32 = vld [vmem:[#allocation10 + $0x60] sm:$0xf] }
  0x64   :  { %392 = vmatpush.bf16.msra.mxu0 %v9413_v1  ;;  %v6580_v29 = vor.u32 %v9430_v27, %v6579_v26  ;;  %v6584_v31 = vor.u32 %v9429_v28, %v6581_v30  ;;  %v9428_v33 = vld [vmem:[#allocation10 + $0x64] sm:$0xf0]  ;;  %v9427_v34 = vld [vmem:[#allocation10 + $0x64] sm:$0xf]  ;;  %v6573_v36 = vld [vmem:[#allocation10 + $0x68] sm:$0xf0] }
  0x65   :  { %v322_v8 = vld [vmem:[%s11368_s24] sm:$0x1]  ;;  %v6572_v35 = vor.u32 %v9428_v33, %v6571_v32  ;;  %v6576_v37 = vor.u32 %v9427_v34, %v6573_v36  ;;  %v9426_v39 = vld [vmem:[#allocation10 + $0x54] sm:$0xf0]  ;;  %v9425_v40 = vld [vmem:[#allocation10 + $0x54] sm:$0xf] }
  0x66   :  { %548 = vmatpush.bf16.msra.mxu1 %v6580_v29  ;;  %561 = vmatpush.bf16.msra.mxu2 %v6584_v31  ;;  %v6563_v38 = vld [vmem:[#allocation10 + $0x50] sm:$0xf]  ;;  %v6565_v42 = vld [vmem:[#allocation10 + $0x58] sm:$0xf0]  ;;  %v6555_v44 = vld [vmem:[#allocation10 + $0x40] sm:$0xf] }
  0x67   :  { %v10174_v15 = vpop.eup %10173  ;;  %v6564_v41 = vor.u32 %v9426_v39, %v6563_v38  ;;  %v6568_v43 = vor.u32 %v9425_v40, %v6565_v42  ;;  %v9424_v45 = vld [vmem:[#allocation10 + $0x44] sm:$0xf0]  ;;  %v9423_v46 = vld [vmem:[#allocation10 + $0x44] sm:$0xf]  ;;  %v6557_v48 = vld [vmem:[#allocation10 + $0x48] sm:$0xf0] }
  0x68   :  { %393 = vmatpush.bf16.msra.mxu0 %v9412_v2  ;;  %v409_v16 = vmul.f32 128.0, %v10174_v15  ;;  %vm413_vm1 = vweird.f32 %v10174_v15  ;;  %v6556_v47 = vor.u32 %v9424_v45, %v6555_v44  ;;  %v6560_v49 = vor.u32 %v9423_v46, %v6557_v48  ;;  %v6547_v50 = vld [vmem:[#allocation10 + $0x30] sm:$0xf]  ;;  %v9422_v51 = vld [vmem:[#allocation10 + $0x34] sm:$0xf0]  ;;  %s6467_s29 = sshll.u32 %s11373_s11, 4  ;;  %s6468_s29 = int_to_ptr.hbm [resolvable:$true] %s6467_s29 }
  0x69   :  { %v9421_v52 = vld [vmem:[#allocation10 + $0x34] sm:$0xf]  ;;  %v6548_v53 = vor.u32 %v9422_v51, %v6547_v50  ;;  %v6549_v54 = vld [vmem:[#allocation10 + $0x38] sm:$0xf0]  ;;  %v6539_v56 = vld [vmem:[#allocation10 + $0x20] sm:$0xf] }
  0x6a   :  { %v410_v17 = vsub.f32 1.0, %v409_v16  ;;  %549 = vmatpush.bf16.msra.mxu1 %v6572_v35  ;;  %562 = vmatpush.bf16.msra.mxu2 %v6576_v37  ;;  %v6552_v55 = vor.u32 %v9421_v52, %v6549_v54  ;;  %v9420_v57 = vld [vmem:[#allocation10 + $0x24] sm:$0xf0]  ;;  %v9419_v58 = vld [vmem:[#allocation10 + $0x24] sm:$0xf]  ;;  %v10709_v39 = vmov 256.0  }
  0x6b   :  { %v6540_v59 = vor.u32 %v9420_v57, %v6539_v56  ;;  %v6541_v60 = vld [vmem:[#allocation10 + $0x28] sm:$0xf0]  ;;  %v6531_v61 = vld [vmem:[#allocation10 + $0x10] sm:$0xf]  ;;  %v9418_v62 = vld [vmem:[#allocation10 + $0x14] sm:$0xf0] }
  0x6c   :  { %394 = vmatpush.bf16.msra.mxu0 %v9411_v3  ;;  %v411_v18 = vmul.f32 %v10174_v15, %v410_v17  ;;  %v6544_v63 = vor.u32 %v9419_v58, %v6541_v60  ;;  %v9417_v0 = vld [vmem:[#allocation10 + $0x14] sm:$0xf]  ;;  %v6533_v1 = vld [vmem:[#allocation10 + $0x18] sm:$0xf0]  ;;  %v6532_v2 = vor.u32 %v9418_v62, %v6531_v61  ;;  %v462_v28 = vld [vmem:[#allocation11] sm:$0x3] }
  0x6d   :  { %v6536_v3 = vor.u32 %v9417_v0, %v6533_v1  ;;  %v464_v30 = vperm.slane %v462_v28, 0  ;;  %v465_v31 = vperm.slane %v462_v28, 1  ;;  %v6699_v42 = vld [vmem:[#allocation16 + $0xe0] sm:$0xf]  ;;  %v9493_v46 = vld [vmem:[#allocation16 + $0x1ec] sm:$0xf0] }
  0x6e   :  { %v412_v19 = vadd.f32 %v10174_v15, %v411_v18  ;;  %550 = vmatpush.bf16.msra.mxu1 %v6564_v41  ;;  %563 = vmatpush.bf16.msra.mxu2 %v6568_v43  ;;  %v9461_v43 = vld [vmem:[#allocation16 + $0xec] sm:$0xf0]  ;;  %v6827_v44 = vld [vmem:[#allocation16 + $0x1e0] sm:$0xf]  ;;  %v6701_v48 = vld [vmem:[#allocation16 + $0xf0] sm:$0xf0] }
  0x6f   :  { %v6700_v45 = vor.u32 %v9461_v43, %v6699_v42  ;;  %v9491_v51 = vld [vmem:[#allocation16 + $0x1e4] sm:$0xf]  ;;  %v6829_v52 = vld [vmem:[#allocation16 + $0x1f0] sm:$0xf0]  ;;  %v6811_v56 = vld [vmem:[#allocation16 + $0x1c0] sm:$0xf] }
  0x70   :  { %395 = vmatpush.bf16.msra.mxu0 %v9410_v4  ;;  %v10881_v20 = vsel %vm413_vm1, %v10174_v15, %v412_v19  ;;  %v6523_v4 = vld [vmem:[#allocation10] sm:$0xf]  ;;  %v10171_v19 = vld [vmem:[#allocation7] ss:$0 sm:$0xff]  ;;  %v6832_v54 = vor.u32 %v9491_v51, %v6829_v52  ;;  %v9489_v57 = vld [vmem:[#allocation16 + $0x1cc] sm:$0xf0] }
  0x71   :  { %1024 = vmatpush.bf16.msra.mxu3 %v6700_v45  ;;  %v9455_v60 = vld [vmem:[#allocation16 + $0xc4] sm:$0xf]  ;;  %v6685_v61 = vld [vmem:[#allocation16 + $0xd0] sm:$0xf0]  ;;  %v6667_v1 = vld [vmem:[#allocation16 + $0xa0] sm:$0xf] }
  0x72   :  { %551 = vmatpush.bf16.msra.mxu1 %v6556_v47  ;;  %564 = vmatpush.bf16.msra.mxu2 %v6560_v49  ;;  %v9459_v47 = vld [vmem:[#allocation16 + $0xe4] sm:$0xf]  ;;  %v6828_v49 = vor.u32 %v9493_v46, %v6827_v44  ;;  %v6813_v0 = vld [vmem:[#allocation16 + $0x1d0] sm:$0xf0]  ;;  %v6651_v28 = vld [vmem:[#allocation16 + $0x80] sm:$0xf] }
  0x73   :  { %v6704_v50 = vor.u32 %v9459_v47, %v6701_v48  ;;  %v9487_v62 = vld [vmem:[#allocation16 + $0x1c4] sm:$0xf]  ;;  %v9477_v43 = vld [vmem:[#allocation16 + $0x16c] sm:$0xf0]  ;;  %v6637_v45 = vld [vmem:[#allocation16 + $0x70] sm:$0xf0] }
  0x74   :  { %396 = vmatpush.bf16.msra.mxu0 %v9409_v5  ;;  %v9416_v5 = vld [vmem:[#allocation10 + $0x4] sm:$0xf0]  ;;  %v9441_v52 = vld [vmem:[#allocation16 + $0x4c] sm:$0xf0] }
  0x75   :  { %v9443_v44 = vld [vmem:[#allocation16 + $0x64] sm:$0xf]  ;;  %v6619_v51 = vld [vmem:[#allocation16 + $0x40] sm:$0xf] }
  0x76   :  { %552 = vmatpush.bf16.msra.mxu1 %v6548_v53  ;;  %565 = vmatpush.bf16.msra.mxu2 %v6552_v55  ;;  %v6683_v53 = vld [vmem:[#allocation16 + $0xc0] sm:$0xf]  ;;  %v9457_v55 = vld [vmem:[#allocation16 + $0xcc] sm:$0xf0]  ;;  %v6640_v47 = vor.u32 %v9443_v44, %v6637_v45  ;;  %v9475_v48 = vld [vmem:[#allocation16 + $0x164] sm:$0xf] }
  0x77   :  { %v6684_v58 = vor.u32 %v9457_v55, %v6683_v53  ;;  %v6747_v53 = vld [vmem:[#allocation16 + $0x140] sm:$0xf]  ;;  %v9473_v55 = vld [vmem:[#allocation16 + $0x14c] sm:$0xf0]  ;;  %v6693_v45 = vld [vmem:[#allocation16 + $0xd8] sm:$0xf0] }
  0x78   :  { %397 = vmatpush.bf16.msra.mxu0 %v9408_v6  ;;  %v9415_v6 = vld [vmem:[#allocation10 + $0x4] sm:$0xf] }
  0x79   :  { %1025 = vmatpush.bf16.msra.mxu3 %v6684_v58  ;;  %v6748_v58 = vor.u32 %v9473_v55, %v6747_v53  ;;  %v9452_v55 = vld [vmem:[#allocation16 + $0xac] sm:$0xf] }
  0x7a   :  { %553 = vmatpush.bf16.msra.mxu1 %v6540_v59  ;;  %566 = vmatpush.bf16.msra.mxu2 %v6544_v63  ;;  %v6812_v59 = vor.u32 %v9489_v57, %v6811_v56  ;;  %v6688_v63 = vor.u32 %v9455_v60, %v6685_v61  ;;  %v9439_v56 = vld [vmem:[#allocation16 + $0x44] sm:$0xf]  ;;  %v6621_v57 = vld [vmem:[#allocation16 + $0x50] sm:$0xf0] }
  0x7b   :  { %v9471_v60 = vld [vmem:[#allocation16 + $0x144] sm:$0xf]  ;;  %v6749_v61 = vld [vmem:[#allocation16 + $0x150] sm:$0xf0] }
  0x7c   :  { %398 = vmatpush.bf16.msra.mxu0 %v9407_v7  ;;  %v6525_v7 = vld [vmem:[#allocation10 + $0x8] sm:$0xf0] }
  0x7e   :  { %554 = vmatpush.bf16.msra.mxu1 %v6532_v2  ;;  %567 = vmatpush.bf16.msra.mxu2 %v6536_v3  ;;  %v9453_v2 = vld [vmem:[#allocation16 + $0xac] sm:$0xf0]  ;;  %v6816_v3 = vor.u32 %v9487_v62, %v6813_v0  ;;  %v6752_v62 = vor.u32 %v9471_v60, %v6749_v61  ;;  %v6805_v60 = vld [vmem:[#allocation16 + $0x1b8] sm:$0xf0]  ;;  %v6659_v61 = vld [vmem:[#allocation16 + $0x88] sm:$0xf] }
  0x7f   :  { %399 = vmatmul.bf16.vlgmr.msra.gmra.mxu0 %v322_v8  ;;  %v6524_v8 = vor.u32 %v9416_v5, %v6523_v4  ;;  %v6795_v4 = vld [vmem:[#allocation16 + $0x1a0] sm:$0xf]  ;;  %v9485_v5 = vld [vmem:[#allocation16 + $0x1ac] sm:$0xf0] }
  0x80   :  { %1037 = vmatpush.bf16.msrb.mxu0 %v6828_v49  ;;  %v6765_v49 = vld [vmem:[#allocation16 + $0x170] sm:$0xf0]  ;;  %v9437_v0 = vld [vmem:[#allocation16 + $0x2c] sm:$0xf0] }
  0x82   :  { %555 = vmatpush.bf16.msra.mxu1 %v6524_v8  ;;  %v6669_v8 = vld [vmem:[#allocation16 + $0xb0] sm:$0xf0] }
  0x84   :  { %1038 = vmatpush.bf16.msrb.mxu0 %v6812_v59  ;;  %v6624_v59 = vor.u32 %v9439_v56, %v6621_v57  ;;  %v6677_v56 = vld [vmem:[#allocation16 + $0xb8] sm:$0xf0] }
  0x86   :  { %1050 = vmatpush.bf16.msrb.mxu1 %v6704_v50  ;;  %v6768_v50 = vor.u32 %v9475_v48, %v6765_v49 }
  0x8a   :  { %1051 = vmatpush.bf16.msrb.mxu1 %v6688_v63  ;;  %v6603_v63 = vld [vmem:[#allocation16 + $0x20] sm:$0xf] }
  0xfc   :  { %v400_v10 = vpop.f32.mrf.mxu0 }
  0xfd   :  { %v401_v11 = vadd.f32 %v10170_v9, %v400_v10  ;;  %v6528_v9 = vor.u32 %v9415_v6, %v6525_v7  ;;  %v9451_v6 = vld [vmem:[#allocation16 + $0xa4] sm:$0xf]  ;;  %v6668_v7 = vor.u32 %v9453_v2, %v6667_v1  ;;  %v6731_v1 = vld [vmem:[#allocation16 + $0x120] sm:$0xf]  ;;  %v6604_v2 = vor.u32 %v9437_v0, %v6603_v63  ;;  %v9450_v63 = vld [vmem:[#allocation16 + $0x94] sm:$0xf0] }
  0xfe   :  { %v6787_v0 = vld [vmem:[#allocation16 + $0x188] sm:$0xf] }
  0xff   :  { %v405_v12 = vsel %vm404_vm0, %v401_v11, 0.0  ;;  %568 = vmatpush.bf16.msra.mxu2 %v6528_v9  ;;  %v9483_v9 = vld [vmem:[#allocation16 + $0x1a4] sm:$0xf]  ;;  %1026 = vmatpush.bf16.msra.mxu3 %v6668_v7 }
 0x100   :  { %406 = vadd.xlane.f32.xlu0 %v405_v12 }
 0x103   :  { %1063 = vmatpush.bf16.msrb.mxu2 %v6832_v54  ;;  %v6620_v54 = vor.u32 %v9441_v52, %v6619_v51  ;;  %v9454_v51 = vld [vmem:[#allocation16 + $0xb4] sm:$0xf0]  ;;  %v6803_v52 = vld [vmem:[#allocation16 + $0x1a8] sm:$0xf] }
 0x104   :  { %v402_v13 = vpop.f32.mrf.mxu0 }
 0x107   :  { %1064 = vmatpush.bf16.msrb.mxu2 %v6816_v3  ;;  %v9469_v3 = vld [vmem:[#allocation16 + $0x12c] sm:$0xf0] }
 0x173   :  { %v407_v21 = vpop.xlane.xlu0 %406 }
 0x174   :  { %v415_v22 = vmul.f32 %v10881_v20, %v407_v21 }
 0x176   :  { %v10884_v23 = vsub.f32 %v401_v11, %v415_v22 }
 0x178   :  { %v417_v24 = vmul.f32 %v10884_v23, %v10884_v23 }
 0x17a   :  { %v418_v25 = vsel %vm404_vm0, %v417_v24, 0.0  ;;  %v10172_v24 = vld [vmem:[#allocation8] ss:$0 sm:$0xff] }
 0x17b   :  { %419 = vadd.xlane.f32.xlu0 %v418_v25 }
 0x1ee   :  { %v420_v10 = vpop.xlane.xlu0 %419 }
 0x1ef   :  { %v421_v11 = vmul.f32 %v420_v10, %v10881_v20  ;;  %v6797_v10 = vld [vmem:[#allocation16 + $0x1b0] sm:$0xf0] }
 0x1f1   :  { %v422_v12 = vadd.f32 1e-05, %v421_v11 }
 0x1f3   :  { %10175 = vrsqrt.f32 %v422_v12  ;;  %vm429_vm3 = vweird.f32 %v422_v12 }
 0x1f4   :  { %10177 = vrcp.f32 %v10709_v39  ;;  %v6635_v39 = vld [vmem:[#allocation16 + $0x60] sm:$0xf] }
 0x1f9   :  { %v10176_v13 = vpop.eup %10175 }
 0x1fa   :  { %v424_v14 = vmul.f32 %v10176_v13, %v422_v12  ;;  %vm430_vm2 = vweird.f32 %v10176_v13  ;;  %v10178_v40 = vpop.eup %10177  ;;  %v6796_v12 = vor.u32 %v9485_v5, %v6795_v4  ;;  %v9435_v4 = vld [vmem:[#allocation16 + $0x24] sm:$0xf]  ;;  %v6605_v5 = vld [vmem:[#allocation16 + $0x30] sm:$0xf0] }
 0x1fb   :  { %vm431_vm4 = vmor %vm429_vm3, %vm430_vm2  ;;  %v580_v41 = vmul.f32 256.0, %v10178_v40  ;;  %vm584_vm5 = vweird.f32 %v10178_v40  ;;  %v6608_v7 = vor.u32 %v9435_v4, %v6605_v5  ;;  %v9480_v4 = vld [vmem:[#allocation16 + $0x18c] sm:$0xf]  ;;  %v6660_v5 = vor.u32 %v9450_v63, %v6659_v61 }
 0x1fc   :  { %v425_v15 = vmul.f32 %v10176_v13, %v424_v14  ;;  %v6800_v14 = vor.u32 %v9483_v9, %v6797_v10  ;;  %1039 = vmatpush.bf16.msrb.mxu0 %v6796_v12  ;;  %v6733_v9 = vld [vmem:[#allocation16 + $0x130] sm:$0xf0]  ;;  %v9433_v12 = vld [vmem:[#allocation16 + $0xc] sm:$0xf0] }
 0x1fd   :  { %v581_v11 = vsub.f32 1.0, %v580_v41  ;;  %v6763_v41 = vld [vmem:[#allocation16 + $0x160] sm:$0xf] }
 0x1fe   :  { %v426_v16 = vmul.f32 0.5, %v425_v15  ;;  %1065 = vmatpush.bf16.msrb.mxu2 %v6800_v14  ;;  %v6764_v46 = vor.u32 %v9477_v43, %v6763_v41  ;;  %v6819_v41 = vld [vmem:[#allocation16 + $0x1c8] sm:$0xf]  ;;  %v9456_v43 = vld [vmem:[#allocation16 + $0xcc] sm:$0xf] }
 0x1ff   :  { %v582_v15 = vmul.f32 %v10178_v40, %v581_v11  ;;  %v6587_v11 = vld [vmem:[#allocation16] sm:$0xf]  ;;  %v6696_v48 = vor.u32 %v9456_v43, %v6693_v45  ;;  %v9436_v43 = vld [vmem:[#allocation16 + $0x2c] sm:$0xf] }
 0x200   :  { %v427_v17 = vsub.f32 1.5, %v426_v16  ;;  %v6588_v14 = vor.u32 %v9433_v12, %v6587_v11  ;;  %v6643_v11 = vld [vmem:[#allocation16 + $0x68] sm:$0xf]  ;;  %v9446_v12 = vld [vmem:[#allocation16 + $0x74] sm:$0xf0] }
 0x201   :  { %v583_v16 = vadd.f32 %v10178_v40, %v582_v15  ;;  %v9465_v15 = vld [vmem:[#allocation16 + $0x10c] sm:$0xf0]  ;;  %v9468_v45 = vld [vmem:[#allocation16 + $0x12c] sm:$0xf] }
 0x202   :  { %v428_v18 = vmul.f32 %v10176_v13, %v427_v17 }
 0x203   :  { %v10899_v17 = vsel %vm584_vm5, %v10178_v40, %v583_v16  ;;  %v9445_v40 = vld [vmem:[#allocation16 + $0x6c] sm:$0xf0]  ;;  %v9431_v16 = vld [vmem:[#allocation16 + $0x4] sm:$0xf] }
 0x204   :  { %v432_v21 = vsel %vm431_vm4, %v10176_v13, %v428_v18  ;;  %v6672_v13 = vor.u32 %v9451_v6, %v6669_v8  ;;  %v6636_v42 = vor.u32 %v9445_v40, %v6635_v39  ;;  %v6732_v6 = vor.u32 %v9469_v3, %v6731_v1  ;;  %v9467_v8 = vld [vmem:[#allocation16 + $0x124] sm:$0xf]  ;;  %v9482_v1 = vld [vmem:[#allocation16 + $0x194] sm:$0xf0]  ;;  %v6661_v3 = vld [vmem:[#allocation16 + $0x98] sm:$0xf0] }
 0x205   :  { %v433_v22 = vmul.f32 %v432_v21, %v10884_v23  ;;  %v6736_v10 = vor.u32 %v9467_v8, %v6733_v9 }
 0x206   :  { %1052 = vmatpush.bf16.msrb.mxu1 %v6672_v13  ;;  %v6715_v13 = vld [vmem:[#allocation16 + $0x100] sm:$0xf] }
 0x207   :  { %v438_v25 = vmul.f32 %v10171_v19, %v433_v22 }
 0x209   :  { %v443_v26 = vadd.f32 %v10172_v24, %v438_v25 }
 0x20b   :  { %v444_v27 = vmax.f32 %v443_v26, 0.0 }
 0x20d   :  { %v445_v20 = vpack.c.bf16 %v444_v27, %v444_v27 }
 0x20f   :  { %556 = vmatmul.bf16.vlgmr.msra.gmra.mxu1 %v445_v20  ;;  %569 = vmatmul.bf16.vlgmr.msra.gmra.mxu2 %v445_v20 }
 0x28c   :  { %v557_v29 = vpop.f32.mrf.mxu1 }
 0x28d   :  { %v10891_v32 = vadd.f32 %v557_v29, %v464_v30  ;;  %v9449_v29 = vld [vmem:[#allocation16 + $0x8c] sm:$0xf0]  ;;  %v6779_v30 = vld [vmem:[#allocation16 + $0x180] sm:$0xf] }
 0x28f   :  { %v574_v23 = vsel %vm404_vm0, %v10891_v32, 0.0 }
 0x292   :  { %v570_v33 = vpop.f32.mrf.mxu2 }
 0x293   :  { %v10893_v34 = vadd.f32 %v570_v33, %v465_v31  ;;  %v6652_v31 = vor.u32 %v9449_v29, %v6651_v28  ;;  %v9447_v33 = vld [vmem:[#allocation16 + $0x84] sm:$0xf]  ;;  %v9462_v28 = vld [vmem:[#allocation16 + $0xf4] sm:$0xf0]  ;;  %v6835_v29 = vld [vmem:[#allocation16 + $0x1e8] sm:$0xf] }
 0x294   :  { %v559_v35 = vpop.f32.mrf.mxu1 }
 0x295   :  { %v575_v36 = vsel %vm404_vm0, %v10893_v34, 0.0  ;;  %1027 = vmatpush.bf16.msra.mxu3 %v6652_v31 }
 0x296   :  { %v576_v37 = vadd.f32 %v575_v36, %v574_v23  ;;  %v9479_v36 = vld [vmem:[#allocation16 + $0x184] sm:$0xf] }
 0x298   :  { %577 = vadd.xlane.f32.xlu1 %v576_v37  ;;  %v6781_v37 = vld [vmem:[#allocation16 + $0x190] sm:$0xf0] }
 0x299   :  { %1028 = vmatpush.bf16.msra.mxu3 %v6636_v42  ;;  %v9490_v42 = vld [vmem:[#allocation16 + $0x1d4] sm:$0xf0] }
 0x29a   :  { %v572_v38 = vpop.f32.mrf.mxu2  ;;  %v6820_v44 = vor.u32 %v9490_v42, %v6819_v41  ;;  %v6739_v41 = vld [vmem:[#allocation16 + $0x128] sm:$0xf]  ;;  %v9470_v42 = vld [vmem:[#allocation16 + $0x134] sm:$0xf0] }
 0x29b   :  { %v6784_v38 = vor.u32 %v9479_v36, %v6781_v37  ;;  %v6837_v36 = vld [vmem:[#allocation16 + $0x1f8] sm:$0xf0]  ;;  %v6691_v37 = vld [vmem:[#allocation16 + $0xc8] sm:$0xf] }
 0x29d   :  { %1066 = vmatpush.bf16.msrb.mxu2 %v6784_v38  ;;  %1029 = vmatpush.bf16.msra.mxu3 %v6620_v54  ;;  %v9458_v38 = vld [vmem:[#allocation16 + $0xd4] sm:$0xf0] }
 0x29e   :  { %v6692_v40 = vor.u32 %v9458_v38, %v6691_v37  ;;  %v9486_v54 = vld [vmem:[#allocation16 + $0x1b4] sm:$0xf0]  ;;  %v6757_v37 = vld [vmem:[#allocation16 + $0x158] sm:$0xf0]  ;;  %v6611_v38 = vld [vmem:[#allocation16 + $0x28] sm:$0xf] }
 0x29f   :  { %v6804_v57 = vor.u32 %v9486_v54, %v6803_v52  ;;  %v6723_v52 = vld [vmem:[#allocation16 + $0x108] sm:$0xf] }
 0x2a1   :  { %1067 = vmatpush.bf16.msrb.mxu2 %v6768_v50  ;;  %1030 = vmatpush.bf16.msra.mxu3 %v6604_v2  ;;  %v6675_v50 = vld [vmem:[#allocation16 + $0xa8] sm:$0xf]  ;;  %v9448_v2 = vld [vmem:[#allocation16 + $0x8c] sm:$0xf] }
 0x2a2   :  { %v6676_v53 = vor.u32 %v9454_v51, %v6675_v50  ;;  %v6664_v8 = vor.u32 %v9448_v2, %v6661_v3  ;;  %v9434_v51 = vld [vmem:[#allocation16 + $0x14] sm:$0xf0] }
 0x2a5   :  { %1068 = vmatpush.bf16.msrb.mxu2 %v6752_v62  ;;  %1031 = vmatpush.bf16.msra.mxu3 %v6588_v14 }
 0x2a9   :  { %1069 = vmatpush.bf16.msrb.mxu2 %v6736_v10 }
 0x30b   :  { %v578_v18 = vpop.xlane.xlu1 %577 }
 0x30c   :  { %v586_v19 = vmul.f32 %v10899_v17, %v578_v18  ;;  %v6589_v18 = vld [vmem:[#allocation16 + $0x10] sm:$0xf0] }
 0x30e   :  { %v10903_v21 = vsub.f32 %v10891_v32, %v586_v19  ;;  %v10906_v22 = vsub.f32 %v10893_v34, %v586_v19  ;;  %v9481_v32 = vld [vmem:[#allocation16 + $0x18c] sm:$0xf0]  ;;  %v6653_v34 = vld [vmem:[#allocation16 + $0x90] sm:$0xf0]  ;;  %v6716_v19 = vor.u32 %v9465_v15, %v6715_v13  ;;  %v6771_v13 = vld [vmem:[#allocation16 + $0x168] sm:$0xf]  ;;  %v6644_v15 = vor.u32 %v9446_v12, %v6643_v11 }
 0x30f   :  { %v6780_v35 = vor.u32 %v9481_v32, %v6779_v30  ;;  %v6656_v23 = vor.u32 %v9447_v33, %v6653_v34  ;;  %v9494_v30 = vld [vmem:[#allocation16 + $0x1f4] sm:$0xf0]  ;;  %v9460_v33 = vld [vmem:[#allocation16 + $0xec] sm:$0xf]  ;;  %v6709_v34 = vld [vmem:[#allocation16 + $0xf8] sm:$0xf0] }
 0x310   :  { %v589_v24 = vmul.f32 %v10903_v21, %v10903_v21  ;;  %v590_v25 = vmul.f32 %v10906_v22, %v10906_v22  ;;  %v6836_v32 = vor.u32 %v9494_v30, %v6835_v29  ;;  %v9442_v30 = vld [vmem:[#allocation16 + $0x54] sm:$0xf0] }
 0x311   :  { %1040 = vmatpush.bf16.msrb.mxu0 %v6780_v35  ;;  %1053 = vmatpush.bf16.msrb.mxu1 %v6656_v23  ;;  %v9492_v35 = vld [vmem:[#allocation16 + $0x1ec] sm:$0xf]  ;;  %v6712_v23 = vor.u32 %v9460_v33, %v6709_v34  ;;  %v6629_v34 = vld [vmem:[#allocation16 + $0x58] sm:$0xf0] }
 0x312   :  { %v591_v26 = vsel %vm404_vm0, %v589_v24, 0.0  ;;  %v592_v27 = vsel %vm404_vm0, %v590_v25, 0.0  ;;  %v6592_v24 = vor.u32 %v9431_v16, %v6589_v18  ;;  %v9463_v25 = vld [vmem:[#allocation16 + $0x104] sm:$0xf]  ;;  %v6840_v39 = vor.u32 %v9492_v35, %v6837_v36  ;;  %v9478_v16 = vld [vmem:[#allocation16 + $0x174] sm:$0xf0] }
 0x313   :  { %v593_v20 = vadd.f32 %v592_v27, %v591_v26  ;;  %v6717_v26 = vld [vmem:[#allocation16 + $0x110] sm:$0xf0]  ;;  %v6707_v27 = vld [vmem:[#allocation16 + $0xe8] sm:$0xf]  ;;  %v9444_v18 = vld [vmem:[#allocation16 + $0x6c] sm:$0xf] }
 0x314   :  { %v6708_v31 = vor.u32 %v9462_v28, %v6707_v27  ;;  %v6773_v27 = vld [vmem:[#allocation16 + $0x178] sm:$0xf0]  ;;  %v9440_v33 = vld [vmem:[#allocation16 + $0x4c] sm:$0xf] }
 0x315   :  { %594 = vadd.xlane.f32.xlu1 %v593_v20  ;;  %1041 = vmatpush.bf16.msrb.mxu0 %v6764_v46  ;;  %v6720_v20 = vor.u32 %v9463_v25, %v6717_v26  ;;  %v9488_v46 = vld [vmem:[#allocation16 + $0x1cc] sm:$0xf] }
 0x316   :  { %1054 = vmatpush.bf16.msrb.mxu1 %v6640_v47  ;;  %1076 = vmatpush.bf16.msrb.mxu3 %v6708_v31  ;;  %v6821_v47 = vld [vmem:[#allocation16 + $0x1d8] sm:$0xf0]  ;;  %v9476_v26 = vld [vmem:[#allocation16 + $0x16c] sm:$0xf]  ;;  %v6755_v31 = vld [vmem:[#allocation16 + $0x148] sm:$0xf] }
 0x317   :  { %1070 = vmatpush.bf16.msrb.mxu2 %v6720_v20  ;;  %v6824_v49 = vor.u32 %v9488_v46, %v6821_v47  ;;  %v6627_v20 = vld [vmem:[#allocation16 + $0x48] sm:$0xf]  ;;  %v6776_v29 = vor.u32 %v9476_v26, %v6773_v27  ;;  %v9472_v36 = vld [vmem:[#allocation16 + $0x14c] sm:$0xf]  ;;  %v6740_v47 = vor.u32 %v9470_v42, %v6739_v41 }
 0x319   :  { %1042 = vmatpush.bf16.msrb.mxu0 %v6748_v58  ;;  %v6680_v58 = vor.u32 %v9452_v55, %v6677_v56  ;;  %v9432_v55 = vld [vmem:[#allocation16 + $0xc] sm:$0xf]  ;;  %v6597_v56 = vld [vmem:[#allocation16 + $0x18] sm:$0xf0] }
 0x31a   :  { %1055 = vmatpush.bf16.msrb.mxu1 %v6624_v59  ;;  %1077 = vmatpush.bf16.msrb.mxu3 %v6692_v40  ;;  %v9484_v59 = vld [vmem:[#allocation16 + $0x1ac] sm:$0xf]  ;;  %v9438_v40 = vld [vmem:[#allocation16 + $0x34] sm:$0xf0]  ;;  %v6600_v63 = vor.u32 %v9432_v55, %v6597_v56 }
 0x31b   :  { %1115 = vmatpush.bf16.msra.mxu2 %v6840_v39  ;;  %v6808_v62 = vor.u32 %v9484_v59, %v6805_v60  ;;  %v6760_v39 = vor.u32 %v9472_v36, %v6757_v37  ;;  %v6612_v46 = vor.u32 %v9438_v40, %v6611_v38  ;;  %v6725_v59 = vld [vmem:[#allocation16 + $0x118] sm:$0xf0] }
 0x31d   :  { %1043 = vmatpush.bf16.msrb.mxu0 %v6732_v6  ;;  %v6788_v6 = vor.u32 %v9482_v1, %v6787_v0 }
 0x31e   :  { %1056 = vmatpush.bf16.msrb.mxu1 %v6608_v7  ;;  %1078 = vmatpush.bf16.msrb.mxu3 %v6676_v53  ;;  %v6789_v7 = vld [vmem:[#allocation16 + $0x198] sm:$0xf0]  ;;  %v9466_v53 = vld [vmem:[#allocation16 + $0x114] sm:$0xf0] }
 0x31f   :  { %1116 = vmatpush.bf16.msra.mxu2 %v6824_v49  ;;  %v6792_v9 = vor.u32 %v9480_v4, %v6789_v7  ;;  %v6595_v49 = vld [vmem:[#allocation16 + $0x8] sm:$0xf]  ;;  %v610_v4 = vld [vmem:[#allocation13] sm:$0x3] }
 0x320   :  { %v6596_v61 = vor.u32 %v9434_v51, %v6595_v49  ;;  %v612_v7 = vperm.slane %v610_v4, 0 }
 0x321   :  { %1044 = vmatpush.bf16.msrb.mxu0 %v6716_v19  ;;  %v6645_v19 = vld [vmem:[#allocation16 + $0x78] sm:$0xf0] }
 0x322   :  { %1057 = vmatpush.bf16.msrb.mxu1 %v6592_v24  ;;  %1079 = vmatpush.bf16.msrb.mxu3 %v6660_v5  ;;  %v6772_v24 = vor.u32 %v9478_v16, %v6771_v13  ;;  %v6648_v25 = vor.u32 %v9444_v18, %v6645_v19 }
 0x323   :  { %1117 = vmatpush.bf16.msra.mxu2 %v6808_v62  ;;  %v6724_v62 = vor.u32 %v9466_v53, %v6723_v52 }
 0x325   :  { %1089 = vmatpush.bf16.msra.mxu0 %v6836_v32  ;;  %v6628_v32 = vor.u32 %v9442_v30, %v6627_v20  ;;  %v694_v30 = vld [vmem:[#allocation17] sm:$0xf] }
 0x326   :  { %1102 = vmatpush.bf16.msra.mxu1 %v6712_v23  ;;  %1080 = vmatpush.bf16.msrb.mxu3 %v6644_v15  ;;  %v6632_v23 = vor.u32 %v9440_v33, %v6629_v34  ;;  %v699_v38 = vperm.slane %v694_v30, 3 }
 0x327   :  { %1118 = vmatpush.bf16.msra.mxu2 %v6792_v9 }
 0x329   :  { %1090 = vmatpush.bf16.msra.mxu0 %v6820_v44  ;;  %v6613_v44 = vld [vmem:[#allocation16 + $0x38] sm:$0xf0] }
 0x32a   :  { %1103 = vmatpush.bf16.msra.mxu1 %v6696_v48  ;;  %1081 = vmatpush.bf16.msrb.mxu3 %v6628_v32  ;;  %v6741_v48 = vld [vmem:[#allocation16 + $0x138] sm:$0xf0]  ;;  %v6616_v50 = vor.u32 %v9436_v43, %v6613_v44 }
 0x32b   :  { %1119 = vmatpush.bf16.msra.mxu2 %v6776_v29  ;;  %v6744_v54 = vor.u32 %v9468_v45, %v6741_v48 }
 0x32d   :  { %1091 = vmatpush.bf16.msra.mxu0 %v6804_v57 }
 0x32e   :  { %1104 = vmatpush.bf16.msra.mxu1 %v6680_v58  ;;  %v9464_v58 = vld [vmem:[#allocation16 + $0x10c] sm:$0xf]  ;;  %1082 = vmatpush.bf16.msrb.mxu3 %v6612_v46 }
 0x32f   :  { %1120 = vmatpush.bf16.msra.mxu2 %v6760_v39  ;;  %v6728_v1 = vor.u32 %v9464_v58, %v6725_v59  ;;  %v698_v39 = vperm.slane %v694_v30, 2  ;;  %v10710_v58 = vmov 512.0  }
 0x331   :  { %1092 = vmatpush.bf16.msra.mxu0 %v6788_v6  ;;  %v618_v6 = vld [vmem:[#allocation14] sm:$0x3] }
 0x332   :  { %1105 = vmatpush.bf16.msra.mxu1 %v6664_v8  ;;  %1083 = vmatpush.bf16.msrb.mxu3 %v6596_v61  ;;  %v613_v8 = vperm.slane %v610_v4, 1  ;;  %v620_v12 = vperm.slane %v618_v6, 0  ;;  %v621_v13 = vperm.slane %v618_v6, 1  ;;  %v9683_v4 = vld [vmem:[#allocation22 + $0x5dc] sm:$0xf0] }
 0x333   :  { %1121 = vmatpush.bf16.msra.mxu2 %v6744_v54 }
 0x335   :  { %1093 = vmatpush.bf16.msra.mxu0 %v6772_v24 }
 0x336   :  { %1106 = vmatpush.bf16.msra.mxu1 %v6648_v25 }
 0x337   :  { %1122 = vmatpush.bf16.msra.mxu2 %v6728_v1 }
 0x33a   :  { %1107 = vmatpush.bf16.msra.mxu1 %v6632_v23 }
 0x33e   :  { %1108 = vmatpush.bf16.msra.mxu1 %v6616_v50 }
 0x342   :  { %1109 = vmatpush.bf16.msra.mxu1 %v6600_v63  ;;  %v9555_v63 = vld [vmem:[#allocation22 + $0x1dc] sm:$0xf0] }
 0x388   :  { %v595_v10 = vpop.xlane.xlu1 %594 }
 0x389   :  { %v596_v14 = vmul.f32 %v595_v10, %v10899_v17  ;;  %v9474_v17 = vld [vmem:[#allocation16 + $0x154] sm:$0xf0] }
 0x38a   :  { %v6756_v35 = vor.u32 %v9474_v17, %v6755_v31  ;;  %v696_v31 = vperm.slane %v694_v30, 0  ;;  %v697_v17 = vperm.slane %v694_v30, 1  ;;  %v9667_v30 = vld [vmem:[#allocation22 + $0x55c] sm:$0xf0] }
 0x38b   :  { %v10915_v28 = vadd.f32 1e-05, %v596_v14 }
 0x38c   :  { %1094 = vmatpush.bf16.msra.mxu0 %v6756_v35 }
 0x38d   :  { %10179 = vrsqrt.f32 %v10915_v28  ;;  %vm604_vm7 = vweird.f32 %v10915_v28 }
 0x38e   :  { %10181 = vrcp.f32 %v10710_v58  ;;  %v7707_v58 = vld [vmem:[#allocation22 + $0x6c0] sm:$0xf] }
 0x390   :  { %1095 = vmatpush.bf16.msra.mxu0 %v6740_v47 }
 0x393   :  { %v10180_v57 = vpop.eup %10179 }
 0x394   :  { %v599_v60 = vmul.f32 %v10180_v57, %v10915_v28  ;;  %1096 = vmatpush.bf16.msra.mxu0 %v6724_v62  ;;  %vm605_vm6 = vweird.f32 %v10180_v57  ;;  %v10938_v59 = vpop.eup %10181  ;;  %v7067_v62 = vld [vmem:[#allocation22 + $0x1c0] sm:$0xf] }
 0x395   :  { %vm606_vm8 = vmor %vm604_vm7, %vm605_vm6  ;;  %v7068_v1 = vor.u32 %v9555_v63, %v7067_v62  ;;  %vm1142_vm9 = vweird.f32 %v10938_v59  ;;  %v6907_v62 = vld [vmem:[#allocation22 + $0x80] sm:$0xf] }
 0x396   :  { %v600_v0 = vmul.f32 %v10180_v57, %v599_v60  ;;  %v1138_v60 = vmul.f32 512.0, %v10938_v59  ;;  %v9515_v63 = vld [vmem:[#allocation22 + $0x9c] sm:$0xf0] }
 0x398   :  { %v601_v2 = vmul.f32 0.5, %v600_v0  ;;  %v1139_v61 = vsub.f32 1.0, %v1138_v60  ;;  %v7323_v0 = vld [vmem:[#allocation22 + $0x3c0] sm:$0xf] }
 0x399   :  { %v9715_v60 = vld [vmem:[#allocation22 + $0x6dc] sm:$0xf0] }
 0x39a   :  { %v602_v3 = vsub.f32 1.5, %v601_v2  ;;  %v9619_v2 = vld [vmem:[#allocation22 + $0x3dc] sm:$0xf0] }
 0x39c   :  { %v603_v5 = vmul.f32 %v10180_v57, %v602_v3  ;;  %v7579_v3 = vld [vmem:[#allocation22 + $0x5c0] sm:$0xf] }
 0x39d   :  { %v7580_v6 = vor.u32 %v9683_v4, %v7579_v3  ;;  %v7163_v3 = vld [vmem:[#allocation22 + $0x280] sm:$0xf] }
 0x39e   :  { %v607_v9 = vsel %vm606_vm8, %v10180_v57, %v603_v5  ;;  %v7324_v5 = vor.u32 %v9619_v2, %v7323_v0  ;;  %v9579_v4 = vld [vmem:[#allocation22 + $0x29c] sm:$0xf0] }
 0x39f   :  { %v608_v10 = vmul.f32 %v607_v9, %v10903_v21  ;;  %v609_v11 = vmul.f32 %v607_v9, %v10906_v22  ;;  %v7035_v9 = vld [vmem:[#allocation22 + $0x180] sm:$0xf] }
 0x3a1   :  { %v616_v14 = vmul.f32 %v612_v7, %v608_v10  ;;  %v617_v15 = vmul.f32 %v613_v8, %v609_v11  ;;  %v7835_v7 = vld [vmem:[#allocation22 + $0x7c0] sm:$0xf] }
 0x3a2   :  { %v9747_v8 = vld [vmem:[#allocation22 + $0x7dc] sm:$0xf0] }
 0x3a3   :  { %v624_v16 = vadd.f32 %v620_v12, %v616_v14  ;;  %v625_v18 = vadd.f32 %v621_v13, %v617_v15  ;;  %v7836_v10 = vor.u32 %v9747_v8, %v7835_v7  ;;  %v9547_v11 = vld [vmem:[#allocation22 + $0x19c] sm:$0xf0] }
 0x3a4   :  { %v7291_v12 = vld [vmem:[#allocation22 + $0x380] sm:$0xf]  ;;  %v7036_v14 = vor.u32 %v9547_v11, %v7035_v9 }
 0x3a5   :  { %v626_v19 = vmax.f32 %v624_v16, 0.0  ;;  %v627_v24 = vmax.f32 %v625_v18, 0.0  ;;  %v9611_v13 = vld [vmem:[#allocation22 + $0x39c] sm:$0xf0] }
 0x3a6   :  { %v7292_v15 = vor.u32 %v9611_v13, %v7291_v12  ;;  %v7547_v16 = vld [vmem:[#allocation22 + $0x580] sm:$0xf]  ;;  %v6908_v12 = vor.u32 %v9515_v63, %v6907_v62  ;;  %v7581_v62 = vld [vmem:[#allocation22 + $0x5e0] sm:$0xf0] }
 0x3a7   :  { %v628_v25 = vpack.c.bf16 %v626_v19, %v626_v19  ;;  %v629_v26 = vpack.c.bf16 %v627_v24, %v627_v24  ;;  %v9675_v18 = vld [vmem:[#allocation22 + $0x59c] sm:$0xf0]  ;;  %v9743_v63 = vld [vmem:[#allocation22 + $0x7c4] sm:$0xf] }
 0x3a8   :  { %v7803_v19 = vld [vmem:[#allocation22 + $0x780] sm:$0xf]  ;;  %v7548_v24 = vor.u32 %v9675_v18, %v7547_v16 }
 0x3a9   :  { %1032 = vmatmul.bf16.vlgmr.msra.gmra.mxu3 %v628_v25  ;;  %1045 = vmatmul.bf16.vlgmr.msrb.gmra.mxu0 %v629_v26  ;;  %v9643_v7 = vld [vmem:[#allocation22 + $0x49c] sm:$0xf0] }
 0x3aa   :  { %1058 = vmatmul.bf16.vlgmr.msrb.gmra.mxu1 %v628_v25  ;;  %1071 = vmatmul.bf16.vlgmr.msrb.gmra.mxu2 %v629_v26  ;;  %v7675_v8 = vld [vmem:[#allocation22 + $0x680] sm:$0xf] }
 0x3ab   :  { %2768 = vmatpush.bf16.msra.mxu3 %v7068_v1  ;;  %2781 = vmatpush.bf16.msrb.mxu0 %v7324_v5  ;;  %v7419_v5 = vld [vmem:[#allocation22 + $0x480] sm:$0xf] }
 0x3ac   :  { %2794 = vmatpush.bf16.msrb.mxu1 %v7580_v6  ;;  %2807 = vmatpush.bf16.msrb.mxu2 %v7836_v10  ;;  %v7708_v6 = vor.u32 %v9715_v60, %v7707_v58  ;;  %v9707_v9 = vld [vmem:[#allocation22 + $0x69c] sm:$0xf0]  ;;  %v7420_v13 = vor.u32 %v9643_v7, %v7419_v5  ;;  %v9607_v7 = vld [vmem:[#allocation22 + $0x384] sm:$0xf] }
 0x3ad   :  { %v9507_v16 = vld [vmem:[#allocation22 + $0x5c] sm:$0xf0] }
 0x3ae   :  { %v7131_v18 = vld [vmem:[#allocation22 + $0x240] sm:$0xf] }
 0x3af   :  { %2769 = vmatpush.bf16.msra.mxu3 %v7036_v14  ;;  %2782 = vmatpush.bf16.msrb.mxu0 %v7292_v15  ;;  %v7676_v14 = vor.u32 %v9707_v9, %v7675_v8  ;;  %v6875_v15 = vld [vmem:[#allocation22 + $0x40] sm:$0xf]  ;;  %v7293_v8 = vld [vmem:[#allocation22 + $0x3a0] sm:$0xf0] }
 0x3b0   :  { %2795 = vmatpush.bf16.msrb.mxu1 %v7548_v24  ;;  %v9671_v9 = vld [vmem:[#allocation22 + $0x584] sm:$0xf] }
 0x3b9   :  { %1084 = vmatmul.bf16.vlgmr.msrb.gmra.mxu3 %v628_v25  ;;  %1097 = vmatmul.bf16.vlgmr.msra.gmra.mxu0 %v629_v26 }
 0x3ba   :  { %1110 = vmatmul.bf16.vlgmr.msra.gmra.mxu1 %v628_v25  ;;  %1123 = vmatmul.bf16.vlgmr.msra.gmra.mxu2 %v629_v26  ;;  %v9739_v25 = vld [vmem:[#allocation22 + $0x79c] sm:$0xf0] }
 0x3bb   :  { %v7003_v26 = vld [vmem:[#allocation22 + $0x140] sm:$0xf] }
 0x426   :  { %v1046_v21 = vpop.f32.mrf.mxu0 }
 0x427   :  { %v1059_v22 = vpop.f32.mrf.mxu1 }
 0x428   :  { %v1060_v36 = vadd.f32 %v1059_v22, %v697_v17  ;;  %v7804_v22 = vor.u32 %v9739_v25, %v7803_v19  ;;  %v1140_v17 = vmul.f32 %v10938_v59, %v1139_v61 }
 0x42a   :  { %2808 = vmatpush.bf16.msrb.mxu2 %v7804_v22  ;;  %v7387_v22 = vld [vmem:[#allocation22 + $0x440] sm:$0xf] }
 0x42c   :  { %v1033_v27 = vpop.f32.mrf.mxu3 }
 0x42d   :  { %v1072_v20 = vpop.f32.mrf.mxu2  ;;  %v1034_v33 = vadd.f32 %v1033_v27, %v696_v31  ;;  %v7259_v27 = vld [vmem:[#allocation22 + $0x340] sm:$0xf] }
 0x42e   :  { %v1048_v28 = vpop.f32.mrf.mxu0  ;;  %v10924_v40 = vadd.f32 %v1072_v20, %v1060_v36  ;;  %v9603_v20 = vld [vmem:[#allocation22 + $0x35c] sm:$0xf0] }
 0x42f   :  { %v1061_v29 = vpop.f32.mrf.mxu1  ;;  %v10922_v37 = vadd.f32 %v1046_v21, %v1034_v33  ;;  %v9539_v21 = vld [vmem:[#allocation22 + $0x15c] sm:$0xf0]  ;;  %v7260_v33 = vor.u32 %v9603_v20, %v7259_v27 }
 0x430   :  { %v1129_v47 = vsel %vm404_vm0, %v10924_v40, 0.0  ;;  %v7515_v28 = vld [vmem:[#allocation22 + $0x540] sm:$0xf]  ;;  %v7004_v29 = vor.u32 %v9539_v21, %v7003_v26 }
 0x431   :  { %v1128_v42 = vsel %vm404_vm0, %v10922_v37, 0.0  ;;  %v7771_v31 = vld [vmem:[#allocation22 + $0x740] sm:$0xf]  ;;  %2783 = vmatpush.bf16.msrb.mxu0 %v7260_v33 }
 0x432   :  { %v1130_v51 = vadd.f32 %v1129_v47, %v1128_v42  ;;  %v7227_v36 = vld [vmem:[#allocation22 + $0x300] sm:$0xf]  ;;  %2770 = vmatpush.bf16.msra.mxu3 %v7004_v29 }
 0x433   :  { %v9659_v42 = vld [vmem:[#allocation22 + $0x51c] sm:$0xf0] }
 0x434   :  { %v1035_v32 = vpop.f32.mrf.mxu3  ;;  %v9571_v21 = vld [vmem:[#allocation22 + $0x25c] sm:$0xf0] }
 0x435   :  { %v1074_v34 = vpop.f32.mrf.mxu2  ;;  %v9731_v32 = vld [vmem:[#allocation22 + $0x75c] sm:$0xf0] }
 0x436   :  { %v1098_v35 = vpop.f32.mrf.mxu0  ;;  %v7516_v34 = vor.u32 %v9667_v30, %v7515_v28  ;;  %v9635_v27 = vld [vmem:[#allocation22 + $0x45c] sm:$0xf0] }
 0x437   :  { %v1111_v23 = vpop.f32.mrf.mxu1  ;;  %v7643_v20 = vld [vmem:[#allocation22 + $0x640] sm:$0xf]  ;;  %v7388_v30 = vor.u32 %v9635_v27, %v7387_v22  ;;  %v7261_v22 = vld [vmem:[#allocation22 + $0x360] sm:$0xf0] }
 0x438   :  { %v1112_v43 = vadd.f32 %v1111_v23, %v699_v38  ;;  %v9531_v23 = vld [vmem:[#allocation22 + $0x11c] sm:$0xf0]  ;;  %v7772_v38 = vor.u32 %v9731_v32, %v7771_v31  ;;  %2796 = vmatpush.bf16.msrb.mxu1 %v7516_v34  ;;  %v9663_v27 = vld [vmem:[#allocation22 + $0x544] sm:$0xf] }
 0x439   :  { %v9699_v28 = vld [vmem:[#allocation22 + $0x65c] sm:$0xf0] }
 0x43a   :  { %2809 = vmatpush.bf16.msrb.mxu2 %v7772_v38  ;;  %v7644_v33 = vor.u32 %v9699_v28, %v7643_v20  ;;  %v7517_v20 = vld [vmem:[#allocation22 + $0x560] sm:$0xf0] }
 0x43c   :  { %v1085_v41 = vpop.f32.mrf.mxu3 }
 0x43d   :  { %v1086_v44 = vadd.f32 %v1085_v41, %v698_v39  ;;  %v1124_v45 = vpop.f32.mrf.mxu2  ;;  %v9595_v39 = vld [vmem:[#allocation22 + $0x31c] sm:$0xf0] }
 0x43e   :  { %v1100_v46 = vpop.f32.mrf.mxu0  ;;  %v10932_v49 = vadd.f32 %v1124_v45, %v1112_v43  ;;  %v7483_v41 = vld [vmem:[#allocation22 + $0x500] sm:$0xf]  ;;  %v7228_v47 = vor.u32 %v9595_v39, %v7227_v36 }
 0x43f   :  { %v10930_v48 = vadd.f32 %v1098_v35, %v1086_v44  ;;  %v1113_v50 = vpop.f32.mrf.mxu1  ;;  %v6971_v35 = vld [vmem:[#allocation22 + $0x100] sm:$0xf]  ;;  %v1141_v46 = vadd.f32 %v10938_v59, %v1140_v17 }
 0x440   :  { %v1133_v54 = vsel %vm404_vm0, %v10932_v49, 0.0  ;;  %v7739_v43 = vld [vmem:[#allocation22 + $0x700] sm:$0xf]  ;;  %v6972_v45 = vor.u32 %v9531_v23, %v6971_v35  ;;  %v7484_v50 = vor.u32 %v9659_v42, %v7483_v41  ;;  %2784 = vmatpush.bf16.msrb.mxu0 %v7228_v47 }
 0x441   :  { %v1131_v52 = vsel %vm404_vm0, %v10930_v48, 0.0  ;;  %v9723_v44 = vld [vmem:[#allocation22 + $0x71c] sm:$0xf0]  ;;  %v10945_v0 = vsel %vm1142_vm9, %v10938_v59, %v1141_v46  ;;  %v7164_v59 = vor.u32 %v9579_v4, %v7163_v3  ;;  %v9543_v3 = vld [vmem:[#allocation22 + $0x184] sm:$0xf] }
 0x442   :  { %v1132_v53 = vadd.f32 %v1131_v52, %v1130_v51  ;;  %v6939_v51 = vld [vmem:[#allocation22 + $0xc0] sm:$0xf]  ;;  %2771 = vmatpush.bf16.msra.mxu3 %v6972_v45  ;;  %2797 = vmatpush.bf16.msrb.mxu1 %v7484_v50  ;;  %v7037_v4 = vld [vmem:[#allocation22 + $0x1a0] sm:$0xf0] }
 0x443   :  { %v9523_v52 = vld [vmem:[#allocation22 + $0xdc] sm:$0xf0] }
 0x444   :  { %v1087_v55 = vpop.f32.mrf.mxu3  ;;  %v1134_v56 = vadd.f32 %v1133_v54, %v1132_v53  ;;  %v7195_v53 = vld [vmem:[#allocation22 + $0x2c0] sm:$0xf]  ;;  %v7740_v54 = vor.u32 %v9723_v44, %v7739_v43  ;;  %v6940_v61 = vor.u32 %v9523_v52, %v6939_v51 }
 0x445   :  { %v1126_v57 = vpop.f32.mrf.mxu2  ;;  %v9587_v55 = vld [vmem:[#allocation22 + $0x2dc] sm:$0xf0] }
 0x446   :  { %1135 = vadd.xlane.f32.xlu2 %v1134_v56  ;;  %v7451_v56 = vld [vmem:[#allocation22 + $0x4c0] sm:$0xf]  ;;  %v7196_v1 = vor.u32 %v9587_v55, %v7195_v53  ;;  %2810 = vmatpush.bf16.msrb.mxu2 %v7740_v54  ;;  %v9551_v53 = vld [vmem:[#allocation22 + $0x1c4] sm:$0xf] }
 0x447   :  { %v9651_v57 = vld [vmem:[#allocation22 + $0x4dc] sm:$0xf0]  ;;  %2772 = vmatpush.bf16.msra.mxu3 %v6940_v61  ;;  %v7069_v55 = vld [vmem:[#allocation22 + $0x1e0] sm:$0xf0] }
 0x448   :  { %v7452_v2 = vor.u32 %v9651_v57, %v7451_v56  ;;  %2785 = vmatpush.bf16.msrb.mxu0 %v7196_v1  ;;  %v6843_v39 = vld [vmem:[#allocation22] sm:$0xf]  ;;  %v9615_v56 = vld [vmem:[#allocation22 + $0x3c4] sm:$0xf]  ;;  %v7072_v58 = vor.u32 %v9551_v53, %v7069_v55 }
 0x449   :  { %v9499_v41 = vld [vmem:[#allocation22 + $0x1c] sm:$0xf0]  ;;  %v7325_v57 = vld [vmem:[#allocation22 + $0x3e0] sm:$0xf0] }
 0x44a   :  { %2798 = vmatpush.bf16.msrb.mxu1 %v7452_v2  ;;  %2811 = vmatpush.bf16.msrb.mxu2 %v7708_v6  ;;  %v7099_v42 = vld [vmem:[#allocation22 + $0x200] sm:$0xf]  ;;  %v6844_v43 = vor.u32 %v9499_v41, %v6843_v39  ;;  %v7328_v60 = vor.u32 %v9615_v56, %v7325_v57  ;;  %v9679_v61 = vld [vmem:[#allocation22 + $0x5c4] sm:$0xf]  ;;  %v7040_v6 = vor.u32 %v9543_v3, %v7037_v4 }
 0x44b   :  { %2773 = vmatpush.bf16.msra.mxu3 %v6908_v12  ;;  %v9563_v44 = vld [vmem:[#allocation22 + $0x21c] sm:$0xf0]  ;;  %v7584_v1 = vor.u32 %v9679_v61, %v7581_v62  ;;  %v7837_v2 = vld [vmem:[#allocation22 + $0x7e0] sm:$0xf0] }
 0x44c   :  { %2786 = vmatpush.bf16.msrb.mxu0 %v7164_v59  ;;  %v7355_v45 = vld [vmem:[#allocation22 + $0x400] sm:$0xf]  ;;  %v7100_v47 = vor.u32 %v9563_v44, %v7099_v42  ;;  %v7840_v5 = vor.u32 %v9743_v63, %v7837_v2  ;;  %v9735_v12 = vld [vmem:[#allocation22 + $0x784] sm:$0xf] }
 0x44d   :  { %v9627_v46 = vld [vmem:[#allocation22 + $0x41c] sm:$0xf0]  ;;  %v7805_v59 = vld [vmem:[#allocation22 + $0x7a0] sm:$0xf0] }
 0x44e   :  { %2799 = vmatpush.bf16.msrb.mxu1 %v7420_v13  ;;  %2812 = vmatpush.bf16.msrb.mxu2 %v7676_v14  ;;  %v7356_v50 = vor.u32 %v9627_v46, %v7355_v45  ;;  %v7611_v51 = vld [vmem:[#allocation22 + $0x600] sm:$0xf]  ;;  %v7808_v14 = vor.u32 %v9735_v12, %v7805_v59  ;;  %v9519_v41 = vld [vmem:[#allocation22 + $0xc4] sm:$0xf] }
 0x44f   :  { %v9691_v52 = vld [vmem:[#allocation22 + $0x61c] sm:$0xf0]  ;;  %v6941_v42 = vld [vmem:[#allocation22 + $0xe0] sm:$0xf0] }
 0x450   :  { %v7612_v54 = vor.u32 %v9691_v52, %v7611_v51  ;;  %v6944_v44 = vor.u32 %v9519_v41, %v6941_v42  ;;  %v7197_v45 = vld [vmem:[#allocation22 + $0x2e0] sm:$0xf0] }
 0x451   :  { %v9647_v46 = vld [vmem:[#allocation22 + $0x4c4] sm:$0xf] }
 0x452   :  { %2800 = vmatpush.bf16.msrb.mxu1 %v7388_v30  ;;  %2813 = vmatpush.bf16.msrb.mxu2 %v7644_v33  ;;  %v6973_v30 = vld [vmem:[#allocation22 + $0x120] sm:$0xf0] }
 0x453   :  { %v9655_v33 = vld [vmem:[#allocation22 + $0x504] sm:$0xf] }
 0x454   :  { %v9711_v52 = vld [vmem:[#allocation22 + $0x6c4] sm:$0xf] }
 0x455   :  { %v7709_v53 = vld [vmem:[#allocation22 + $0x6e0] sm:$0xf0] }
 0x456   :  { %2801 = vmatpush.bf16.msrb.mxu1 %v7356_v50  ;;  %2814 = vmatpush.bf16.msrb.mxu2 %v7612_v54  ;;  %v7712_v54 = vor.u32 %v9711_v52, %v7709_v53  ;;  %v9511_v55 = vld [vmem:[#allocation22 + $0x84] sm:$0xf] }
 0x457   :  { %v6909_v56 = vld [vmem:[#allocation22 + $0xa0] sm:$0xf0] }
 0x458   :  { %v9575_v57 = vld [vmem:[#allocation22 + $0x284] sm:$0xf] }
 0x459   :  { %v9639_v61 = vld [vmem:[#allocation22 + $0x484] sm:$0xf] }
 0x45a   :  { %2846 = vmatpush.bf16.msra.mxu1 %v7584_v1  ;;  %2859 = vmatpush.bf16.msra.mxu2 %v7840_v5  ;;  %v7421_v62 = vld [vmem:[#allocation22 + $0x4a0] sm:$0xf0] }
 0x45b   :  { %v7424_v1 = vor.u32 %v9639_v61, %v7421_v62  ;;  %v9703_v2 = vld [vmem:[#allocation22 + $0x684] sm:$0xf] }
 0x45c   :  { %v7677_v3 = vld [vmem:[#allocation22 + $0x6a0] sm:$0xf0] }
 0x45d   :  { %v7680_v4 = vor.u32 %v9703_v2, %v7677_v3  ;;  %v9503_v5 = vld [vmem:[#allocation22 + $0x44] sm:$0xf]  ;;  %v9556_v2 = vld [vmem:[#allocation22 + $0x1e4] sm:$0xf0] }
 0x45e   :  { %2860 = vmatpush.bf16.msra.mxu2 %v7808_v14  ;;  %v7645_v14 = vld [vmem:[#allocation22 + $0x660] sm:$0xf0]  ;;  %v7331_v3 = vld [vmem:[#allocation22 + $0x3c8] sm:$0xf] }
 0x4b9   :  { %v1136_v10 = vpop.xlane.xlu2 %1135 }
 0x4ba   :  { %v1144_v11 = vmul.f32 %v10945_v0, %v1136_v10  ;;  %v7296_v10 = vor.u32 %v9607_v7, %v7293_v8  ;;  %v9567_v7 = vld [vmem:[#allocation22 + $0x244] sm:$0xf] }
 0x4bc   :  { %v10949_v19 = vsub.f32 %v10922_v37, %v1144_v11  ;;  %v10952_v24 = vsub.f32 %v10924_v40, %v1144_v11  ;;  %v10955_v25 = vsub.f32 %v10930_v48, %v1144_v11  ;;  %v10958_v26 = vsub.f32 %v10932_v49, %v1144_v11  ;;  %v7549_v11 = vld [vmem:[#allocation22 + $0x5a0] sm:$0xf0] }
 0x4bd   :  { %v6876_v48 = vor.u32 %v9507_v16, %v6875_v15  ;;  %v7132_v49 = vor.u32 %v9571_v21, %v7131_v18  ;;  %v7552_v13 = vor.u32 %v9671_v9, %v7549_v11  ;;  %v9535_v15 = vld [vmem:[#allocation22 + $0x144] sm:$0xf] }
 0x4be   :  { %v1149_v29 = vmul.f32 %v10949_v19, %v10949_v19  ;;  %v1150_v37 = vmul.f32 %v10952_v24, %v10952_v24  ;;  %v1151_v40 = vmul.f32 %v10955_v25, %v10955_v25  ;;  %v1152_v31 = vmul.f32 %v10958_v26, %v10958_v26  ;;  %v7005_v16 = vld [vmem:[#allocation22 + $0x160] sm:$0xf0] }
 0x4bf   :  { %2774 = vmatpush.bf16.msra.mxu3 %v6876_v48  ;;  %2787 = vmatpush.bf16.msrb.mxu0 %v7132_v49  ;;  %v9599_v18 = vld [vmem:[#allocation22 + $0x344] sm:$0xf]  ;;  %v7008_v21 = vor.u32 %v9535_v15, %v7005_v16 }
 0x4c0   :  { %v1153_v32 = vsel %vm404_vm0, %v1149_v29, 0.0  ;;  %v1154_v17 = vsel %vm404_vm0, %v1150_v37, 0.0  ;;  %v1156_v35 = vsel %vm404_vm0, %v1151_v40, 0.0  ;;  %v1158_v36 = vsel %vm404_vm0, %v1152_v31, 0.0  ;;  %2847 = vmatpush.bf16.msra.mxu1 %v7552_v13  ;;  %v9727_v37 = vld [vmem:[#allocation22 + $0x744] sm:$0xf] }
 0x4c1   :  { %v1155_v34 = vadd.f32 %v1154_v17, %v1153_v32  ;;  %v7264_v28 = vor.u32 %v9599_v18, %v7261_v22  ;;  %v7520_v29 = vor.u32 %v9663_v27, %v7517_v20  ;;  %v7773_v40 = vld [vmem:[#allocation22 + $0x760] sm:$0xf0] }
 0x4c2   :  { %v7776_v48 = vor.u32 %v9727_v37, %v7773_v40  ;;  %v9527_v49 = vld [vmem:[#allocation22 + $0x104] sm:$0xf] }
 0x4c3   :  { %v1157_v23 = vadd.f32 %v1156_v35, %v1155_v34  ;;  %2775 = vmatpush.bf16.msra.mxu3 %v6844_v43  ;;  %2788 = vmatpush.bf16.msrb.mxu0 %v7100_v47  ;;  %v9591_v31 = vld [vmem:[#allocation22 + $0x304] sm:$0xf]  ;;  %v6976_v32 = vor.u32 %v9527_v49, %v6973_v30 }
 0x4c4   :  { %v7229_v17 = vld [vmem:[#allocation22 + $0x320] sm:$0xf0]  ;;  %2848 = vmatpush.bf16.msra.mxu1 %v7520_v29  ;;  %2861 = vmatpush.bf16.msra.mxu2 %v7776_v48 }
 0x4c5   :  { %v1159_v38 = vadd.f32 %v1158_v36, %v1157_v23  ;;  %v7485_v34 = vld [vmem:[#allocation22 + $0x520] sm:$0xf0]  ;;  %v7232_v35 = vor.u32 %v9591_v31, %v7229_v17 }
 0x4c6   :  { %v7488_v23 = vor.u32 %v9655_v33, %v7485_v34  ;;  %v9719_v36 = vld [vmem:[#allocation22 + $0x704] sm:$0xf] }
 0x4c7   :  { %1160 = vadd.xlane.f32.xlu2 %v1159_v38  ;;  %2820 = vmatpush.bf16.msrb.mxu3 %v7072_v58  ;;  %v7741_v38 = vld [vmem:[#allocation22 + $0x720] sm:$0xf0]  ;;  %v6912_v58 = vor.u32 %v9511_v55, %v6909_v56 }
 0x4c8   :  { %2833 = vmatpush.bf16.msra.mxu0 %v7328_v60  ;;  %v7744_v39 = vor.u32 %v9719_v36, %v7741_v38  ;;  %v9583_v43 = vld [vmem:[#allocation22 + $0x2c4] sm:$0xf]  ;;  %2849 = vmatpush.bf16.msra.mxu1 %v7488_v23  ;;  %v1178_v23 = vld [vmem:[#allocation19] sm:$0xf]  ;;  %v1192_v36 = vld [vmem:[#allocation20] sm:$0xf] }
 0x4c9   :  { %v7453_v47 = vld [vmem:[#allocation22 + $0x4e0] sm:$0xf0]  ;;  %v7200_v50 = vor.u32 %v9583_v43, %v7197_v45  ;;  %v1182_v42 = vperm.slane %v1178_v23, 2  ;;  %v1183_v43 = vperm.slane %v1178_v23, 3  ;;  %v1195_v45 = vperm.slane %v1192_v36, 1 }
 0x4ca   :  { %v7456_v51 = vor.u32 %v9647_v46, %v7453_v47  ;;  %2862 = vmatpush.bf16.msra.mxu2 %v7744_v39  ;;  %v7165_v60 = vld [vmem:[#allocation22 + $0x2a0] sm:$0xf0]  ;;  %v1180_v39 = vperm.slane %v1178_v23, 0  ;;  %v1196_v46 = vperm.slane %v1192_v36, 2  ;;  %v1197_v47 = vperm.slane %v1192_v36, 3 }
 0x4cb   :  { %2821 = vmatpush.bf16.msrb.mxu3 %v7040_v6  ;;  %v7168_v63 = vor.u32 %v9575_v57, %v7165_v60  ;;  %v6877_v6 = vld [vmem:[#allocation22 + $0x60] sm:$0xf0]  ;;  %v7075_v60 = vld [vmem:[#allocation22 + $0x1c8] sm:$0xf] }
 0x4cc   :  { %2834 = vmatpush.bf16.msra.mxu0 %v7296_v10  ;;  %2850 = vmatpush.bf16.msra.mxu1 %v7456_v51  ;;  %v6880_v8 = vor.u32 %v9503_v5, %v6877_v6  ;;  %v7133_v9 = vld [vmem:[#allocation22 + $0x260] sm:$0xf0]  ;;  %v7587_v5 = vld [vmem:[#allocation22 + $0x5c8] sm:$0xf] }
 0x4cd   :  { %v9631_v10 = vld [vmem:[#allocation22 + $0x444] sm:$0xf]  ;;  %v7136_v12 = vor.u32 %v9567_v7, %v7133_v9  ;;  %v7843_v6 = vld [vmem:[#allocation22 + $0x7c8] sm:$0xf]  ;;  %v7076_v9 = vor.u32 %v9556_v2, %v7075_v60 }
 0x4ce   :  { %2863 = vmatpush.bf16.msra.mxu2 %v7712_v54  ;;  %v7389_v11 = vld [vmem:[#allocation22 + $0x460] sm:$0xf0]  ;;  %v7459_v60 = vld [vmem:[#allocation22 + $0x4c8] sm:$0xf] }
 0x4cf   :  { %2822 = vmatpush.bf16.msrb.mxu3 %v7008_v21  ;;  %v7392_v59 = vor.u32 %v9631_v10, %v7389_v11  ;;  %v9695_v13 = vld [vmem:[#allocation22 + $0x644] sm:$0xf] }
 0x4d0   :  { %2835 = vmatpush.bf16.msra.mxu0 %v7264_v28  ;;  %2851 = vmatpush.bf16.msra.mxu1 %v7424_v1  ;;  %v7648_v15 = vor.u32 %v9695_v13, %v7645_v14  ;;  %v9495_v16 = vld [vmem:[#allocation22 + $0x4] sm:$0xf]  ;;  %v7043_v14 = vld [vmem:[#allocation22 + $0x188] sm:$0xf] }
 0x4d1   :  { %v6845_v18 = vld [vmem:[#allocation22 + $0x20] sm:$0xf0] }
 0x4d2   :  { %2864 = vmatpush.bf16.msra.mxu2 %v7680_v4  ;;  %v9559_v21 = vld [vmem:[#allocation22 + $0x204] sm:$0xf]  ;;  %v6848_v22 = vor.u32 %v9495_v16, %v6845_v18  ;;  %v9620_v4 = vld [vmem:[#allocation22 + $0x3e4] sm:$0xf0] }
 0x4d3   :  { %2823 = vmatpush.bf16.msrb.mxu3 %v6976_v32  ;;  %v7101_v27 = vld [vmem:[#allocation22 + $0x220] sm:$0xf0]  ;;  %v7332_v10 = vor.u32 %v9620_v4, %v7331_v3  ;;  %v6915_v3 = vld [vmem:[#allocation22 + $0x88] sm:$0xf] }
 0x4d4   :  { %2836 = vmatpush.bf16.msra.mxu0 %v7232_v35  ;;  %v9623_v20 = vld [vmem:[#allocation22 + $0x404] sm:$0xf]  ;;  %2852 = vmatpush.bf16.msra.mxu1 %v7392_v59  ;;  %v7104_v37 = vor.u32 %v9559_v21, %v7101_v27  ;;  %v7299_v21 = vld [vmem:[#allocation22 + $0x388] sm:$0xf] }
 0x4d5   :  { %v7357_v28 = vld [vmem:[#allocation22 + $0x420] sm:$0xf0]  ;;  %v7555_v27 = vld [vmem:[#allocation22 + $0x588] sm:$0xf] }
 0x4d6   :  { %v7360_v40 = vor.u32 %v9623_v20, %v7357_v28  ;;  %v9687_v48 = vld [vmem:[#allocation22 + $0x604] sm:$0xf]  ;;  %2865 = vmatpush.bf16.msra.mxu2 %v7648_v15  ;;  %v9548_v15 = vld [vmem:[#allocation22 + $0x1a4] sm:$0xf0] }
 0x4d7   :  { %2824 = vmatpush.bf16.msrb.mxu3 %v6944_v44  ;;  %v7613_v49 = vld [vmem:[#allocation22 + $0x620] sm:$0xf0]  ;;  %v1194_v44 = vperm.slane %v1192_v36, 0  ;;  %v9676_v20 = vld [vmem:[#allocation22 + $0x5a4] sm:$0xf0] }
 0x4d8   :  { %2837 = vmatpush.bf16.msra.mxu0 %v7200_v50  ;;  %v7616_v31 = vor.u32 %v9687_v48, %v7613_v49  ;;  %2853 = vmatpush.bf16.msra.mxu1 %v7360_v40  ;;  %v7811_v28 = vld [vmem:[#allocation22 + $0x788] sm:$0xf] }
 0x4d9   :  { %v7011_v48 = vld [vmem:[#allocation22 + $0x148] sm:$0xf] }
 0x4da   :  { %2866 = vmatpush.bf16.msra.mxu2 %v7616_v31  ;;  %v9540_v49 = vld [vmem:[#allocation22 + $0x164] sm:$0xf0] }
 0x4db   :  { %2825 = vmatpush.bf16.msrb.mxu3 %v6912_v58  ;;  %v7012_v36 = vor.u32 %v9540_v49, %v7011_v48  ;;  %v9516_v4 = vld [vmem:[#allocation22 + $0xa4] sm:$0xf0] }
 0x4dc   :  { %2838 = vmatpush.bf16.msra.mxu0 %v7168_v63  ;;  %v9500_v49 = vld [vmem:[#allocation22 + $0x24] sm:$0xf0] }
 0x4df   :  { %2826 = vmatpush.bf16.msrb.mxu3 %v6880_v8 }
 0x4e0   :  { %2839 = vmatpush.bf16.msra.mxu0 %v7136_v12 }
 0x4e3   :  { %2827 = vmatpush.bf16.msrb.mxu3 %v6848_v22  ;;  %v9612_v22 = vld [vmem:[#allocation22 + $0x3a4] sm:$0xf0] }
 0x4e4   :  { %2840 = vmatpush.bf16.msra.mxu0 %v7104_v37  ;;  %v7044_v37 = vor.u32 %v9548_v15, %v7043_v14  ;;  %v7300_v40 = vor.u32 %v9612_v22, %v7299_v21  ;;  %v6883_v14 = vld [vmem:[#allocation22 + $0x48] sm:$0xf] }
 0x4e5   :  { %v9508_v15 = vld [vmem:[#allocation22 + $0x64] sm:$0xf0] }
 0x4e6   :  { %v7139_v21 = vld [vmem:[#allocation22 + $0x248] sm:$0xf] }
 0x4e7   :  { %v9572_v22 = vld [vmem:[#allocation22 + $0x264] sm:$0xf0] }
 0x4e8   :  { %v7140_v48 = vor.u32 %v9572_v22, %v7139_v21  ;;  %v9592_v21 = vld [vmem:[#allocation22 + $0x30c] sm:$0xf] }
 0x4e9   :  { %v7237_v22 = vld [vmem:[#allocation22 + $0x328] sm:$0xf0] }
 0x53a   :  { %v1161_v29 = vpop.xlane.xlu2 %1160 }
 0x53b   :  { %v1162_v30 = vmul.f32 %v1161_v29, %v10945_v0  ;;  %v1181_v0 = vperm.slane %v1178_v23, 1  ;;  %v9740_v29 = vld [vmem:[#allocation22 + $0x7a4] sm:$0xf0] }
 0x53c   :  { %v7812_v31 = vor.u32 %v9740_v29, %v7811_v28  ;;  %v9732_v23 = vld [vmem:[#allocation22 + $0x764] sm:$0xf0] }
 0x53d   :  { %v1163_v32 = vadd.f32 1e-05, %v1162_v30  ;;  %v7556_v30 = vor.u32 %v9676_v20, %v7555_v27  ;;  %v7395_v27 = vld [vmem:[#allocation22 + $0x448] sm:$0xf] }
 0x53e   :  { %v9636_v20 = vld [vmem:[#allocation22 + $0x464] sm:$0xf0] }
 0x53f   :  { %10183 = vrsqrt.f32 %v1163_v32  ;;  %vm1170_vm11 = vweird.f32 %v1163_v32  ;;  %v7651_v28 = vld [vmem:[#allocation22 + $0x648] sm:$0xf] }
 0x540   :  { %v9700_v29 = vld [vmem:[#allocation22 + $0x664] sm:$0xf0] }
 0x545   :  { %v10184_v17 = vpop.eup %10183 }
 0x546   :  { %v1165_v33 = vmul.f32 %v10184_v17, %v1163_v32  ;;  %vm1171_vm10 = vweird.f32 %v10184_v17  ;;  %v7267_v32 = vld [vmem:[#allocation22 + $0x348] sm:$0xf] }
 0x547   :  { %vm1172_vm12 = vmor %vm1170_vm11, %vm1171_vm10 }
 0x548   :  { %v1166_v34 = vmul.f32 %v10184_v17, %v1165_v33  ;;  %v7523_v33 = vld [vmem:[#allocation22 + $0x548] sm:$0xf] }
 0x54a   :  { %v1167_v35 = vmul.f32 0.5, %v1166_v34  ;;  %v9668_v34 = vld [vmem:[#allocation22 + $0x564] sm:$0xf0] }
 0x54c   :  { %v1168_v38 = vsub.f32 1.5, %v1167_v35  ;;  %v7779_v35 = vld [vmem:[#allocation22 + $0x748] sm:$0xf] }
 0x54e   :  { %v1169_v41 = vmul.f32 %v10184_v17, %v1168_v38 }
 0x550   :  { %v1173_v50 = vsel %vm1172_vm12, %v10184_v17, %v1169_v41  ;;  %v9604_v17 = vld [vmem:[#allocation22 + $0x364] sm:$0xf0] }
 0x551   :  { %v1174_v51 = vmul.f32 %v1173_v50, %v10949_v19  ;;  %v1175_v52 = vmul.f32 %v1173_v50, %v10952_v24  ;;  %v1176_v53 = vmul.f32 %v1173_v50, %v10955_v25  ;;  %v1177_v54 = vmul.f32 %v1173_v50, %v10958_v26  ;;  %v9684_v19 = vld [vmem:[#allocation22 + $0x5e4] sm:$0xf0] }
 0x552   :  { %v9748_v26 = vld [vmem:[#allocation22 + $0x7e4] sm:$0xf0]  ;;  %v7588_v16 = vor.u32 %v9684_v19, %v7587_v5  ;;  %v7268_v38 = vor.u32 %v9604_v17, %v7267_v32  ;;  %v7396_v32 = vor.u32 %v9636_v20, %v7395_v27  ;;  %v7652_v17 = vor.u32 %v9700_v29, %v7651_v28  ;;  %v9656_v27 = vld [vmem:[#allocation22 + $0x50c] sm:$0xf] }
 0x553   :  { %v1188_v55 = vmul.f32 %v1180_v39, %v1174_v51  ;;  %v1189_v56 = vmul.f32 %v1181_v0, %v1175_v52  ;;  %v1190_v57 = vmul.f32 %v1182_v42, %v1176_v53  ;;  %v1191_v58 = vmul.f32 %v1183_v43, %v1177_v54  ;;  %v6979_v39 = vld [vmem:[#allocation22 + $0x108] sm:$0xf]  ;;  %v7493_v20 = vld [vmem:[#allocation22 + $0x528] sm:$0xf0] }
 0x554   :  { %v7844_v18 = vor.u32 %v9748_v26, %v7843_v6  ;;  %v9532_v41 = vld [vmem:[#allocation22 + $0x124] sm:$0xf0]  ;;  %v7524_v0 = vor.u32 %v9668_v34, %v7523_v33  ;;  %v7780_v42 = vor.u32 %v9732_v23, %v7779_v35  ;;  %v9720_v28 = vld [vmem:[#allocation22 + $0x70c] sm:$0xf] }
 0x555   :  { %v1202_v61 = vadd.f32 %v1194_v44, %v1188_v55  ;;  %v1203_v62 = vadd.f32 %v1195_v45, %v1189_v56  ;;  %v1204_v63 = vadd.f32 %v1196_v46, %v1190_v57  ;;  %v1205_v1 = vadd.f32 %v1197_v47, %v1191_v58  ;;  %v7235_v43 = vld [vmem:[#allocation22 + $0x308] sm:$0xf]  ;;  %v7749_v29 = vld [vmem:[#allocation22 + $0x728] sm:$0xf0] }
 0x556   :  { %v9596_v44 = vld [vmem:[#allocation22 + $0x324] sm:$0xf0]  ;;  %v6980_v51 = vor.u32 %v9532_v41, %v6979_v39  ;;  %v9616_v39 = vld [vmem:[#allocation22 + $0x3cc] sm:$0xf] }
 0x557   :  { %v1206_v24 = vmax.f32 %v1202_v61, 0.0  ;;  %v1207_v7 = vmax.f32 %v1203_v62, 0.0  ;;  %v1208_v25 = vmax.f32 %v1204_v63, 0.0  ;;  %v1209_v8 = vmax.f32 %v1205_v1, 0.0  ;;  %v7491_v45 = vld [vmem:[#allocation22 + $0x508] sm:$0xf] }
 0x558   :  { %v9660_v46 = vld [vmem:[#allocation22 + $0x524] sm:$0xf0]  ;;  %v7236_v52 = vor.u32 %v9596_v44, %v7235_v43  ;;  %v7333_v41 = vld [vmem:[#allocation22 + $0x3e8] sm:$0xf0] }
 0x559   :  { %v10977_v11 = vpack.c.bf16 %v1206_v24, %v1206_v24  ;;  %v10979_v12 = vpack.c.bf16 %v1207_v7, %v1207_v7  ;;  %v10981_v59 = vpack.c.bf16 %v1208_v25, %v1208_v25  ;;  %v10983_v13 = vpack.c.bf16 %v1209_v8, %v1209_v8  ;;  %v7747_v47 = vld [vmem:[#allocation22 + $0x708] sm:$0xf]  ;;  %v7589_v44 = vld [vmem:[#allocation22 + $0x5e8] sm:$0xf0] }
 0x55a   :  { %v9724_v50 = vld [vmem:[#allocation22 + $0x724] sm:$0xf0]  ;;  %v7492_v55 = vor.u32 %v9660_v46, %v7491_v45  ;;  %v9744_v45 = vld [vmem:[#allocation22 + $0x7cc] sm:$0xf] }
 0x55b   :  { %2776 = vmatmul.bf16.vlgmr.msra.gmra.mxu3 %v10977_v11  ;;  %2789 = vmatmul.bf16.vlgmr.msrb.gmra.mxu0 %v10979_v12  ;;  %v6947_v53 = vld [vmem:[#allocation22 + $0xc8] sm:$0xf]  ;;  %v7748_v56 = vor.u32 %v9724_v50, %v7747_v47  ;;  %v7845_v46 = vld [vmem:[#allocation22 + $0x7e8] sm:$0xf0] }
 0x55c   :  { %2802 = vmatmul.bf16.vlgmr.msrb.gmra.mxu1 %v10981_v59  ;;  %2815 = vmatmul.bf16.vlgmr.msrb.gmra.mxu2 %v10983_v13  ;;  %v9524_v54 = vld [vmem:[#allocation22 + $0xe4] sm:$0xf0] }
 0x55d   :  { %2872 = vmatpush.bf16.msra.mxu3 %v7076_v9  ;;  %2885 = vmatpush.bf16.msrb.mxu0 %v7332_v10  ;;  %v7203_v57 = vld [vmem:[#allocation22 + $0x2c8] sm:$0xf]  ;;  %v6948_v1 = vor.u32 %v9524_v54, %v6947_v53  ;;  %v6916_v9 = vor.u32 %v9516_v4, %v6915_v3  ;;  %v9544_v53 = vld [vmem:[#allocation22 + $0x18c] sm:$0xf] }
 0x55e   :  { %2898 = vmatpush.bf16.msrb.mxu1 %v7588_v16  ;;  %2911 = vmatpush.bf16.msrb.mxu2 %v7844_v18  ;;  %v9588_v58 = vld [vmem:[#allocation22 + $0x2e4] sm:$0xf0]  ;;  %v7045_v54 = vld [vmem:[#allocation22 + $0x1a8] sm:$0xf0] }
 0x55f   :  { %v9652_v61 = vld [vmem:[#allocation22 + $0x4e4] sm:$0xf0]  ;;  %v7204_v2 = vor.u32 %v9588_v58, %v7203_v57  ;;  %v9608_v57 = vld [vmem:[#allocation22 + $0x38c] sm:$0xf] }
 0x560   :  { %v7715_v62 = vld [vmem:[#allocation22 + $0x6c8] sm:$0xf]  ;;  %v7460_v5 = vor.u32 %v9652_v61, %v7459_v60  ;;  %v7301_v58 = vld [vmem:[#allocation22 + $0x3a8] sm:$0xf0] }
 0x561   :  { %2873 = vmatpush.bf16.msra.mxu3 %v7044_v37  ;;  %2886 = vmatpush.bf16.msrb.mxu0 %v7300_v40  ;;  %v9716_v63 = vld [vmem:[#allocation22 + $0x6e4] sm:$0xf0]  ;;  %v6884_v40 = vor.u32 %v9508_v15, %v6883_v14  ;;  %v9672_v60 = vld [vmem:[#allocation22 + $0x58c] sm:$0xf] }
 0x562   :  { %2899 = vmatpush.bf16.msrb.mxu1 %v7556_v30  ;;  %2912 = vmatpush.bf16.msrb.mxu2 %v7812_v31  ;;  %v7716_v19 = vor.u32 %v9716_v63, %v7715_v62  ;;  %v7171_v6 = vld [vmem:[#allocation22 + $0x288] sm:$0xf]  ;;  %v7557_v61 = vld [vmem:[#allocation22 + $0x5a8] sm:$0xf0] }
 0x563   :  { %v9580_v24 = vld [vmem:[#allocation22 + $0x2a4] sm:$0xf0]  ;;  %v9736_v62 = vld [vmem:[#allocation22 + $0x78c] sm:$0xf] }
 0x564   :  { %v7427_v7 = vld [vmem:[#allocation22 + $0x488] sm:$0xf]  ;;  %v7172_v10 = vor.u32 %v9580_v24, %v7171_v6  ;;  %v7813_v63 = vld [vmem:[#allocation22 + $0x7a8] sm:$0xf0] }
 0x565   :  { %2874 = vmatpush.bf16.msra.mxu3 %v7012_v36  ;;  %2887 = vmatpush.bf16.msrb.mxu0 %v7268_v38  ;;  %v9644_v25 = vld [vmem:[#allocation22 + $0x4a4] sm:$0xf0]  ;;  %v9552_v36 = vld [vmem:[#allocation22 + $0x1cc] sm:$0xf] }
 0x566   :  { %2900 = vmatpush.bf16.msrb.mxu1 %v7524_v0  ;;  %2913 = vmatpush.bf16.msrb.mxu2 %v7780_v42  ;;  %v7683_v8 = vld [vmem:[#allocation22 + $0x688] sm:$0xf]  ;;  %v7428_v16 = vor.u32 %v9644_v25, %v7427_v7  ;;  %v7077_v38 = vld [vmem:[#allocation22 + $0x1e8] sm:$0xf0] }
 0x567   :  { %v9708_v26 = vld [vmem:[#allocation22 + $0x6a4] sm:$0xf0]  ;;  %v9680_v0 = vld [vmem:[#allocation22 + $0x5cc] sm:$0xf] }
 0x568   :  { %v7684_v18 = vor.u32 %v9708_v26, %v7683_v8  ;;  %v6851_v37 = vld [vmem:[#allocation22 + $0x8] sm:$0xf]  ;;  %v9536_v3 = vld [vmem:[#allocation22 + $0x14c] sm:$0xf] }
 0x569   :  { %2875 = vmatpush.bf16.msra.mxu3 %v6980_v51  ;;  %2888 = vmatpush.bf16.msrb.mxu0 %v7236_v52  ;;  %v7107_v30 = vld [vmem:[#allocation22 + $0x208] sm:$0xf]  ;;  %v6852_v42 = vor.u32 %v9500_v49, %v6851_v37  ;;  %v7080_v51 = vor.u32 %v9552_v36, %v7077_v38  ;;  %v7336_v52 = vor.u32 %v9616_v39, %v7333_v41  ;;  %v7013_v4 = vld [vmem:[#allocation22 + $0x168] sm:$0xf0] }
 0x56a   :  { %2901 = vmatpush.bf16.msrb.mxu1 %v7492_v55  ;;  %2914 = vmatpush.bf16.msrb.mxu2 %v7748_v56  ;;  %v9564_v31 = vld [vmem:[#allocation22 + $0x224] sm:$0xf0]  ;;  %v7592_v55 = vor.u32 %v9680_v0, %v7589_v44  ;;  %v7848_v56 = vor.u32 %v9744_v45, %v7845_v46  ;;  %v9600_v6 = vld [vmem:[#allocation22 + $0x34c] sm:$0xf] }
 0x56b   :  { %2828 = vmatmul.bf16.vlgmr.msrb.gmra.mxu3 %v10977_v11  ;;  %2841 = vmatmul.bf16.vlgmr.msra.gmra.mxu0 %v10979_v12  ;;  %v7363_v33 = vld [vmem:[#allocation22 + $0x408] sm:$0xf]  ;;  %v7108_v43 = vor.u32 %v9564_v31, %v7107_v30  ;;  %v7269_v24 = vld [vmem:[#allocation22 + $0x368] sm:$0xf0]  ;;  %v7496_v30 = vor.u32 %v9656_v27, %v7493_v20  ;;  %v7752_v31 = vor.u32 %v9720_v28, %v7749_v29  ;;  %v7851_v27 = vld [vmem:[#allocation22 + $0x7d0] sm:$0xf] }
 0x56c   :  { %2854 = vmatmul.bf16.vlgmr.msra.gmra.mxu1 %v10981_v59  ;;  %2867 = vmatmul.bf16.vlgmr.msra.gmra.mxu2 %v10983_v13  ;;  %v9628_v34 = vld [vmem:[#allocation22 + $0x424] sm:$0xf0]  ;;  %v9664_v7 = vld [vmem:[#allocation22 + $0x54c] sm:$0xf]  ;;  %v9749_v20 = vld [vmem:[#allocation22 + $0x7ec] sm:$0xf0] }
 0x56d   :  { %2876 = vmatpush.bf16.msra.mxu3 %v6948_v1  ;;  %2889 = vmatpush.bf16.msrb.mxu0 %v7204_v2  ;;  %v7619_v35 = vld [vmem:[#allocation22 + $0x608] sm:$0xf]  ;;  %v7364_v47 = vor.u32 %v9628_v34, %v7363_v33  ;;  %v7048_v1 = vor.u32 %v9544_v53, %v7045_v54  ;;  %v7304_v2 = vor.u32 %v9608_v57, %v7301_v58  ;;  %v7525_v25 = vld [vmem:[#allocation22 + $0x568] sm:$0xf0] }
 0x56e   :  { %2902 = vmatpush.bf16.msrb.mxu1 %v7460_v5  ;;  %2915 = vmatpush.bf16.msrb.mxu2 %v7716_v19  ;;  %v9692_v23 = vld [vmem:[#allocation22 + $0x624] sm:$0xf0]  ;;  %v7560_v5 = vor.u32 %v9672_v60, %v7557_v61  ;;  %v7816_v19 = vor.u32 %v9736_v62, %v7813_v63  ;;  %v9728_v8 = vld [vmem:[#allocation22 + $0x74c] sm:$0xf] }
 0x56f   :  { %v7620_v50 = vor.u32 %v9692_v23, %v7619_v35  ;;  %v7781_v26 = vld [vmem:[#allocation22 + $0x768] sm:$0xf0] }
 0x570   :  { %v9528_v14 = vld [vmem:[#allocation22 + $0x10c] sm:$0xf] }
 0x571   :  { %2877 = vmatpush.bf16.msra.mxu3 %v6916_v9  ;;  %2890 = vmatpush.bf16.msrb.mxu0 %v7172_v10  ;;  %v7016_v9 = vor.u32 %v9536_v3, %v7013_v4  ;;  %v7272_v10 = vor.u32 %v9600_v6, %v7269_v24  ;;  %v6981_v15 = vld [vmem:[#allocation22 + $0x128] sm:$0xf0] }
 0x572   :  { %2903 = vmatpush.bf16.msrb.mxu1 %v7428_v16  ;;  %2916 = vmatpush.bf16.msrb.mxu2 %v7684_v18  ;;  %v7528_v16 = vor.u32 %v9664_v7, %v7525_v25  ;;  %v7784_v18 = vor.u32 %v9728_v8, %v7781_v26  ;;  %v6984_v37 = vor.u32 %v9528_v14, %v6981_v15  ;;  %v6949_v49 = vld [vmem:[#allocation22 + $0xe8] sm:$0xf0]  ;;  %v7339_v14 = vld [vmem:[#allocation22 + $0x3d0] sm:$0xf] }
 0x573   :  { %v9648_v33 = vld [vmem:[#allocation22 + $0x4cc] sm:$0xf]  ;;  %v9621_v15 = vld [vmem:[#allocation22 + $0x3ec] sm:$0xf0] }
 0x574   :  { %v7461_v34 = vld [vmem:[#allocation22 + $0x4e8] sm:$0xf0] }
 0x575   :  { %2878 = vmatpush.bf16.msra.mxu3 %v6884_v40  ;;  %2891 = vmatpush.bf16.msrb.mxu0 %v7140_v48  ;;  %v7240_v40 = vor.u32 %v9592_v21, %v7237_v22  ;;  %v9520_v48 = vld [vmem:[#allocation22 + $0xcc] sm:$0xf]  ;;  %v7464_v0 = vor.u32 %v9648_v33, %v7461_v34  ;;  %v9685_v22 = vld [vmem:[#allocation22 + $0x5ec] sm:$0xf0] }
 0x576   :  { %2904 = vmatpush.bf16.msrb.mxu1 %v7396_v32  ;;  %2917 = vmatpush.bf16.msrb.mxu2 %v7652_v17  ;;  %v9584_v32 = vld [vmem:[#allocation22 + $0x2cc] sm:$0xf]  ;;  %v6952_v36 = vor.u32 %v9520_v48, %v6949_v49  ;;  %v7051_v48 = vld [vmem:[#allocation22 + $0x190] sm:$0xf] }
 0x577   :  { %v7205_v17 = vld [vmem:[#allocation22 + $0x2e8] sm:$0xf0]  ;;  %v9549_v49 = vld [vmem:[#allocation22 + $0x1ac] sm:$0xf0] }
 0x578   :  { %v9712_v35 = vld [vmem:[#allocation22 + $0x6cc] sm:$0xf]  ;;  %v7208_v38 = vor.u32 %v9584_v32, %v7205_v17  ;;  %v7307_v32 = vld [vmem:[#allocation22 + $0x390] sm:$0xf] }
 0x579   :  { %2879 = vmatpush.bf16.msra.mxu3 %v6852_v42  ;;  %2892 = vmatpush.bf16.msrb.mxu0 %v7108_v43  ;;  %v7717_v23 = vld [vmem:[#allocation22 + $0x6e8] sm:$0xf0]  ;;  %v9613_v17 = vld [vmem:[#allocation22 + $0x3ac] sm:$0xf0] }
 0x57a   :  { %2905 = vmatpush.bf16.msrb.mxu1 %v7364_v47  ;;  %2918 = vmatpush.bf16.msrb.mxu2 %v7620_v50  ;;  %v9512_v39 = vld [vmem:[#allocation22 + $0x8c] sm:$0xf]  ;;  %v7720_v42 = vor.u32 %v9712_v35, %v7717_v23  ;;  %v7563_v33 = vld [vmem:[#allocation22 + $0x590] sm:$0xf] }
 0x57b   :  { %v6917_v41 = vld [vmem:[#allocation22 + $0xa8] sm:$0xf0]  ;;  %v9677_v34 = vld [vmem:[#allocation22 + $0x5ac] sm:$0xf0] }
 0x57c   :  { %2880 = vmatmul.bf16.vlgmr.msra.gmra.mxu3 %v10977_v11  ;;  %2893 = vmatmul.bf16.vlgmr.msrb.gmra.mxu0 %v10979_v12  ;;  %v9576_v43 = vld [vmem:[#allocation22 + $0x28c] sm:$0xf]  ;;  %v7819_v35 = vld [vmem:[#allocation22 + $0x790] sm:$0xf] }
 0x57d   :  { %2924 = vmatpush.bf16.msrb.mxu3 %v7080_v51  ;;  %2937 = vmatpush.bf16.msra.mxu0 %v7336_v52  ;;  %v7173_v44 = vld [vmem:[#allocation22 + $0x2a8] sm:$0xf0]  ;;  %v6920_v51 = vor.u32 %v9512_v39, %v6917_v41  ;;  %v9741_v23 = vld [vmem:[#allocation22 + $0x7ac] sm:$0xf0] }
 0x57e   :  { %2950 = vmatpush.bf16.msra.mxu1 %v7592_v55  ;;  %2963 = vmatpush.bf16.msra.mxu2 %v7848_v56  ;;  %v9640_v45 = vld [vmem:[#allocation22 + $0x48c] sm:$0xf]  ;;  %v7176_v52 = vor.u32 %v9576_v43, %v7173_v44  ;;  %v7019_v39 = vld [vmem:[#allocation22 + $0x150] sm:$0xf] }
 0x57f   :  { %2906 = vmatmul.bf16.vlgmr.msrb.gmra.mxu1 %v10981_v59  ;;  %2919 = vmatmul.bf16.vlgmr.msrb.gmra.mxu2 %v10983_v13  ;;  %v7429_v46 = vld [vmem:[#allocation22 + $0x4a8] sm:$0xf0]  ;;  %v9541_v41 = vld [vmem:[#allocation22 + $0x16c] sm:$0xf0] }
 0x580   :  { %v9704_v47 = vld [vmem:[#allocation22 + $0x68c] sm:$0xf]  ;;  %v7432_v55 = vor.u32 %v9640_v45, %v7429_v46  ;;  %v7275_v43 = vld [vmem:[#allocation22 + $0x350] sm:$0xf] }
 0x581   :  { %2925 = vmatpush.bf16.msrb.mxu3 %v7048_v1  ;;  %2938 = vmatpush.bf16.msra.mxu0 %v7304_v2  ;;  %v7685_v50 = vld [vmem:[#allocation22 + $0x6a8] sm:$0xf0]  ;;  %v9605_v44 = vld [vmem:[#allocation22 + $0x36c] sm:$0xf0] }
 0x582   :  { %2951 = vmatpush.bf16.msra.mxu1 %v7560_v5  ;;  %2964 = vmatpush.bf16.msra.mxu2 %v7816_v19  ;;  %v9504_v53 = vld [vmem:[#allocation22 + $0x4c] sm:$0xf]  ;;  %v7688_v56 = vor.u32 %v9704_v47, %v7685_v50  ;;  %v7531_v45 = vld [vmem:[#allocation22 + $0x550] sm:$0xf] }
 0x583   :  { %v6885_v54 = vld [vmem:[#allocation22 + $0x68] sm:$0xf0]  ;;  %v9669_v46 = vld [vmem:[#allocation22 + $0x56c] sm:$0xf0] }
 0x584   :  { %v9568_v57 = vld [vmem:[#allocation22 + $0x24c] sm:$0xf]  ;;  %v6888_v2 = vor.u32 %v9504_v53, %v6885_v54  ;;  %v7787_v47 = vld [vmem:[#allocation22 + $0x750] sm:$0xf] }
 0x585   :  { %2926 = vmatpush.bf16.msrb.mxu3 %v7016_v9  ;;  %2939 = vmatpush.bf16.msra.mxu0 %v7272_v10  ;;  %v7141_v58 = vld [vmem:[#allocation22 + $0x268] sm:$0xf0]  ;;  %v7083_v9 = vld [vmem:[#allocation22 + $0x1d0] sm:$0xf] }
 0x586   :  { %2952 = vmatpush.bf16.msra.mxu1 %v7528_v16  ;;  %2965 = vmatpush.bf16.msra.mxu2 %v7784_v18  ;;  %v9632_v60 = vld [vmem:[#allocation22 + $0x44c] sm:$0xf]  ;;  %v7144_v3 = vor.u32 %v9568_v57, %v7141_v58  ;;  %v9557_v10 = vld [vmem:[#allocation22 + $0x1ec] sm:$0xf0] }
 0x587   :  { %v7397_v61 = vld [vmem:[#allocation22 + $0x468] sm:$0xf0]  ;;  %v7595_v16 = vld [vmem:[#allocation22 + $0x5d0] sm:$0xf] }
 0x588   :  { %v9696_v62 = vld [vmem:[#allocation22 + $0x64c] sm:$0xf]  ;;  %v7400_v6 = vor.u32 %v9632_v60, %v7397_v61  ;;  %v9733_v50 = vld [vmem:[#allocation22 + $0x76c] sm:$0xf0] }
 0x589   :  { %2927 = vmatpush.bf16.msrb.mxu3 %v6984_v37  ;;  %2940 = vmatpush.bf16.msra.mxu0 %v7240_v40  ;;  %v7653_v63 = vld [vmem:[#allocation22 + $0x668] sm:$0xf0]  ;;  %v7084_v37 = vor.u32 %v9557_v10, %v7083_v9  ;;  %v7340_v40 = vor.u32 %v9621_v15, %v7339_v14  ;;  %v6987_v53 = vld [vmem:[#allocation22 + $0x110] sm:$0xf] }
 0x58a   :  { %2953 = vmatpush.bf16.msra.mxu1 %v7496_v30  ;;  %2966 = vmatpush.bf16.msra.mxu2 %v7752_v31  ;;  %v9496_v1 = vld [vmem:[#allocation22 + $0xc] sm:$0xf]  ;;  %v7656_v24 = vor.u32 %v9696_v62, %v7653_v63  ;;  %v7596_v30 = vor.u32 %v9685_v22, %v7595_v16  ;;  %v7852_v31 = vor.u32 %v9749_v20, %v7851_v27  ;;  %v9533_v54 = vld [vmem:[#allocation22 + $0x12c] sm:$0xf0] }
 0x58b   :  { %v6853_v4 = vld [vmem:[#allocation22 + $0x28] sm:$0xf0]  ;;  %v7243_v57 = vld [vmem:[#allocation22 + $0x310] sm:$0xf] }
 0x58c   :  { %v9560_v5 = vld [vmem:[#allocation22 + $0x20c] sm:$0xf]  ;;  %v6856_v18 = vor.u32 %v9496_v1, %v6853_v4  ;;  %v9597_v58 = vld [vmem:[#allocation22 + $0x32c] sm:$0xf0]  ;;  %v6988_v1 = vor.u32 %v9533_v54, %v6987_v53  ;;  %v9617_v53 = vld [vmem:[#allocation22 + $0x3d4] sm:$0xf] }
 0x58d   :  { %2928 = vmatpush.bf16.msrb.mxu3 %v6952_v36  ;;  %2941 = vmatpush.bf16.msra.mxu0 %v7208_v38  ;;  %v7109_v19 = vld [vmem:[#allocation22 + $0x228] sm:$0xf0]  ;;  %v7052_v36 = vor.u32 %v9549_v49, %v7051_v48  ;;  %v7308_v38 = vor.u32 %v9613_v17, %v7307_v32  ;;  %v7499_v60 = vld [vmem:[#allocation22 + $0x510] sm:$0xf]  ;;  %v7341_v54 = vld [vmem:[#allocation22 + $0x3f0] sm:$0xf0] }
 0x58e   :  { %2954 = vmatpush.bf16.msra.mxu1 %v7464_v0  ;;  %2967 = vmatpush.bf16.msra.mxu2 %v7720_v42  ;;  %v9624_v7 = vld [vmem:[#allocation22 + $0x40c] sm:$0xf]  ;;  %v7112_v21 = vor.u32 %v9560_v5, %v7109_v19  ;;  %v7564_v0 = vor.u32 %v9677_v34, %v7563_v33  ;;  %v7820_v42 = vor.u32 %v9741_v23, %v7819_v35  ;;  %v9661_v61 = vld [vmem:[#allocation22 + $0x52c] sm:$0xf0] }
 0x58f   :  { %v7365_v25 = vld [vmem:[#allocation22 + $0x428] sm:$0xf0]  ;;  %v7755_v62 = vld [vmem:[#allocation22 + $0x710] sm:$0xf]  ;;  %v7500_v5 = vor.u32 %v9661_v61, %v7499_v60  ;;  %v9745_v60 = vld [vmem:[#allocation22 + $0x7d4] sm:$0xf] }
 0x590   :  { %v9688_v8 = vld [vmem:[#allocation22 + $0x60c] sm:$0xf]  ;;  %v7368_v28 = vor.u32 %v9624_v7, %v7365_v25  ;;  %v9725_v63 = vld [vmem:[#allocation22 + $0x72c] sm:$0xf0]  ;;  %v7853_v61 = vld [vmem:[#allocation22 + $0x7f0] sm:$0xf0] }
 0x591   :  { %2929 = vmatpush.bf16.msrb.mxu3 %v6920_v51  ;;  %2942 = vmatpush.bf16.msra.mxu0 %v7176_v52  ;;  %v7621_v26 = vld [vmem:[#allocation22 + $0x628] sm:$0xf0]  ;;  %v7020_v51 = vor.u32 %v9541_v41, %v7019_v39  ;;  %v7276_v52 = vor.u32 %v9605_v44, %v7275_v43  ;;  %v9525_v4 = vld [vmem:[#allocation22 + $0xec] sm:$0xf0]  ;;  %v7756_v19 = vor.u32 %v9725_v63, %v7755_v62 }
 0x592   :  { %2955 = vmatpush.bf16.msra.mxu1 %v7432_v55  ;;  %2968 = vmatpush.bf16.msra.mxu2 %v7688_v56  ;;  %v7624_v29 = vor.u32 %v9688_v8, %v7621_v26  ;;  %v7532_v55 = vor.u32 %v9669_v46, %v7531_v45  ;;  %v7788_v56 = vor.u32 %v9733_v50, %v7787_v47  ;;  %v7467_v7 = vld [vmem:[#allocation22 + $0x4d0] sm:$0xf] }
 0x593   :  { %v9653_v25 = vld [vmem:[#allocation22 + $0x4ec] sm:$0xf0] }
 0x594   :  { %v7723_v8 = vld [vmem:[#allocation22 + $0x6d0] sm:$0xf]  ;;  %v7468_v16 = vor.u32 %v9653_v25, %v7467_v7  ;;  %v9673_v7 = vld [vmem:[#allocation22 + $0x594] sm:$0xf] }
 0x595   :  { %2930 = vmatpush.bf16.msrb.mxu3 %v6888_v2  ;;  %2943 = vmatpush.bf16.msra.mxu0 %v7144_v3  ;;  %v7244_v2 = vor.u32 %v9597_v58, %v7243_v57  ;;  %v6955_v3 = vld [vmem:[#allocation22 + $0xd0] sm:$0xf]  ;;  %v7597_v58 = vld [vmem:[#allocation22 + $0x5f0] sm:$0xf0] }
 0x596   :  { %2956 = vmatpush.bf16.msra.mxu1 %v7400_v6  ;;  %2969 = vmatpush.bf16.msra.mxu2 %v7656_v24  ;;  %v7211_v6 = vld [vmem:[#allocation22 + $0x2d0] sm:$0xf]  ;;  %v6956_v9 = vor.u32 %v9525_v4, %v6955_v3  ;;  %v9545_v3 = vld [vmem:[#allocation22 + $0x194] sm:$0xf] }
 0x597   :  { %v9589_v24 = vld [vmem:[#allocation22 + $0x2ec] sm:$0xf0]  ;;  %v7053_v4 = vld [vmem:[#allocation22 + $0x1b0] sm:$0xf0] }
 0x598   :  { %v9717_v26 = vld [vmem:[#allocation22 + $0x6ec] sm:$0xf0]  ;;  %v7212_v10 = vor.u32 %v9589_v24, %v7211_v6  ;;  %v9609_v6 = vld [vmem:[#allocation22 + $0x394] sm:$0xf] }
 0x599   :  { %2931 = vmatpush.bf16.msrb.mxu3 %v6856_v18  ;;  %2944 = vmatpush.bf16.msra.mxu0 %v7112_v21  ;;  %v6923_v14 = vld [vmem:[#allocation22 + $0x90] sm:$0xf]  ;;  %v7724_v18 = vor.u32 %v9717_v26, %v7723_v8  ;;  %v7309_v24 = vld [vmem:[#allocation22 + $0x3b0] sm:$0xf0] }
 0x59a   :  { %2957 = vmatpush.bf16.msra.mxu1 %v7368_v28  ;;  %2970 = vmatpush.bf16.msra.mxu2 %v7624_v29  ;;  %v9517_v15 = vld [vmem:[#allocation22 + $0xac] sm:$0xf0]  ;;  %v7565_v25 = vld [vmem:[#allocation22 + $0x5b0] sm:$0xf0] }
 0x59b   :  { %v7179_v21 = vld [vmem:[#allocation22 + $0x290] sm:$0xf]  ;;  %v9737_v8 = vld [vmem:[#allocation22 + $0x794] sm:$0xf] }
 0x59c   :  { %2932 = vmatmul.bf16.vlgmr.msrb.gmra.mxu3 %v10977_v11  ;;  %2945 = vmatmul.bf16.vlgmr.msra.gmra.mxu0 %v10979_v12  ;;  %v9581_v22 = vld [vmem:[#allocation22 + $0x2ac] sm:$0xf0]  ;;  %v7821_v26 = vld [vmem:[#allocation22 + $0x7b0] sm:$0xf0] }
 0x59d   :  { %2976 = vmatpush.bf16.msra.mxu3 %v7084_v37  ;;  %2989 = vmatpush.bf16.msrb.mxu0 %v7340_v40  ;;  %v7435_v27 = vld [vmem:[#allocation22 + $0x490] sm:$0xf]  ;;  %v6924_v37 = vor.u32 %v9517_v15, %v6923_v14  ;;  %v7180_v40 = vor.u32 %v9581_v22, %v7179_v21  ;;  %v9537_v14 = vld [vmem:[#allocation22 + $0x154] sm:$0xf] }
 0x59e   :  { %3002 = vmatpush.bf16.msrb.mxu1 %v7596_v30  ;;  %3015 = vmatpush.bf16.msrb.mxu2 %v7852_v31  ;;  %v9645_v20 = vld [vmem:[#allocation22 + $0x4ac] sm:$0xf0]  ;;  %v7021_v15 = vld [vmem:[#allocation22 + $0x170] sm:$0xf0] }
 0x59f   :  { %2958 = vmatmul.bf16.vlgmr.msra.gmra.mxu1 %v10981_v59  ;;  %2971 = vmatmul.bf16.vlgmr.msra.gmra.mxu2 %v10983_v13  ;;  %v7691_v28 = vld [vmem:[#allocation22 + $0x690] sm:$0xf]  ;;  %v7436_v30 = vor.u32 %v9645_v20, %v7435_v27  ;;  %v9601_v21 = vld [vmem:[#allocation22 + $0x354] sm:$0xf] }
 0x5a0   :  { %v9709_v29 = vld [vmem:[#allocation22 + $0x6ac] sm:$0xf0]  ;;  %v7277_v22 = vld [vmem:[#allocation22 + $0x370] sm:$0xf0] }
 0x5a1   :  { %2977 = vmatpush.bf16.msra.mxu3 %v7052_v36  ;;  %2990 = vmatpush.bf16.msrb.mxu0 %v7308_v38  ;;  %v6891_v48 = vld [vmem:[#allocation22 + $0x50] sm:$0xf]  ;;  %v7692_v31 = vor.u32 %v9709_v29, %v7691_v28  ;;  %v9665_v27 = vld [vmem:[#allocation22 + $0x554] sm:$0xf] }
 0x5a2   :  { %3003 = vmatpush.bf16.msrb.mxu1 %v7564_v0  ;;  %3016 = vmatpush.bf16.msrb.mxu2 %v7820_v42  ;;  %v9509_v49 = vld [vmem:[#allocation22 + $0x6c] sm:$0xf0]  ;;  %v7533_v20 = vld [vmem:[#allocation22 + $0x570] sm:$0xf0] }
 0x5a3   :  { %v7147_v32 = vld [vmem:[#allocation22 + $0x250] sm:$0xf]  ;;  %v6892_v38 = vor.u32 %v9509_v49, %v6891_v48  ;;  %v9729_v28 = vld [vmem:[#allocation22 + $0x754] sm:$0xf] }
 0x5a4   :  { %v9573_v17 = vld [vmem:[#allocation22 + $0x26c] sm:$0xf0]  ;;  %v7789_v29 = vld [vmem:[#allocation22 + $0x770] sm:$0xf0] }
 0x5a5   :  { %2978 = vmatpush.bf16.msra.mxu3 %v7020_v51  ;;  %2991 = vmatpush.bf16.msrb.mxu0 %v7276_v52  ;;  %v7403_v33 = vld [vmem:[#allocation22 + $0x450] sm:$0xf]  ;;  %v7148_v39 = vor.u32 %v9573_v17, %v7147_v32  ;;  %v9553_v51 = vld [vmem:[#allocation22 + $0x1d4] sm:$0xf] }
 0x5a6   :  { %3004 = vmatpush.bf16.msrb.mxu1 %v7532_v55  ;;  %3017 = vmatpush.bf16.msrb.mxu2 %v7788_v56  ;;  %v9637_v34 = vld [vmem:[#allocation22 + $0x46c] sm:$0xf0]  ;;  %v7085_v52 = vld [vmem:[#allocation22 + $0x1f0] sm:$0xf0] }
 0x5a7   :  { %v7659_v35 = vld [vmem:[#allocation22 + $0x650] sm:$0xf]  ;;  %v7404_v43 = vor.u32 %v9637_v34, %v7403_v33  ;;  %v9681_v55 = vld [vmem:[#allocation22 + $0x5d4] sm:$0xf] }
 0x5a8   :  { %v9701_v23 = vld [vmem:[#allocation22 + $0x66c] sm:$0xf0]  ;;  %v9529_v48 = vld [vmem:[#allocation22 + $0x114] sm:$0xf] }
 0x5a9   :  { %2979 = vmatpush.bf16.msra.mxu3 %v6988_v1  ;;  %2992 = vmatpush.bf16.msrb.mxu0 %v7244_v2  ;;  %v6859_v36 = vld [vmem:[#allocation22 + $0x10] sm:$0xf]  ;;  %v7660_v44 = vor.u32 %v9701_v23, %v7659_v35  ;;  %v7088_v1 = vor.u32 %v9553_v51, %v7085_v52  ;;  %v7344_v2 = vor.u32 %v9617_v53, %v7341_v54  ;;  %v6989_v49 = vld [vmem:[#allocation22 + $0x130] sm:$0xf0] }
 0x5aa   :  { %3005 = vmatpush.bf16.msrb.mxu1 %v7500_v5  ;;  %3018 = vmatpush.bf16.msrb.mxu2 %v7756_v19  ;;  %v9501_v41 = vld [vmem:[#allocation22 + $0x2c] sm:$0xf0]  ;;  %v7600_v5 = vor.u32 %v9681_v55, %v7597_v58  ;;  %v7856_v19 = vor.u32 %v9745_v60, %v7853_v61  ;;  %v9593_v32 = vld [vmem:[#allocation22 + $0x314] sm:$0xf] }
 0x5ab   :  { %v7115_v0 = vld [vmem:[#allocation22 + $0x210] sm:$0xf]  ;;  %v6860_v56 = vor.u32 %v9501_v41, %v6859_v36  ;;  %v7245_v17 = vld [vmem:[#allocation22 + $0x330] sm:$0xf0]  ;;  %v6992_v36 = vor.u32 %v9529_v48, %v6989_v49  ;;  %v7347_v48 = vld [vmem:[#allocation22 + $0x3d8] sm:$0xf] }
 0x5ac   :  { %v9565_v42 = vld [vmem:[#allocation22 + $0x22c] sm:$0xf0]  ;;  %v9657_v33 = vld [vmem:[#allocation22 + $0x514] sm:$0xf]  ;;  %v9622_v49 = vld [vmem:[#allocation22 + $0x3f4] sm:$0xf0] }
 0x5ad   :  { %2980 = vmatpush.bf16.msra.mxu3 %v6956_v9  ;;  %2993 = vmatpush.bf16.msrb.mxu0 %v7212_v10  ;;  %v7371_v45 = vld [vmem:[#allocation22 + $0x410] sm:$0xf]  ;;  %v7116_v57 = vor.u32 %v9565_v42, %v7115_v0  ;;  %v7056_v9 = vor.u32 %v9545_v3, %v7053_v4  ;;  %v7312_v10 = vor.u32 %v9609_v6, %v7309_v24  ;;  %v7501_v34 = vld [vmem:[#allocation22 + $0x530] sm:$0xf0] }
 0x5ae   :  { %3006 = vmatpush.bf16.msrb.mxu1 %v7468_v16  ;;  %3019 = vmatpush.bf16.msrb.mxu2 %v7724_v18  ;;  %v9629_v46 = vld [vmem:[#allocation22 + $0x42c] sm:$0xf0]  ;;  %v7568_v16 = vor.u32 %v9673_v7, %v7565_v25  ;;  %v7824_v18 = vor.u32 %v9737_v8, %v7821_v26  ;;  %v9721_v35 = vld [vmem:[#allocation22 + $0x714] sm:$0xf]  ;;  %v7504_v0 = vor.u32 %v9657_v33, %v7501_v34  ;;  %v7859_v33 = vld [vmem:[#allocation22 + $0x7d8] sm:$0xf] }
 0x5af   :  { %v7627_v47 = vld [vmem:[#allocation22 + $0x610] sm:$0xf]  ;;  %v7372_v62 = vor.u32 %v9629_v46, %v7371_v45  ;;  %v7757_v23 = vld [vmem:[#allocation22 + $0x730] sm:$0xf0]  ;;  %v9750_v34 = vld [vmem:[#allocation22 + $0x7f4] sm:$0xf0] }
 0x5b0   :  { %v9693_v50 = vld [vmem:[#allocation22 + $0x62c] sm:$0xf0]  ;;  %v6957_v41 = vld [vmem:[#allocation22 + $0xf0] sm:$0xf0]  ;;  %v7760_v42 = vor.u32 %v9721_v35, %v7757_v23 }
 0x5b1   :  { %2981 = vmatpush.bf16.msra.mxu3 %v6924_v37  ;;  %2994 = vmatpush.bf16.msrb.mxu0 %v7180_v40  ;;  %v7628_v63 = vor.u32 %v9693_v50, %v7627_v47  ;;  %v7024_v37 = vor.u32 %v9537_v14, %v7021_v15  ;;  %v7280_v40 = vor.u32 %v9601_v21, %v7277_v22  ;;  %v9649_v45 = vld [vmem:[#allocation22 + $0x4d4] sm:$0xf] }
 0x5b2   :  { %3007 = vmatpush.bf16.msrb.mxu1 %v7436_v30  ;;  %3020 = vmatpush.bf16.msrb.mxu2 %v7692_v31  ;;  %v7536_v30 = vor.u32 %v9665_v27, %v7533_v20  ;;  %v7792_v31 = vor.u32 %v9729_v28, %v7789_v29  ;;  %v7469_v46 = vld [vmem:[#allocation22 + $0x4f0] sm:$0xf0] }
 0x5b3   :  { %v9713_v47 = vld [vmem:[#allocation22 + $0x6d4] sm:$0xf]  ;;  %v7472_v55 = vor.u32 %v9649_v45, %v7469_v46  ;;  %v7571_v45 = vld [vmem:[#allocation22 + $0x598] sm:$0xf] }
 0x5b4   :  { %v7725_v50 = vld [vmem:[#allocation22 + $0x6f0] sm:$0xf0]  ;;  %v9678_v46 = vld [vmem:[#allocation22 + $0x5b4] sm:$0xf0] }
 0x5b5   :  { %2982 = vmatpush.bf16.msra.mxu3 %v6892_v38  ;;  %2995 = vmatpush.bf16.msrb.mxu0 %v7148_v39  ;;  %v7248_v38 = vor.u32 %v9593_v32, %v7245_v17  ;;  %v9521_v39 = vld [vmem:[#allocation22 + $0xd4] sm:$0xf]  ;;  %v9686_v17 = vld [vmem:[#allocation22 + $0x5f4] sm:$0xf0] }
 0x5b6   :  { %3008 = vmatpush.bf16.msrb.mxu1 %v7404_v43  ;;  %3021 = vmatpush.bf16.msrb.mxu2 %v7660_v44  ;;  %v9585_v43 = vld [vmem:[#allocation22 + $0x2d4] sm:$0xf]  ;;  %v6960_v51 = vor.u32 %v9521_v39, %v6957_v41  ;;  %v7059_v39 = vld [vmem:[#allocation22 + $0x198] sm:$0xf] }
 0x5b7   :  { %v7213_v44 = vld [vmem:[#allocation22 + $0x2f0] sm:$0xf0]  ;;  %v9550_v41 = vld [vmem:[#allocation22 + $0x1b4] sm:$0xf0] }
 0x5b8   :  { %v7216_v52 = vor.u32 %v9585_v43, %v7213_v44  ;;  %v9513_v53 = vld [vmem:[#allocation22 + $0x94] sm:$0xf]  ;;  %v7315_v43 = vld [vmem:[#allocation22 + $0x398] sm:$0xf] }
 0x5b9   :  { %2983 = vmatpush.bf16.msra.mxu3 %v6860_v56  ;;  %2996 = vmatpush.bf16.msrb.mxu0 %v7116_v57  ;;  %v6925_v54 = vld [vmem:[#allocation22 + $0xb0] sm:$0xf0]  ;;  %v7728_v56 = vor.u32 %v9713_v47, %v7725_v50  ;;  %v9614_v44 = vld [vmem:[#allocation22 + $0x3b4] sm:$0xf0] }
 0x5ba   :  { %3009 = vmatpush.bf16.msrb.mxu1 %v7372_v62  ;;  %3022 = vmatpush.bf16.msrb.mxu2 %v7628_v63  ;;  %v9577_v57 = vld [vmem:[#allocation22 + $0x294] sm:$0xf]  ;;  %v7827_v47 = vld [vmem:[#allocation22 + $0x798] sm:$0xf] }
 0x5bb   :  { %v7181_v58 = vld [vmem:[#allocation22 + $0x2b0] sm:$0xf0]  ;;  %v9742_v50 = vld [vmem:[#allocation22 + $0x7b4] sm:$0xf0] }
 0x5bc   :  { %2984 = vmatmul.bf16.vlgmr.msra.gmra.mxu3 %v10977_v11  ;;  %2997 = vmatmul.bf16.vlgmr.msrb.gmra.mxu0 %v10979_v12  ;;  %v9641_v60 = vld [vmem:[#allocation22 + $0x494] sm:$0xf] }
 0x5bd   :  { %3028 = vmatpush.bf16.msrb.mxu3 %v7088_v1  ;;  %3041 = vmatpush.bf16.msra.mxu0 %v7344_v2  ;;  %v7437_v61 = vld [vmem:[#allocation22 + $0x4b0] sm:$0xf0]  ;;  %v6928_v1 = vor.u32 %v9513_v53, %v6925_v54  ;;  %v7184_v2 = vor.u32 %v9577_v57, %v7181_v58  ;;  %v7027_v53 = vld [vmem:[#allocation22 + $0x158] sm:$0xf] }
 0x5be   :  { %3054 = vmatpush.bf16.msra.mxu1 %v7600_v5  ;;  %3067 = vmatpush.bf16.msra.mxu2 %v7856_v19  ;;  %v9705_v62 = vld [vmem:[#allocation22 + $0x694] sm:$0xf]  ;;  %v7440_v5 = vor.u32 %v9641_v60, %v7437_v61  ;;  %v9542_v54 = vld [vmem:[#allocation22 + $0x174] sm:$0xf0] }
 0x5bf   :  { %3010 = vmatmul.bf16.vlgmr.msrb.gmra.mxu1 %v10981_v59  ;;  %3023 = vmatmul.bf16.vlgmr.msrb.gmra.mxu2 %v10983_v13  ;;  %v7693_v63 = vld [vmem:[#allocation22 + $0x6b0] sm:$0xf0]  ;;  %v7283_v57 = vld [vmem:[#allocation22 + $0x358] sm:$0xf] }
 0x5c0   :  { %v9505_v3 = vld [vmem:[#allocation22 + $0x54] sm:$0xf]  ;;  %v7696_v19 = vor.u32 %v9705_v62, %v7693_v63  ;;  %v9606_v58 = vld [vmem:[#allocation22 + $0x374] sm:$0xf0] }
 0x5c1   :  { %3029 = vmatpush.bf16.msrb.mxu3 %v7056_v9  ;;  %3042 = vmatpush.bf16.msra.mxu0 %v7312_v10  ;;  %v6893_v4 = vld [vmem:[#allocation22 + $0x70] sm:$0xf0]  ;;  %v7539_v60 = vld [vmem:[#allocation22 + $0x558] sm:$0xf] }
 0x5c2   :  { %3055 = vmatpush.bf16.msra.mxu1 %v7568_v16  ;;  %3068 = vmatpush.bf16.msra.mxu2 %v7824_v18  ;;  %v9569_v6 = vld [vmem:[#allocation22 + $0x254] sm:$0xf]  ;;  %v6896_v10 = vor.u32 %v9505_v3, %v6893_v4  ;;  %v9670_v61 = vld [vmem:[#allocation22 + $0x574] sm:$0xf0]  ;;  %v7028_v3 = vor.u32 %v9542_v54, %v7027_v53  ;;  %v7284_v4 = vor.u32 %v9606_v58, %v7283_v57 }
 0x5c3   :  { %v7149_v24 = vld [vmem:[#allocation22 + $0x270] sm:$0xf0]  ;;  %v7795_v62 = vld [vmem:[#allocation22 + $0x758] sm:$0xf] }
 0x5c4   :  { %v9633_v7 = vld [vmem:[#allocation22 + $0x454] sm:$0xf]  ;;  %v7152_v14 = vor.u32 %v9569_v6, %v7149_v24  ;;  %v9734_v63 = vld [vmem:[#allocation22 + $0x774] sm:$0xf0] }
 0x5c5   :  { %3030 = vmatpush.bf16.msrb.mxu3 %v7024_v37  ;;  %3043 = vmatpush.bf16.msra.mxu0 %v7280_v40  ;;  %v7405_v25 = vld [vmem:[#allocation22 + $0x470] sm:$0xf0]  ;;  %v7091_v37 = vld [vmem:[#allocation22 + $0x1d8] sm:$0xf] }
 0x5c6   :  { %3056 = vmatpush.bf16.msra.mxu1 %v7536_v30  ;;  %3069 = vmatpush.bf16.msra.mxu2 %v7792_v31  ;;  %v9697_v8 = vld [vmem:[#allocation22 + $0x654] sm:$0xf]  ;;  %v7408_v21 = vor.u32 %v9633_v7, %v7405_v25  ;;  %v9558_v40 = vld [vmem:[#allocation22 + $0x1f4] sm:$0xf0]  ;;  %v7540_v7 = vor.u32 %v9670_v61, %v7539_v60  ;;  %v7796_v25 = vor.u32 %v9734_v63, %v7795_v62 }
 0x5c7   :  { %v7661_v26 = vld [vmem:[#allocation22 + $0x670] sm:$0xf0]  ;;  %v7603_v30 = vld [vmem:[#allocation22 + $0x5d8] sm:$0xf] }
 0x5c8   :  { %v9497_v9 = vld [vmem:[#allocation22 + $0x14] sm:$0xf]  ;;  %v7664_v22 = vor.u32 %v9697_v8, %v7661_v26  ;;  %v9534_v6 = vld [vmem:[#allocation22 + $0x134] sm:$0xf0] }
 0x5c9   :  { %3031 = vmatpush.bf16.msrb.mxu3 %v6992_v36  ;;  %3044 = vmatpush.bf16.msra.mxu0 %v7248_v38  ;;  %v6861_v15 = vld [vmem:[#allocation22 + $0x30] sm:$0xf0]  ;;  %v7092_v36 = vor.u32 %v9558_v40, %v7091_v37  ;;  %v7348_v38 = vor.u32 %v9622_v49, %v7347_v48  ;;  %v7251_v24 = vld [vmem:[#allocation22 + $0x318] sm:$0xf] }
 0x5ca   :  { %3057 = vmatpush.bf16.msra.mxu1 %v7504_v0  ;;  %3070 = vmatpush.bf16.msra.mxu2 %v7760_v42  ;;  %v9561_v16 = vld [vmem:[#allocation22 + $0x214] sm:$0xf]  ;;  %v6864_v31 = vor.u32 %v9497_v9, %v6861_v15  ;;  %v7604_v0 = vor.u32 %v9686_v17, %v7603_v30  ;;  %v7860_v42 = vor.u32 %v9750_v34, %v7859_v33  ;;  %v9598_v8 = vld [vmem:[#allocation22 + $0x334] sm:$0xf0] }
 0x5cb   :  { %v7117_v18 = vld [vmem:[#allocation22 + $0x230] sm:$0xf0]  ;;  %v7507_v26 = vld [vmem:[#allocation22 + $0x518] sm:$0xf] }
 0x5cc   :  { %v9625_v27 = vld [vmem:[#allocation22 + $0x414] sm:$0xf]  ;;  %v7120_v32 = vor.u32 %v9561_v16, %v7117_v18  ;;  %v9662_v9 = vld [vmem:[#allocation22 + $0x534] sm:$0xf0]  ;;  %v7252_v18 = vor.u32 %v9598_v8, %v7251_v24 }
 0x5cd   :  { %3032 = vmatpush.bf16.msrb.mxu3 %v6960_v51  ;;  %3045 = vmatpush.bf16.msra.mxu0 %v7216_v52  ;;  %v7373_v20 = vld [vmem:[#allocation22 + $0x430] sm:$0xf0]  ;;  %v7060_v51 = vor.u32 %v9550_v41, %v7059_v39  ;;  %v7316_v52 = vor.u32 %v9614_v44, %v7315_v43  ;;  %v9590_v37 = vld [vmem:[#allocation22 + $0x2f4] sm:$0xf0] }
 0x5ce   :  { %3058 = vmatpush.bf16.msra.mxu1 %v7472_v55  ;;  %3071 = vmatpush.bf16.msra.mxu2 %v7728_v56  ;;  %v9689_v28 = vld [vmem:[#allocation22 + $0x614] sm:$0xf]  ;;  %v7376_v35 = vor.u32 %v9625_v27, %v7373_v20  ;;  %v7572_v55 = vor.u32 %v9678_v46, %v7571_v45  ;;  %v7828_v56 = vor.u32 %v9742_v50, %v7827_v47  ;;  %v7475_v40 = vld [vmem:[#allocation22 + $0x4d8] sm:$0xf] }
 0x5cf   :  { %v7629_v29 = vld [vmem:[#allocation22 + $0x630] sm:$0xf0]  ;;  %v7508_v27 = vor.u32 %v9662_v9, %v7507_v26  ;;  %v9654_v30 = vld [vmem:[#allocation22 + $0x4f4] sm:$0xf0] }
 0x5d0   :  { %v7632_v23 = vor.u32 %v9689_v28, %v7629_v29  ;;  %v7219_v29 = vld [vmem:[#allocation22 + $0x2d8] sm:$0xf]  ;;  %v7476_v39 = vor.u32 %v9654_v30, %v7475_v40  ;;  %v7605_v40 = vld [vmem:[#allocation22 + $0x5f8] sm:$0xf0] }
 0x5d1   :  { %3033 = vmatpush.bf16.msrb.mxu3 %v6928_v1  ;;  %3046 = vmatpush.bf16.msra.mxu0 %v7184_v2  ;;  %v11009_v2 = vld [vmem:[#allocation23] sm:$0xff]  ;;  %v7443_v43 = vld [vmem:[#allocation22 + $0x498] sm:$0xf] }
 0x5d2   :  { %3059 = vmatpush.bf16.msra.mxu1 %v7440_v5  ;;  %3072 = vmatpush.bf16.msra.mxu2 %v7696_v19  ;;  %v6995_v19 = vld [vmem:[#allocation22 + $0x118] sm:$0xf]  ;;  %v1472_v15 = vperm.slane %v11009_v2, 0 }
 0x5d3   :  { %v6996_v16 = vor.u32 %v9534_v6, %v6995_v19  ;;  %v9646_v45 = vld [vmem:[#allocation22 + $0x4b4] sm:$0xf0] }
 0x5d4   :  { %v7699_v46 = vld [vmem:[#allocation22 + $0x698] sm:$0xf] }
 0x5d5   :  { %3034 = vmatpush.bf16.msrb.mxu3 %v6896_v10  ;;  %3047 = vmatpush.bf16.msra.mxu0 %v7152_v14  ;;  %v7763_v10 = vld [vmem:[#allocation22 + $0x718] sm:$0xf] }
 0x5d6   :  { %3060 = vmatpush.bf16.msra.mxu1 %v7408_v21  ;;  %3073 = vmatpush.bf16.msra.mxu2 %v7664_v22  ;;  %v9726_v14 = vld [vmem:[#allocation22 + $0x734] sm:$0xf0] }
 0x5d7   :  { %v6963_v21 = vld [vmem:[#allocation22 + $0xd8] sm:$0xf]  ;;  %v7764_v20 = vor.u32 %v9726_v14, %v7763_v10 }
 0x5d8   :  { %v2790_v1 = vpop.f32.mrf.mxu0  ;;  %v9526_v22 = vld [vmem:[#allocation22 + $0xf4] sm:$0xf0] }
 0x5d9   :  { %3035 = vmatpush.bf16.msrb.mxu3 %v6864_v31  ;;  %3048 = vmatpush.bf16.msra.mxu0 %v7120_v32  ;;  %v2803_v5 = vpop.f32.mrf.mxu1  ;;  %v7731_v31 = vld [vmem:[#allocation22 + $0x6d8] sm:$0xf]  ;;  %v6964_v34 = vor.u32 %v9526_v22, %v6963_v21  ;;  %v7093_v21 = vld [vmem:[#allocation22 + $0x1f8] sm:$0xf0]  ;;  %v1473_v22 = vperm.slane %v11009_v2, 1 }
 0x5da   :  { %3061 = vmatpush.bf16.msra.mxu1 %v7376_v35  ;;  %3074 = vmatpush.bf16.msra.mxu2 %v7632_v23  ;;  %v9718_v32 = vld [vmem:[#allocation22 + $0x6f4] sm:$0xf0]  ;;  %v7220_v35 = vor.u32 %v9590_v37, %v7219_v29 }
 0x5db   :  { %v7732_v41 = vor.u32 %v9718_v32, %v7731_v31  ;;  %v9710_v47 = vld [vmem:[#allocation22 + $0x6b4] sm:$0xf0] }
 0x5dc   :  { %3036 = vmatmul.bf16.vlgmr.msrb.gmra.mxu3 %v10977_v11  ;;  %3049 = vmatmul.bf16.vlgmr.msra.gmra.mxu0 %v10979_v12  ;;  %v6899_v53 = vld [vmem:[#allocation22 + $0x58] sm:$0xf] }
 0x5dd   :  { %3080 = vmatpush.bf16.msra.mxu3 %v7092_v36  ;;  %3093 = vmatpush.bf16.msrb.mxu0 %v7348_v38  ;;  %v6931_v36 = vld [vmem:[#allocation22 + $0x98] sm:$0xf] }
 0x5de   :  { %3106 = vmatpush.bf16.msrb.mxu1 %v7604_v0  ;;  %3119 = vmatpush.bf16.msrb.mxu2 %v7860_v42  ;;  %v2777_v28 = vpop.f32.mrf.mxu3  ;;  %v9518_v38 = vld [vmem:[#allocation22 + $0xb4] sm:$0xf0] }
 0x5df   :  { %3062 = vmatmul.bf16.vlgmr.msra.gmra.mxu1 %v10981_v59  ;;  %3075 = vmatmul.bf16.vlgmr.msra.gmra.mxu2 %v10983_v13  ;;  %v2778_v48 = vadd.f32 %v2777_v28, %v1472_v15  ;;  %v2816_v49 = vpop.f32.mrf.mxu2  ;;  %v7187_v0 = vld [vmem:[#allocation22 + $0x298] sm:$0xf]  ;;  %v9682_v28 = vld [vmem:[#allocation22 + $0x5dc] sm:$0xf] }
 0x5e0   :  { %v2792_v17 = vpop.f32.mrf.mxu0  ;;  %v9582_v42 = vld [vmem:[#allocation22 + $0x2b4] sm:$0xf0] }
 0x5e1   :  { %3081 = vmatpush.bf16.msra.mxu3 %v7060_v51  ;;  %3094 = vmatpush.bf16.msrb.mxu0 %v7316_v52  ;;  %v2791_v33 = vadd.f32 %v2790_v1, %v2778_v48  ;;  %v2805_v23 = vpop.f32.mrf.mxu1  ;;  %v6932_v51 = vor.u32 %v9518_v38, %v6931_v36  ;;  %v7188_v52 = vor.u32 %v9582_v42, %v7187_v0  ;;  %v9510_v54 = vld [vmem:[#allocation22 + $0x74] sm:$0xf0]  ;;  %v9746_v48 = vld [vmem:[#allocation22 + $0x7dc] sm:$0xf] }
 0x5e2   :  { %3107 = vmatpush.bf16.msrb.mxu1 %v7572_v55  ;;  %3120 = vmatpush.bf16.msrb.mxu2 %v7828_v56  ;;  %v7444_v55 = vor.u32 %v9646_v45, %v7443_v43  ;;  %v7700_v56 = vor.u32 %v9710_v47, %v7699_v46  ;;  %v7155_v58 = vld [vmem:[#allocation22 + $0x258] sm:$0xf]  ;;  %v6900_v6 = vor.u32 %v9510_v54, %v6899_v53  ;;  %v9546_v23 = vld [vmem:[#allocation22 + $0x19c] sm:$0xf] }
 0x5e3   :  { %v2804_v44 = vadd.f32 %v2803_v5, %v2791_v33  ;;  %v9574_v60 = vld [vmem:[#allocation22 + $0x274] sm:$0xf0]  ;;  %v7061_v36 = vld [vmem:[#allocation22 + $0x1b8] sm:$0xf0]  ;;  %v7608_v38 = vor.u32 %v9682_v28, %v7605_v40 }
 0x5e4   :  { %v7411_v61 = vld [vmem:[#allocation22 + $0x458] sm:$0xf]  ;;  %v7156_v24 = vor.u32 %v9574_v60, %v7155_v58  ;;  %v9610_v0 = vld [vmem:[#allocation22 + $0x39c] sm:$0xf]  ;;  %v7064_v53 = vor.u32 %v9546_v23, %v7061_v36 }
 0x5e5   :  { %3082 = vmatpush.bf16.msra.mxu3 %v7028_v3  ;;  %3095 = vmatpush.bf16.msrb.mxu0 %v7284_v4  ;;  %v11012_v50 = vadd.f32 %v2816_v49, %v2804_v44  ;;  %v9638_v63 = vld [vmem:[#allocation22 + $0x474] sm:$0xf0]  ;;  %v7861_v49 = vld [vmem:[#allocation22 + $0x7f8] sm:$0xf0] }
 0x5e6   :  { %3108 = vmatpush.bf16.msrb.mxu1 %v7540_v7  ;;  %3121 = vmatpush.bf16.msrb.mxu2 %v7796_v25  ;;  %v2779_v57 = vpop.f32.mrf.mxu3  ;;  %v7667_v1 = vld [vmem:[#allocation22 + $0x658] sm:$0xf]  ;;  %v7412_v9 = vor.u32 %v9638_v63, %v7411_v61  ;;  %v7317_v42 = vld [vmem:[#allocation22 + $0x3b8] sm:$0xf0] }
 0x5e7   :  { %v2818_v62 = vpop.f32.mrf.mxu2  ;;  %v9702_v3 = vld [vmem:[#allocation22 + $0x674] sm:$0xf0]  ;;  %v9674_v43 = vld [vmem:[#allocation22 + $0x59c] sm:$0xf]  ;;  %v7320_v54 = vor.u32 %v9610_v0, %v7317_v42 }
 0x5e8   :  { %v2842_v4 = vpop.f32.mrf.mxu0  ;;  %v6867_v5 = vld [vmem:[#allocation22 + $0x18] sm:$0xf]  ;;  %v7668_v10 = vor.u32 %v9702_v3, %v7667_v1  ;;  %v7573_v46 = vld [vmem:[#allocation22 + $0x5b8] sm:$0xf0] }
 0x5e9   :  { %3083 = vmatpush.bf16.msra.mxu3 %v6996_v16  ;;  %3096 = vmatpush.bf16.msrb.mxu0 %v7252_v18  ;;  %v9502_v19 = vld [vmem:[#allocation22 + $0x34] sm:$0xf0]  ;;  %v2855_v7 = vpop.f32.mrf.mxu1  ;;  %v9554_v18 = vld [vmem:[#allocation22 + $0x1dc] sm:$0xf]  ;;  %v7576_v57 = vor.u32 %v9674_v43, %v7573_v46 }
 0x5ea   :  { %3109 = vmatpush.bf16.msrb.mxu1 %v7508_v27  ;;  %3122 = vmatpush.bf16.msrb.mxu2 %v7764_v20  ;;  %v7123_v25 = vld [vmem:[#allocation22 + $0x218] sm:$0xf]  ;;  %v9618_v27 = vld [vmem:[#allocation22 + $0x3dc] sm:$0xf]  ;;  %v6868_v29 = vor.u32 %v9502_v19, %v6867_v5  ;;  %v7096_v17 = vor.u32 %v9554_v18, %v7093_v21 }
 0x5eb   :  { %v9566_v8 = vld [vmem:[#allocation22 + $0x234] sm:$0xf0]  ;;  %v7349_v20 = vld [vmem:[#allocation22 + $0x3f8] sm:$0xf0] }
 0x5ec   :  { %v7379_v26 = vld [vmem:[#allocation22 + $0x418] sm:$0xf]  ;;  %v7124_v37 = vor.u32 %v9566_v8, %v7123_v25  ;;  %v7352_v33 = vor.u32 %v9618_v27, %v7349_v20  ;;  %v9738_v47 = vld [vmem:[#allocation22 + $0x79c] sm:$0xf] }
 0x5ed   :  { %3084 = vmatpush.bf16.msra.mxu3 %v6964_v34  ;;  %3097 = vmatpush.bf16.msrb.mxu0 %v7220_v35  ;;  %v9630_v14 = vld [vmem:[#allocation22 + $0x434] sm:$0xf0]  ;;  %v9602_v60 = vld [vmem:[#allocation22 + $0x35c] sm:$0xf] }
 0x5ee   :  { %3110 = vmatpush.bf16.msrb.mxu1 %v7476_v39  ;;  %3123 = vmatpush.bf16.msrb.mxu2 %v7732_v41  ;;  %v7635_v15 = vld [vmem:[#allocation22 + $0x618] sm:$0xf]  ;;  %v7380_v30 = vor.u32 %v9630_v14, %v7379_v26  ;;  %v2829_v32 = vpop.f32.mrf.mxu3  ;;  %v7864_v39 = vor.u32 %v9746_v48, %v7861_v49  ;;  %v7285_v61 = vld [vmem:[#allocation22 + $0x378] sm:$0xf0] }
 0x5ef   :  { %v9694_v16 = vld [vmem:[#allocation22 + $0x634] sm:$0xf0]  ;;  %v2830_v34 = vadd.f32 %v2829_v32, %v1473_v22  ;;  %v2868_v35 = vpop.f32.mrf.mxu2  ;;  %v9666_v62 = vld [vmem:[#allocation22 + $0x55c] sm:$0xf] }
 0x5f0   :  { %v7636_v31 = vor.u32 %v9694_v16, %v7635_v15  ;;  %v2844_v41 = vpop.f32.mrf.mxu0  ;;  %v7541_v1 = vld [vmem:[#allocation22 + $0x578] sm:$0xf0] }
 0x5f1   :  { %3085 = vmatpush.bf16.msra.mxu3 %v6932_v51  ;;  %3098 = vmatpush.bf16.msrb.mxu0 %v7188_v52  ;;  %v2843_v44 = vadd.f32 %v2842_v4, %v2830_v34  ;;  %v2857_v45 = vpop.f32.mrf.mxu1  ;;  %v7829_v51 = vld [vmem:[#allocation22 + $0x7b8] sm:$0xf0]  ;;  %v7544_v8 = vor.u32 %v9666_v62, %v7541_v1 }
 0x5f2   :  { %3111 = vmatpush.bf16.msrb.mxu1 %v7444_v55  ;;  %3124 = vmatpush.bf16.msrb.mxu2 %v7700_v56  ;;  %v9538_v55 = vld [vmem:[#allocation22 + $0x15c] sm:$0xf]  ;;  %v7832_v58 = vor.u32 %v9738_v47, %v7829_v51 }
 0x5f3   :  { %v2856_v52 = vadd.f32 %v2855_v7, %v2843_v44  ;;  %v7029_v56 = vld [vmem:[#allocation22 + $0x178] sm:$0xf0] }
 0x5f4   :  { %v9730_v3 = vld [vmem:[#allocation22 + $0x75c] sm:$0xf]  ;;  %v7032_v19 = vor.u32 %v9538_v55, %v7029_v56 }
 0x5f5   :  { %3086 = vmatpush.bf16.msra.mxu3 %v6900_v6  ;;  %3099 = vmatpush.bf16.msrb.mxu0 %v7156_v24  ;;  %v11015_v63 = vadd.f32 %v2868_v35, %v2856_v52  ;;  %v7797_v4 = vld [vmem:[#allocation22 + $0x778] sm:$0xf0]  ;;  %v7288_v6 = vor.u32 %v9602_v60, %v7285_v61 }
 0x5f6   :  { %3112 = vmatpush.bf16.msrb.mxu1 %v7412_v9  ;;  %3125 = vmatpush.bf16.msrb.mxu2 %v7668_v10  ;;  %v2831_v5 = vpop.f32.mrf.mxu3  ;;  %v9530_v7 = vld [vmem:[#allocation22 + $0x11c] sm:$0xf]  ;;  %v7800_v26 = vor.u32 %v9730_v3, %v7797_v4 }
 0x5f7   :  { %v2870_v24 = vpop.f32.mrf.mxu2  ;;  %v6997_v25 = vld [vmem:[#allocation22 + $0x138] sm:$0xf0] }
 0x5f8   :  { %v9594_v9 = vld [vmem:[#allocation22 + $0x31c] sm:$0xf]  ;;  %v7000_v27 = vor.u32 %v9530_v7, %v6997_v25 }
 0x5f9   :  { %3087 = vmatpush.bf16.msra.mxu3 %v6868_v29  ;;  %3100 = vmatpush.bf16.msrb.mxu0 %v7124_v37  ;;  %v7253_v10 = vld [vmem:[#allocation22 + $0x338] sm:$0xf0]  ;;  %v2894_v21 = vpop.f32.mrf.mxu0 }
 0x5fa   :  { %3113 = vmatpush.bf16.msrb.mxu1 %v7380_v30  ;;  %3126 = vmatpush.bf16.msrb.mxu2 %v7636_v31  ;;  %v9658_v14 = vld [vmem:[#allocation22 + $0x51c] sm:$0xf]  ;;  %v7256_v20 = vor.u32 %v9594_v9, %v7253_v10 }
 0x5fb   :  { %v7509_v15 = vld [vmem:[#allocation22 + $0x538] sm:$0xf0] }
 0x5fc   :  { %3088 = vmatmul.bf16.vlgmr.msra.gmra.mxu3 %v10977_v11  ;;  %3101 = vmatmul.bf16.vlgmr.msrb.gmra.mxu0 %v10979_v12  ;;  %v9722_v16 = vld [vmem:[#allocation22 + $0x71c] sm:$0xf]  ;;  %v2907_v22 = vpop.f32.mrf.mxu1  ;;  %v7512_v40 = vor.u32 %v9658_v14, %v7509_v15 }
 0x5fd   :  { %3132 = vmatpush.bf16.msrb.mxu3 %v7096_v17  ;;  %3145 = vmatpush.bf16.msra.mxu0 %v7352_v33  ;;  %v7765_v18 = vld [vmem:[#allocation22 + $0x738] sm:$0xf0]  ;;  %v1474_v33 = vperm.slane %v11009_v2, 2 }
 0x5fe   :  { %3158 = vmatpush.bf16.msra.mxu1 %v7608_v38  ;;  %3171 = vmatpush.bf16.msra.mxu2 %v7864_v39  ;;  %v9522_v28 = vld [vmem:[#allocation22 + $0xdc] sm:$0xf]  ;;  %v7768_v48 = vor.u32 %v9722_v16, %v7765_v18 }
 0x5ff   :  { %3114 = vmatmul.bf16.vlgmr.msrb.gmra.mxu1 %v10981_v59  ;;  %3127 = vmatmul.bf16.vlgmr.msrb.gmra.mxu2 %v10983_v13  ;;  %v6965_v29 = vld [vmem:[#allocation22 + $0xf8] sm:$0xf0]  ;;  %v2881_v41 = vpop.f32.mrf.mxu3 }
 0x600   :  { %v9586_v37 = vld [vmem:[#allocation22 + $0x2dc] sm:$0xf]  ;;  %v6968_v34 = vor.u32 %v9522_v28, %v6965_v29  ;;  %v2882_v44 = vadd.f32 %v2881_v41, %v1474_v33 }
 0x601   :  { %3133 = vmatpush.bf16.msrb.mxu3 %v7064_v53  ;;  %3146 = vmatpush.bf16.msra.mxu0 %v7320_v54  ;;  %v7221_v49 = vld [vmem:[#allocation22 + $0x2f8] sm:$0xf0]  ;;  %v2896_v52 = vpop.f32.mrf.mxu0 }
 0x602   :  { %3159 = vmatpush.bf16.msra.mxu1 %v7576_v57  ;;  %3172 = vmatpush.bf16.msra.mxu2 %v7832_v58  ;;  %v9650_v30 = vld [vmem:[#allocation22 + $0x4dc] sm:$0xf]  ;;  %v7224_v35 = vor.u32 %v9586_v37, %v7221_v49  ;;  %v2920_v45 = vpop.f32.mrf.mxu2  ;;  %v2895_v53 = vadd.f32 %v2894_v21, %v2882_v44 }
 0x603   :  { %v7477_v31 = vld [vmem:[#allocation22 + $0x4f8] sm:$0xf0] }
 0x604   :  { %v9714_v32 = vld [vmem:[#allocation22 + $0x6dc] sm:$0xf]  ;;  %v7480_v38 = vor.u32 %v9650_v30, %v7477_v31  ;;  %v2909_v54 = vpop.f32.mrf.mxu1  ;;  %v2908_v4 = vadd.f32 %v2907_v22, %v2895_v53  ;;  %v1475_v30 = vperm.slane %v11009_v2, 3 }
 0x605   :  { %3134 = vmatpush.bf16.msrb.mxu3 %v7032_v19  ;;  %3147 = vmatpush.bf16.msra.mxu0 %v7288_v6  ;;  %v7733_v17 = vld [vmem:[#allocation22 + $0x6f8] sm:$0xf0] }
 0x606   :  { %3160 = vmatpush.bf16.msra.mxu1 %v7544_v8  ;;  %3173 = vmatpush.bf16.msra.mxu2 %v7800_v26  ;;  %v9514_v23 = vld [vmem:[#allocation22 + $0x9c] sm:$0xf]  ;;  %v7736_v39 = vor.u32 %v9714_v32, %v7733_v17  ;;  %v11022_v24 = vadd.f32 %v2920_v45, %v2908_v4 }
 0x607   :  { %v6933_v36 = vld [vmem:[#allocation22 + $0xb8] sm:$0xf0]  ;;  %v2883_v14 = vpop.f32.mrf.mxu3 }
 0x608   :  { %v9578_v0 = vld [vmem:[#allocation22 + $0x29c] sm:$0xf]  ;;  %v6936_v55 = vor.u32 %v9514_v23, %v6933_v36 }
 0x609   :  { %3135 = vmatpush.bf16.msrb.mxu3 %v7000_v27  ;;  %3148 = vmatpush.bf16.msra.mxu0 %v7256_v20  ;;  %v7189_v42 = vld [vmem:[#allocation22 + $0x2b8] sm:$0xf0] }
 0x60a   :  { %3161 = vmatpush.bf16.msra.mxu1 %v7512_v40  ;;  %3174 = vmatpush.bf16.msra.mxu2 %v7768_v48  ;;  %v9642_v43 = vld [vmem:[#allocation22 + $0x49c] sm:$0xf]  ;;  %v7192_v56 = vor.u32 %v9578_v0, %v7189_v42  ;;  %v2922_v21 = vpop.f32.mrf.mxu2 }
 0x60b   :  { %v7445_v46 = vld [vmem:[#allocation22 + $0x4b8] sm:$0xf0]  ;;  %v3184_v21 = vsel %vm404_vm0, %v11012_v50, 0.0 }
 0x60c   :  { %v9706_v47 = vld [vmem:[#allocation22 + $0x69c] sm:$0xf]  ;;  %v7448_v60 = vor.u32 %v9642_v43, %v7445_v46 }
 0x60d   :  { %v7701_v51 = vld [vmem:[#allocation22 + $0x6b8] sm:$0xf0]  ;;  %3136 = vmatpush.bf16.msrb.mxu3 %v6968_v34  ;;  %3149 = vmatpush.bf16.msra.mxu0 %v7224_v35 }
 0x60e   :  { %v9506_v57 = vld [vmem:[#allocation22 + $0x5c] sm:$0xf]  ;;  %3162 = vmatpush.bf16.msra.mxu1 %v7480_v38  ;;  %3175 = vmatpush.bf16.msra.mxu2 %v7736_v39  ;;  %v7704_v61 = vor.u32 %v9706_v47, %v7701_v51 }
 0x60f   :  { %v6901_v58 = vld [vmem:[#allocation22 + $0x78] sm:$0xf0] }
 0x610   :  { %v9570_v62 = vld [vmem:[#allocation22 + $0x25c] sm:$0xf]  ;;  %v6904_v7 = vor.u32 %v9506_v57, %v6901_v58 }
 0x611   :  { %v7157_v1 = vld [vmem:[#allocation22 + $0x278] sm:$0xf0]  ;;  %3137 = vmatpush.bf16.msrb.mxu3 %v6936_v55  ;;  %3150 = vmatpush.bf16.msra.mxu0 %v7192_v56 }
 0x612   :  { %v9634_v3 = vld [vmem:[#allocation22 + $0x45c] sm:$0xf]  ;;  %v7160_v25 = vor.u32 %v9570_v62, %v7157_v1  ;;  %3163 = vmatpush.bf16.msra.mxu1 %v7448_v60  ;;  %3176 = vmatpush.bf16.msra.mxu2 %v7704_v61 }
 0x613   :  { %v7413_v5 = vld [vmem:[#allocation22 + $0x478] sm:$0xf0] }
 0x614   :  { %v9698_v19 = vld [vmem:[#allocation22 + $0x65c] sm:$0xf]  ;;  %v7416_v9 = vor.u32 %v9634_v3, %v7413_v5 }
 0x615   :  { %v7669_v6 = vld [vmem:[#allocation22 + $0x678] sm:$0xf0]  ;;  %3138 = vmatpush.bf16.msrb.mxu3 %v6904_v7  ;;  %3151 = vmatpush.bf16.msra.mxu0 %v7160_v25  ;;  %v1477_v7 = vperm.slane %v11009_v2, 5  ;;  %v1478_v25 = vperm.slane %v11009_v2, 6 }
 0x616   :  { %v9498_v8 = vld [vmem:[#allocation22 + $0x1c] sm:$0xf]  ;;  %v7672_v10 = vor.u32 %v9698_v19, %v7669_v6  ;;  %3164 = vmatpush.bf16.msra.mxu1 %v7416_v9 }
 0x617   :  { %v6869_v26 = vld [vmem:[#allocation22 + $0x38] sm:$0xf0] }
 0x618   :  { %v9562_v15 = vld [vmem:[#allocation22 + $0x21c] sm:$0xf]  ;;  %v6872_v28 = vor.u32 %v9498_v8, %v6869_v26  ;;  %3177 = vmatpush.bf16.msra.mxu2 %v7672_v10 }
 0x619   :  { %v7125_v16 = vld [vmem:[#allocation22 + $0x238] sm:$0xf0]  ;;  %v2946_v48 = vpop.f32.mrf.mxu0 }
 0x61a   :  { %v9626_v18 = vld [vmem:[#allocation22 + $0x41c] sm:$0xf]  ;;  %v7128_v29 = vor.u32 %v9562_v15, %v7125_v16  ;;  %3139 = vmatpush.bf16.msrb.mxu3 %v6872_v28  ;;  %v3185_v15 = vsel %vm404_vm0, %v11015_v63, 0.0 }
 0x61b   :  { %v7381_v22 = vld [vmem:[#allocation22 + $0x438] sm:$0xf0]  ;;  %v3186_v28 = vadd.f32 %v3185_v15, %v3184_v21  ;;  %v9934_v15 = vld [vmem:[#allocation28 + $0x5b4] sm:$0xf0] }
 0x61c   :  { %v9690_v27 = vld [vmem:[#allocation22 + $0x61c] sm:$0xf]  ;;  %v7384_v37 = vor.u32 %v9626_v18, %v7381_v22  ;;  %3152 = vmatpush.bf16.msra.mxu0 %v7128_v29  ;;  %v2959_v49 = vpop.f32.mrf.mxu1  ;;  %v3187_v22 = vsel %vm404_vm0, %v11022_v24, 0.0 }
 0x61d   :  { %v7637_v20 = vld [vmem:[#allocation22 + $0x638] sm:$0xf0]  ;;  %3140 = vmatmul.bf16.vlgmr.msrb.gmra.mxu3 %v10977_v11 }
 0x61e   :  { %v7640_v40 = vor.u32 %v9690_v27, %v7637_v20  ;;  %3165 = vmatpush.bf16.msra.mxu1 %v7384_v37  ;;  %v1479_v20 = vperm.slane %v11009_v2, 7 }
 0x61f   :  { %3153 = vmatmul.bf16.vlgmr.msra.gmra.mxu0 %v10979_v12  ;;  %v2933_v31 = vpop.f32.mrf.mxu3 }
 0x620   :  { %3178 = vmatpush.bf16.msra.mxu2 %v7640_v40  ;;  %v2934_v32 = vadd.f32 %v2933_v31, %v1475_v30  ;;  %v3188_v40 = vadd.f32 %v3187_v22, %v3186_v28  ;;  %v8179_v22 = vld [vmem:[#allocation28 + $0x270] sm:$0xf] }
 0x621   :  { %3166 = vmatmul.bf16.vlgmr.msra.gmra.mxu1 %v10981_v59  ;;  %v2948_v33 = vpop.f32.mrf.mxu0  ;;  %v1476_v59 = vperm.slane %v11009_v2, 4 }
 0x622   :  { %v2972_v17 = vpop.f32.mrf.mxu2  ;;  %v2947_v34 = vadd.f32 %v2946_v48, %v2934_v32 }
 0x623   :  { %3179 = vmatmul.bf16.vlgmr.msra.gmra.mxu2 %v10983_v13 }
 0x624   :  { %v2961_v35 = vpop.f32.mrf.mxu1  ;;  %v2960_v23 = vadd.f32 %v2959_v49, %v2947_v34 }
 0x626   :  { %v11029_v36 = vadd.f32 %v2972_v17, %v2960_v23 }
 0x627   :  { %v2935_v11 = vpop.f32.mrf.mxu3 }
 0x628   :  { %v3189_v29 = vsel %vm404_vm0, %v11029_v36, 0.0 }
 0x629   :  { %v3190_v17 = vadd.f32 %v3189_v29, %v3188_v40  ;;  %v9880_v29 = vld [vmem:[#allocation28 + $0x404] sm:$0xf0]  ;;  %v8563_v40 = vld [vmem:[#allocation28 + $0x570] sm:$0xf] }
 0x62a   :  { %v2974_v38 = vpop.f32.mrf.mxu2 }
 0x639   :  { %v2998_v12 = vpop.f32.mrf.mxu0 }
 0x63c   :  { %v3011_v39 = vpop.f32.mrf.mxu1 }
 0x63f   :  { %v2985_v13 = vpop.f32.mrf.mxu3 }
 0x640   :  { %v2986_v41 = vadd.f32 %v2985_v13, %v1476_v59 }
 0x641   :  { %v3000_v42 = vpop.f32.mrf.mxu0 }
 0x642   :  { %v3024_v0 = vpop.f32.mrf.mxu2  ;;  %v2999_v43 = vadd.f32 %v2998_v12, %v2986_v41 }
 0x644   :  { %v3013_v44 = vpop.f32.mrf.mxu1  ;;  %v3012_v45 = vadd.f32 %v3011_v39, %v2999_v43  ;;  %v10711_v43 = vmov 1024.0  }
 0x645   :  { %10185 = vrcp.f32 %v10711_v43 }
 0x646   :  { %v11032_v46 = vadd.f32 %v3024_v0, %v3012_v45 }
 0x647   :  { %v2987_v47 = vpop.f32.mrf.mxu3 }
 0x648   :  { %v3191_v49 = vsel %vm404_vm0, %v11032_v46, 0.0 }
 0x649   :  { %v3192_v23 = vadd.f32 %v3191_v49, %v3190_v17  ;;  %v7963_v17 = vld [vmem:[#allocation28 + $0xc0] sm:$0xf] }
 0x64a   :  { %v3026_v51 = vpop.f32.mrf.mxu2 }
 0x64b   :  { %v10186_v44 = vpop.eup %10185 }
 0x64c   :  { %v3202_v45 = vmul.f32 1024.0, %v10186_v44  ;;  %vm3206_vm13 = vweird.f32 %v10186_v44 }
 0x64e   :  { %v3203_v47 = vsub.f32 1.0, %v3202_v45  ;;  %v9772_v45 = vld [vmem:[#allocation28 + $0xa4] sm:$0xf0] }
 0x650   :  { %v3204_v51 = vmul.f32 %v10186_v44, %v3203_v47 }
 0x659   :  { %v3050_v52 = vpop.f32.mrf.mxu0 }
 0x65c   :  { %v3063_v53 = vpop.f32.mrf.mxu1 }
 0x65f   :  { %v3037_v54 = vpop.f32.mrf.mxu3 }
 0x660   :  { %v3038_v8 = vadd.f32 %v3037_v54, %v1477_v7  ;;  %v8227_v54 = vld [vmem:[#allocation28 + $0x2d0] sm:$0xf]  ;;  %v3205_v7 = vadd.f32 %v10186_v44, %v3204_v51 }
 0x661   :  { %v3052_v56 = vpop.f32.mrf.mxu0 }
 0x662   :  { %v3076_v55 = vpop.f32.mrf.mxu2  ;;  %v3051_v9 = vadd.f32 %v3050_v52, %v3038_v8  ;;  %v8035_v52 = vld [vmem:[#allocation28 + $0x150] sm:$0xf]  ;;  %v9844_v56 = vld [vmem:[#allocation28 + $0x2e4] sm:$0xf0]  ;;  %v11059_v49 = vsel %vm3206_vm13, %v10186_v44, %v3205_v7  ;;  %v9814_v7 = vld [vmem:[#allocation28 + $0x1f4] sm:$0xf0] }
 0x663   :  { %v7939_v44 = vld [vmem:[#allocation28 + $0x90] sm:$0xf] }
 0x664   :  { %v3065_v57 = vpop.f32.mrf.mxu1  ;;  %v3064_v16 = vadd.f32 %v3063_v53, %v3051_v9  ;;  %v9796_v53 = vld [vmem:[#allocation28 + $0x164] sm:$0xf0]  ;;  %v9886_v9 = vld [vmem:[#allocation28 + $0x434] sm:$0xf0] }
 0x665   :  { %v8419_v57 = vld [vmem:[#allocation28 + $0x450] sm:$0xf] }
 0x666   :  { %v11045_v37 = vadd.f32 %v3076_v55, %v3064_v16  ;;  %v8036_v55 = vor.u32 %v9796_v53, %v8035_v52  ;;  %v7987_v16 = vld [vmem:[#allocation28 + $0xf0] sm:$0xf] }
 0x667   :  { %v3039_v58 = vpop.f32.mrf.mxu3 }
 0x668   :  { %v3193_v2 = vsel %vm404_vm0, %v11045_v37, 0.0  ;;  %v9892_v58 = vld [vmem:[#allocation28 + $0x464] sm:$0xf0]  ;;  %5648 = vmatpush.bf16.msra.mxu3 %v8036_v55 }
 0x669   :  { %v3194_v12 = vadd.f32 %v3193_v2, %v3192_v23  ;;  %v8155_v2 = vld [vmem:[#allocation28 + $0x240] sm:$0xf]  ;;  %v9820_v55 = vld [vmem:[#allocation28 + $0x224] sm:$0xf0] }
 0x66a   :  { %v3078_v60 = vpop.f32.mrf.mxu2  ;;  %v8347_v23 = vld [vmem:[#allocation28 + $0x3c0] sm:$0xf] }
 0x66b   :  { %v8228_v60 = vor.u32 %v9844_v56, %v8227_v54  ;;  %v8131_v54 = vld [vmem:[#allocation28 + $0x210] sm:$0xf] }
 0x66d   :  { %5661 = vmatpush.bf16.msrb.mxu0 %v8228_v60  ;;  %v8515_v60 = vld [vmem:[#allocation28 + $0x510] sm:$0xf] }
 0x679   :  { %v3102_v61 = vpop.f32.mrf.mxu0 }
 0x67c   :  { %v3115_v62 = vpop.f32.mrf.mxu1 }
 0x67f   :  { %v3089_v1 = vpop.f32.mrf.mxu3 }
 0x680   :  { %v3090_v26 = vadd.f32 %v3089_v1, %v1478_v25  ;;  %v9940_v1 = vld [vmem:[#allocation28 + $0x5e4] sm:$0xf0] }
 0x681   :  { %v3104_v4 = vpop.f32.mrf.mxu0 }
 0x682   :  { %v3128_v3 = vpop.f32.mrf.mxu2  ;;  %v3103_v10 = vadd.f32 %v3102_v61, %v3090_v26  ;;  %v8420_v61 = vor.u32 %v9892_v58, %v8419_v57  ;;  %v8395_v26 = vld [vmem:[#allocation28 + $0x420] sm:$0xf]  ;;  %v8323_v57 = vld [vmem:[#allocation28 + $0x390] sm:$0xf]  ;;  %v7940_v58 = vor.u32 %v9772_v45, %v7939_v44 }
 0x684   :  { %v3117_v5 = vpop.f32.mrf.mxu1  ;;  %v3116_v27 = vadd.f32 %v3115_v62, %v3103_v10  ;;  %v8611_v62 = vld [vmem:[#allocation28 + $0x5d0] sm:$0xf]  ;;  %5674 = vmatpush.bf16.msrb.mxu1 %v8420_v61  ;;  %v8587_v10 = vld [vmem:[#allocation28 + $0x5a0] sm:$0xf]  ;;  %v9916_v61 = vld [vmem:[#allocation28 + $0x524] sm:$0xf0] }
 0x685   :  { %v8612_v4 = vor.u32 %v9940_v1, %v8611_v62  ;;  %v9790_v5 = vld [vmem:[#allocation28 + $0x134] sm:$0xf0]  ;;  %v8588_v21 = vor.u32 %v9934_v15, %v8587_v10  ;;  %v8132_v62 = vor.u32 %v9820_v55, %v8131_v54  ;;  %v7915_v1 = vld [vmem:[#allocation28 + $0x60] sm:$0xf] }
 0x686   :  { %v11049_v30 = vadd.f32 %v3128_v3, %v3116_v27  ;;  %v8011_v3 = vld [vmem:[#allocation28 + $0x120] sm:$0xf]  ;;  %v9832_v27 = vld [vmem:[#allocation28 + $0x284] sm:$0xf0] }
 0x687   :  { %v3091_v19 = vpop.f32.mrf.mxu3  ;;  %v8012_v25 = vor.u32 %v9790_v5, %v8011_v3  ;;  %5687 = vmatpush.bf16.msrb.mxu2 %v8612_v4  ;;  %v8107_v3 = vld [vmem:[#allocation28 + $0x1e0] sm:$0xf] }
 0x688   :  { %v3195_v11 = vsel %vm404_vm0, %v11049_v30, 0.0  ;;  %v8203_v19 = vld [vmem:[#allocation28 + $0x2a0] sm:$0xf] }
 0x689   :  { %v3196_v13 = vadd.f32 %v3195_v11, %v3194_v12  ;;  %5649 = vmatpush.bf16.msra.mxu3 %v8012_v25  ;;  %v9874_v11 = vld [vmem:[#allocation28 + $0x3d4] sm:$0xf0]  ;;  %v8539_v12 = vld [vmem:[#allocation28 + $0x540] sm:$0xf] }
 0x68a   :  { %v3130_v6 = vpop.f32.mrf.mxu2  ;;  %v8299_v25 = vld [vmem:[#allocation28 + $0x360] sm:$0xf] }
 0x68b   :  { %v9838_v6 = vld [vmem:[#allocation28 + $0x2b4] sm:$0xf0]  ;;  %5688 = vmatpush.bf16.msrb.mxu2 %v8588_v21  ;;  %v8491_v10 = vld [vmem:[#allocation28 + $0x4e0] sm:$0xf] }
 0x68c   :  { %v8204_v8 = vor.u32 %v9838_v6, %v8203_v19 }
 0x68e   :  { %5662 = vmatpush.bf16.msrb.mxu0 %v8204_v8 }
 0x69c   :  { %v3154_v14 = vpop.f32.mrf.mxu0 }
 0x69e   :  { %v3167_v18 = vpop.f32.mrf.mxu1 }
 0x6a0   :  { %v3141_v48 = vpop.f32.mrf.mxu3 }
 0x6a1   :  { %v3142_v31 = vadd.f32 %v3141_v48, %v1479_v20  ;;  %v8371_v20 = vld [vmem:[#allocation28 + $0x3f0] sm:$0xf]  ;;  %v9928_v48 = vld [vmem:[#allocation28 + $0x584] sm:$0xf0] }
 0x6a3   :  { %v3155_v34 = vadd.f32 %v3154_v14, %v3142_v31  ;;  %v8396_v14 = vor.u32 %v9886_v9, %v8395_v26  ;;  %v8180_v31 = vor.u32 %v9832_v27, %v8179_v22 }
 0x6a4   :  { %v3156_v33 = vpop.f32.mrf.mxu0 }
 0x6a5   :  { %v3168_v38 = vadd.f32 %v3167_v18, %v3155_v34  ;;  %v9784_v18 = vld [vmem:[#allocation28 + $0x104] sm:$0xf0]  ;;  %5675 = vmatpush.bf16.msrb.mxu1 %v8396_v14  ;;  %v9778_v33 = vld [vmem:[#allocation28 + $0xd4] sm:$0xf0]  ;;  %v8564_v34 = vor.u32 %v9928_v48, %v8563_v40  ;;  %5663 = vmatpush.bf16.msrb.mxu0 %v8180_v31 }
 0x6a6   :  { %v3180_v32 = vpop.f32.mrf.mxu2  ;;  %v3169_v35 = vpop.f32.mrf.mxu1  ;;  %v7988_v28 = vor.u32 %v9784_v18, %v7987_v16  ;;  %v9910_v14 = vld [vmem:[#allocation28 + $0x4f4] sm:$0xf0]  ;;  %v8516_v18 = vor.u32 %v9916_v61, %v8515_v60 }
 0x6a7   :  { %v11055_v39 = vadd.f32 %v3180_v32, %v3168_v38  ;;  %v8372_v32 = vor.u32 %v9880_v29, %v8371_v20  ;;  %v9826_v35 = vld [vmem:[#allocation28 + $0x254] sm:$0xf0]  ;;  %5689 = vmatpush.bf16.msrb.mxu2 %v8564_v34  ;;  %v7891_v20 = vld [vmem:[#allocation28 + $0x30] sm:$0xf] }
 0x6a8   :  { %v3143_v59 = vpop.f32.mrf.mxu3  ;;  %5650 = vmatpush.bf16.msra.mxu3 %v7988_v28  ;;  %v9760_v28 = vld [vmem:[#allocation28 + $0x44] sm:$0xf0]  ;;  %v8083_v29 = vld [vmem:[#allocation28 + $0x1b0] sm:$0xf]  ;;  %v9850_v60 = vld [vmem:[#allocation28 + $0x314] sm:$0xf0] }
 0x6a9   :  { %v3197_v0 = vsel %vm404_vm0, %v11055_v39, 0.0  ;;  %v9922_v59 = vld [vmem:[#allocation28 + $0x554] sm:$0xf0]  ;;  %5676 = vmatpush.bf16.msrb.mxu1 %v8372_v32  ;;  %v8492_v32 = vor.u32 %v9910_v14, %v8491_v10  ;;  %v8467_v34 = vld [vmem:[#allocation28 + $0x4b0] sm:$0xf] }
 0x6aa   :  { %v3198_v42 = vadd.f32 %v3197_v0, %v3196_v13  ;;  %v8156_v0 = vor.u32 %v9826_v35, %v8155_v2  ;;  %v8540_v43 = vor.u32 %v9922_v59, %v8539_v12  ;;  %v9904_v35 = vld [vmem:[#allocation28 + $0x4c4] sm:$0xf0]  ;;  %v9379_v10 = vld [vmem:[#allocation28 + $0xbd0] sm:$0xf] }
 0x6ac   :  { %3199 = vadd.xlane.f32.xlu0 %v3198_v42  ;;  %v8348_v42 = vor.u32 %v9874_v11, %v8347_v23  ;;  %5664 = vmatpush.bf16.msrb.mxu0 %v8156_v0 }
 0x6ad   :  { %5690 = vmatpush.bf16.msrb.mxu2 %v8540_v43 }
 0x6ae   :  { %v3182_v41 = vpop.f32.mrf.mxu2  ;;  %5677 = vmatpush.bf16.msrb.mxu1 %v8348_v42  ;;  %v8468_v42 = vor.u32 %v9904_v35, %v8467_v34  ;;  %v10024_v35 = vld [vmem:[#allocation28 + $0x884] sm:$0xf0] }
 0x6af   :  { %v7964_v41 = vor.u32 %v9778_v33, %v7963_v17  ;;  %v9808_v17 = vld [vmem:[#allocation28 + $0x1c4] sm:$0xf0]  ;;  %v8275_v33 = vld [vmem:[#allocation28 + $0x330] sm:$0xf] }
 0x6b0   :  { %5665 = vmatpush.bf16.msrb.mxu0 %v8132_v62  ;;  %v8084_v59 = vor.u32 %v9808_v17, %v8083_v29 }
 0x6b1   :  { %5651 = vmatpush.bf16.msra.mxu3 %v7964_v41  ;;  %5691 = vmatpush.bf16.msrb.mxu2 %v8516_v18  ;;  %v9982_v18 = vld [vmem:[#allocation28 + $0x734] sm:$0xf0] }
 0x6b5   :  { %5652 = vmatpush.bf16.msra.mxu3 %v7940_v58  ;;  %5692 = vmatpush.bf16.msrb.mxu2 %v8492_v32  ;;  %v9802_v58 = vld [vmem:[#allocation28 + $0x194] sm:$0xf0] }
 0x6b9   :  { %5693 = vmatpush.bf16.msrb.mxu2 %v8468_v42  ;;  %v9970_v42 = vld [vmem:[#allocation28 + $0x6d4] sm:$0xf0] }
 0x71f   :  { %v3200_v38 = vpop.xlane.xlu0 %3199 }
 0x720   :  { %v3208_v13 = vmul.f32 %v11059_v49, %v3200_v38  ;;  %v7892_v38 = vor.u32 %v9760_v28, %v7891_v20  ;;  %v10030_v20 = vld [vmem:[#allocation28 + $0x8b4] sm:$0xf0]  ;;  %v9163_v28 = vld [vmem:[#allocation28 + $0xa20] sm:$0xf] }
 0x722   :  { %v11063_v47 = vsub.f32 %v11012_v50, %v3208_v13  ;;  %v11066_v51 = vsub.f32 %v11015_v63, %v3208_v13  ;;  %v11069_v52 = vsub.f32 %v11022_v24, %v3208_v13  ;;  %v11072_v53 = vsub.f32 %v11029_v36, %v3208_v13  ;;  %v9868_v36 = vld [vmem:[#allocation28 + $0x3a4] sm:$0xf0] }
 0x723   :  { %v11075_v56 = vsub.f32 %v11032_v46, %v3208_v13  ;;  %v9766_v46 = vld [vmem:[#allocation28 + $0x74] sm:$0xf0]  ;;  %v11084_v4 = vsub.f32 %v11045_v37, %v3208_v13  ;;  %v11091_v8 = vsub.f32 %v11049_v30, %v3208_v13  ;;  %v8324_v16 = vor.u32 %v9868_v36, %v8323_v57  ;;  %v7867_v57 = vld [vmem:[#allocation28] sm:$0xf] }
 0x724   :  { %v3217_v50 = vmul.f32 %v11063_v47, %v11063_v47  ;;  %v3218_v63 = vmul.f32 %v11066_v51, %v11066_v51  ;;  %v3219_v24 = vmul.f32 %v11069_v52, %v11069_v52  ;;  %v3220_v5 = vmul.f32 %v11072_v53, %v11072_v53  ;;  %v9862_v37 = vld [vmem:[#allocation28 + $0x374] sm:$0xf0]  ;;  %v8251_v36 = vld [vmem:[#allocation28 + $0x300] sm:$0xf] }
 0x725   :  { %v3221_v26 = vmul.f32 %v11075_v56, %v11075_v56  ;;  %v7916_v21 = vor.u32 %v9766_v46, %v7915_v1  ;;  %v11097_v22 = vsub.f32 %v11055_v39, %v3208_v13  ;;  %v8108_v30 = vor.u32 %v9814_v7, %v8107_v3  ;;  %5678 = vmatpush.bf16.msrb.mxu1 %v8324_v16  ;;  %v9856_v39 = vld [vmem:[#allocation28 + $0x344] sm:$0xf0]  ;;  %v8443_v1 = vld [vmem:[#allocation28 + $0x480] sm:$0xf]  ;;  %v9898_v46 = vld [vmem:[#allocation28 + $0x494] sm:$0xf0] }
 0x726   :  { %v3225_v19 = vsel %vm404_vm0, %v3217_v50, 0.0  ;;  %v3226_v6 = vsel %vm404_vm0, %v3218_v63, 0.0  ;;  %v3228_v15 = vsel %vm404_vm0, %v3219_v24, 0.0  ;;  %v3222_v40 = vmul.f32 %v11084_v4, %v11084_v4  ;;  %v9754_v50 = vld [vmem:[#allocation28 + $0x14] sm:$0xf0] }
 0x727   :  { %v3227_v9 = vadd.f32 %v3226_v6, %v3225_v19  ;;  %v3230_v48 = vsel %vm404_vm0, %v3220_v5, 0.0  ;;  %v8300_v31 = vor.u32 %v9862_v37, %v8299_v25  ;;  %v3223_v23 = vmul.f32 %v11091_v8, %v11091_v8  ;;  %5653 = vmatpush.bf16.msra.mxu3 %v7916_v21  ;;  %5666 = vmatpush.bf16.msrb.mxu0 %v8108_v30  ;;  %v8059_v63 = vld [vmem:[#allocation28 + $0x180] sm:$0xf]  ;;  %v8803_v3 = vld [vmem:[#allocation28 + $0x750] sm:$0xf] }
 0x728   :  { %v3232_v11 = vsel %vm404_vm0, %v3221_v26, 0.0  ;;  %v3224_v13 = vmul.f32 %v11097_v22, %v11097_v22  ;;  %v3234_v41 = vsel %vm404_vm0, %v3222_v40, 0.0  ;;  %v8276_v0 = vor.u32 %v9856_v39, %v8275_v33  ;;  %v9988_v19 = vld [vmem:[#allocation28 + $0x764] sm:$0xf0]  ;;  %v8995_v6 = vld [vmem:[#allocation28 + $0x8d0] sm:$0xf] }
 0x729   :  { %v3229_v27 = vadd.f32 %v3228_v15, %v3227_v9  ;;  %5679 = vmatpush.bf16.msrb.mxu1 %v8300_v31  ;;  %v3236_v44 = vsel %vm404_vm0, %v3223_v23, 0.0  ;;  %v7868_v24 = vor.u32 %v9754_v50, %v7867_v57  ;;  %v8060_v61 = vor.u32 %v9802_v58, %v8059_v63  ;;  %v10036_v7 = vld [vmem:[#allocation28 + $0x8e4] sm:$0xf0]  ;;  %v9187_v9 = vld [vmem:[#allocation28 + $0xa50] sm:$0xf] }
 0x72a   :  { %v3238_v54 = vsel %vm404_vm0, %v3224_v13, 0.0  ;;  %v8252_v62 = vor.u32 %v9850_v60, %v8251_v36  ;;  %v8444_v5 = vor.u32 %v9898_v46, %v8443_v1  ;;  %v8804_v25 = vor.u32 %v9988_v19, %v8803_v3  ;;  %v10084_v37 = vld [vmem:[#allocation28 + $0xa64] sm:$0xf0]  ;;  %v8779_v16 = vld [vmem:[#allocation28 + $0x720] sm:$0xf] }
 0x72b   :  { %v3231_v2 = vadd.f32 %v3230_v48, %v3229_v27  ;;  %5654 = vmatpush.bf16.msra.mxu3 %v7892_v38  ;;  %5667 = vmatpush.bf16.msrb.mxu0 %v8084_v59  ;;  %v8996_v26 = vor.u32 %v10036_v7, %v8995_v6  ;;  %v9188_v14 = vor.u32 %v10084_v37, %v9187_v9  ;;  %v10132_v15 = vld [vmem:[#allocation28 + $0xbe4] sm:$0xf0]  ;;  %v8971_v30 = vld [vmem:[#allocation28 + $0x8a0] sm:$0xf]  ;;  %v10078_v40 = vld [vmem:[#allocation28 + $0xa34] sm:$0xf0] }
 0x72c   :  { %5694 = vmatpush.bf16.msrb.mxu2 %v8444_v5  ;;  %v9380_v21 = vor.u32 %v10132_v15, %v9379_v10  ;;  %v8780_v27 = vor.u32 %v9982_v18, %v8779_v16  ;;  %v8972_v29 = vor.u32 %v10030_v20, %v8971_v30  ;;  %v9355_v48 = vld [vmem:[#allocation28 + $0xba0] sm:$0xf]  ;;  %v10126_v31 = vld [vmem:[#allocation28 + $0xbb4] sm:$0xf0]  ;;  %v9164_v32 = vor.u32 %v10078_v40, %v9163_v28  ;;  %v8755_v33 = vld [vmem:[#allocation28 + $0x6f0] sm:$0xf] }
 0x72d   :  { %v3233_v12 = vadd.f32 %v3232_v11, %v3231_v2  ;;  %5680 = vmatpush.bf16.msrb.mxu1 %v8276_v0  ;;  %v9356_v17 = vor.u32 %v10126_v31, %v9355_v48  ;;  %v9976_v2 = vld [vmem:[#allocation28 + $0x704] sm:$0xf0]  ;;  %v8947_v39 = vld [vmem:[#allocation28 + $0x870] sm:$0xf]  ;;  %v8731_v0 = vld [vmem:[#allocation28 + $0x6c0] sm:$0xf] }
 0x72e   :  { %v8756_v34 = vor.u32 %v9976_v2, %v8755_v33  ;;  %v9139_v23 = vld [vmem:[#allocation28 + $0x9f0] sm:$0xf]  ;;  %v10072_v11 = vld [vmem:[#allocation28 + $0xa04] sm:$0xf0]  ;;  %v8948_v38 = vor.u32 %v10024_v35, %v8947_v39  ;;  %v9307_v63 = vld [vmem:[#allocation28 + $0xb40] sm:$0xf] }
 0x72f   :  { %v3235_v43 = vadd.f32 %v3234_v41, %v3233_v12  ;;  %5655 = vmatpush.bf16.msra.mxu3 %v7868_v24  ;;  %5668 = vmatpush.bf16.msrb.mxu0 %v8060_v61  ;;  %v9140_v12 = vor.u32 %v10072_v11, %v9139_v23  ;;  %v9331_v59 = vld [vmem:[#allocation28 + $0xb70] sm:$0xf]  ;;  %v10120_v13 = vld [vmem:[#allocation28 + $0xb84] sm:$0xf0]  ;;  %v10114_v24 = vld [vmem:[#allocation28 + $0xb54] sm:$0xf0] }
 0x730   :  { %5739 = vmatpush.bf16.msra.mxu2 %v9380_v21  ;;  %v9332_v41 = vor.u32 %v10120_v13, %v9331_v59  ;;  %v9308_v58 = vor.u32 %v10114_v24, %v9307_v63  ;;  %v8707_v36 = vld [vmem:[#allocation28 + $0x690] sm:$0xf]  ;;  %v9964_v60 = vld [vmem:[#allocation28 + $0x6a4] sm:$0xf0]  ;;  %v9958_v9 = vld [vmem:[#allocation28 + $0x674] sm:$0xf0] }
 0x731   :  { %v3237_v45 = vadd.f32 %v3236_v44, %v3235_v43  ;;  %5681 = vmatpush.bf16.msrb.mxu1 %v8252_v62  ;;  %v8923_v43 = vld [vmem:[#allocation28 + $0x840] sm:$0xf]  ;;  %v8732_v44 = vor.u32 %v9970_v42, %v8731_v0  ;;  %v8899_v61 = vld [vmem:[#allocation28 + $0x810] sm:$0xf]  ;;  %v8708_v62 = vor.u32 %v9964_v60, %v8707_v36  ;;  %v10012_v1 = vld [vmem:[#allocation28 + $0x824] sm:$0xf0] }
 0x732   :  { %v9091_v46 = vld [vmem:[#allocation28 + $0x990] sm:$0xf]  ;;  %v10060_v3 = vld [vmem:[#allocation28 + $0x9a4] sm:$0xf0]  ;;  %v8900_v5 = vor.u32 %v10012_v1, %v8899_v61  ;;  %v8875_v37 = vld [vmem:[#allocation28 + $0x7e0] sm:$0xf] }
 0x733   :  { %v3239_v55 = vadd.f32 %v3238_v54, %v3237_v45  ;;  %5700 = vmatpush.bf16.msrb.mxu3 %v8804_v25  ;;  %5713 = vmatpush.bf16.msra.mxu0 %v8996_v26  ;;  %v10018_v45 = vld [vmem:[#allocation28 + $0x854] sm:$0xf0]  ;;  %v9115_v54 = vld [vmem:[#allocation28 + $0x9c0] sm:$0xf]  ;;  %v9092_v19 = vor.u32 %v10060_v3, %v9091_v46  ;;  %v9283_v6 = vld [vmem:[#allocation28 + $0xb10] sm:$0xf] }
 0x734   :  { %5740 = vmatpush.bf16.msra.mxu2 %v9356_v17  ;;  %v8924_v57 = vor.u32 %v10018_v45, %v8923_v43  ;;  %v10108_v7 = vld [vmem:[#allocation28 + $0xb24] sm:$0xf0]  ;;  %v8683_v26 = vld [vmem:[#allocation28 + $0x660] sm:$0xf]  ;;  %v10006_v10 = vld [vmem:[#allocation28 + $0x7f4] sm:$0xf0] }
 0x735   :  { %3240 = vadd.xlane.f32.xlu1 %v3239_v55  ;;  %5726 = vmatpush.bf16.msra.mxu1 %v9188_v14  ;;  %v10066_v55 = vld [vmem:[#allocation28 + $0x9d4] sm:$0xf0]  ;;  %v9284_v25 = vor.u32 %v10108_v7, %v9283_v6  ;;  %v9067_v14 = vld [vmem:[#allocation28 + $0x960] sm:$0xf]  ;;  %v8684_v16 = vor.u32 %v9958_v9, %v8683_v26  ;;  %v8876_v18 = vor.u32 %v10006_v10, %v8875_v37  ;;  %v8659_v30 = vld [vmem:[#allocation28 + $0x630] sm:$0xf] }
 0x736   :  { %v9116_v50 = vor.u32 %v10066_v55, %v9115_v54  ;;  %v10054_v15 = vld [vmem:[#allocation28 + $0x974] sm:$0xf0]  ;;  %v9259_v21 = vld [vmem:[#allocation28 + $0xae0] sm:$0xf]  ;;  %v9952_v28 = vld [vmem:[#allocation28 + $0x644] sm:$0xf0] }
 0x737   :  { %5701 = vmatpush.bf16.msrb.mxu3 %v8780_v27  ;;  %5714 = vmatpush.bf16.msra.mxu0 %v8972_v29  ;;  %v10102_v27 = vld [vmem:[#allocation28 + $0xaf4] sm:$0xf0]  ;;  %v9068_v20 = vor.u32 %v10054_v15, %v9067_v14  ;;  %v8851_v29 = vld [vmem:[#allocation28 + $0x7b0] sm:$0xf]  ;;  %v10000_v40 = vld [vmem:[#allocation28 + $0x7c4] sm:$0xf0]  ;;  %v8660_v2 = vor.u32 %v9952_v28, %v8659_v30 }
 0x738   :  { %5741 = vmatpush.bf16.msra.mxu2 %v9332_v41  ;;  %v9260_v48 = vor.u32 %v10102_v27, %v9259_v21  ;;  %v9043_v31 = vld [vmem:[#allocation28 + $0x930] sm:$0xf]  ;;  %v10096_v33 = vld [vmem:[#allocation28 + $0xac4] sm:$0xf0]  ;;  %v8852_v39 = vor.u32 %v10000_v40, %v8851_v29  ;;  %v9946_v23 = vld [vmem:[#allocation28 + $0x614] sm:$0xf0] }
 0x739   :  { %5727 = vmatpush.bf16.msra.mxu1 %v9164_v32  ;;  %v10048_v32 = vld [vmem:[#allocation28 + $0x944] sm:$0xf0]  ;;  %v9235_v17 = vld [vmem:[#allocation28 + $0xab0] sm:$0xf]  ;;  %v8827_v11 = vld [vmem:[#allocation28 + $0x780] sm:$0xf] }
 0x73a   :  { %v9044_v35 = vor.u32 %v10048_v32, %v9043_v31  ;;  %v9019_v59 = vld [vmem:[#allocation28 + $0x900] sm:$0xf]  ;;  %v10042_v13 = vld [vmem:[#allocation28 + $0x914] sm:$0xf0]  ;;  %v11111_v36 = vld [vmem:[#allocation25] sm:$0xff] }
 0x73b   :  { %5702 = vmatpush.bf16.msrb.mxu3 %v8756_v34  ;;  %5715 = vmatpush.bf16.msra.mxu0 %v8948_v38  ;;  %v8635_v34 = vld [vmem:[#allocation28 + $0x600] sm:$0xf]  ;;  %v9994_v38 = vld [vmem:[#allocation28 + $0x794] sm:$0xf0]  ;;  %v9020_v54 = vor.u32 %v10042_v13, %v9019_v59  ;;  %v3265_v46 = vperm.slane %v11111_v36, 1  ;;  %v3266_v3 = vperm.slane %v11111_v36, 2 }
 0x73c   :  { %5742 = vmatpush.bf16.msra.mxu2 %v9308_v58  ;;  %v9211_v41 = vld [vmem:[#allocation28 + $0xa80] sm:$0xf]  ;;  %v10090_v0 = vld [vmem:[#allocation28 + $0xa94] sm:$0xf0]  ;;  %v8636_v43 = vor.u32 %v9946_v23, %v8635_v34  ;;  %v9793_v14 = vld [vmem:[#allocation28 + $0x154] sm:$0xf] }
 0x73d   :  { %5728 = vmatpush.bf16.msra.mxu1 %v9140_v12  ;;  %v9236_v12 = vor.u32 %v10096_v33, %v9235_v17  ;;  %v9212_v55 = vor.u32 %v10090_v0, %v9211_v41  ;;  %v11113_v61 = vld [vmem:[#allocation26] sm:$0xff]  ;;  %v8037_v15 = vld [vmem:[#allocation28 + $0x168] sm:$0xf0]  ;;  %v9889_v28 = vld [vmem:[#allocation28 + $0x454] sm:$0xf]  ;;  %v3269_v41 = vperm.slane %v11111_v36, 5 }
 0x73e   :  { %v3290_v1 = vperm.slane %v11113_v61, 0  ;;  %v3291_v6 = vperm.slane %v11113_v61, 1  ;;  %v3292_v7 = vperm.slane %v11113_v61, 2  ;;  %v8421_v29 = vld [vmem:[#allocation28 + $0x468] sm:$0xf0]  ;;  %v8040_v17 = vor.u32 %v9793_v14, %v8037_v15 }
 0x73f   :  { %5703 = vmatpush.bf16.msrb.mxu3 %v8732_v44  ;;  %5716 = vmatpush.bf16.msra.mxu0 %v8924_v57  ;;  %v8828_v44 = vor.u32 %v9994_v38, %v8827_v11  ;;  %v9937_v32 = vld [vmem:[#allocation28 + $0x5d4] sm:$0xf]  ;;  %v8424_v33 = vor.u32 %v9889_v28, %v8421_v29  ;;  %v9787_v23 = vld [vmem:[#allocation28 + $0x124] sm:$0xf]  ;;  %v8013_v38 = vld [vmem:[#allocation28 + $0x138] sm:$0xf0] }
 0x740   :  { %5743 = vmatpush.bf16.msra.mxu2 %v9284_v25  ;;  %v3293_v25 = vperm.slane %v11113_v61, 3  ;;  %v8565_v14 = vld [vmem:[#allocation28 + $0x588] sm:$0xf0]  ;;  %v9823_v29 = vld [vmem:[#allocation28 + $0x244] sm:$0xf] }
 0x741   :  { %5729 = vmatpush.bf16.msra.mxu1 %v9116_v50 }
 0x743   :  { %5704 = vmatpush.bf16.msrb.mxu3 %v8708_v62  ;;  %5717 = vmatpush.bf16.msra.mxu0 %v8900_v5  ;;  %v3264_v62 = vperm.slane %v11111_v36, 0  ;;  %v3267_v5 = vperm.slane %v11111_v36, 3 }
 0x744   :  { %5744 = vmatpush.bf16.msra.mxu2 %v9260_v48 }
 0x745   :  { %5730 = vmatpush.bf16.msra.mxu1 %v9092_v19 }
 0x747   :  { %5705 = vmatpush.bf16.msrb.mxu3 %v8684_v16  ;;  %5718 = vmatpush.bf16.msra.mxu0 %v8876_v18  ;;  %v9841_v16 = vld [vmem:[#allocation28 + $0x2d4] sm:$0xf] }
 0x748   :  { %5745 = vmatpush.bf16.msra.mxu2 %v9236_v12  ;;  %v9835_v12 = vld [vmem:[#allocation28 + $0x2a4] sm:$0xf] }
 0x749   :  { %5731 = vmatpush.bf16.msra.mxu1 %v9068_v20  ;;  %v8229_v20 = vld [vmem:[#allocation28 + $0x2e8] sm:$0xf0] }
 0x74b   :  { %5706 = vmatpush.bf16.msrb.mxu3 %v8660_v2  ;;  %5719 = vmatpush.bf16.msra.mxu0 %v8852_v39 }
 0x74c   :  { %5746 = vmatpush.bf16.msra.mxu2 %v9212_v55  ;;  %v8397_v55 = vld [vmem:[#allocation28 + $0x438] sm:$0xf0] }
 0x74d   :  { %5732 = vmatpush.bf16.msra.mxu1 %v9044_v35 }
 0x74f   :  { %5707 = vmatpush.bf16.msrb.mxu3 %v8636_v43  ;;  %5720 = vmatpush.bf16.msra.mxu0 %v8828_v44 }
 0x751   :  { %5733 = vmatpush.bf16.msra.mxu1 %v9020_v54  ;;  %v9883_v54 = vld [vmem:[#allocation28 + $0x424] sm:$0xf] }
 0x7a8   :  { %v3241_v42 = vpop.xlane.xlu1 %3240 }
 0x7a9   :  { %v3242_v45 = vmul.f32 %v3241_v42, %v11059_v49 }
 0x7ab   :  { %v3243_v57 = vadd.f32 1e-05, %v3242_v45  ;;  %v8205_v45 = vld [vmem:[#allocation28 + $0x2b8] sm:$0xf0] }
 0x7ad   :  { %10187 = vrsqrt.f32 %v3243_v57  ;;  %vm3250_vm15 = vweird.f32 %v3243_v57 }
 0x7b3   :  { %v10188_v50 = vpop.eup %10187 }
 0x7b4   :  { %v3245_v63 = vmul.f32 %v10188_v50, %v3243_v57  ;;  %vm3251_vm14 = vweird.f32 %v10188_v50  ;;  %v9931_v57 = vld [vmem:[#allocation28 + $0x5a4] sm:$0xf] }
 0x7b5   :  { %vm3252_vm1 = vmor %vm3250_vm15, %vm3251_vm14 }
 0x7b6   :  { %v3246_v24 = vmul.f32 %v10188_v50, %v3245_v63 }
 0x7b8   :  { %v3247_v58 = vmul.f32 0.5, %v3246_v24  ;;  %v3271_v24 = vperm.slane %v11111_v36, 7 }
 0x7ba   :  { %v3248_v60 = vsub.f32 1.5, %v3247_v58  ;;  %v3294_v58 = vperm.slane %v11113_v61, 4 }
 0x7bc   :  { %v3249_v49 = vmul.f32 %v10188_v50, %v3248_v60  ;;  %v8016_v60 = vor.u32 %v9787_v23, %v8013_v38 }
 0x7be   :  { %v3253_v19 = vsel %vm3252_vm1, %v10188_v50, %v3249_v49  ;;  %v8589_v50 = vld [vmem:[#allocation28 + $0x5b8] sm:$0xf0]  ;;  %v8208_v49 = vor.u32 %v9835_v12, %v8205_v45  ;;  %v8517_v45 = vld [vmem:[#allocation28 + $0x528] sm:$0xf0] }
 0x7bf   :  { %v3254_v26 = vmul.f32 %v3253_v19, %v11063_v47  ;;  %v3255_v9 = vmul.f32 %v3253_v19, %v11066_v51  ;;  %v3256_v37 = vmul.f32 %v3253_v19, %v11069_v52  ;;  %v3257_v10 = vmul.f32 %v3253_v19, %v11072_v53  ;;  %v8613_v51 = vld [vmem:[#allocation28 + $0x5e8] sm:$0xf0] }
 0x7c0   :  { %v8232_v52 = vor.u32 %v9841_v16, %v8229_v20  ;;  %v3268_v53 = vperm.slane %v11111_v36, 4  ;;  %v8616_v11 = vor.u32 %v9937_v32, %v8613_v51  ;;  %v3258_v59 = vmul.f32 %v3253_v19, %v11075_v56  ;;  %v9919_v32 = vld [vmem:[#allocation28 + $0x544] sm:$0xf]  ;;  %v8541_v51 = vld [vmem:[#allocation28 + $0x558] sm:$0xf0] }
 0x7c1   :  { %v3280_v18 = vmul.f32 %v3264_v62, %v3254_v26  ;;  %v3281_v21 = vmul.f32 %v3265_v46, %v3255_v9  ;;  %v3282_v27 = vmul.f32 %v3266_v3, %v3256_v37  ;;  %v3283_v30 = vmul.f32 %v3267_v5, %v3257_v10  ;;  %v9829_v46 = vld [vmem:[#allocation28 + $0x274] sm:$0xf]  ;;  %v8181_v3 = vld [vmem:[#allocation28 + $0x288] sm:$0xf0] }
 0x7c2   :  { %v3259_v13 = vmul.f32 %v3253_v19, %v11084_v4  ;;  %v3260_v63 = vmul.f32 %v3253_v19, %v11091_v8  ;;  %v3270_v56 = vperm.slane %v11111_v36, 6  ;;  %v3261_v4 = vmul.f32 %v3253_v19, %v11097_v22  ;;  %v9781_v8 = vld [vmem:[#allocation28 + $0xf4] sm:$0xf]  ;;  %v7989_v36 = vld [vmem:[#allocation28 + $0x108] sm:$0xf0] }
 0x7c3   :  { %v3306_v40 = vadd.f32 %v3290_v1, %v3280_v18  ;;  %v3307_v48 = vadd.f32 %v3291_v6, %v3281_v21  ;;  %v3308_v31 = vadd.f32 %v3292_v7, %v3282_v27  ;;  %v3309_v47 = vadd.f32 %v3293_v25, %v3283_v30  ;;  %v9877_v6 = vld [vmem:[#allocation28 + $0x3f4] sm:$0xf]  ;;  %v8373_v7 = vld [vmem:[#allocation28 + $0x408] sm:$0xf0]  ;;  %v9775_v21 = vld [vmem:[#allocation28 + $0xc4] sm:$0xf] }
 0x7c4   :  { %v8400_v62 = vor.u32 %v9883_v54, %v8397_v55  ;;  %v3295_v1 = vperm.slane %v11113_v61, 5  ;;  %v8592_v22 = vor.u32 %v9931_v57, %v8589_v50  ;;  %v3284_v5 = vmul.f32 %v3268_v53, %v3258_v59  ;;  %v9925_v10 = vld [vmem:[#allocation28 + $0x574] sm:$0xf]  ;;  %v7965_v27 = vld [vmem:[#allocation28 + $0xd8] sm:$0xf0] }
 0x7c5   :  { %v3314_v2 = vmax.f32 %v3306_v40, 0.0  ;;  %v3315_v39 = vmax.f32 %v3307_v48, 0.0  ;;  %v3316_v34 = vmax.f32 %v3308_v31, 0.0  ;;  %v3317_v35 = vmax.f32 %v3309_v47, 0.0  ;;  %v8157_v40 = vld [vmem:[#allocation28 + $0x258] sm:$0xf0] }
 0x7c6   :  { %v3285_v19 = vmul.f32 %v3269_v41, %v3259_v13  ;;  %v3286_v25 = vmul.f32 %v3270_v56, %v3260_v63  ;;  %v3296_v26 = vperm.slane %v11113_v61, 6  ;;  %v3287_v9 = vmul.f32 %v3271_v24, %v3261_v4  ;;  %v9871_v48 = vld [vmem:[#allocation28 + $0x3c4] sm:$0xf]  ;;  %v9865_v59 = vld [vmem:[#allocation28 + $0x394] sm:$0xf] }
 0x7c7   :  { %v11131_v0 = vpack.c.bf16 %v3314_v2, %v3314_v2  ;;  %v11133_v42 = vpack.c.bf16 %v3315_v39, %v3315_v39  ;;  %v11135_v43 = vpack.c.bf16 %v3316_v34, %v3316_v34  ;;  %v11137_v44 = vpack.c.bf16 %v3317_v35, %v3317_v35  ;;  %v9817_v34 = vld [vmem:[#allocation28 + $0x214] sm:$0xf]  ;;  %v8133_v35 = vld [vmem:[#allocation28 + $0x228] sm:$0xf0]  ;;  %v9763_v56 = vld [vmem:[#allocation28 + $0x64] sm:$0xf] }
 0x7c8   :  { %v3297_v37 = vperm.slane %v11113_v61, 7  ;;  %v7992_v15 = vor.u32 %v9781_v8, %v7989_v36  ;;  %v8184_v16 = vor.u32 %v9829_v46, %v8181_v3  ;;  %v8376_v18 = vor.u32 %v9877_v6, %v8373_v7  ;;  %v8349_v61 = vld [vmem:[#allocation28 + $0x3d8] sm:$0xf0]  ;;  %v8325_v13 = vld [vmem:[#allocation28 + $0x3a8] sm:$0xf0] }
 0x7c9   :  { %5656 = vmatmul.bf16.vlgmr.msra.gmra.mxu3 %v11131_v0  ;;  %5669 = vmatmul.bf16.vlgmr.msrb.gmra.mxu0 %v11133_v42  ;;  %v3310_v30 = vadd.f32 %v3294_v58, %v3284_v5  ;;  %v3311_v20 = vadd.f32 %v3295_v1, %v3285_v19  ;;  %v8568_v28 = vor.u32 %v9925_v10, %v8565_v14  ;;  %v9913_v41 = vld [vmem:[#allocation28 + $0x514] sm:$0xf]  ;;  %v7917_v4 = vld [vmem:[#allocation28 + $0x78] sm:$0xf0]  ;;  %v9859_v8 = vld [vmem:[#allocation28 + $0x364] sm:$0xf] }
 0x7ca   :  { %5682 = vmatmul.bf16.vlgmr.msrb.gmra.mxu1 %v11135_v43  ;;  %5695 = vmatmul.bf16.vlgmr.msrb.gmra.mxu2 %v11137_v44  ;;  %v3312_v31 = vadd.f32 %v3296_v26, %v3286_v25  ;;  %v3313_v47 = vadd.f32 %v3297_v37, %v3287_v9  ;;  %v8160_v53 = vor.u32 %v9823_v29, %v8157_v40  ;;  %v8301_v1 = vld [vmem:[#allocation28 + $0x378] sm:$0xf0]  ;;  %v9757_v5 = vld [vmem:[#allocation28 + $0x34] sm:$0xf]  ;;  %v7893_v19 = vld [vmem:[#allocation28 + $0x48] sm:$0xf0] }
 0x7cb   :  { %5752 = vmatpush.bf16.msra.mxu3 %v8040_v17  ;;  %5765 = vmatpush.bf16.msrb.mxu0 %v8232_v52  ;;  %v9769_v17 = vld [vmem:[#allocation28 + $0x94] sm:$0xf]  ;;  %v7941_v52 = vld [vmem:[#allocation28 + $0xa8] sm:$0xf0]  ;;  %v3318_v2 = vmax.f32 %v3310_v30, 0.0  ;;  %v3319_v39 = vmax.f32 %v3311_v20, 0.0  ;;  %v8352_v23 = vor.u32 %v9871_v48, %v8349_v61  ;;  %v8136_v55 = vor.u32 %v9817_v34, %v8133_v35 }
 0x7cc   :  { %5778 = vmatpush.bf16.msrb.mxu1 %v8424_v33  ;;  %5791 = vmatpush.bf16.msrb.mxu2 %v8616_v11  ;;  %v7968_v33 = vor.u32 %v9775_v21, %v7965_v27  ;;  %v8544_v11 = vor.u32 %v9919_v32, %v8541_v51  ;;  %v3320_v38 = vmax.f32 %v3312_v31, 0.0  ;;  %v3321_v12 = vmax.f32 %v3313_v47, 0.0  ;;  %v8493_v36 = vld [vmem:[#allocation28 + $0x4f8] sm:$0xf0]  ;;  %v9805_v25 = vld [vmem:[#allocation28 + $0x1b4] sm:$0xf] }
 0x7cd   :  { %v7944_v54 = vor.u32 %v9769_v17, %v7941_v52  ;;  %v11151_v57 = vpack.c.bf16 %v3318_v2, %v3318_v2  ;;  %v11153_v50 = vpack.c.bf16 %v3319_v39, %v3319_v39  ;;  %v8328_v63 = vor.u32 %v9865_v59, %v8325_v13  ;;  %v8085_v26 = vld [vmem:[#allocation28 + $0x1c8] sm:$0xf0]  ;;  %v9853_v9 = vld [vmem:[#allocation28 + $0x334] sm:$0xf]  ;;  %v7869_v21 = vld [vmem:[#allocation28 + $0x18] sm:$0xf0] }
 0x7ce   :  { %v11155_v24 = vpack.c.bf16 %v3320_v38, %v3320_v38  ;;  %v11157_v58 = vpack.c.bf16 %v3321_v12, %v3321_v12  ;;  %v7920_v46 = vor.u32 %v9763_v56, %v7917_v4  ;;  %v8304_v6 = vor.u32 %v9859_v8, %v8301_v1  ;;  %v8277_v37 = vld [vmem:[#allocation28 + $0x348] sm:$0xf0]  ;;  %v9901_v10 = vld [vmem:[#allocation28 + $0x4b4] sm:$0xf]  ;;  %v9799_v27 = vld [vmem:[#allocation28 + $0x184] sm:$0xf] }
 0x7cf   :  { %5753 = vmatpush.bf16.msra.mxu3 %v8016_v60  ;;  %5766 = vmatpush.bf16.msrb.mxu0 %v8208_v49  ;;  %v8520_v60 = vor.u32 %v9913_v41, %v8517_v45  ;;  %v9811_v49 = vld [vmem:[#allocation28 + $0x1e4] sm:$0xf]  ;;  %v8469_v14 = vld [vmem:[#allocation28 + $0x4c8] sm:$0xf0]  ;;  %v8061_v30 = vld [vmem:[#allocation28 + $0x198] sm:$0xf0]  ;;  %v8280_v20 = vor.u32 %v9853_v9, %v8277_v37 }
 0x7d0   :  { %5779 = vmatpush.bf16.msrb.mxu1 %v8400_v62  ;;  %5792 = vmatpush.bf16.msrb.mxu2 %v8592_v22  ;;  %v8109_v62 = vld [vmem:[#allocation28 + $0x1f8] sm:$0xf0]  ;;  %v9907_v22 = vld [vmem:[#allocation28 + $0x4e4] sm:$0xf]  ;;  %v9985_v47 = vld [vmem:[#allocation28 + $0x754] sm:$0xf] }
 0x7d1   :  { %v8112_v3 = vor.u32 %v9811_v49, %v8109_v62  ;;  %v8496_v7 = vor.u32 %v9907_v22, %v8493_v36  ;;  %v9847_v29 = vld [vmem:[#allocation28 + $0x304] sm:$0xf]  ;;  %v8253_v40 = vld [vmem:[#allocation28 + $0x318] sm:$0xf0]  ;;  %v8805_v61 = vld [vmem:[#allocation28 + $0x768] sm:$0xf0] }
 0x7d2   :  { %v9895_v48 = vld [vmem:[#allocation28 + $0x484] sm:$0xf]  ;;  %v8445_v31 = vld [vmem:[#allocation28 + $0x498] sm:$0xf0]  ;;  %v10033_v32 = vld [vmem:[#allocation28 + $0x8d4] sm:$0xf]  ;;  %v8256_v34 = vor.u32 %v9847_v29, %v8253_v40 }
 0x7d3   :  { %5754 = vmatpush.bf16.msra.mxu3 %v7992_v15  ;;  %5767 = vmatpush.bf16.msrb.mxu0 %v8184_v16  ;;  %v9751_v15 = vld [vmem:[#allocation28 + $0x4] sm:$0xf]  ;;  %v7896_v16 = vor.u32 %v9757_v5, %v7893_v19  ;;  %v8997_v51 = vld [vmem:[#allocation28 + $0x8e8] sm:$0xf0]  ;;  %v10081_v17 = vld [vmem:[#allocation28 + $0xa54] sm:$0xf]  ;;  %v8448_v35 = vor.u32 %v9895_v48, %v8445_v31 }
 0x7d4   :  { %5780 = vmatpush.bf16.msrb.mxu1 %v8376_v18  ;;  %5793 = vmatpush.bf16.msrb.mxu2 %v8568_v28  ;;  %v8088_v18 = vor.u32 %v9805_v25, %v8085_v26  ;;  %v8472_v28 = vor.u32 %v9901_v10, %v8469_v14  ;;  %v7872_v52 = vor.u32 %v9751_v15, %v7869_v21  ;;  %v10129_v2 = vld [vmem:[#allocation28 + $0xbd4] sm:$0xf]  ;;  %v9381_v39 = vld [vmem:[#allocation28 + $0xbe8] sm:$0xf0]  ;;  %v9979_v38 = vld [vmem:[#allocation28 + $0x724] sm:$0xf] }
 0x7d5   :  { %v8781_v12 = vld [vmem:[#allocation28 + $0x738] sm:$0xf0]  ;;  %v9384_v13 = vor.u32 %v10129_v2, %v9381_v39  ;;  %v10027_v41 = vld [vmem:[#allocation28 + $0x8a4] sm:$0xf]  ;;  %v9973_v49 = vld [vmem:[#allocation28 + $0x6f4] sm:$0xf] }
 0x7d6   :  { %v8973_v45 = vld [vmem:[#allocation28 + $0x8b8] sm:$0xf0]  ;;  %v8784_v4 = vor.u32 %v9979_v38, %v8781_v12  ;;  %v8757_v62 = vld [vmem:[#allocation28 + $0x708] sm:$0xf0]  ;;  %v10021_v22 = vld [vmem:[#allocation28 + $0x874] sm:$0xf] }
 0x7d7   :  { %5755 = vmatpush.bf16.msra.mxu3 %v7968_v33  ;;  %5768 = vmatpush.bf16.msrb.mxu0 %v8160_v53  ;;  %v8064_v33 = vor.u32 %v9799_v27, %v8061_v30  ;;  %v9189_v53 = vld [vmem:[#allocation28 + $0xa68] sm:$0xf0]  ;;  %v9357_v56 = vld [vmem:[#allocation28 + $0xbb8] sm:$0xf0]  ;;  %v10117_v5 = vld [vmem:[#allocation28 + $0xb74] sm:$0xf] }
 0x7d8   :  { %5781 = vmatpush.bf16.msrb.mxu1 %v8352_v23  ;;  %5794 = vmatpush.bf16.msrb.mxu2 %v8544_v11  ;;  %v8808_v23 = vor.u32 %v9985_v47, %v8805_v61  ;;  %v9000_v11 = vor.u32 %v10033_v32, %v8997_v51  ;;  %v9192_v59 = vor.u32 %v10081_v17, %v9189_v53  ;;  %v8949_v36 = vld [vmem:[#allocation28 + $0x888] sm:$0xf0]  ;;  %v9967_v25 = vld [vmem:[#allocation28 + $0x6c4] sm:$0xf]  ;;  %v8733_v26 = vld [vmem:[#allocation28 + $0x6d8] sm:$0xf0] }
 0x7d9   :  { %5708 = vmatmul.bf16.vlgmr.msrb.gmra.mxu3 %v11151_v57  ;;  %5721 = vmatmul.bf16.vlgmr.msra.gmra.mxu0 %v11153_v50  ;;  %v9333_v19 = vld [vmem:[#allocation28 + $0xb88] sm:$0xf0]  ;;  %v10015_v10 = vld [vmem:[#allocation28 + $0x844] sm:$0xf]  ;;  %v8925_v14 = vld [vmem:[#allocation28 + $0x858] sm:$0xf0]  ;;  %v8736_v27 = vor.u32 %v9967_v25, %v8733_v26 }
 0x7da   :  { %5734 = vmatmul.bf16.vlgmr.msra.gmra.mxu1 %v11155_v24  ;;  %5747 = vmatmul.bf16.vlgmr.msra.gmra.mxu2 %v11157_v58  ;;  %v9336_v37 = vor.u32 %v10117_v5, %v9333_v19  ;;  %v10063_v15 = vld [vmem:[#allocation28 + $0x9c4] sm:$0xf]  ;;  %v9309_v21 = vld [vmem:[#allocation28 + $0xb58] sm:$0xf0]  ;;  %v8928_v30 = vor.u32 %v10015_v10, %v8925_v14  ;;  %v10009_v48 = vld [vmem:[#allocation28 + $0x814] sm:$0xf] }
 0x7db   :  { %5756 = vmatpush.bf16.msra.mxu3 %v7944_v54  ;;  %5769 = vmatpush.bf16.msrb.mxu0 %v8136_v55  ;;  %v10075_v54 = vld [vmem:[#allocation28 + $0xa24] sm:$0xf]  ;;  %v9165_v55 = vld [vmem:[#allocation28 + $0xa38] sm:$0xf0]  ;;  %v8901_v31 = vld [vmem:[#allocation28 + $0x828] sm:$0xf0] }
 0x7dc   :  { %5782 = vmatpush.bf16.msrb.mxu1 %v8328_v63  ;;  %5795 = vmatpush.bf16.msrb.mxu2 %v8520_v60  ;;  %v10123_v63 = vld [vmem:[#allocation28 + $0xba4] sm:$0xf]  ;;  %v8976_v60 = vor.u32 %v10027_v41, %v8973_v45  ;;  %v9168_v8 = vor.u32 %v10075_v54, %v9165_v55  ;;  %v10057_v47 = vld [vmem:[#allocation28 + $0x994] sm:$0xf]  ;;  %v9093_v61 = vld [vmem:[#allocation28 + $0x9a8] sm:$0xf0] }
 0x7dd   :  { %v9360_v1 = vor.u32 %v10123_v63, %v9357_v56  ;;  %v10105_v32 = vld [vmem:[#allocation28 + $0xb14] sm:$0xf]  ;;  %v9285_v51 = vld [vmem:[#allocation28 + $0xb28] sm:$0xf0]  ;;  %v8685_v53 = vld [vmem:[#allocation28 + $0x678] sm:$0xf0]  ;;  %v9096_v2 = vor.u32 %v10057_v47, %v9093_v61 }
 0x7de   :  { %v9288_v39 = vor.u32 %v10105_v32, %v9285_v51  ;;  %v10099_v38 = vld [vmem:[#allocation28 + $0xae4] sm:$0xf]  ;;  %v9261_v12 = vld [vmem:[#allocation28 + $0xaf8] sm:$0xf0]  ;;  %v9949_v41 = vld [vmem:[#allocation28 + $0x634] sm:$0xf] }
 0x7df   :  { %5757 = vmatpush.bf16.msra.mxu3 %v7920_v46  ;;  %5770 = vmatpush.bf16.msrb.mxu0 %v8112_v3  ;;  %v10069_v46 = vld [vmem:[#allocation28 + $0x9f4] sm:$0xf]  ;;  %v9141_v3 = vld [vmem:[#allocation28 + $0xa08] sm:$0xf0]  ;;  %v9264_v55 = vor.u32 %v10099_v38, %v9261_v12  ;;  %v10087_v25 = vld [vmem:[#allocation28 + $0xa84] sm:$0xf] }
 0x7e0   :  { %5783 = vmatpush.bf16.msrb.mxu1 %v8304_v6  ;;  %5796 = vmatpush.bf16.msrb.mxu2 %v8496_v7  ;;  %v8760_v6 = vor.u32 %v9973_v49, %v8757_v62  ;;  %v8952_v7 = vor.u32 %v10021_v22, %v8949_v36  ;;  %v9144_v9 = vor.u32 %v10069_v46, %v9141_v3  ;;  %v8661_v45 = vld [vmem:[#allocation28 + $0x648] sm:$0xf0]  ;;  %v9997_v63 = vld [vmem:[#allocation28 + $0x7b4] sm:$0xf]  ;;  %v8637_v36 = vld [vmem:[#allocation28 + $0x618] sm:$0xf0] }
 0x7e1   :  { %v8853_v56 = vld [vmem:[#allocation28 + $0x7c8] sm:$0xf0]  ;;  %v10093_v49 = vld [vmem:[#allocation28 + $0xab4] sm:$0xf]  ;;  %v9991_v46 = vld [vmem:[#allocation28 + $0x784] sm:$0xf] }
 0x7e2   :  { %v9237_v62 = vld [vmem:[#allocation28 + $0xac8] sm:$0xf0]  ;;  %v8856_v22 = vor.u32 %v9997_v63, %v8853_v56  ;;  %v8829_v3 = vld [vmem:[#allocation28 + $0x798] sm:$0xf0]  ;;  %v8235_v10 = vld [vmem:[#allocation28 + $0x2d8] sm:$0xf] }
 0x7e3   :  { %5758 = vmatpush.bf16.msra.mxu3 %v7896_v16  ;;  %5771 = vmatpush.bf16.msrb.mxu0 %v8088_v18  ;;  %v9117_v16 = vld [vmem:[#allocation28 + $0x9d8] sm:$0xf0]  ;;  %v10111_v18 = vld [vmem:[#allocation28 + $0xb44] sm:$0xf]  ;;  %v9240_v19 = vor.u32 %v10093_v49, %v9237_v62  ;;  %v9845_v14 = vld [vmem:[#allocation28 + $0x2ec] sm:$0xf0] }
 0x7e4   :  { %5784 = vmatpush.bf16.msrb.mxu1 %v8280_v20  ;;  %5797 = vmatpush.bf16.msrb.mxu2 %v8472_v28  ;;  %v9961_v20 = vld [vmem:[#allocation28 + $0x694] sm:$0xf]  ;;  %v8709_v28 = vld [vmem:[#allocation28 + $0x6a8] sm:$0xf0]  ;;  %v9120_v29 = vor.u32 %v10063_v15, %v9117_v16  ;;  %v9312_v40 = vor.u32 %v10111_v18, %v9309_v21  ;;  %v9213_v26 = vld [vmem:[#allocation28 + $0xa98] sm:$0xf0]  ;;  %v8832_v18 = vor.u32 %v9991_v46, %v8829_v3 }
 0x7e5   :  { %v8712_v17 = vor.u32 %v9961_v20, %v8709_v28  ;;  %v8427_v15 = vld [vmem:[#allocation28 + $0x458] sm:$0xf]  ;;  %v9893_v21 = vld [vmem:[#allocation28 + $0x46c] sm:$0xf0]  ;;  %v9216_v28 = vor.u32 %v10087_v25, %v9213_v26  ;;  %v8211_v32 = vld [vmem:[#allocation28 + $0x2a8] sm:$0xf] }
 0x7e6   :  { %v8428_v47 = vor.u32 %v9893_v21, %v8427_v15  ;;  %v9839_v51 = vld [vmem:[#allocation28 + $0x2bc] sm:$0xf0]  ;;  %v8187_v38 = vld [vmem:[#allocation28 + $0x278] sm:$0xf]  ;;  %v9833_v12 = vld [vmem:[#allocation28 + $0x28c] sm:$0xf0] }
 0x7e7   :  { %5759 = vmatpush.bf16.msra.mxu3 %v7872_v52  ;;  %5772 = vmatpush.bf16.msrb.mxu0 %v8064_v33  ;;  %v8904_v52 = vor.u32 %v10009_v48, %v8901_v31  ;;  %v9955_v33 = vld [vmem:[#allocation28 + $0x664] sm:$0xf]  ;;  %v8019_v48 = vld [vmem:[#allocation28 + $0x128] sm:$0xf]  ;;  %v9791_v31 = vld [vmem:[#allocation28 + $0x13c] sm:$0xf0] }
 0x7e8   :  { %5785 = vmatpush.bf16.msrb.mxu1 %v8256_v34  ;;  %5798 = vmatpush.bf16.msrb.mxu2 %v8448_v35  ;;  %v10003_v34 = vld [vmem:[#allocation28 + $0x7e4] sm:$0xf]  ;;  %v8877_v35 = vld [vmem:[#allocation28 + $0x7f8] sm:$0xf0]  ;;  %v7971_v63 = vld [vmem:[#allocation28 + $0xc8] sm:$0xf] }
 0x7e9   :  { %v9779_v56 = vld [vmem:[#allocation28 + $0xdc] sm:$0xf0]  ;;  %v8163_v49 = vld [vmem:[#allocation28 + $0x248] sm:$0xf]  ;;  %v8139_v25 = vld [vmem:[#allocation28 + $0x218] sm:$0xf] }
 0x7ea   :  { %5760 = vmatmul.bf16.vlgmr.msra.gmra.mxu3 %v11131_v0  ;;  %5773 = vmatmul.bf16.vlgmr.msrb.gmra.mxu0 %v11133_v42  ;;  %v9827_v62 = vld [vmem:[#allocation28 + $0x25c] sm:$0xf0]  ;;  %v7972_v46 = vor.u32 %v9779_v56, %v7971_v63  ;;  %v9821_v26 = vld [vmem:[#allocation28 + $0x22c] sm:$0xf0]  ;;  %v8451_v63 = vld [vmem:[#allocation28 + $0x488] sm:$0xf] }
 0x7eb   :  { %5804 = vmatpush.bf16.msrb.mxu3 %v8808_v23  ;;  %5817 = vmatpush.bf16.msra.mxu0 %v9000_v11  ;;  %v10051_v23 = vld [vmem:[#allocation28 + $0x964] sm:$0xf]  ;;  %v9069_v11 = vld [vmem:[#allocation28 + $0x978] sm:$0xf0]  ;;  %v8164_v3 = vor.u32 %v9827_v62, %v8163_v49  ;;  %v9767_v21 = vld [vmem:[#allocation28 + $0x7c] sm:$0xf0] }
 0x7ec   :  { %5830 = vmatpush.bf16.msra.mxu1 %v9192_v59  ;;  %5843 = vmatpush.bf16.msra.mxu2 %v9384_v13  ;;  %v8688_v59 = vor.u32 %v9955_v33, %v8685_v53  ;;  %v8880_v13 = vor.u32 %v10003_v34, %v8877_v35  ;;  %v9072_v54 = vor.u32 %v10051_v23, %v9069_v11  ;;  %v8595_v33 = vld [vmem:[#allocation28 + $0x5a8] sm:$0xf]  ;;  %v9935_v53 = vld [vmem:[#allocation28 + $0x5bc] sm:$0xf0]  ;;  %v7995_v34 = vld [vmem:[#allocation28 + $0xf8] sm:$0xf] }
 0x7ed   :  { %5786 = vmatmul.bf16.vlgmr.msrb.gmra.mxu1 %v11135_v43  ;;  %5799 = vmatmul.bf16.vlgmr.msrb.gmra.mxu2 %v11137_v44  ;;  %v9785_v35 = vld [vmem:[#allocation28 + $0x10c] sm:$0xf0]  ;;  %v8596_v11 = vor.u32 %v9935_v53, %v8595_v33  ;;  %v8091_v33 = vld [vmem:[#allocation28 + $0x1b8] sm:$0xf]  ;;  %v9899_v56 = vld [vmem:[#allocation28 + $0x49c] sm:$0xf0] }
 0x7ee   :  { %v9809_v53 = vld [vmem:[#allocation28 + $0x1cc] sm:$0xf0]  ;;  %v9003_v49 = vld [vmem:[#allocation28 + $0x8d8] sm:$0xf] }
 0x7ef   :  { %5805 = vmatpush.bf16.msrb.mxu3 %v8784_v4  ;;  %5818 = vmatpush.bf16.msra.mxu0 %v8976_v60  ;;  %v10045_v4 = vld [vmem:[#allocation28 + $0x934] sm:$0xf]  ;;  %v9045_v60 = vld [vmem:[#allocation28 + $0x948] sm:$0xf0]  ;;  %v10037_v62 = vld [vmem:[#allocation28 + $0x8ec] sm:$0xf0] }
 0x7f0   :  { %5831 = vmatpush.bf16.msra.mxu1 %v9168_v8  ;;  %5844 = vmatpush.bf16.msra.mxu2 %v9360_v1  ;;  %v9943_v8 = vld [vmem:[#allocation28 + $0x604] sm:$0xf]  ;;  %v8664_v1 = vor.u32 %v9949_v41, %v8661_v45  ;;  %v9048_v5 = vor.u32 %v10045_v4, %v9045_v60  ;;  %v8571_v41 = vld [vmem:[#allocation28 + $0x578] sm:$0xf]  ;;  %v9929_v45 = vld [vmem:[#allocation28 + $0x58c] sm:$0xf0] }
 0x7f1   :  { %v8640_v16 = vor.u32 %v9943_v8, %v8637_v36  ;;  %v8572_v60 = vor.u32 %v9929_v45, %v8571_v41  ;;  %v8355_v8 = vld [vmem:[#allocation28 + $0x3c8] sm:$0xf]  ;;  %v9923_v36 = vld [vmem:[#allocation28 + $0x55c] sm:$0xf0] }
 0x7f3   :  { %5806 = vmatpush.bf16.msrb.mxu3 %v8760_v6  ;;  %5819 = vmatpush.bf16.msra.mxu0 %v8952_v7  ;;  %v10039_v6 = vld [vmem:[#allocation28 + $0x904] sm:$0xf]  ;;  %v9021_v7 = vld [vmem:[#allocation28 + $0x918] sm:$0xf0] }
 0x7f4   :  { %5832 = vmatpush.bf16.msra.mxu1 %v9144_v9  ;;  %5845 = vmatpush.bf16.msra.mxu2 %v9336_v37  ;;  %v8043_v9 = vld [vmem:[#allocation28 + $0x158] sm:$0xf]  ;;  %v9797_v37 = vld [vmem:[#allocation28 + $0x16c] sm:$0xf0]  ;;  %v9024_v20 = vor.u32 %v10039_v6, %v9021_v7 }
 0x7f7   :  { %5807 = vmatpush.bf16.msrb.mxu3 %v8736_v27  ;;  %5820 = vmatpush.bf16.msra.mxu0 %v8928_v30  ;;  %v8619_v27 = vld [vmem:[#allocation28 + $0x5d8] sm:$0xf]  ;;  %v9941_v30 = vld [vmem:[#allocation28 + $0x5ec] sm:$0xf0] }
 0x7f8   :  { %5833 = vmatpush.bf16.msra.mxu1 %v9120_v29  ;;  %5846 = vmatpush.bf16.msra.mxu2 %v9312_v40  ;;  %v8044_v29 = vor.u32 %v9797_v37, %v8043_v9  ;;  %v8236_v40 = vor.u32 %v9845_v14, %v8235_v10  ;;  %v8620_v61 = vor.u32 %v9941_v30, %v8619_v27  ;;  %v8331_v9 = vld [vmem:[#allocation28 + $0x398] sm:$0xf]  ;;  %v9869_v37 = vld [vmem:[#allocation28 + $0x3ac] sm:$0xf0] }
 0x7f9   :  { %v8523_v10 = vld [vmem:[#allocation28 + $0x518] sm:$0xf]  ;;  %v9917_v14 = vld [vmem:[#allocation28 + $0x52c] sm:$0xf0]  ;;  %v8332_v27 = vor.u32 %v9869_v37, %v8331_v9 }
 0x7fa   :  { %v8524_v30 = vor.u32 %v9917_v14, %v8523_v10  ;;  %v8979_v10 = vld [vmem:[#allocation28 + $0x8a8] sm:$0xf]  ;;  %v10031_v14 = vld [vmem:[#allocation28 + $0x8bc] sm:$0xf0] }
 0x7fb   :  { %5808 = vmatpush.bf16.msrb.mxu3 %v8712_v17  ;;  %5821 = vmatpush.bf16.msra.mxu0 %v8904_v52  ;;  %v8403_v17 = vld [vmem:[#allocation28 + $0x428] sm:$0xf]  ;;  %v9887_v52 = vld [vmem:[#allocation28 + $0x43c] sm:$0xf0] }
 0x7fc   :  { %5834 = vmatpush.bf16.msra.mxu1 %v9096_v2  ;;  %5847 = vmatpush.bf16.msra.mxu2 %v9288_v39  ;;  %v8020_v2 = vor.u32 %v9791_v31, %v8019_v48  ;;  %v8212_v39 = vor.u32 %v9839_v51, %v8211_v32  ;;  %v8404_v23 = vor.u32 %v9887_v52, %v8403_v17  ;;  %v8499_v48 = vld [vmem:[#allocation28 + $0x4e8] sm:$0xf]  ;;  %v9911_v31 = vld [vmem:[#allocation28 + $0x4fc] sm:$0xf0]  ;;  %v7899_v32 = vld [vmem:[#allocation28 + $0x38] sm:$0xf] }
 0x7fd   :  { %v9761_v51 = vld [vmem:[#allocation28 + $0x4c] sm:$0xf0]  ;;  %v8500_v52 = vor.u32 %v9911_v31, %v8499_v48  ;;  %v8955_v48 = vld [vmem:[#allocation28 + $0x878] sm:$0xf] }
 0x7fe   :  { %v10025_v31 = vld [vmem:[#allocation28 + $0x88c] sm:$0xf0] }
 0x7ff   :  { %5809 = vmatpush.bf16.msrb.mxu3 %v8688_v59  ;;  %5822 = vmatpush.bf16.msra.mxu0 %v8880_v13  ;;  %v8379_v59 = vld [vmem:[#allocation28 + $0x3f8] sm:$0xf]  ;;  %v9881_v13 = vld [vmem:[#allocation28 + $0x40c] sm:$0xf0] }
 0x800   :  { %5835 = vmatpush.bf16.msra.mxu1 %v9072_v54  ;;  %5848 = vmatpush.bf16.msra.mxu2 %v9264_v55  ;;  %v7996_v54 = vor.u32 %v9785_v35, %v7995_v34  ;;  %v8188_v55 = vor.u32 %v9833_v12, %v8187_v38  ;;  %v8380_v4 = vor.u32 %v9881_v13, %v8379_v59  ;;  %v8475_v34 = vld [vmem:[#allocation28 + $0x4b8] sm:$0xf]  ;;  %v9905_v35 = vld [vmem:[#allocation28 + $0x4cc] sm:$0xf0]  ;;  %v9755_v12 = vld [vmem:[#allocation28 + $0x1c] sm:$0xf0] }
 0x801   :  { %v8092_v38 = vor.u32 %v9809_v53, %v8091_v33  ;;  %v8067_v59 = vld [vmem:[#allocation28 + $0x188] sm:$0xf]  ;;  %v9803_v13 = vld [vmem:[#allocation28 + $0x19c] sm:$0xf0]  ;;  %v8476_v45 = vor.u32 %v9905_v35, %v8475_v34 }
 0x802   :  { %v8739_v33 = vld [vmem:[#allocation28 + $0x6c8] sm:$0xf]  ;;  %v9971_v53 = vld [vmem:[#allocation28 + $0x6dc] sm:$0xf0] }
 0x803   :  { %5810 = vmatpush.bf16.msrb.mxu3 %v8664_v1  ;;  %5823 = vmatpush.bf16.msra.mxu0 %v8856_v22  ;;  %v9875_v1 = vld [vmem:[#allocation28 + $0x3dc] sm:$0xf0]  ;;  %v8547_v22 = vld [vmem:[#allocation28 + $0x548] sm:$0xf] }
 0x804   :  { %5836 = vmatpush.bf16.msra.mxu1 %v9048_v5  ;;  %5849 = vmatpush.bf16.msra.mxu2 %v9240_v19  ;;  %v7947_v5 = vld [vmem:[#allocation28 + $0x98] sm:$0xf]  ;;  %v9773_v19 = vld [vmem:[#allocation28 + $0xac] sm:$0xf0]  ;;  %v8356_v6 = vor.u32 %v9875_v1, %v8355_v8  ;;  %v8548_v7 = vor.u32 %v9923_v36, %v8547_v22  ;;  %v8068_v22 = vor.u32 %v9803_v13, %v8067_v59  ;;  %v8931_v34 = vld [vmem:[#allocation28 + $0x848] sm:$0xf] }
 0x805   :  { %v7948_v15 = vor.u32 %v9773_v19, %v7947_v5  ;;  %v9195_v8 = vld [vmem:[#allocation28 + $0xa58] sm:$0xf]  ;;  %v10085_v36 = vld [vmem:[#allocation28 + $0xa6c] sm:$0xf0]  ;;  %v8452_v19 = vor.u32 %v9899_v56, %v8451_v63  ;;  %v10019_v35 = vld [vmem:[#allocation28 + $0x85c] sm:$0xf0]  ;;  %v8740_v59 = vor.u32 %v9971_v53, %v8739_v33 }
 0x806   :  { %v9196_v9 = vor.u32 %v10085_v36, %v9195_v8  ;;  %v8932_v13 = vor.u32 %v10019_v35, %v8931_v34  ;;  %v8907_v63 = vld [vmem:[#allocation28 + $0x818] sm:$0xf]  ;;  %v10013_v56 = vld [vmem:[#allocation28 + $0x82c] sm:$0xf0]  ;;  %v9959_v36 = vld [vmem:[#allocation28 + $0x67c] sm:$0xf0] }
 0x807   :  { %5811 = vmatpush.bf16.msrb.mxu3 %v8640_v16  ;;  %5824 = vmatpush.bf16.msra.mxu0 %v8832_v18  ;;  %v8140_v16 = vor.u32 %v9821_v26, %v8139_v25  ;;  %v7923_v18 = vld [vmem:[#allocation28 + $0x68] sm:$0xf]  ;;  %v9983_v26 = vld [vmem:[#allocation28 + $0x73c] sm:$0xf0]  ;;  %v9842_v34 = vld [vmem:[#allocation28 + $0x2dc] sm:$0xf] }
 0x808   :  { %5837 = vmatpush.bf16.msra.mxu1 %v9024_v20  ;;  %5850 = vmatpush.bf16.msra.mxu2 %v9216_v28  ;;  %v8115_v20 = vld [vmem:[#allocation28 + $0x1e8] sm:$0xf]  ;;  %v9815_v28 = vld [vmem:[#allocation28 + $0x1fc] sm:$0xf0]  ;;  %v8237_v35 = vld [vmem:[#allocation28 + $0x2f0] sm:$0xf0] }
 0x809   :  { %v8787_v25 = vld [vmem:[#allocation28 + $0x728] sm:$0xf]  ;;  %v10091_v53 = vld [vmem:[#allocation28 + $0xa9c] sm:$0xf0] }
 0x80a   :  { %5812 = vmatmul.bf16.vlgmr.msrb.gmra.mxu3 %v11151_v57  ;;  %5825 = vmatmul.bf16.vlgmr.msra.gmra.mxu0 %v11153_v50  ;;  %v9219_v33 = vld [vmem:[#allocation28 + $0xa88] sm:$0xf] }
 0x80b   :  { %5856 = vmatpush.bf16.msra.mxu3 %v8044_v29  ;;  %5869 = vmatpush.bf16.msrb.mxu0 %v8236_v40  ;;  %v8307_v29 = vld [vmem:[#allocation28 + $0x368] sm:$0xf]  ;;  %v9863_v40 = vld [vmem:[#allocation28 + $0x37c] sm:$0xf0] }
 0x80c   :  { %5882 = vmatpush.bf16.msrb.mxu1 %v8428_v47  ;;  %5895 = vmatpush.bf16.msrb.mxu2 %v8620_v61  ;;  %v7924_v47 = vor.u32 %v9767_v21, %v7923_v18  ;;  %v8116_v61 = vor.u32 %v9815_v28, %v8115_v20  ;;  %v8308_v17 = vor.u32 %v9863_v40, %v8307_v29  ;;  %v9363_v18 = vld [vmem:[#allocation28 + $0xba8] sm:$0xf]  ;;  %v10127_v21 = vld [vmem:[#allocation28 + $0xbbc] sm:$0xf0]  ;;  %v8763_v20 = vld [vmem:[#allocation28 + $0x6f8] sm:$0xf] }
 0x80d   :  { %5838 = vmatmul.bf16.vlgmr.msra.gmra.mxu1 %v11155_v24  ;;  %5851 = vmatmul.bf16.vlgmr.msra.gmra.mxu2 %v11157_v58  ;;  %v9977_v28 = vld [vmem:[#allocation28 + $0x70c] sm:$0xf0]  ;;  %v9364_v40 = vor.u32 %v10127_v21, %v9363_v18  ;;  %v8859_v18 = vld [vmem:[#allocation28 + $0x7b8] sm:$0xf] }
 0x80e   :  { %v10001_v21 = vld [vmem:[#allocation28 + $0x7cc] sm:$0xf0] }
 0x80f   :  { %5857 = vmatpush.bf16.msra.mxu3 %v8020_v2  ;;  %5870 = vmatpush.bf16.msrb.mxu0 %v8212_v39  ;;  %v8283_v2 = vld [vmem:[#allocation28 + $0x338] sm:$0xf]  ;;  %v9857_v39 = vld [vmem:[#allocation28 + $0x34c] sm:$0xf0] }
 0x810   :  { %5883 = vmatpush.bf16.msrb.mxu1 %v8404_v23  ;;  %5896 = vmatpush.bf16.msrb.mxu2 %v8596_v11  ;;  %v7875_v23 = vld [vmem:[#allocation28 + $0x8] sm:$0xf]  ;;  %v7900_v11 = vor.u32 %v9761_v51, %v7899_v32  ;;  %v8284_v41 = vor.u32 %v9857_v39, %v8283_v2  ;;  %v9339_v32 = vld [vmem:[#allocation28 + $0xb78] sm:$0xf]  ;;  %v10121_v51 = vld [vmem:[#allocation28 + $0xb8c] sm:$0xf0] }
 0x811   :  { %v7876_v1 = vor.u32 %v9755_v12, %v7875_v23  ;;  %v9340_v39 = vor.u32 %v10121_v51, %v9339_v32  ;;  %v9123_v23 = vld [vmem:[#allocation28 + $0x9c8] sm:$0xf]  ;;  %v10115_v12 = vld [vmem:[#allocation28 + $0xb5c] sm:$0xf0] }
 0x813   :  { %5858 = vmatpush.bf16.msra.mxu3 %v7996_v54  ;;  %5871 = vmatpush.bf16.msrb.mxu0 %v8188_v55  ;;  %v8259_v54 = vld [vmem:[#allocation28 + $0x308] sm:$0xf]  ;;  %v9851_v55 = vld [vmem:[#allocation28 + $0x31c] sm:$0xf0] }
 0x814   :  { %5884 = vmatpush.bf16.msrb.mxu1 %v8380_v4  ;;  %5897 = vmatpush.bf16.msrb.mxu2 %v8572_v60  ;;  %v8811_v4 = vld [vmem:[#allocation28 + $0x758] sm:$0xf]  ;;  %v9989_v60 = vld [vmem:[#allocation28 + $0x76c] sm:$0xf0]  ;;  %v8260_v5 = vor.u32 %v9851_v55, %v8259_v54 }
 0x817   :  { %5859 = vmatpush.bf16.msra.mxu3 %v7972_v46  ;;  %5872 = vmatpush.bf16.msrb.mxu0 %v8164_v3  ;;  %v9387_v46 = vld [vmem:[#allocation28 + $0xbd8] sm:$0xf]  ;;  %v10133_v3 = vld [vmem:[#allocation28 + $0xbec] sm:$0xf0] }
 0x818   :  { %5885 = vmatpush.bf16.msrb.mxu1 %v8356_v6  ;;  %5898 = vmatpush.bf16.msrb.mxu2 %v8548_v7  ;;  %v8812_v6 = vor.u32 %v9989_v60, %v8811_v4  ;;  %v9004_v7 = vor.u32 %v10037_v62, %v9003_v49  ;;  %v9388_v37 = vor.u32 %v10133_v3, %v9387_v46  ;;  %v9099_v4 = vld [vmem:[#allocation28 + $0x998] sm:$0xf]  ;;  %v10061_v60 = vld [vmem:[#allocation28 + $0x9ac] sm:$0xf0] }
 0x819   :  { %v9291_v49 = vld [vmem:[#allocation28 + $0xb18] sm:$0xf]  ;;  %v10109_v62 = vld [vmem:[#allocation28 + $0xb2c] sm:$0xf0]  ;;  %v9100_v46 = vor.u32 %v10061_v60, %v9099_v4 }
 0x81a   :  { %v9292_v3 = vor.u32 %v10109_v62, %v9291_v49  ;;  %v9836_v49 = vld [vmem:[#allocation28 + $0x2ac] sm:$0xf]  ;;  %v8213_v62 = vld [vmem:[#allocation28 + $0x2c0] sm:$0xf0] }
 0x81b   :  { %5860 = vmatpush.bf16.msra.mxu3 %v7948_v15  ;;  %5873 = vmatpush.bf16.msrb.mxu0 %v8140_v16  ;;  %v9171_v15 = vld [vmem:[#allocation28 + $0xa28] sm:$0xf]  ;;  %v10079_v16 = vld [vmem:[#allocation28 + $0xa3c] sm:$0xf0] }
 0x81c   :  { %5886 = vmatpush.bf16.msrb.mxu1 %v8332_v27  ;;  %5899 = vmatpush.bf16.msrb.mxu2 %v8524_v30  ;;  %v8788_v27 = vor.u32 %v9983_v26, %v8787_v25  ;;  %v8980_v30 = vor.u32 %v10031_v14, %v8979_v10  ;;  %v9172_v29 = vor.u32 %v10079_v16, %v9171_v15  ;;  %v9267_v25 = vld [vmem:[#allocation28 + $0xae8] sm:$0xf]  ;;  %v10103_v26 = vld [vmem:[#allocation28 + $0xafc] sm:$0xf0]  ;;  %v8667_v10 = vld [vmem:[#allocation28 + $0x638] sm:$0xf] }
 0x81d   :  { %v9953_v14 = vld [vmem:[#allocation28 + $0x64c] sm:$0xf0]  ;;  %v9268_v16 = vor.u32 %v10103_v26, %v9267_v25  ;;  %v9830_v25 = vld [vmem:[#allocation28 + $0x27c] sm:$0xf]  ;;  %v8189_v26 = vld [vmem:[#allocation28 + $0x290] sm:$0xf0] }
 0x81f   :  { %5861 = vmatpush.bf16.msra.mxu3 %v7924_v47  ;;  %5874 = vmatpush.bf16.msrb.mxu0 %v8116_v61  ;;  %v9147_v47 = vld [vmem:[#allocation28 + $0x9f8] sm:$0xf]  ;;  %v10073_v61 = vld [vmem:[#allocation28 + $0xa0c] sm:$0xf0] }
 0x820   :  { %5887 = vmatpush.bf16.msrb.mxu1 %v8308_v17  ;;  %5900 = vmatpush.bf16.msrb.mxu2 %v8500_v52  ;;  %v8764_v17 = vor.u32 %v9977_v28, %v8763_v20  ;;  %v8956_v52 = vor.u32 %v10025_v31, %v8955_v48  ;;  %v9148_v2 = vor.u32 %v10073_v61, %v9147_v47  ;;  %v9243_v20 = vld [vmem:[#allocation28 + $0xab8] sm:$0xf]  ;;  %v10097_v28 = vld [vmem:[#allocation28 + $0xacc] sm:$0xf0]  ;;  %v9947_v31 = vld [vmem:[#allocation28 + $0x61c] sm:$0xf0] }
 0x821   :  { %v8860_v48 = vor.u32 %v10001_v21, %v8859_v18  ;;  %v8835_v47 = vld [vmem:[#allocation28 + $0x788] sm:$0xf]  ;;  %v9995_v61 = vld [vmem:[#allocation28 + $0x79c] sm:$0xf0]  ;;  %v9244_v51 = vor.u32 %v10097_v28, %v9243_v20  ;;  %v8192_v21 = vor.u32 %v9830_v25, %v8189_v26  ;;  %v7973_v20 = vld [vmem:[#allocation28 + $0xe0] sm:$0xf0] }
 0x822   :  { %v9824_v28 = vld [vmem:[#allocation28 + $0x24c] sm:$0xf]  ;;  %v9758_v25 = vld [vmem:[#allocation28 + $0x3c] sm:$0xf]  ;;  %v7901_v26 = vld [vmem:[#allocation28 + $0x50] sm:$0xf0] }
 0x823   :  { %5862 = vmatpush.bf16.msra.mxu3 %v7900_v11  ;;  %5875 = vmatpush.bf16.msrb.mxu0 %v8092_v38  ;;  %v10067_v11 = vld [vmem:[#allocation28 + $0x9dc] sm:$0xf0]  ;;  %v9315_v38 = vld [vmem:[#allocation28 + $0xb48] sm:$0xf] }
 0x824   :  { %5888 = vmatpush.bf16.msrb.mxu1 %v8284_v41  ;;  %5901 = vmatpush.bf16.msrb.mxu2 %v8476_v45  ;;  %v8715_v41 = vld [vmem:[#allocation28 + $0x698] sm:$0xf]  ;;  %v9965_v45 = vld [vmem:[#allocation28 + $0x6ac] sm:$0xf0]  ;;  %v9124_v54 = vor.u32 %v10067_v11, %v9123_v23  ;;  %v9316_v55 = vor.u32 %v10115_v12, %v9315_v38  ;;  %v9890_v23 = vld [vmem:[#allocation28 + $0x45c] sm:$0xf]  ;;  %v8836_v38 = vor.u32 %v9995_v61, %v8835_v47 }
 0x825   :  { %v8716_v8 = vor.u32 %v9965_v45, %v8715_v41  ;;  %v8429_v12 = vld [vmem:[#allocation28 + $0x470] sm:$0xf0]  ;;  %v9220_v45 = vor.u32 %v10091_v53, %v9219_v33  ;;  %v8357_v47 = vld [vmem:[#allocation28 + $0x3e0] sm:$0xf0]  ;;  %v9920_v61 = vld [vmem:[#allocation28 + $0x54c] sm:$0xf] }
 0x826   :  { %v8432_v4 = vor.u32 %v9890_v23, %v8429_v12  ;;  %v9770_v33 = vld [vmem:[#allocation28 + $0x9c] sm:$0xf]  ;;  %v7949_v53 = vld [vmem:[#allocation28 + $0xb0] sm:$0xf0] }
 0x827   :  { %5863 = vmatpush.bf16.msra.mxu3 %v7876_v1  ;;  %5876 = vmatpush.bf16.msrb.mxu0 %v8068_v22  ;;  %v8908_v1 = vor.u32 %v10013_v56, %v8907_v63  ;;  %v8691_v22 = vld [vmem:[#allocation28 + $0x668] sm:$0xf]  ;;  %v9788_v63 = vld [vmem:[#allocation28 + $0x12c] sm:$0xf]  ;;  %v8021_v56 = vld [vmem:[#allocation28 + $0x140] sm:$0xf0] }
 0x828   :  { %5889 = vmatpush.bf16.msrb.mxu1 %v8260_v5  ;;  %5902 = vmatpush.bf16.msrb.mxu2 %v8452_v19  ;;  %v8883_v5 = vld [vmem:[#allocation28 + $0x7e8] sm:$0xf]  ;;  %v10007_v19 = vld [vmem:[#allocation28 + $0x7fc] sm:$0xf0]  ;;  %v8141_v23 = vld [vmem:[#allocation28 + $0x230] sm:$0xf0] }
 0x82a   :  { %5864 = vmatmul.bf16.vlgmr.msra.gmra.mxu3 %v11131_v0  ;;  %5877 = vmatmul.bf16.vlgmr.msrb.gmra.mxu0 %v11133_v42 }
 0x82b   :  { %5908 = vmatpush.bf16.msrb.mxu3 %v8812_v6  ;;  %5921 = vmatpush.bf16.msra.mxu0 %v9004_v7  ;;  %v9075_v6 = vld [vmem:[#allocation28 + $0x968] sm:$0xf]  ;;  %v10055_v7 = vld [vmem:[#allocation28 + $0x97c] sm:$0xf0] }
 0x82c   :  { %5934 = vmatpush.bf16.msra.mxu1 %v9196_v9  ;;  %5947 = vmatpush.bf16.msra.mxu2 %v9388_v37  ;;  %v8692_v9 = vor.u32 %v9959_v36, %v8691_v22  ;;  %v8884_v37 = vor.u32 %v10007_v19, %v8883_v5  ;;  %v9076_v15 = vor.u32 %v10055_v7, %v9075_v6  ;;  %v9932_v22 = vld [vmem:[#allocation28 + $0x5ac] sm:$0xf]  ;;  %v8597_v36 = vld [vmem:[#allocation28 + $0x5c0] sm:$0xf0]  ;;  %v9782_v5 = vld [vmem:[#allocation28 + $0xfc] sm:$0xf] }
 0x82d   :  { %5890 = vmatmul.bf16.vlgmr.msrb.gmra.mxu1 %v11135_v43  ;;  %5903 = vmatmul.bf16.vlgmr.msrb.gmra.mxu2 %v11137_v44  ;;  %v7997_v19 = vld [vmem:[#allocation28 + $0x110] sm:$0xf0]  ;;  %v8600_v7 = vor.u32 %v9932_v22, %v8597_v36  ;;  %v9860_v22 = vld [vmem:[#allocation28 + $0x36c] sm:$0xf] }
 0x82e   :  { %v8000_v18 = vor.u32 %v9782_v5, %v7997_v19  ;;  %v8501_v5 = vld [vmem:[#allocation28 + $0x500] sm:$0xf0] }
 0x82f   :  { %5909 = vmatpush.bf16.msrb.mxu3 %v8788_v27  ;;  %5922 = vmatpush.bf16.msra.mxu0 %v8980_v30  ;;  %v9051_v27 = vld [vmem:[#allocation28 + $0x938] sm:$0xf]  ;;  %v10049_v30 = vld [vmem:[#allocation28 + $0x94c] sm:$0xf0] }
 0x830   :  { %5935 = vmatpush.bf16.msra.mxu1 %v9172_v29  ;;  %5948 = vmatpush.bf16.msra.mxu2 %v9364_v40  ;;  %v8643_v29 = vld [vmem:[#allocation28 + $0x608] sm:$0xf]  ;;  %v8668_v40 = vor.u32 %v9953_v14, %v8667_v10  ;;  %v9052_v32 = vor.u32 %v10049_v30, %v9051_v27  ;;  %v9926_v10 = vld [vmem:[#allocation28 + $0x57c] sm:$0xf]  ;;  %v8573_v14 = vld [vmem:[#allocation28 + $0x590] sm:$0xf0] }
 0x831   :  { %v8644_v11 = vor.u32 %v9947_v31, %v8643_v29  ;;  %v9776_v30 = vld [vmem:[#allocation28 + $0xcc] sm:$0xf] }
 0x832   :  { %v9872_v31 = vld [vmem:[#allocation28 + $0x3cc] sm:$0xf] }
 0x833   :  { %5910 = vmatpush.bf16.msrb.mxu3 %v8764_v17  ;;  %5923 = vmatpush.bf16.msra.mxu0 %v8956_v52  ;;  %v9027_v17 = vld [vmem:[#allocation28 + $0x908] sm:$0xf]  ;;  %v10043_v52 = vld [vmem:[#allocation28 + $0x91c] sm:$0xf0] }
 0x834   :  { %5936 = vmatpush.bf16.msra.mxu1 %v9148_v2  ;;  %5949 = vmatpush.bf16.msra.mxu2 %v9340_v39  ;;  %v9794_v2 = vld [vmem:[#allocation28 + $0x15c] sm:$0xf]  ;;  %v8045_v39 = vld [vmem:[#allocation28 + $0x170] sm:$0xf0]  ;;  %v9028_v41 = vor.u32 %v10043_v52, %v9027_v17  ;;  %v7976_v17 = vor.u32 %v9776_v30, %v7973_v20 }
 0x835   :  { %v9902_v30 = vld [vmem:[#allocation28 + $0x4bc] sm:$0xf]  ;;  %v8477_v20 = vld [vmem:[#allocation28 + $0x4d0] sm:$0xf0] }
 0x837   :  { %5911 = vmatpush.bf16.msrb.mxu3 %v8740_v59  ;;  %5924 = vmatpush.bf16.msra.mxu0 %v8932_v13  ;;  %v9938_v59 = vld [vmem:[#allocation28 + $0x5dc] sm:$0xf]  ;;  %v8621_v13 = vld [vmem:[#allocation28 + $0x5f0] sm:$0xf0] }
 0x838   :  { %5937 = vmatpush.bf16.msra.mxu1 %v9124_v54  ;;  %5950 = vmatpush.bf16.msra.mxu2 %v9316_v55  ;;  %v8048_v54 = vor.u32 %v9794_v2, %v8045_v39  ;;  %v8240_v55 = vor.u32 %v9842_v34, %v8237_v35  ;;  %v8624_v60 = vor.u32 %v9938_v59, %v8621_v13  ;;  %v9818_v35 = vld [vmem:[#allocation28 + $0x21c] sm:$0xf]  ;;  %v8333_v59 = vld [vmem:[#allocation28 + $0x3b0] sm:$0xf0] }
 0x839   :  { %v8360_v2 = vor.u32 %v9872_v31, %v8357_v47  ;;  %v9914_v13 = vld [vmem:[#allocation28 + $0x51c] sm:$0xf]  ;;  %v7877_v47 = vld [vmem:[#allocation28 + $0x20] sm:$0xf0] }
 0x83b   :  { %5912 = vmatpush.bf16.msrb.mxu3 %v8716_v8  ;;  %5925 = vmatpush.bf16.msra.mxu0 %v8908_v1  ;;  %v9884_v8 = vld [vmem:[#allocation28 + $0x42c] sm:$0xf]  ;;  %v8405_v1 = vld [vmem:[#allocation28 + $0x440] sm:$0xf0] }
 0x83c   :  { %5938 = vmatpush.bf16.msra.mxu1 %v9100_v46  ;;  %5951 = vmatpush.bf16.msra.mxu2 %v9292_v3  ;;  %v8024_v46 = vor.u32 %v9788_v63, %v8021_v56  ;;  %v8216_v3 = vor.u32 %v9836_v49, %v8213_v62  ;;  %v8408_v6 = vor.u32 %v9884_v8, %v8405_v1  ;;  %v9812_v8 = vld [vmem:[#allocation28 + $0x1ec] sm:$0xf]  ;;  %v8117_v1 = vld [vmem:[#allocation28 + $0x200] sm:$0xf0] }
 0x83d   :  { %v8144_v63 = vor.u32 %v9818_v35, %v8141_v23  ;;  %v10034_v35 = vld [vmem:[#allocation28 + $0x8dc] sm:$0xf]  ;;  %v9005_v23 = vld [vmem:[#allocation28 + $0x8f0] sm:$0xf0] }
 0x83f   :  { %5913 = vmatpush.bf16.msrb.mxu3 %v8692_v9  ;;  %5926 = vmatpush.bf16.msra.mxu0 %v8884_v37  ;;  %v9878_v9 = vld [vmem:[#allocation28 + $0x3fc] sm:$0xf]  ;;  %v8381_v37 = vld [vmem:[#allocation28 + $0x410] sm:$0xf0] }
 0x840   :  { %5939 = vmatpush.bf16.msra.mxu1 %v9076_v15  ;;  %5952 = vmatpush.bf16.msra.mxu2 %v9268_v16  ;;  %v11179_v16 = vld [vmem:[#allocation29] sm:$0x3f]  ;;  %v8384_v29 = vor.u32 %v9878_v9, %v8381_v37 }
 0x843   :  { %5914 = vmatpush.bf16.msrb.mxu3 %v8668_v40  ;;  %5927 = vmatpush.bf16.msra.mxu0 %v8860_v48  ;;  %v8576_v40 = vor.u32 %v9926_v10, %v8573_v14  ;;  %v8165_v48 = vld [vmem:[#allocation28 + $0x260] sm:$0xf0]  ;;  %v9806_v14 = vld [vmem:[#allocation28 + $0x1bc] sm:$0xf] }
 0x844   :  { %5940 = vmatpush.bf16.msra.mxu1 %v9052_v32  ;;  %5953 = vmatpush.bf16.msra.mxu2 %v9244_v51  ;;  %v8549_v32 = vld [vmem:[#allocation28 + $0x560] sm:$0xf0]  ;;  %v3716_v51 = vperm.slane %v11179_v16, 0  ;;  %v8168_v52 = vor.u32 %v9824_v28, %v8165_v48 }
 0x845   :  { %v8552_v39 = vor.u32 %v9920_v61, %v8549_v32  ;;  %v9800_v61 = vld [vmem:[#allocation28 + $0x18c] sm:$0xf]  ;;  %v8069_v32 = vld [vmem:[#allocation28 + $0x1a0] sm:$0xf0] }
 0x846   :  { %v5670_v15 = vpop.f32.mrf.mxu0 }
 0x847   :  { %5915 = vmatpush.bf16.msrb.mxu3 %v8644_v11  ;;  %5928 = vmatpush.bf16.msra.mxu0 %v8836_v38  ;;  %v5683_v27 = vpop.f32.mrf.mxu1  ;;  %v9866_v11 = vld [vmem:[#allocation28 + $0x39c] sm:$0xf] }
 0x848   :  { %5941 = vmatpush.bf16.msra.mxu1 %v9028_v41  ;;  %5954 = vmatpush.bf16.msra.mxu2 %v9220_v45  ;;  %v8525_v41 = vld [vmem:[#allocation28 + $0x530] sm:$0xf0]  ;;  %v8336_v49 = vor.u32 %v9866_v11, %v8333_v59  ;;  %v10082_v11 = vld [vmem:[#allocation28 + $0xa5c] sm:$0xf] }
 0x849   :  { %v8528_v62 = vor.u32 %v9914_v13, %v8525_v41  ;;  %v9197_v59 = vld [vmem:[#allocation28 + $0xa70] sm:$0xf0]  ;;  %v10130_v13 = vld [vmem:[#allocation28 + $0xbdc] sm:$0xf] }
 0x84a   :  { %5916 = vmatmul.bf16.vlgmr.msrb.gmra.mxu3 %v11151_v57  ;;  %5929 = vmatmul.bf16.vlgmr.msra.gmra.mxu0 %v11153_v50  ;;  %v9389_v41 = vld [vmem:[#allocation28 + $0xbf0] sm:$0xf0] }
 0x84b   :  { %5960 = vmatpush.bf16.msra.mxu3 %v8048_v54  ;;  %5973 = vmatpush.bf16.msrb.mxu0 %v8240_v55  ;;  %v7952_v55 = vor.u32 %v9770_v33, %v7949_v53  ;;  %v8261_v33 = vld [vmem:[#allocation28 + $0x320] sm:$0xf0]  ;;  %v9896_v53 = vld [vmem:[#allocation28 + $0x48c] sm:$0xf] }
 0x84c   :  { %5986 = vmatpush.bf16.msrb.mxu1 %v8432_v4  ;;  %5999 = vmatpush.bf16.msrb.mxu2 %v8624_v60  ;;  %v5657_v34 = vpop.f32.mrf.mxu3  ;;  %v9764_v4 = vld [vmem:[#allocation28 + $0x6c] sm:$0xf]  ;;  %v7925_v60 = vld [vmem:[#allocation28 + $0x80] sm:$0xf0] }
 0x84d   :  { %5942 = vmatmul.bf16.vlgmr.msra.gmra.mxu1 %v11155_v24  ;;  %5955 = vmatmul.bf16.vlgmr.msra.gmra.mxu2 %v11157_v58  ;;  %v5658_v38 = vadd.f32 %v5657_v34, %v3716_v51  ;;  %v5696_v12 = vpop.f32.mrf.mxu2  ;;  %v8813_v34 = vld [vmem:[#allocation28 + $0x770] sm:$0xf0] }
 0x84e   :  { %v5672_v45 = vpop.f32.mrf.mxu0 }
 0x84f   :  { %5961 = vmatpush.bf16.msra.mxu3 %v8024_v46  ;;  %5974 = vmatpush.bf16.msrb.mxu0 %v8216_v3  ;;  %v5671_v54 = vadd.f32 %v5670_v15, %v5658_v38  ;;  %v5685_v56 = vpop.f32.mrf.mxu1  ;;  %v8309_v46 = vld [vmem:[#allocation28 + $0x380] sm:$0xf0]  ;;  %v9908_v3 = vld [vmem:[#allocation28 + $0x4ec] sm:$0xf]  ;;  %v8093_v15 = vld [vmem:[#allocation28 + $0x1d0] sm:$0xf0] }
 0x850   :  { %5987 = vmatpush.bf16.msrb.mxu1 %v8408_v6  ;;  %6000 = vmatpush.bf16.msrb.mxu2 %v8600_v7  ;;  %v7928_v6 = vor.u32 %v9764_v4, %v7925_v60  ;;  %v8120_v7 = vor.u32 %v9812_v8, %v8117_v1  ;;  %v8312_v9 = vor.u32 %v9860_v22, %v8309_v46  ;;  %v8981_v46 = vld [vmem:[#allocation28 + $0x8c0] sm:$0xf0] }
 0x851   :  { %v5684_v36 = vadd.f32 %v5683_v27, %v5671_v54  ;;  %v8504_v37 = vor.u32 %v9908_v3, %v8501_v5  ;;  %v8285_v27 = vld [vmem:[#allocation28 + $0x350] sm:$0xf0]  ;;  %v8096_v48 = vor.u32 %v9806_v14, %v8093_v15  ;;  %v9008_v56 = vor.u32 %v10034_v35, %v9005_v23  ;;  %v10076_v3 = vld [vmem:[#allocation28 + $0xa2c] sm:$0xf]  ;;  %v9317_v23 = vld [vmem:[#allocation28 + $0xb60] sm:$0xf0] }
 0x852   :  { %v9200_v8 = vor.u32 %v10082_v11, %v9197_v59  ;;  %v9392_v1 = vor.u32 %v10130_v13, %v9389_v41  ;;  %v8765_v14 = vld [vmem:[#allocation28 + $0x710] sm:$0xf0]  ;;  %v10112_v35 = vld [vmem:[#allocation28 + $0xb4c] sm:$0xf]  ;;  %v9962_v13 = vld [vmem:[#allocation28 + $0x69c] sm:$0xf] }
 0x853   :  { %5962 = vmatpush.bf16.msra.mxu3 %v8000_v18  ;;  %5975 = vmatpush.bf16.msrb.mxu0 %v8192_v21  ;;  %v5697_v19 = vadd.f32 %v5696_v12, %v5684_v36  ;;  %v9854_v18 = vld [vmem:[#allocation28 + $0x33c] sm:$0xf]  ;;  %v8072_v12 = vor.u32 %v9800_v61, %v8069_v32  ;;  %v10028_v36 = vld [vmem:[#allocation28 + $0x8ac] sm:$0xf]  ;;  %v8717_v41 = vld [vmem:[#allocation28 + $0x6b0] sm:$0xf0] }
 0x854   :  { %5988 = vmatpush.bf16.msrb.mxu1 %v8384_v29  ;;  %6001 = vmatpush.bf16.msrb.mxu2 %v8576_v40  ;;  %v5659_v10 = vpop.f32.mrf.mxu3  ;;  %v9752_v29 = vld [vmem:[#allocation28 + $0xc] sm:$0xf]  ;;  %v7904_v40 = vor.u32 %v9758_v25, %v7901_v26  ;;  %v8288_v51 = vor.u32 %v9854_v18, %v8285_v27  ;;  %v9365_v26 = vld [vmem:[#allocation28 + $0xbc0] sm:$0xf0]  ;;  %v8957_v27 = vld [vmem:[#allocation28 + $0x890] sm:$0xf0] }
 0x855   :  { %v5698_v21 = vpop.f32.mrf.mxu2  ;;  %v7880_v38 = vor.u32 %v9752_v29, %v7877_v47  ;;  %v10124_v25 = vld [vmem:[#allocation28 + $0xbac] sm:$0xf]  ;;  %v9974_v10 = vld [vmem:[#allocation28 + $0x6fc] sm:$0xf] }
 0x856   :  { %v5722_v28 = vpop.f32.mrf.mxu0  ;;  %v9368_v18 = vor.u32 %v10124_v25, %v9365_v26  ;;  %v10022_v21 = vld [vmem:[#allocation28 + $0x87c] sm:$0xf]  ;;  %v8768_v47 = vor.u32 %v9974_v10, %v8765_v14  ;;  %v10052_v25 = vld [vmem:[#allocation28 + $0x96c] sm:$0xf]  ;;  %v9269_v10 = vld [vmem:[#allocation28 + $0xb00] sm:$0xf0] }
 0x857   :  { %5963 = vmatpush.bf16.msra.mxu3 %v7976_v17  ;;  %5976 = vmatpush.bf16.msrb.mxu0 %v8168_v52  ;;  %v5735_v31 = vpop.f32.mrf.mxu1  ;;  %v8480_v17 = vor.u32 %v9902_v30, %v8477_v20  ;;  %v9848_v52 = vld [vmem:[#allocation28 + $0x30c] sm:$0xf]  ;;  %v10070_v30 = vld [vmem:[#allocation28 + $0x9fc] sm:$0xf]  ;;  %v8960_v61 = vor.u32 %v10022_v21, %v8957_v27 }
 0x858   :  { %5989 = vmatpush.bf16.msrb.mxu1 %v8360_v2  ;;  %6002 = vmatpush.bf16.msrb.mxu2 %v8552_v39  ;;  %v8453_v2 = vld [vmem:[#allocation28 + $0x4a0] sm:$0xf0]  ;;  %v9986_v39 = vld [vmem:[#allocation28 + $0x75c] sm:$0xf]  ;;  %v8264_v45 = vor.u32 %v9848_v52, %v8261_v33  ;;  %v10016_v52 = vld [vmem:[#allocation28 + $0x84c] sm:$0xf] }
 0x859   :  { %v8456_v54 = vor.u32 %v9896_v53, %v8453_v2  ;;  %v10118_v29 = vld [vmem:[#allocation28 + $0xb7c] sm:$0xf]  ;;  %v8933_v2 = vld [vmem:[#allocation28 + $0x860] sm:$0xf0] }
 0x85a   :  { %v8936_v59 = vor.u32 %v10016_v52, %v8933_v2  ;;  %v9944_v52 = vld [vmem:[#allocation28 + $0x60c] sm:$0xf] }
 0x85b   :  { %5964 = vmatpush.bf16.msra.mxu3 %v7952_v55  ;;  %5977 = vmatpush.bf16.msrb.mxu0 %v8144_v63  ;;  %v8816_v63 = vor.u32 %v9986_v39, %v8813_v34  ;;  %v10064_v39 = vld [vmem:[#allocation28 + $0x9cc] sm:$0xf]  ;;  %v9125_v34 = vld [vmem:[#allocation28 + $0x9e0] sm:$0xf0] }
 0x85c   :  { %5990 = vmatpush.bf16.msrb.mxu1 %v8336_v49  ;;  %6003 = vmatpush.bf16.msrb.mxu2 %v8528_v62  ;;  %v5709_v55 = vpop.f32.mrf.mxu3  ;;  %v9980_v49 = vld [vmem:[#allocation28 + $0x72c] sm:$0xf]  ;;  %v8789_v62 = vld [vmem:[#allocation28 + $0x740] sm:$0xf0] }
 0x85d   :  { %v5710_v4 = vadd.f32 %v5709_v55, %v5697_v19  ;;  %v5748_v60 = vpop.f32.mrf.mxu2  ;;  %v9320_v55 = vor.u32 %v10112_v35, %v9317_v23  ;;  %v8837_v35 = vld [vmem:[#allocation28 + $0x7a0] sm:$0xf0] }
 0x85e   :  { %v5724_v22 = vpop.f32.mrf.mxu0 }
 0x85f   :  { %5965 = vmatpush.bf16.msra.mxu3 %v7928_v6  ;;  %5978 = vmatpush.bf16.msrb.mxu0 %v8120_v7  ;;  %v5723_v5 = vadd.f32 %v5722_v28, %v5710_v4  ;;  %v5737_v6 = vpop.f32.mrf.mxu1  ;;  %v9173_v7 = vld [vmem:[#allocation28 + $0xa40] sm:$0xf0]  ;;  %v9149_v28 = vld [vmem:[#allocation28 + $0xa10] sm:$0xf0]  ;;  %v9956_v22 = vld [vmem:[#allocation28 + $0x66c] sm:$0xf] }
 0x860   :  { %5991 = vmatpush.bf16.msrb.mxu1 %v8312_v9  ;;  %6004 = vmatpush.bf16.msrb.mxu2 %v8504_v37  ;;  %v8792_v9 = vor.u32 %v9980_v49, %v8789_v62  ;;  %v8984_v37 = vor.u32 %v10028_v36, %v8981_v46  ;;  %v9176_v15 = vor.u32 %v10076_v3, %v9173_v7  ;;  %v9101_v4 = vld [vmem:[#allocation28 + $0x9b0] sm:$0xf0]  ;;  %v3717_v62 = vperm.slane %v11179_v16, 1  ;;  %v8693_v36 = vld [vmem:[#allocation28 + $0x680] sm:$0xf0] }
 0x861   :  { %v5736_v19 = vadd.f32 %v5735_v31, %v5723_v5  ;;  %v6406_v31 = vld [vmem:[%s11353_s19] sm:$0xff]  ;;  %v9152_v33 = vor.u32 %v10070_v30, %v9149_v28  ;;  %v9293_v49 = vld [vmem:[#allocation28 + $0xb30] sm:$0xf0]  ;;  %v8885_v7 = vld [vmem:[#allocation28 + $0x800] sm:$0xf0]  ;;  %v8696_v21 = vor.u32 %v9956_v22, %v8693_v36 }
 0x862   :  { %6410 = vst [vmem:[#allocation1] ss:$4 sm:$0xff] %v6406_v31  ;;  %v10004_v6 = vld [vmem:[#allocation28 + $0x7ec] sm:$0xf]  ;;  %v9950_v30 = vld [vmem:[#allocation28 + $0x63c] sm:$0xf] }
 0x863   :  { %5966 = vmatpush.bf16.msra.mxu3 %v7904_v40  ;;  %5979 = vmatpush.bf16.msrb.mxu0 %v8096_v48  ;;  %v11182_v20 = vadd.f32 %v5748_v60, %v5736_v19  ;;  %v9341_v40 = vld [vmem:[#allocation28 + $0xb90] sm:$0xf0]  ;;  %v10106_v60 = vld [vmem:[#allocation28 + $0xb1c] sm:$0xf]  ;;  %v8888_v27 = vor.u32 %v10004_v6, %v8885_v7  ;;  %v9792_v6 = vld [vmem:[#allocation28 + $0x144] sm:$0xf0] }
 0x864   :  { %5992 = vmatpush.bf16.msrb.mxu1 %v8288_v51  ;;  %6005 = vmatpush.bf16.msrb.mxu2 %v8480_v17  ;;  %v5711_v48 = vpop.f32.mrf.mxu3  ;;  %v9968_v51 = vld [vmem:[#allocation28 + $0x6cc] sm:$0xf]  ;;  %v8741_v17 = vld [vmem:[#allocation28 + $0x6e0] sm:$0xf0]  ;;  %v9344_v53 = vor.u32 %v10118_v29, %v9341_v40  ;;  %v9296_v3 = vor.u32 %v10106_v60, %v9293_v49  ;;  %v8669_v28 = vld [vmem:[#allocation28 + $0x650] sm:$0xf0] }
 0x865   :  { %v5750_v32 = vpop.f32.mrf.mxu2  ;;  %v9998_v48 = vld [vmem:[#allocation28 + $0x7bc] sm:$0xf]  ;;  %v8861_v31 = vld [vmem:[#allocation28 + $0x7d0] sm:$0xf0] }
 0x866   :  { %v9053_v32 = vld [vmem:[#allocation28 + $0x950] sm:$0xf0]  ;;  %v8864_v2 = vor.u32 %v9998_v48, %v8861_v31  ;;  %v9834_v48 = vld [vmem:[#allocation28 + $0x294] sm:$0xf0]  ;;  %v8387_v31 = vld [vmem:[#allocation28 + $0x400] sm:$0xf] }
 0x867   :  { %5967 = vmatpush.bf16.msra.mxu3 %v7880_v38  ;;  %5980 = vmatpush.bf16.msrb.mxu0 %v8072_v12  ;;  %v5774_v11 = vpop.f32.mrf.mxu0  ;;  %v8744_v12 = vor.u32 %v9968_v51, %v8741_v17  ;;  %v10094_v51 = vld [vmem:[#allocation28 + $0xabc] sm:$0xf]  ;;  %v9245_v17 = vld [vmem:[#allocation28 + $0xad0] sm:$0xf0] }
 0x868   :  { %5993 = vmatpush.bf16.msrb.mxu1 %v8264_v45  ;;  %6006 = vmatpush.bf16.msrb.mxu2 %v8456_v54  ;;  %v10010_v45 = vld [vmem:[#allocation28 + $0x81c] sm:$0xf]  ;;  %v9128_v54 = vor.u32 %v10064_v39, %v9125_v34  ;;  %v8645_v39 = vld [vmem:[#allocation28 + $0x620] sm:$0xf0]  ;;  %v9992_v34 = vld [vmem:[#allocation28 + $0x78c] sm:$0xf] }
 0x869   :  { %v8648_v60 = vor.u32 %v9944_v52, %v8645_v39  ;;  %v8840_v49 = vor.u32 %v9992_v34, %v8837_v35  ;;  %v9780_v52 = vld [vmem:[#allocation28 + $0xe4] sm:$0xf0]  ;;  %v8171_v39 = vld [vmem:[#allocation28 + $0x250] sm:$0xf] }
 0x86a   :  { %5968 = vmatmul.bf16.vlgmr.msra.gmra.mxu3 %v11131_v0  ;;  %5981 = vmatmul.bf16.vlgmr.msrb.gmra.mxu0 %v11133_v42  ;;  %v5787_v38 = vpop.f32.mrf.mxu1  ;;  %v9828_v34 = vld [vmem:[#allocation28 + $0x264] sm:$0xf0]  ;;  %v8363_v35 = vld [vmem:[#allocation28 + $0x3d0] sm:$0xf] }
 0x86b   :  { %6012 = vmatpush.bf16.msrb.mxu3 %v8816_v63  ;;  %6025 = vmatpush.bf16.msra.mxu0 %v9008_v56  ;;  %v8909_v63 = vld [vmem:[#allocation28 + $0x830] sm:$0xf0]  ;;  %v10058_v56 = vld [vmem:[#allocation28 + $0x99c] sm:$0xf] }
 0x86c   :  { %6038 = vmatpush.bf16.msra.mxu1 %v9200_v8  ;;  %6051 = vmatpush.bf16.msra.mxu2 %v9392_v1  ;;  %v8720_v8 = vor.u32 %v9962_v13, %v8717_v41  ;;  %v8912_v1 = vor.u32 %v10010_v45, %v8909_v63  ;;  %v9104_v46 = vor.u32 %v10058_v56, %v9101_v4  ;;  %v10088_v13 = vld [vmem:[#allocation28 + $0xa8c] sm:$0xf]  ;;  %v9221_v45 = vld [vmem:[#allocation28 + $0xaa0] sm:$0xf0]  ;;  %v8243_v63 = vld [vmem:[#allocation28 + $0x2e0] sm:$0xf] }
 0x86d   :  { %5994 = vmatmul.bf16.vlgmr.msrb.gmra.mxu1 %v11135_v43  ;;  %6007 = vmatmul.bf16.vlgmr.msrb.gmra.mxu2 %v11137_v44  ;;  %v5761_v5 = vpop.f32.mrf.mxu3  ;;  %v9846_v56 = vld [vmem:[#allocation28 + $0x2f4] sm:$0xf0]  ;;  %v8435_v4 = vld [vmem:[#allocation28 + $0x460] sm:$0xf]  ;;  %v9224_v36 = vor.u32 %v10088_v13, %v9221_v45 }
 0x86e   :  { %v5762_v26 = vadd.f32 %v5761_v5, %v3717_v62  ;;  %v9894_v62 = vld [vmem:[#allocation28 + $0x474] sm:$0xf0]  ;;  %v8027_v5 = vld [vmem:[#allocation28 + $0x130] sm:$0xf]  ;;  %v7955_v45 = vld [vmem:[#allocation28 + $0xa0] sm:$0xf] }
 0x86f   :  { %6013 = vmatpush.bf16.msrb.mxu3 %v8792_v9  ;;  %6026 = vmatpush.bf16.msra.mxu0 %v8984_v37  ;;  %v9077_v9 = vld [vmem:[#allocation28 + $0x980] sm:$0xf0]  ;;  %v10100_v37 = vld [vmem:[#allocation28 + $0xaec] sm:$0xf]  ;;  %v5776_v14 = vpop.f32.mrf.mxu0  ;;  %v8436_v7 = vor.u32 %v9894_v62, %v8435_v4  ;;  %v8147_v4 = vld [vmem:[#allocation28 + $0x220] sm:$0xf] }
 0x870   :  { %6039 = vmatpush.bf16.msra.mxu1 %v9176_v15  ;;  %6052 = vmatpush.bf16.msra.mxu2 %v9368_v18  ;;  %v5800_v19 = vpop.f32.mrf.mxu2  ;;  %v5775_v15 = vadd.f32 %v5774_v11, %v5762_v26  ;;  %v9080_v29 = vor.u32 %v10052_v25, %v9077_v9  ;;  %v9272_v40 = vor.u32 %v10100_v37, %v9269_v10  ;;  %v8219_v26 = vld [vmem:[#allocation28 + $0x2b0] sm:$0xf]  ;;  %v9888_v37 = vld [vmem:[#allocation28 + $0x444] sm:$0xf0]  ;;  %v9870_v62 = vld [vmem:[#allocation28 + $0x3b4] sm:$0xf0] }
 0x871   :  { %v9248_v11 = vor.u32 %v10094_v51, %v9245_v17  ;;  %v8411_v9 = vld [vmem:[#allocation28 + $0x430] sm:$0xf]  ;;  %v9936_v14 = vld [vmem:[#allocation28 + $0x5c4] sm:$0xf0] }
 0x872   :  { %v5789_v18 = vpop.f32.mrf.mxu1  ;;  %v8603_v10 = vld [vmem:[#allocation28 + $0x5b0] sm:$0xf] }
 0x873   :  { %6014 = vmatpush.bf16.msrb.mxu3 %v8768_v47  ;;  %6027 = vmatpush.bf16.msra.mxu0 %v8960_v61  ;;  %v10046_v47 = vld [vmem:[#allocation28 + $0x93c] sm:$0xf]  ;;  %v5788_v61 = vadd.f32 %v5787_v38, %v5775_v15  ;;  %v9029_v38 = vld [vmem:[#allocation28 + $0x920] sm:$0xf0]  ;;  %v9401_v15 = vmul.f32 -1.442695, %v11182_v20  ;;  %v8028_v18 = vor.u32 %v9792_v6, %v8027_v5 }
 0x874   :  { %6040 = vmatpush.bf16.msra.mxu1 %v9152_v33  ;;  %6053 = vmatpush.bf16.msra.mxu2 %v9344_v53  ;;  %v8672_v53 = vor.u32 %v9950_v30, %v8669_v28  ;;  %v9056_v23 = vor.u32 %v10046_v47, %v9053_v32  ;;  %v9786_v30 = vld [vmem:[#allocation28 + $0x114] sm:$0xf0]  ;;  %v8412_v28 = vor.u32 %v9888_v37, %v8411_v9  ;;  %v8579_v47 = vld [vmem:[#allocation28 + $0x580] sm:$0xf]  ;;  %v7979_v17 = vld [vmem:[#allocation28 + $0xd0] sm:$0xf] }
 0x875   :  { %v11192_v33 = vadd.f32 %v5800_v19, %v5788_v61  ;;  %v9840_v19 = vld [vmem:[#allocation28 + $0x2c4] sm:$0xf0]  ;;  %v9882_v20 = vld [vmem:[#allocation28 + $0x414] sm:$0xf0]  ;;  %10189 = vpow2.f32 %v9401_v15  ;;  %v7980_v13 = vor.u32 %v9780_v52, %v7979_v17  ;;  %v8315_v9 = vld [vmem:[#allocation28 + $0x370] sm:$0xf] }
 0x876   :  { %v9930_v61 = vld [vmem:[#allocation28 + $0x594] sm:$0xf0]  ;;  %v9768_v5 = vld [vmem:[#allocation28 + $0x84] sm:$0xf0]  ;;  %v8507_v15 = vld [vmem:[#allocation28 + $0x4f0] sm:$0xf] }
 0x877   :  { %6015 = vmatpush.bf16.msrb.mxu3 %v8744_v12  ;;  %6028 = vmatpush.bf16.msra.mxu0 %v8936_v59  ;;  %v5763_v12 = vpop.f32.mrf.mxu3  ;;  %v10040_v59 = vld [vmem:[#allocation28 + $0x90c] sm:$0xf]  ;;  %v8483_v17 = vld [vmem:[#allocation28 + $0x4c0] sm:$0xf]  ;;  %v9906_v52 = vld [vmem:[#allocation28 + $0x4d4] sm:$0xf0] }
 0x878   :  { %6041 = vmatpush.bf16.msra.mxu1 %v9128_v54  ;;  %6054 = vmatpush.bf16.msra.mxu2 %v9320_v55  ;;  %v5802_v41 = vpop.f32.mrf.mxu2  ;;  %v8051_v54 = vld [vmem:[#allocation28 + $0x160] sm:$0xf]  ;;  %v9798_v55 = vld [vmem:[#allocation28 + $0x174] sm:$0xf0]  ;;  %v9032_v22 = vor.u32 %v10040_v59, %v9029_v38  ;;  %v9924_v12 = vld [vmem:[#allocation28 + $0x564] sm:$0xf0] }
 0x879   :  { %v8172_v41 = vor.u32 %v9828_v34, %v8171_v39 }
 0x87b   :  { %6016 = vmatpush.bf16.msrb.mxu3 %v8720_v8  ;;  %6029 = vmatpush.bf16.msra.mxu0 %v8912_v1  ;;  %v8627_v8 = vld [vmem:[#allocation28 + $0x5e0] sm:$0xf]  ;;  %v9942_v1 = vld [vmem:[#allocation28 + $0x5f4] sm:$0xf0] }
 0x87c   :  { %6042 = vmatpush.bf16.msra.mxu1 %v9104_v46  ;;  %6055 = vmatpush.bf16.msra.mxu2 %v9296_v3  ;;  %v8052_v46 = vor.u32 %v9798_v55, %v8051_v54  ;;  %v8244_v3 = vor.u32 %v9846_v56, %v8243_v63  ;;  %v8628_v25 = vor.u32 %v9942_v1, %v8627_v8  ;;  %v9774_v54 = vld [vmem:[#allocation28 + $0xb4] sm:$0xf0]  ;;  %v10190_v55 = vpop.eup %10189  ;;  %v8531_v8 = vld [vmem:[#allocation28 + $0x520] sm:$0xf] }
 0x87d   :  { %v9918_v1 = vld [vmem:[#allocation28 + $0x534] sm:$0xf0] }
 0x87f   :  { %6017 = vmatpush.bf16.msrb.mxu3 %v8696_v21  ;;  %6030 = vmatpush.bf16.msra.mxu0 %v8888_v27  ;;  %v8220_v21 = vor.u32 %v9840_v19, %v8219_v26  ;;  %v8003_v27 = vld [vmem:[#allocation28 + $0x100] sm:$0xf]  ;;  %v8123_v26 = vld [vmem:[#allocation28 + $0x1f0] sm:$0xf]  ;;  %v9816_v19 = vld [vmem:[#allocation28 + $0x204] sm:$0xf0] }
 0x880   :  { %6043 = vmatpush.bf16.msra.mxu1 %v9080_v29  ;;  %6056 = vmatpush.bf16.msra.mxu2 %v9272_v40  ;;  %v8604_v29 = vor.u32 %v9936_v14, %v8603_v10  ;;  %v8195_v40 = vld [vmem:[#allocation28 + $0x280] sm:$0xf]  ;;  %v8004_v32 = vor.u32 %v9786_v30, %v8003_v27  ;;  %v9864_v14 = vld [vmem:[#allocation28 + $0x384] sm:$0xf0] }
 0x881   :  { %v8196_v51 = vor.u32 %v9834_v48, %v8195_v40  ;;  %v7907_v40 = vld [vmem:[#allocation28 + $0x40] sm:$0xf]  ;;  %v9762_v48 = vld [vmem:[#allocation28 + $0x54] sm:$0xf0] }
 0x882   :  { %v7908_v34 = vor.u32 %v9762_v48, %v7907_v40 }
 0x883   :  { %6018 = vmatpush.bf16.msrb.mxu3 %v8672_v53  ;;  %6031 = vmatpush.bf16.msra.mxu0 %v8864_v2  ;;  %v8388_v53 = vor.u32 %v9882_v20, %v8387_v31  ;;  %v8580_v2 = vor.u32 %v9930_v61, %v8579_v47  ;;  %v8316_v31 = vor.u32 %v9864_v14, %v8315_v9  ;;  %v9810_v47 = vld [vmem:[#allocation28 + $0x1d4] sm:$0xf0]  ;;  %v8291_v61 = vld [vmem:[#allocation28 + $0x340] sm:$0xf]  ;;  %v8795_v9 = vld [vmem:[#allocation28 + $0x730] sm:$0xf] }
 0x884   :  { %6044 = vmatpush.bf16.msra.mxu1 %v9056_v23  ;;  %6057 = vmatpush.bf16.msra.mxu2 %v9248_v11  ;;  %v9876_v23 = vld [vmem:[#allocation28 + $0x3e4] sm:$0xf0]  ;;  %v8555_v11 = vld [vmem:[#allocation28 + $0x550] sm:$0xf] }
 0x885   :  { %v8364_v63 = vor.u32 %v9876_v23, %v8363_v35  ;;  %v8556_v56 = vor.u32 %v9924_v12, %v8555_v11  ;;  %v8075_v23 = vld [vmem:[#allocation28 + $0x190] sm:$0xf]  ;;  %v9804_v11 = vld [vmem:[#allocation28 + $0x1a4] sm:$0xf0] }
 0x886   :  { %v8267_v12 = vld [vmem:[#allocation28 + $0x310] sm:$0xf] }
 0x887   :  { %6019 = vmatpush.bf16.msrb.mxu3 %v8648_v60  ;;  %6032 = vmatpush.bf16.msra.mxu0 %v8840_v49  ;;  %v5826_v59 = vpop.f32.mrf.mxu0  ;;  %v9822_v60 = vld [vmem:[#allocation28 + $0x234] sm:$0xf0]  ;;  %v8339_v49 = vld [vmem:[#allocation28 + $0x3a0] sm:$0xf] }
 0x888   :  { %6045 = vmatpush.bf16.msra.mxu1 %v9032_v22  ;;  %6058 = vmatpush.bf16.msra.mxu2 %v9224_v36  ;;  %v11199_v22 = vadd.f32 1.0, %v10190_v55  ;;  %v7956_v36 = vor.u32 %v9774_v54, %v7955_v45  ;;  %v8340_v6 = vor.u32 %v9870_v62, %v8339_v49  ;;  %v9852_v45 = vld [vmem:[#allocation28 + $0x324] sm:$0xf0]  ;;  %v9011_v49 = vld [vmem:[#allocation28 + $0x8e0] sm:$0xf] }
 0x889   :  { %v9900_v54 = vld [vmem:[#allocation28 + $0x4a4] sm:$0xf0]  ;;  %v10038_v62 = vld [vmem:[#allocation28 + $0x8f4] sm:$0xf0] }
 0x88a   :  { %6020 = vmatmul.bf16.vlgmr.msrb.gmra.mxu3 %v11151_v57  ;;  %6033 = vmatmul.bf16.vlgmr.msra.gmra.mxu0 %v11153_v50  ;;  %v5839_v38 = vpop.f32.mrf.mxu1  ;;  %10191 = vrcp.f32 %v11199_v22  ;;  %vm6301_vm3 = vweird.f32 %v11199_v22 }
 0x88b   :  { %6064 = vmatpush.bf16.msra.mxu3 %v8052_v46  ;;  %6077 = vmatpush.bf16.msrb.mxu0 %v8244_v3  ;;  %v8148_v46 = vor.u32 %v9822_v60, %v8147_v4  ;;  %v7931_v3 = vld [vmem:[#allocation28 + $0x70] sm:$0xf]  ;;  %v8819_v4 = vld [vmem:[#allocation28 + $0x760] sm:$0xf]  ;;  %v9990_v60 = vld [vmem:[#allocation28 + $0x774] sm:$0xf0] }
 0x88c   :  { %6090 = vmatpush.bf16.msrb.mxu1 %v8436_v7  ;;  %6103 = vmatpush.bf16.msrb.mxu2 %v8628_v25  ;;  %v8532_v7 = vor.u32 %v9918_v1, %v8531_v8  ;;  %v9203_v8 = vld [vmem:[#allocation28 + $0xa60] sm:$0xf] }
 0x88d   :  { %6046 = vmatmul.bf16.vlgmr.msra.gmra.mxu1 %v11155_v24  ;;  %6059 = vmatmul.bf16.vlgmr.msra.gmra.mxu2 %v11157_v58  ;;  %v5813_v25 = vpop.f32.mrf.mxu3 }
 0x88e   :  { %v5814_v37 = vadd.f32 %v5813_v25, %v11192_v33  ;;  %v8099_v33 = vld [vmem:[#allocation28 + $0x1c0] sm:$0xf] }
 0x88f   :  { %6065 = vmatpush.bf16.msra.mxu3 %v8028_v18  ;;  %6078 = vmatpush.bf16.msrb.mxu0 %v8220_v21  ;;  %v9912_v18 = vld [vmem:[#allocation28 + $0x504] sm:$0xf0]  ;;  %v5828_v21 = vpop.f32.mrf.mxu0  ;;  %v8100_v35 = vor.u32 %v9810_v47, %v8099_v33  ;;  %v9978_v33 = vld [vmem:[#allocation28 + $0x714] sm:$0xf0]  ;;  %v8963_v47 = vld [vmem:[#allocation28 + $0x880] sm:$0xf] }
 0x890   :  { %6091 = vmatpush.bf16.msrb.mxu1 %v8412_v28  ;;  %6104 = vmatpush.bf16.msrb.mxu2 %v8604_v29  ;;  %v5852_v10 = vpop.f32.mrf.mxu2  ;;  %v5827_v27 = vadd.f32 %v5826_v59, %v5814_v37  ;;  %v7932_v28 = vor.u32 %v9768_v5, %v7931_v3  ;;  %v8124_v29 = vor.u32 %v9816_v19, %v8123_v26  ;;  %v11203_v55 = vpop.eup %10191  ;;  %v9395_v3 = vld [vmem:[#allocation28 + $0xbe0] sm:$0xf]  ;;  %v10134_v5 = vld [vmem:[#allocation28 + $0xbf4] sm:$0xf0]  ;;  %v9984_v37 = vld [vmem:[#allocation28 + $0x744] sm:$0xf0] }
 0x891   :  { %v8508_v20 = vor.u32 %v9912_v18, %v8507_v15  ;;  %v8820_v26 = vor.u32 %v9990_v60, %v8819_v4  ;;  %v9012_v19 = vor.u32 %v10038_v62, %v9011_v49  ;;  %v9396_v14 = vor.u32 %v10134_v5, %v9395_v3  ;;  %v8987_v15 = vld [vmem:[#allocation28 + $0x8b0] sm:$0xf]  ;;  %v10032_v18 = vld [vmem:[#allocation28 + $0x8c4] sm:$0xf0]  ;;  %v9966_v3 = vld [vmem:[#allocation28 + $0x6b4] sm:$0xf0] }
 0x892   :  { %v5841_v30 = vpop.f32.mrf.mxu1  ;;  %v9179_v21 = vld [vmem:[#allocation28 + $0xa30] sm:$0xf]  ;;  %v8796_v48 = vor.u32 %v9984_v37, %v8795_v9  ;;  %v6305_v4 = vand.u32 2147483647, %v11199_v22  ;;  %v6307_v60 = vand.u32 2147483648, %v11199_v22  ;;  %vm6302_vm2 = vweird.f32 %v11203_v55 }
 0x893   :  { %6066 = vmatpush.bf16.msra.mxu3 %v8004_v32  ;;  %6079 = vmatpush.bf16.msrb.mxu0 %v8196_v51  ;;  %v5840_v32 = vadd.f32 %v5839_v38, %v5827_v27  ;;  %v9858_v51 = vld [vmem:[#allocation28 + $0x354] sm:$0xf0]  ;;  %v8459_v38 = vld [vmem:[#allocation28 + $0x490] sm:$0xf]  ;;  %v10080_v27 = vld [vmem:[#allocation28 + $0xa44] sm:$0xf0] }
 0x894   :  { %6092 = vmatpush.bf16.msrb.mxu1 %v8388_v53  ;;  %6105 = vmatpush.bf16.msrb.mxu2 %v8580_v2  ;;  %v7883_v53 = vld [vmem:[#allocation28 + $0x10] sm:$0xf]  ;;  %v9756_v2 = vld [vmem:[#allocation28 + $0x24] sm:$0xf0]  ;;  %v8292_v59 = vor.u32 %v9858_v51, %v8291_v61  ;;  %v8460_v25 = vor.u32 %v9900_v54, %v8459_v38  ;;  %v8915_v5 = vld [vmem:[#allocation28 + $0x820] sm:$0xf] }
 0x895   :  { %v5853_v39 = vadd.f32 %v5852_v10, %v5840_v32  ;;  %v7884_v1 = vor.u32 %v9756_v2, %v7883_v53  ;;  %v9371_v30 = vld [vmem:[#allocation28 + $0xbb0] sm:$0xf]  ;;  %v9180_v32 = vor.u32 %v10080_v27, %v9179_v21  ;;  %v10074_v53 = vld [vmem:[#allocation28 + $0xa14] sm:$0xf0]  ;;  %v9347_v2 = vld [vmem:[#allocation28 + $0xb80] sm:$0xf] }
 0x896   :  { %v9131_v38 = vld [vmem:[#allocation28 + $0x9d0] sm:$0xf]  ;;  %v10068_v54 = vld [vmem:[#allocation28 + $0x9e4] sm:$0xf0]  ;;  %v10062_v9 = vld [vmem:[#allocation28 + $0x9b4] sm:$0xf0] }
 0x897   :  { %6067 = vmatpush.bf16.msra.mxu3 %v7980_v13  ;;  %6080 = vmatpush.bf16.msrb.mxu0 %v8172_v41  ;;  %v8484_v13 = vor.u32 %v9906_v52, %v8483_v17  ;;  %v5815_v41 = vpop.f32.mrf.mxu3  ;;  %v10026_v17 = vld [vmem:[#allocation28 + $0x894] sm:$0xf0]  ;;  %v9155_v52 = vld [vmem:[#allocation28 + $0xa00] sm:$0xf]  ;;  %vm11229_vm4 = vmor %vm6301_vm3, %vm6302_vm2  ;;  %v6308_v21 = vor.u32 1.1754944e-38, %v6307_v60  ;;  %vm6306_vm5 = vcmp.eq.f32.partialorder %v6305_v4, 8.507059e+37 }
 0x898   :  { %6093 = vmatpush.bf16.msrb.mxu1 %v8364_v63  ;;  %6106 = vmatpush.bf16.msrb.mxu2 %v8556_v56  ;;  %v9402_v63 = vmul.f32 -1.442695, %v5853_v39  ;;  %v5854_v56 = vpop.f32.mrf.mxu2  ;;  %v10122_v39 = vld [vmem:[#allocation28 + $0xb94] sm:$0xf0]  ;;  %v8939_v41 = vld [vmem:[#allocation28 + $0x850] sm:$0xf] }
 0x899   :  { %v10116_v56 = vld [vmem:[#allocation28 + $0xb64] sm:$0xf0]  ;;  %v8699_v27 = vld [vmem:[#allocation28 + $0x670] sm:$0xf]  ;;  %vm6397_vm3 = vcmask 1045508  }
 0x89a   :  { %10193 = vpow2.f32 %v9402_v63  ;;  %v9323_v63 = vld [vmem:[#allocation28 + $0xb50] sm:$0xf] }
 0x89b   :  { %6068 = vmatpush.bf16.msra.mxu3 %v7956_v36  ;;  %6081 = vmatpush.bf16.msrb.mxu0 %v8148_v46  ;;  %v8076_v36 = vor.u32 %v9804_v11, %v8075_v23  ;;  %v10086_v46 = vld [vmem:[#allocation28 + $0xa74] sm:$0xf0]  ;;  %v8964_v23 = vor.u32 %v10026_v17, %v8963_v47  ;;  %v8747_v11 = vld [vmem:[#allocation28 + $0x6d0] sm:$0xf] }
 0x89c   :  { %6094 = vmatpush.bf16.msrb.mxu1 %v8340_v6  ;;  %6107 = vmatpush.bf16.msrb.mxu2 %v8532_v7  ;;  %v6297_v6 = vmul.f32 %v11203_v55, %v11199_v22  ;;  %v8268_v7 = vor.u32 %v9852_v45, %v8267_v12  ;;  %v9204_v10 = vor.u32 %v10086_v46, %v9203_v8  ;;  %v9972_v12 = vld [vmem:[#allocation28 + $0x6e4] sm:$0xf0]  ;;  %v8723_v46 = vld [vmem:[#allocation28 + $0x6a0] sm:$0xf] }
 0x89d   :  { %v10020_v45 = vld [vmem:[#allocation28 + $0x864] sm:$0xf0]  ;;  %v8724_v22 = vor.u32 %v9966_v3, %v8723_v46  ;;  %v10098_v46 = vld [vmem:[#allocation28 + $0xad4] sm:$0xf0] }
 0x89f   :  { %6069 = vmatpush.bf16.msra.mxu3 %v7932_v28  ;;  %6082 = vmatpush.bf16.msrb.mxu0 %v8124_v29  ;;  %v10128_v28 = vld [vmem:[#allocation28 + $0xbc4] sm:$0xf0]  ;;  %v6298_v29 = vsub.f32 1.0, %v6297_v6 }
 0x8a0   :  { %6095 = vmatpush.bf16.msrb.mxu1 %v8316_v31  ;;  %6108 = vmatpush.bf16.msrb.mxu2 %v8508_v20  ;;  %v10194_v40 = vpop.eup %10193  ;;  %v8988_v31 = vor.u32 %v10032_v18, %v8987_v15  ;;  %v8771_v20 = vld [vmem:[#allocation28 + $0x700] sm:$0xf]  ;;  %v9372_v51 = vor.u32 %v10128_v28, %v9371_v30  ;;  %v3718_v15 = vperm.slane %v11179_v16, 2  ;;  %v9960_v30 = vld [vmem:[#allocation28 + $0x684] sm:$0xf0] }
 0x8a1   :  { %v11207_v61 = vadd.f32 1.0, %v10194_v40  ;;  %v8891_v40 = vld [vmem:[#allocation28 + $0x7f0] sm:$0xf] }
 0x8a3   :  { %6070 = vmatpush.bf16.msra.mxu3 %v7908_v34  ;;  %6083 = vmatpush.bf16.msrb.mxu0 %v8100_v35  ;;  %10195 = vrcp.f32 %v11207_v61  ;;  %v6299_v34 = vmul.f32 %v11203_v55, %v6298_v29  ;;  %v8772_v35 = vor.u32 %v9978_v33, %v8771_v20  ;;  %vm6316_vm7 = vweird.f32 %v11207_v61 }
 0x8a4   :  { %6096 = vmatpush.bf16.msrb.mxu1 %v8292_v59  ;;  %6109 = vmatpush.bf16.msrb.mxu2 %v8484_v13  ;;  %v9156_v59 = vor.u32 %v10074_v53, %v9155_v52  ;;  %v9348_v13 = vor.u32 %v10122_v39, %v9347_v2  ;;  %v6320_v52 = vand.u32 2147483647, %v11207_v61  ;;  %v9275_v39 = vld [vmem:[#allocation28 + $0xaf0] sm:$0xf] }
 0x8a5   :  { %v6300_v62 = vadd.f32 %v11203_v55, %v6299_v34  ;;  %v11240_v34 = vld.sshfl [vmem:[#allocation1] sm:$0xff pattern:$0x73625140] }
 0x8a6   :  { %vm6321_vm9 = vcmp.eq.f32.partialorder %v6320_v52, 8.507059e+37  ;;  %v8629_v52 = vld [vmem:[#allocation28 + $0x5f8] sm:$0xf0] }
 0x8a7   :  { %6071 = vmatpush.bf16.msra.mxu3 %v7884_v1  ;;  %6084 = vmatpush.bf16.msrb.mxu0 %v8076_v36  ;;  %v5878_v49 = vpop.f32.mrf.mxu0  ;;  %v8748_v1 = vor.u32 %v9972_v12, %v8747_v11  ;;  %v8940_v36 = vor.u32 %v10020_v45, %v8939_v41  ;;  %v6304_v16 = vsel %vm11229_vm4, %v11203_v55, %v6300_v62  ;;  %v10104_v55 = vld [vmem:[#allocation28 + $0xb04] sm:$0xf0]  ;;  %v8675_v11 = vld [vmem:[#allocation28 + $0x640] sm:$0xf]  ;;  %v9954_v12 = vld [vmem:[#allocation28 + $0x654] sm:$0xf0] }
 0x8a8   :  { %6097 = vmatpush.bf16.msrb.mxu1 %v8268_v7  ;;  %6110 = vmatpush.bf16.msrb.mxu2 %v8460_v25  ;;  %v9132_v7 = vor.u32 %v10068_v54, %v9131_v38  ;;  %v9324_v25 = vor.u32 %v10116_v56, %v9323_v63  ;;  %v8867_v54 = vld [vmem:[#allocation28 + $0x7c0] sm:$0xf]  ;;  %v10002_v63 = vld [vmem:[#allocation28 + $0x7d4] sm:$0xf0]  ;;  %vm6399_vm4 = vcmask 1043456  }
 0x8a9   :  { %v11221_v6 = vpop.eup %10195  ;;  %v9059_v56 = vld [vmem:[#allocation28 + $0x940] sm:$0xf] }
 0x8aa   :  { %6072 = vmatmul.bf16.vlgmr.msra.gmra.mxu3 %v11131_v0  ;;  %6085 = vmatmul.bf16.vlgmr.msrb.gmra.mxu0 %v11133_v42  ;;  %v11219_v8 = vpop.f32.mrf.mxu1  ;;  %v6312_v37 = vmul.f32 %v11221_v6, %v11207_v61  ;;  %vm6317_vm6 = vweird.f32 %v11221_v6 }
 0x8ab   :  { %6116 = vmatpush.bf16.msrb.mxu3 %v8820_v26  ;;  %6129 = vmatpush.bf16.msra.mxu0 %v9012_v19  ;;  %v10014_v26 = vld [vmem:[#allocation28 + $0x834] sm:$0xf0]  ;;  %v9107_v19 = vld [vmem:[#allocation28 + $0x9a0] sm:$0xf]  ;;  %vm11248_vm8 = vmor %vm6316_vm7, %vm6317_vm6 }
 0x8ac   :  { %6142 = vmatpush.bf16.msra.mxu1 %v9204_v10  ;;  %6155 = vmatpush.bf16.msra.mxu2 %v9396_v14  ;;  %v9299_v10 = vld [vmem:[#allocation28 + $0xb20] sm:$0xf]  ;;  %v10110_v14 = vld [vmem:[#allocation28 + $0xb34] sm:$0xf0]  ;;  %v6313_v28 = vsub.f32 1.0, %v6312_v37  ;;  %v8916_v29 = vor.u32 %v10014_v26, %v8915_v5  ;;  %v9108_v20 = vor.u32 %v10062_v9, %v9107_v19  ;;  %v8676_v37 = vor.u32 %v9954_v12, %v8675_v11 }
 0x8ad   :  { %6098 = vmatmul.bf16.vlgmr.msrb.gmra.mxu1 %v11135_v43  ;;  %6111 = vmatmul.bf16.vlgmr.msrb.gmra.mxu2 %v11137_v44  ;;  %v9300_v33 = vor.u32 %v10110_v14, %v9299_v10  ;;  %v5865_v47 = vpop.f32.mrf.mxu3  ;;  %v6414_v5 = vld.sshfl [vmem:[#allocation1 + $0x8] sm:$0xff pattern:$0x73625140]  ;;  %v8868_v10 = vor.u32 %v10002_v63, %v8867_v54  ;;  %v9996_v14 = vld [vmem:[#allocation28 + $0x7a4] sm:$0xf0] }
 0x8ae   :  { %v6314_v17 = vmul.f32 %v11221_v6, %v6313_v28  ;;  %v5866_v53 = vadd.f32 %v5865_v47, %v3718_v15  ;;  %v9035_v15 = vld [vmem:[#allocation28 + $0x910] sm:$0xf]  ;;  %v10092_v28 = vld [vmem:[#allocation28 + $0xaa4] sm:$0xf0]  ;;  %v9789_v11 = vld [vmem:[#allocation28 + $0x134] sm:$0xf] }
 0x8af   :  { %6117 = vmatpush.bf16.msrb.mxu3 %v8796_v48  ;;  %6130 = vmatpush.bf16.msra.mxu0 %v8988_v31  ;;  %v10008_v48 = vld [vmem:[#allocation28 + $0x804] sm:$0xf0]  ;;  %v6322_v31 = vand.u32 2147483648, %v11207_v61  ;;  %v10050_v61 = vld [vmem:[#allocation28 + $0x954] sm:$0xf0] }
 0x8b0   :  { %6143 = vmatpush.bf16.msra.mxu1 %v9180_v32  ;;  %6156 = vmatpush.bf16.msra.mxu2 %v9372_v51  ;;  %v9083_v32 = vld [vmem:[#allocation28 + $0x970] sm:$0xf]  ;;  %v10056_v51 = vld [vmem:[#allocation28 + $0x984] sm:$0xf0]  ;;  %v5904_v2 = vpop.f32.mrf.mxu2  ;;  %v5879_v41 = vadd.f32 %v5878_v49, %v5866_v53  ;;  %v8892_v38 = vor.u32 %v10008_v48, %v8891_v40  ;;  %v9795_v40 = vld [vmem:[#allocation28 + $0x164] sm:$0xf] }
 0x8b1   :  { %v6323_v60 = vor.u32 1.1754944e-38, %v6322_v31  ;;  %v9084_v62 = vor.u32 %v10056_v51, %v9083_v32  ;;  %v8053_v48 = vld [vmem:[#allocation28 + $0x178] sm:$0xf0]  ;;  %v9843_v31 = vld [vmem:[#allocation28 + $0x2e4] sm:$0xf] }
 0x8b2   :  { %v5893_v45 = vpop.f32.mrf.mxu1  ;;  %v5892_v49 = vadd.f32 %v11219_v8, %v5879_v41  ;;  %v8843_v8 = vld [vmem:[#allocation28 + $0x790] sm:$0xf]  ;;  %v8437_v51 = vld [vmem:[#allocation28 + $0x478] sm:$0xf0]  ;;  %v8029_v12 = vld [vmem:[#allocation28 + $0x148] sm:$0xf0] }
 0x8b3   :  { %6118 = vmatpush.bf16.msrb.mxu3 %v8772_v35  ;;  %6131 = vmatpush.bf16.msra.mxu0 %v8964_v23  ;;  %v5880_v35 = vpop.f32.mrf.mxu0  ;;  %v8700_v23 = vor.u32 %v9960_v30, %v8699_v27  ;;  %v10044_v27 = vld [vmem:[#allocation28 + $0x924] sm:$0xf0]  ;;  %v9227_v30 = vld [vmem:[#allocation28 + $0xa90] sm:$0xf]  ;;  %v8844_v32 = vor.u32 %v9996_v14, %v8843_v8  ;;  %v9837_v45 = vld [vmem:[#allocation28 + $0x2b4] sm:$0xf] }
 0x8b4   :  { %6144 = vmatpush.bf16.msra.mxu1 %v9156_v59  ;;  %6157 = vmatpush.bf16.msra.mxu2 %v9348_v13  ;;  %v11242_v59 = vsel %vm6306_vm5, %v6308_v21, %v6304_v16  ;;  %v6315_v13 = vadd.f32 %v11221_v6, %v6314_v17  ;;  %v11258_v9 = vadd.f32 %v5904_v2, %v5892_v49  ;;  %v9939_v17 = vld [vmem:[#allocation28 + $0x5e4] sm:$0xf]  ;;  %v9885_v54 = vld [vmem:[#allocation28 + $0x434] sm:$0xf]  ;;  %v8413_v63 = vld [vmem:[#allocation28 + $0x448] sm:$0xf0] }
 0x8b5   :  { %v6425_v19 = vsub.f32 %v11242_v59, %v11240_v34  ;;  %v5867_v21 = vpop.f32.mrf.mxu3  ;;  %v9036_v2 = vor.u32 %v10044_v27, %v9035_v15  ;;  %v8056_v35 = vor.u32 %v9795_v40, %v8053_v48  ;;  %v8632_v41 = vor.u32 %v9939_v17, %v8629_v52  ;;  %v9777_v14 = vld [vmem:[#allocation28 + $0xd4] sm:$0xf]  ;;  %v7981_v15 = vld [vmem:[#allocation28 + $0xe8] sm:$0xf0]  ;;  %v8149_v17 = vld [vmem:[#allocation28 + $0x238] sm:$0xf0] }
 0x8b6   :  { %v6319_v3 = vsel %vm11248_vm8, %v11221_v6, %v6315_v13  ;;  %v9060_v6 = vor.u32 %v10050_v61, %v9059_v56  ;;  %v8605_v56 = vld [vmem:[#allocation28 + $0x5c8] sm:$0xf0]  ;;  %v9783_v61 = vld [vmem:[#allocation28 + $0x104] sm:$0xf]  ;;  %v9825_v21 = vld [vmem:[#allocation28 + $0x254] sm:$0xf] }
 0x8b7   :  { %6119 = vmatpush.bf16.msrb.mxu3 %v8748_v1  ;;  %6132 = vmatpush.bf16.msra.mxu0 %v8940_v36  ;;  %v9276_v1 = vor.u32 %v10104_v55, %v9275_v39  ;;  %v9251_v36 = vld [vmem:[#allocation28 + $0xac0] sm:$0xf]  ;;  %v6324_v26 = vsel %vm6321_vm9, %v6323_v60, %v6319_v3  ;;  %v9228_v39 = vor.u32 %v10092_v28, %v9227_v30  ;;  %v6431_v55 = vand.u32 2147483647, %v6425_v19  ;;  %v9927_v19 = vld [vmem:[#allocation28 + $0x584] sm:$0xf] }
 0x8b8   :  { %6145 = vmatpush.bf16.msra.mxu1 %v9132_v7  ;;  %6158 = vmatpush.bf16.msra.mxu2 %v9324_v25  ;;  %v8651_v7 = vld [vmem:[#allocation28 + $0x610] sm:$0xf]  ;;  %v9948_v25 = vld [vmem:[#allocation28 + $0x624] sm:$0xf0]  ;;  %v9252_v18 = vor.u32 %v10098_v46, %v9251_v36  ;;  %v6392_v16 = vrot.slane %v6324_v26, 6  ;;  %v8416_v46 = vor.u32 %v9885_v54, %v8413_v63 }
 0x8b9   :  { %v8652_v47 = vor.u32 %v9948_v25, %v8651_v7  ;;  %v6437_v4 = vsel %vm404_vm0, %v6431_v55, 0.0  ;;  %v8005_v36 = vld [vmem:[#allocation28 + $0x118] sm:$0xf0]  ;;  %v9879_v25 = vld [vmem:[#allocation28 + $0x404] sm:$0xf] }
 0x8ba   :  { %v11262_v53 = vsel %vm404_vm0, %v11242_v59, %v6392_v16  ;;  %v9933_v59 = vld [vmem:[#allocation28 + $0x5b4] sm:$0xf]  ;;  %v8197_v7 = vld [vmem:[#allocation28 + $0x298] sm:$0xf0]  ;;  %v8173_v27 = vld [vmem:[#allocation28 + $0x268] sm:$0xf0]  ;;  %v7984_v16 = vor.u32 %v9777_v14, %v7981_v15 }
 0x8bb   :  { %6120 = vmatpush.bf16.msrb.mxu3 %v8724_v22  ;;  %6133 = vmatpush.bf16.msra.mxu0 %v8916_v29  ;;  %v6426_v22 = vsub.f32 %v6324_v26, %v6414_v5  ;;  %v5906_v29 = vpop.f32.mrf.mxu2  ;;  %v8608_v3 = vor.u32 %v9933_v59, %v8605_v56  ;;  %v9831_v5 = vld [vmem:[#allocation28 + $0x284] sm:$0xf]  ;;  %v8389_v26 = vld [vmem:[#allocation28 + $0x418] sm:$0xf0]  ;;  %v9873_v30 = vld [vmem:[#allocation28 + $0x3d4] sm:$0xf] }
 0x8bc   :  { %6146 = vmatpush.bf16.msra.mxu1 %v9108_v20  ;;  %6159 = vmatpush.bf16.msra.mxu2 %v9300_v33  ;;  %v8245_v20 = vld [vmem:[#allocation28 + $0x2f8] sm:$0xf0]  ;;  %v9891_v33 = vld [vmem:[#allocation28 + $0x464] sm:$0xf]  ;;  %v8200_v8 = vor.u32 %v9831_v5, %v8197_v7  ;;  %v8365_v28 = vld [vmem:[#allocation28 + $0x3e8] sm:$0xf0] }
 0x8bd   :  { %v6432_v34 = vand.u32 2147483647, %v6426_v22  ;;  %v8440_v13 = vor.u32 %v9891_v33, %v8437_v51  ;;  %v9921_v22 = vld [vmem:[#allocation28 + $0x554] sm:$0xf]  ;;  %v8557_v29 = vld [vmem:[#allocation28 + $0x568] sm:$0xf0] }
 0x8be   :  { %v7957_v33 = vld [vmem:[#allocation28 + $0xb8] sm:$0xf0]  ;;  %v9819_v51 = vld [vmem:[#allocation28 + $0x224] sm:$0xf]  ;;  %v9861_v54 = vld [vmem:[#allocation28 + $0x374] sm:$0xf] }
 0x8bf   :  { %6121 = vmatpush.bf16.msrb.mxu3 %v8700_v23  ;;  %6134 = vmatpush.bf16.msra.mxu0 %v8892_v38  ;;  %v8248_v23 = vor.u32 %v9843_v31, %v8245_v20  ;;  %v8221_v38 = vld [vmem:[#allocation28 + $0x2c8] sm:$0xf0]  ;;  %v6438_v60 = vsel %vm404_vm0, %v6432_v34, 0.0  ;;  %v8176_v31 = vor.u32 %v9825_v21, %v8173_v27  ;;  %v9771_v20 = vld [vmem:[#allocation28 + $0xa4] sm:$0xf] }
 0x8c0   :  { %6147 = vmatpush.bf16.msra.mxu1 %v9084_v62  ;;  %6160 = vmatpush.bf16.msra.mxu2 %v9276_v1  ;;  %v8032_v62 = vor.u32 %v9789_v11, %v8029_v12  ;;  %v8224_v1 = vor.u32 %v9837_v45, %v8221_v38  ;;  %v11266_v49 = vadd.f32 %v6438_v60, %v6437_v4  ;;  %v9867_v52 = vld [vmem:[#allocation28 + $0x3a4] sm:$0xf]  ;;  %v8533_v55 = vld [vmem:[#allocation28 + $0x538] sm:$0xf0]  ;;  %v7933_v11 = vld [vmem:[#allocation28 + $0x88] sm:$0xf0] }
 0x8c1   :  { %v7960_v34 = vor.u32 %v9771_v20, %v7957_v33  ;;  %v9813_v45 = vld [vmem:[#allocation28 + $0x1f4] sm:$0xf]  ;;  %v8125_v38 = vld [vmem:[#allocation28 + $0x208] sm:$0xf0]  ;;  %v7909_v5 = vld [vmem:[#allocation28 + $0x58] sm:$0xf0] }
 0x8c2   :  { %v8317_v56 = vld [vmem:[#allocation28 + $0x388] sm:$0xf0]  ;;  %v9909_v4 = vld [vmem:[#allocation28 + $0x4f4] sm:$0xf]  ;;  %v8485_v14 = vld [vmem:[#allocation28 + $0x4d8] sm:$0xf0] }
 0x8c3   :  { %6122 = vmatpush.bf16.msrb.mxu3 %v8676_v37  ;;  %6135 = vmatpush.bf16.msra.mxu0 %v8868_v10  ;;  %v8581_v37 = vld [vmem:[#allocation28 + $0x598] sm:$0xf0]  ;;  %v8008_v10 = vor.u32 %v9783_v61, %v8005_v36  ;;  %v8509_v60 = vld [vmem:[#allocation28 + $0x508] sm:$0xf0]  ;;  %v8320_v7 = vor.u32 %v9861_v54, %v8317_v56  ;;  %v9753_v15 = vld [vmem:[#allocation28 + $0x14] sm:$0xf] }
 0x8c4   :  { %6148 = vmatpush.bf16.msra.mxu1 %v9060_v6  ;;  %6161 = vmatpush.bf16.msra.mxu2 %v9252_v18  ;;  %v8392_v6 = vor.u32 %v9879_v25, %v8389_v26  ;;  %v8584_v18 = vor.u32 %v9927_v19, %v8581_v37  ;;  %v8512_v25 = vor.u32 %v9909_v4, %v8509_v60  ;;  %v9807_v26 = vld [vmem:[#allocation28 + $0x1c4] sm:$0xf]  ;;  %v8101_v19 = vld [vmem:[#allocation28 + $0x1d8] sm:$0xf0]  ;;  %v8461_v20 = vld [vmem:[#allocation28 + $0x4a8] sm:$0xf0] }
 0x8c5   :  { %v8104_v27 = vor.u32 %v9807_v26, %v8101_v19  ;;  %v8989_v56 = vld [vmem:[#allocation28 + $0x8c8] sm:$0xf0]  ;;  %v10077_v4 = vld [vmem:[#allocation28 + $0xa34] sm:$0xf] }
 0x8c6   :  { %v9181_v60 = vld [vmem:[#allocation28 + $0xa48] sm:$0xf0] }
 0x8c7   :  { %6123 = vmatpush.bf16.msrb.mxu3 %v8652_v47  ;;  %6136 = vmatpush.bf16.msra.mxu0 %v8844_v32  ;;  %v5930_v40 = vpop.f32.mrf.mxu0  ;;  %v8368_v47 = vor.u32 %v9873_v30, %v8365_v28  ;;  %v8560_v32 = vor.u32 %v9921_v22, %v8557_v29  ;;  %v9801_v30 = vld [vmem:[#allocation28 + $0x194] sm:$0xf]  ;;  %v8077_v28 = vld [vmem:[#allocation28 + $0x1a8] sm:$0xf0]  ;;  %v9184_v26 = vor.u32 %v10077_v4, %v9181_v60 }
 0x8c8   :  { %6149 = vmatpush.bf16.msra.mxu1 %v9036_v2  ;;  %6162 = vmatpush.bf16.msra.mxu2 %v9228_v39  ;;  %v8341_v2 = vld [vmem:[#allocation28 + $0x3b8] sm:$0xf0]  ;;  %v9915_v39 = vld [vmem:[#allocation28 + $0x524] sm:$0xf]  ;;  %v9849_v22 = vld [vmem:[#allocation28 + $0x314] sm:$0xf] }
 0x8c9   :  { %v8344_v12 = vor.u32 %v9867_v52, %v8341_v2  ;;  %v9013_v52 = vld [vmem:[#allocation28 + $0x8f8] sm:$0xf0]  ;;  %v10083_v2 = vld [vmem:[#allocation28 + $0xa64] sm:$0xf]  ;;  %v9085_v4 = vld [vmem:[#allocation28 + $0x988] sm:$0xf0] }
 0x8ca   :  { %6124 = vmatmul.bf16.vlgmr.msrb.gmra.mxu3 %v11151_v57  ;;  %6137 = vmatmul.bf16.vlgmr.msra.gmra.mxu0 %v11153_v50  ;;  %v5943_v48 = vpop.f32.mrf.mxu1 }
 0x8cb   :  { %6168 = vmatpush.bf16.msra.mxu3 %v8056_v35  ;;  %6181 = vmatpush.bf16.msrb.mxu0 %v8248_v23  ;;  %v8152_v35 = vor.u32 %v9819_v51, %v8149_v17  ;;  %v9765_v23 = vld [vmem:[#allocation28 + $0x74] sm:$0xf]  ;;  %v8821_v51 = vld [vmem:[#allocation28 + $0x778] sm:$0xf0]  ;;  %v10035_v17 = vld [vmem:[#allocation28 + $0x8e4] sm:$0xf] }
 0x8cc   :  { %6194 = vmatpush.bf16.msrb.mxu1 %v8440_v13  ;;  %6207 = vmatpush.bf16.msrb.mxu2 %v8632_v41  ;;  %v8536_v13 = vor.u32 %v9915_v39, %v8533_v55  ;;  %v7936_v36 = vor.u32 %v9765_v23, %v7933_v11  ;;  %v8080_v55 = vor.u32 %v9801_v30, %v8077_v28  ;;  %v9397_v23 = vld [vmem:[#allocation28 + $0xbf8] sm:$0xf0]  ;;  %v8941_v30 = vld [vmem:[#allocation28 + $0x868] sm:$0xf0]  ;;  %v10065_v28 = vld [vmem:[#allocation28 + $0x9d4] sm:$0xf] }
 0x8cd   :  { %6150 = vmatmul.bf16.vlgmr.msra.gmra.mxu1 %v11155_v24  ;;  %6163 = vmatmul.bf16.vlgmr.msra.gmra.mxu2 %v11157_v58  ;;  %v5917_v41 = vpop.f32.mrf.mxu3 }
 0x8ce   :  { %v5918_v63 = vadd.f32 %v5917_v41, %v11258_v9  ;;  %v9855_v9 = vld [vmem:[#allocation28 + $0x344] sm:$0xf]  ;;  %v9016_v41 = vor.u32 %v10035_v17, %v9013_v52  ;;  %v8917_v17 = vld [vmem:[#allocation28 + $0x838] sm:$0xf0] }
 0x8cf   :  { %6169 = vmatpush.bf16.msra.mxu3 %v8032_v62  ;;  %6182 = vmatpush.bf16.msrb.mxu0 %v8224_v1  ;;  %v5932_v62 = vpop.f32.mrf.mxu0  ;;  %v10059_v52 = vld [vmem:[#allocation28 + $0x9a4] sm:$0xf] }
 0x8d0   :  { %6195 = vmatpush.bf16.msrb.mxu1 %v8416_v46  ;;  %6208 = vmatpush.bf16.msrb.mxu2 %v8608_v3  ;;  %v5956_v59 = vpop.f32.mrf.mxu2  ;;  %v5931_v1 = vadd.f32 %v5930_v40, %v5918_v63  ;;  %v8128_v46 = vor.u32 %v9813_v45, %v8125_v38  ;;  %v9759_v3 = vld [vmem:[#allocation28 + $0x44] sm:$0xf]  ;;  %v9981_v45 = vld [vmem:[#allocation28 + $0x734] sm:$0xf]  ;;  %v8797_v38 = vld [vmem:[#allocation28 + $0x748] sm:$0xf0] }
 0x8d1   :  { %v7912_v21 = vor.u32 %v9759_v3, %v7909_v5  ;;  %v10125_v62 = vld [vmem:[#allocation28 + $0xbb4] sm:$0xf]  ;;  %v9975_v3 = vld [vmem:[#allocation28 + $0x704] sm:$0xf]  ;;  %v8773_v5 = vld [vmem:[#allocation28 + $0x718] sm:$0xf0] }
 0x8d2   :  { %v5945_v61 = vpop.f32.mrf.mxu1  ;;  %v5944_v37 = vadd.f32 %v5943_v48, %v5931_v1  ;;  %v9897_v48 = vld [vmem:[#allocation28 + $0x494] sm:$0xf]  ;;  %v9373_v1 = vld [vmem:[#allocation28 + $0xbc8] sm:$0xf0] }
 0x8d3   :  { %6170 = vmatpush.bf16.msra.mxu3 %v8008_v10  ;;  %6183 = vmatpush.bf16.msrb.mxu0 %v8200_v8  ;;  %v8293_v10 = vld [vmem:[#allocation28 + $0x358] sm:$0xf0]  ;;  %v9903_v8 = vld [vmem:[#allocation28 + $0x4c4] sm:$0xf]  ;;  %v9376_v19 = vor.u32 %v10125_v62, %v9373_v1  ;;  %v10101_v1 = vld [vmem:[#allocation28 + $0xaf4] sm:$0xf] }
 0x8d4   :  { %6196 = vmatpush.bf16.msrb.mxu1 %v8392_v6  ;;  %6209 = vmatpush.bf16.msrb.mxu2 %v8584_v18  ;;  %v7885_v6 = vld [vmem:[#allocation28 + $0x28] sm:$0xf0]  ;;  %v5957_v18 = vadd.f32 %v5956_v59, %v5944_v37  ;;  %v8296_v29 = vor.u32 %v9855_v9, %v8293_v10  ;;  %v8488_v40 = vor.u32 %v9903_v8, %v8485_v14  ;;  %v10029_v59 = vld [vmem:[#allocation28 + $0x8b4] sm:$0xf]  ;;  %v8965_v9 = vld [vmem:[#allocation28 + $0x898] sm:$0xf0] }
 0x8d5   :  { %v7888_v39 = vor.u32 %v9753_v15, %v7885_v6  ;;  %v10071_v37 = vld [vmem:[#allocation28 + $0xa04] sm:$0xf]  ;;  %v9157_v10 = vld [vmem:[#allocation28 + $0xa18] sm:$0xf0]  ;;  %v8776_v15 = vor.u32 %v9975_v3, %v8773_v5 }
 0x8d6   :  { %v9403_v33 = vmul.f32 -1.442695, %v5957_v18  ;;  %v10119_v8 = vld [vmem:[#allocation28 + $0xb84] sm:$0xf]  ;;  %v9349_v14 = vld [vmem:[#allocation28 + $0xb98] sm:$0xf0] }
 0x8d7   :  { %6171 = vmatpush.bf16.msra.mxu3 %v7984_v16  ;;  %6184 = vmatpush.bf16.msrb.mxu0 %v8176_v31  ;;  %v5919_v16 = vpop.f32.mrf.mxu3  ;;  %v8269_v31 = vld [vmem:[#allocation28 + $0x328] sm:$0xf0]  ;;  %v9969_v18 = vld [vmem:[#allocation28 + $0x6d4] sm:$0xf]  ;;  %v9951_v3 = vld [vmem:[#allocation28 + $0x644] sm:$0xf] }
 0x8d8   :  { %6197 = vmatpush.bf16.msrb.mxu1 %v8368_v47  ;;  %6210 = vmatpush.bf16.msrb.mxu2 %v8560_v32  ;;  %v5958_v47 = vpop.f32.mrf.mxu2  ;;  %v9987_v32 = vld [vmem:[#allocation28 + $0x764] sm:$0xf]  ;;  %10197 = vpow2.f32 %v9403_v33  ;;  %v8272_v11 = vor.u32 %v9849_v22, %v8269_v31  ;;  %v9133_v22 = vld [vmem:[#allocation28 + $0x9e8] sm:$0xf0]  ;;  %v8677_v5 = vld [vmem:[#allocation28 + $0x658] sm:$0xf0] }
 0x8d9   :  { %v9136_v47 = vor.u32 %v10065_v28, %v9133_v22  ;;  %v8680_v28 = vor.u32 %v9951_v3, %v8677_v5 }
 0x8db   :  { %6172 = vmatpush.bf16.msra.mxu3 %v7960_v34  ;;  %6185 = vmatpush.bf16.msrb.mxu0 %v8152_v35  ;;  %v9205_v34 = vld [vmem:[#allocation28 + $0xa78] sm:$0xf0]  ;;  %v10131_v35 = vld [vmem:[#allocation28 + $0xbe4] sm:$0xf] }
 0x8dc   :  { %6198 = vmatpush.bf16.msrb.mxu1 %v8344_v12  ;;  %6211 = vmatpush.bf16.msrb.mxu2 %v8536_v13  ;;  %v8464_v12 = vor.u32 %v9897_v48, %v8461_v20  ;;  %v8824_v13 = vor.u32 %v9987_v32, %v8821_v51  ;;  %v9208_v54 = vor.u32 %v10083_v2, %v9205_v34  ;;  %v9963_v48 = vld [vmem:[#allocation28 + $0x6a4] sm:$0xf]  ;;  %v8725_v20 = vld [vmem:[#allocation28 + $0x6b8] sm:$0xf0] }
 0x8dd   :  { %v9400_v63 = vor.u32 %v10131_v35, %v9397_v23  ;;  %v10011_v51 = vld [vmem:[#allocation28 + $0x824] sm:$0xf]  ;;  %v9301_v34 = vld [vmem:[#allocation28 + $0xb38] sm:$0xf0]  ;;  %v9957_v35 = vld [vmem:[#allocation28 + $0x674] sm:$0xf] }
 0x8de   :  { %v10198_v61 = vpop.eup %10197  ;;  %v8701_v23 = vld [vmem:[#allocation28 + $0x688] sm:$0xf0] }
 0x8df   :  { %6173 = vmatpush.bf16.msra.mxu3 %v7936_v36  ;;  %6186 = vmatpush.bf16.msrb.mxu0 %v8128_v46  ;;  %v8800_v36 = vor.u32 %v9981_v45, %v8797_v38  ;;  %v8992_v46 = vor.u32 %v10029_v59, %v8989_v56  ;;  %v8893_v45 = vld [vmem:[#allocation28 + $0x808] sm:$0xf0]  ;;  %v10053_v56 = vld [vmem:[#allocation28 + $0x974] sm:$0xf] }
 0x8e0   :  { %6199 = vmatpush.bf16.msrb.mxu1 %v8320_v7  ;;  %6212 = vmatpush.bf16.msrb.mxu2 %v8512_v25  ;;  %v10023_v7 = vld [vmem:[#allocation28 + $0x884] sm:$0xf]  ;;  %v11273_v25 = vadd.f32 1.0, %v10198_v61  ;;  %v9277_v61 = vld [vmem:[#allocation28 + $0xb08] sm:$0xf0] }
 0x8e1   :  { %v8968_v6 = vor.u32 %v10023_v7, %v8965_v9  ;;  %v9999_v9 = vld [vmem:[#allocation28 + $0x7c4] sm:$0xf] }
 0x8e2   :  { %10199 = vrcp.f32 %v11273_v25  ;;  %v6337_v38 = vand.u32 2147483648, %v11273_v25  ;;  %vm6331_vm11 = vweird.f32 %v11273_v25 }
 0x8e3   :  { %6174 = vmatpush.bf16.msra.mxu3 %v7912_v21  ;;  %6187 = vmatpush.bf16.msrb.mxu0 %v8104_v27  ;;  %v8749_v21 = vld [vmem:[#allocation28 + $0x6e8] sm:$0xf0]  ;;  %v9352_v27 = vor.u32 %v10119_v8, %v9349_v14 }
 0x8e4   :  { %6200 = vmatpush.bf16.msrb.mxu1 %v8296_v29  ;;  %6213 = vmatpush.bf16.msrb.mxu2 %v8488_v40  ;;  %v10113_v29 = vld [vmem:[#allocation28 + $0xb54] sm:$0xf]  ;;  %v9325_v40 = vld [vmem:[#allocation28 + $0xb68] sm:$0xf0]  ;;  %v6338_v14 = vor.u32 1.1754944e-38, %v6337_v38 }
 0x8e5   :  { %v9328_v32 = vor.u32 %v10113_v29, %v9325_v40  ;;  %v9945_v29 = vld [vmem:[#allocation28 + $0x614] sm:$0xf]  ;;  %v8653_v40 = vld [vmem:[#allocation28 + $0x628] sm:$0xf0] }
 0x8e7   :  { %6175 = vmatpush.bf16.msra.mxu3 %v7888_v39  ;;  %6188 = vmatpush.bf16.msrb.mxu0 %v8080_v55  ;;  %v11280_v16 = vpop.f32.mrf.mxu0  ;;  %v9109_v39 = vld [vmem:[#allocation28 + $0x9b8] sm:$0xf0]  ;;  %v10107_v55 = vld [vmem:[#allocation28 + $0xb24] sm:$0xf] }
 0x8e8   :  { %6201 = vmatpush.bf16.msrb.mxu1 %v8272_v11  ;;  %6214 = vmatpush.bf16.msrb.mxu2 %v8464_v12  ;;  %v10200_v33 = vpop.eup %10199  ;;  %v8728_v12 = vor.u32 %v9963_v48, %v8725_v20 }
 0x8e9   :  { %v6327_v2 = vmul.f32 %v10200_v33, %v11273_v25  ;;  %vm6332_vm10 = vweird.f32 %v10200_v33 }
 0x8ea   :  { %6176 = vmatmul.bf16.vlgmr.msra.gmra.mxu3 %v11131_v0  ;;  %6189 = vmatmul.bf16.vlgmr.msrb.gmra.mxu0 %v11133_v42  ;;  %v9160_v0 = vor.u32 %v10071_v37, %v9157_v10  ;;  %v10017_v42 = vld [vmem:[#allocation28 + $0x854] sm:$0xf]  ;;  %v8869_v37 = vld [vmem:[#allocation28 + $0x7d8] sm:$0xf0]  ;;  %v10047_v10 = vld [vmem:[#allocation28 + $0x944] sm:$0xf] }
 0x8eb   :  { %6220 = vmatpush.bf16.msrb.mxu3 %v8824_v13  ;;  %6233 = vmatpush.bf16.msra.mxu0 %v9016_v41  ;;  %v8944_v31 = vor.u32 %v10017_v42, %v8941_v30  ;;  %v6328_v11 = vsub.f32 1.0, %v6327_v2  ;;  %v8920_v13 = vor.u32 %v10011_v51, %v8917_v17  ;;  %v10005_v41 = vld [vmem:[#allocation28 + $0x7f4] sm:$0xf]  ;;  %vm6333_vm12 = vmor %vm6331_vm11, %vm6332_vm10  ;;  %v8872_v22 = vor.u32 %v9999_v9, %v8869_v37 }
 0x8ec   :  { %6246 = vmatpush.bf16.msra.mxu1 %v9208_v54  ;;  %6259 = vmatpush.bf16.msra.mxu2 %v9400_v63  ;;  %v9112_v54 = vor.u32 %v10059_v52, %v9109_v39  ;;  %v9304_v63 = vor.u32 %v10107_v55, %v9301_v34  ;;  %v10089_v17 = vld [vmem:[#allocation28 + $0xa94] sm:$0xf]  ;;  %v9229_v52 = vld [vmem:[#allocation28 + $0xaa8] sm:$0xf0]  ;;  %v8656_v39 = vor.u32 %v9945_v29, %v8653_v40 }
 0x8ed   :  { %6202 = vmatmul.bf16.vlgmr.msrb.gmra.mxu1 %v11135_v43  ;;  %6215 = vmatmul.bf16.vlgmr.msrb.gmra.mxu2 %v11137_v44  ;;  %v11282_v43 = vpop.f32.mrf.mxu1  ;;  %v8752_v44 = vor.u32 %v9969_v18, %v8749_v21  ;;  %v11286_v59 = vpop.f32.mrf.mxu3  ;;  %v6329_v60 = vmul.f32 %v10200_v33, %v6328_v11  ;;  %v9061_v18 = vld [vmem:[#allocation28 + $0x958] sm:$0xf0] }
 0x8ee   :  { %v6415_v21 = vld.sshfl [vmem:[#allocation1 + $0x10] sm:$0xff pattern:$0x73625140] }
 0x8ef   :  { %6221 = vmatpush.bf16.msrb.mxu3 %v8800_v36  ;;  %6234 = vmatpush.bf16.msra.mxu0 %v8992_v46  ;;  %v6335_v36 = vand.u32 2147483647, %v11273_v25  ;;  %v5984_v46 = vpop.f32.mrf.mxu0  ;;  %v6330_v8 = vadd.f32 %v10200_v33, %v6329_v60  ;;  %v9064_v25 = vor.u32 %v10047_v10, %v9061_v18 }
 0x8f0   :  { %6247 = vmatpush.bf16.msra.mxu1 %v9184_v26  ;;  %6260 = vmatpush.bf16.msra.mxu2 %v9376_v19  ;;  %v11288_v62 = vpop.f32.mrf.mxu2  ;;  %v8704_v26 = vor.u32 %v9957_v35, %v8701_v23  ;;  %v8896_v19 = vor.u32 %v10005_v41, %v8893_v45  ;;  %v9232_v23 = vor.u32 %v10089_v17, %v9229_v52  ;;  %v6407_v52 = vld [vmem:[%s11353_s19 + $0x8] sm:$0xf] }
 0x8f1   :  { %v6334_v42 = vsel %vm6333_vm12, %v10200_v33, %v6330_v8  ;;  %vm6336_vm13 = vcmp.eq.f32.partialorder %v6335_v36, 8.507059e+37  ;;  %v9037_v33 = vld [vmem:[#allocation28 + $0x928] sm:$0xf0]  ;;  %6412 = vst [vmem:[#allocation1 + $0x20] ss:$4 sm:$0xff] %v6407_v52 }
 0x8f2   :  { %v11295_v30 = vsel %vm6336_vm13, %v6338_v14, %v6334_v42 }
 0x8f3   :  { %6222 = vmatpush.bf16.msrb.mxu3 %v8776_v15  ;;  %6235 = vmatpush.bf16.msra.mxu0 %v8968_v6  ;;  %v9088_v15 = vor.u32 %v10053_v56, %v9085_v4  ;;  %v9280_v6 = vor.u32 %v10101_v1, %v9277_v61  ;;  %v6393_v29 = vrot.slane %v11295_v30, 4 }
 0x8f4   :  { %6248 = vmatpush.bf16.msra.mxu1 %v9160_v0  ;;  %6261 = vmatpush.bf16.msra.mxu2 %v9352_v27  ;;  %v10095_v0 = vld [vmem:[#allocation28 + $0xac4] sm:$0xf]  ;;  %v9253_v27 = vld [vmem:[#allocation28 + $0xad8] sm:$0xf0] }
 0x8f5   :  { %v5997_v7 = vpop.f32.mrf.mxu1  ;;  %v9256_v48 = vor.u32 %v10095_v0, %v9253_v27  ;;  %v5971_v20 = vpop.f32.mrf.mxu3  ;;  %v6416_v27 = vld.sshfl [vmem:[#allocation1 + $0x18] sm:$0xff pattern:$0x73625140] }
 0x8f7   :  { %6223 = vmatpush.bf16.msrb.mxu3 %v8752_v44  ;;  %6236 = vmatpush.bf16.msra.mxu0 %v8944_v31  ;;  %v9993_v44 = vld [vmem:[#allocation28 + $0x794] sm:$0xf]  ;;  %v6427_v31 = vsub.f32 %v11295_v30, %v6415_v21 }
 0x8f8   :  { %6249 = vmatpush.bf16.msra.mxu1 %v9136_v47  ;;  %6262 = vmatpush.bf16.msra.mxu2 %v9328_v32  ;;  %v8845_v47 = vld [vmem:[#allocation28 + $0x7a8] sm:$0xf0]  ;;  %v10041_v32 = vld [vmem:[#allocation28 + $0x914] sm:$0xf]  ;;  %v6010_v51 = vpop.f32.mrf.mxu2 }
 0x8f9   :  { %v6433_v2 = vand.u32 2147483647, %v6427_v31  ;;  %v8848_v55 = vor.u32 %v9993_v44, %v8845_v47  ;;  %v9040_v35 = vor.u32 %v10041_v32, %v9037_v33 }
 0x8fb   :  { %6224 = vmatpush.bf16.msrb.mxu3 %v8728_v12  ;;  %6237 = vmatpush.bf16.msra.mxu0 %v8920_v13  ;;  %v6440_v34 = vsel %vm404_vm0, %v6433_v2, 0.0  ;;  %v11302_v12 = vld [vmem:[#allocation29] sm:$0x3f] }
 0x8fc   :  { %6250 = vmatpush.bf16.msra.mxu1 %v9112_v54  ;;  %6263 = vmatpush.bf16.msra.mxu2 %v9304_v63  ;;  %v11300_v11 = vadd.f32 %v6440_v34, %v11266_v49  ;;  %v3719_v13 = vperm.slane %v11302_v12, 3 }
 0x8fe   :  { %v5970_v41 = vadd.f32 %v11286_v59, %v3719_v13 }
 0x8ff   :  { %6225 = vmatpush.bf16.msrb.mxu3 %v8704_v26  ;;  %6238 = vmatpush.bf16.msra.mxu0 %v8896_v19 }
 0x900   :  { %6251 = vmatpush.bf16.msra.mxu1 %v9088_v15  ;;  %6264 = vmatpush.bf16.msra.mxu2 %v9280_v6  ;;  %v5983_v49 = vadd.f32 %v11280_v16, %v5970_v41 }
 0x902   :  { %v5996_v38 = vadd.f32 %v11282_v43, %v5983_v49 }
 0x903   :  { %6226 = vmatpush.bf16.msrb.mxu3 %v8680_v28  ;;  %6239 = vmatpush.bf16.msra.mxu0 %v8872_v22 }
 0x904   :  { %6252 = vmatpush.bf16.msra.mxu1 %v9064_v25  ;;  %6265 = vmatpush.bf16.msra.mxu2 %v9256_v48  ;;  %v6009_v63 = vadd.f32 %v11288_v62, %v5996_v38  ;;  %v3720_v62 = vperm.slane %v11302_v12, 4 }
 0x907   :  { %6227 = vmatpush.bf16.msrb.mxu3 %v8656_v39  ;;  %6240 = vmatpush.bf16.msra.mxu0 %v8848_v55  ;;  %v6034_v45 = vpop.f32.mrf.mxu0 }
 0x908   :  { %6253 = vmatpush.bf16.msra.mxu1 %v9040_v35  ;;  %6266 = vmatpush.bf16.msra.mxu2 %v9232_v23 }
 0x90a   :  { %6228 = vmatmul.bf16.vlgmr.msrb.gmra.mxu3 %v11151_v57  ;;  %6241 = vmatmul.bf16.vlgmr.msra.gmra.mxu0 %v11153_v50  ;;  %v6047_v54 = vpop.f32.mrf.mxu1 }
 0x90b   :  { %6254 = vmatmul.bf16.vlgmr.msra.gmra.mxu1 %v11155_v24  ;;  %6267 = vmatmul.bf16.vlgmr.msra.gmra.mxu2 %v11157_v58 }
 0x90d   :  { %v6021_v56 = vpop.f32.mrf.mxu3 }
 0x90e   :  { %v6022_v4 = vadd.f32 %v6021_v56, %v6009_v63 }
 0x90f   :  { %v6036_v59 = vpop.f32.mrf.mxu0 }
 0x910   :  { %v6060_v60 = vpop.f32.mrf.mxu2  ;;  %v6035_v1 = vadd.f32 %v6034_v45, %v6022_v4 }
 0x912   :  { %v6049_v57 = vpop.f32.mrf.mxu1  ;;  %v6048_v61 = vadd.f32 %v6047_v54, %v6035_v1 }
 0x914   :  { %v6061_v50 = vadd.f32 %v6060_v60, %v6048_v61 }
 0x915   :  { %v6023_v36 = vpop.f32.mrf.mxu3 }
 0x916   :  { %v9404_v24 = vmul.f32 -1.442695, %v6061_v50 }
 0x918   :  { %v6062_v46 = vpop.f32.mrf.mxu2  ;;  %10201 = vpow2.f32 %v9404_v24 }
 0x91e   :  { %v10202_v58 = vpop.eup %10201 }
 0x91f   :  { %v6293_v16 = vadd.f32 1.0, %v10202_v58 }
 0x921   :  { %10203 = vrcp.f32 %v6293_v16  ;;  %v6352_v9 = vand.u32 2147483648, %v6293_v16  ;;  %v6350_v14 = vand.u32 2147483647, %v6293_v16  ;;  %vm6346_vm15 = vweird.f32 %v6293_v16 }
 0x923   :  { %v6353_v0 = vor.u32 1.1754944e-38, %v6352_v9  ;;  %vm6351_vm2 = vcmp.eq.f32.partialorder %v6350_v14, 8.507059e+37  ;;  %v3721_v9 = vperm.slane %v11302_v12, 5 }
 0x927   :  { %v6086_v3 = vpop.f32.mrf.mxu0  ;;  %v10204_v5 = vpop.eup %10203 }
 0x928   :  { %v6342_v7 = vmul.f32 %v10204_v5, %v6293_v16  ;;  %vm6347_vm14 = vweird.f32 %v10204_v5  ;;  %v6417_v16 = vld.sshfl [vmem:[#allocation1 + $0x20] sm:$0xff pattern:$0x73625140] }
 0x929   :  { %vm6348_vm1 = vmor %vm6346_vm15, %vm6347_vm14 }
 0x92a   :  { %v6099_v43 = vpop.f32.mrf.mxu1  ;;  %v6343_v26 = vsub.f32 1.0, %v6342_v7 }
 0x92c   :  { %v6344_v37 = vmul.f32 %v10204_v5, %v6343_v26 }
 0x92d   :  { %v6073_v19 = vpop.f32.mrf.mxu3 }
 0x92e   :  { %v6074_v10 = vadd.f32 %v6073_v19, %v3720_v62  ;;  %v6345_v21 = vadd.f32 %v10204_v5, %v6344_v37 }
 0x92f   :  { %v6088_v15 = vpop.f32.mrf.mxu0 }
 0x930   :  { %v6112_v8 = vpop.f32.mrf.mxu2  ;;  %v6087_v6 = vadd.f32 %v6086_v3, %v6074_v10  ;;  %v6349_v28 = vsel %vm6348_vm1, %v10204_v5, %v6345_v21 }
 0x931   :  { %v6354_v22 = vsel %vm6351_vm2, %v6353_v0, %v6349_v28 }
 0x932   :  { %v6101_v18 = vpop.f32.mrf.mxu1  ;;  %v6100_v42 = vadd.f32 %v6099_v43, %v6087_v6  ;;  %v6394_v44 = vrot.slane %v6354_v22, 2  ;;  %v6428_v31 = vsub.f32 %v6354_v22, %v6416_v27 }
 0x934   :  { %v6113_v40 = vadd.f32 %v6112_v8, %v6100_v42  ;;  %v6398_v20 = vsel %vm6397_vm3, %v6393_v29, %v6394_v44  ;;  %v6434_v47 = vand.u32 2147483647, %v6428_v31 }
 0x935   :  { %v6075_v25 = vpop.f32.mrf.mxu3  ;;  %v6400_v32 = vsel %vm6399_vm4, %v11262_v53, %v6398_v20 }
 0x936   :  { %v6442_v33 = vsel %vm404_vm0, %v6434_v47, 0.0  ;;  %6404 = vst [vmem:[%s11354_s20] sm:$0xff] %v6400_v32 }
 0x937   :  { %v6443_v51 = vadd.f32 %v6442_v33, %v11300_v11 }
 0x938   :  { %v6114_v48 = vpop.f32.mrf.mxu2 }
 0x947   :  { %v6138_v30 = vpop.f32.mrf.mxu0 }
 0x94a   :  { %v6151_v17 = vpop.f32.mrf.mxu1 }
 0x94d   :  { %v6125_v2 = vpop.f32.mrf.mxu3 }
 0x94e   :  { %v6126_v39 = vadd.f32 %v6125_v2, %v6113_v40  ;;  %v6418_v2 = vld.sshfl [vmem:[#allocation1 + $0x28] sm:$0xff pattern:$0x73625140] }
 0x94f   :  { %v6140_v34 = vpop.f32.mrf.mxu0 }
 0x950   :  { %v6164_v55 = vpop.f32.mrf.mxu2  ;;  %v6139_v53 = vadd.f32 %v6138_v30, %v6126_v39 }
 0x952   :  { %v6153_v35 = vpop.f32.mrf.mxu1  ;;  %v6152_v23 = vadd.f32 %v6151_v17, %v6139_v53 }
 0x954   :  { %v6165_v13 = vadd.f32 %v6164_v55, %v6152_v23 }
 0x955   :  { %v6127_v41 = vpop.f32.mrf.mxu3 }
 0x956   :  { %v9405_v49 = vmul.f32 -1.442695, %v6165_v13 }
 0x958   :  { %v6166_v45 = vpop.f32.mrf.mxu2  ;;  %10205 = vpow2.f32 %v9405_v49 }
 0x95e   :  { %v10206_v11 = vpop.eup %10205 }
 0x95f   :  { %v6294_v38 = vadd.f32 1.0, %v10206_v11 }
 0x961   :  { %10207 = vrcp.f32 %v6294_v38  ;;  %v6367_v1 = vand.u32 2147483648, %v6294_v38  ;;  %v6365_v50 = vand.u32 2147483647, %v6294_v38  ;;  %vm6361_vm6 = vweird.f32 %v6294_v38 }
 0x963   :  { %v6368_v58 = vor.u32 1.1754944e-38, %v6367_v1  ;;  %vm6366_vm8 = vcmp.eq.f32.partialorder %v6365_v50, 8.507059e+37 }
 0x967   :  { %v6190_v54 = vpop.f32.mrf.mxu0  ;;  %v10208_v56 = vpop.eup %10207 }
 0x968   :  { %v6357_v4 = vmul.f32 %v10208_v56, %v6294_v38  ;;  %vm6362_vm5 = vweird.f32 %v10208_v56 }
 0x969   :  { %vm6363_vm7 = vmor %vm6361_vm6, %vm6362_vm5 }
 0x96a   :  { %v6203_v63 = vpop.f32.mrf.mxu1  ;;  %v6358_v60 = vsub.f32 1.0, %v6357_v4 }
 0x96c   :  { %v6359_v61 = vmul.f32 %v10208_v56, %v6358_v60 }
 0x96d   :  { %v6177_v59 = vpop.f32.mrf.mxu3 }
 0x96e   :  { %v6360_v46 = vadd.f32 %v10208_v56, %v6359_v61  ;;  %v6178_v10 = vadd.f32 %v6177_v59, %v3721_v9 }
 0x96f   :  { %v6192_v36 = vpop.f32.mrf.mxu0 }
 0x970   :  { %v6216_v57 = vpop.f32.mrf.mxu2  ;;  %v6364_v3 = vsel %vm6363_vm7, %v10208_v56, %v6360_v46  ;;  %v6191_v8 = vadd.f32 %v6190_v54, %v6178_v10 }
 0x971   :  { %v6369_v43 = vsel %vm6366_vm8, %v6368_v58, %v6364_v3 }
 0x972   :  { %v6205_v24 = vpop.f32.mrf.mxu1  ;;  %v6429_v5 = vsub.f32 %v6369_v43, %v6417_v16  ;;  %v6204_v15 = vadd.f32 %v6203_v63, %v6191_v8 }
 0x974   :  { %v6435_v26 = vand.u32 2147483647, %v6429_v5  ;;  %v6217_v18 = vadd.f32 %v6216_v57, %v6204_v15 }
 0x975   :  { %v6179_v7 = vpop.f32.mrf.mxu3 }
 0x976   :  { %v6444_v19 = vsel %vm404_vm0, %v6435_v26, 0.0 }
 0x977   :  { %v6445_v37 = vadd.f32 %v6444_v19, %v6443_v51 }
 0x978   :  { %v6218_v62 = vpop.f32.mrf.mxu2 }
 0x987   :  { %v6242_v14 = vpop.f32.mrf.mxu0 }
 0x988   :  { %v6255_v6 = vpop.f32.mrf.mxu1 }
 0x98d   :  { %v6229_v21 = vpop.f32.mrf.mxu3 }
 0x98e   :  { %v6230_v0 = vadd.f32 %v6229_v21, %v6217_v18  ;;  %v6268_v27 = vpop.f32.mrf.mxu2 }
 0x98f   :  { %v6244_v42 = vpop.f32.mrf.mxu0 }
 0x990   :  { %v6243_v28 = vadd.f32 %v6242_v14, %v6230_v0  ;;  %v6257_v22 = vpop.f32.mrf.mxu1 }
 0x992   :  { %v6256_v29 = vadd.f32 %v6255_v6, %v6243_v28 }
 0x994   :  { %v6269_v40 = vadd.f32 %v6268_v27, %v6256_v29 }
 0x995   :  { %v6231_v44 = vpop.f32.mrf.mxu3 }
 0x996   :  { %v9406_v31 = vmul.f32 -1.442695, %v6269_v40  ;;  %v6270_v25 = vpop.f32.mrf.mxu2 }
 0x998   :  { %10209 = vpow2.f32 %v9406_v31 }
 0x99e   :  { %v10210_v12 = vpop.eup %10209 }
 0x99f   :  { %v6295_v48 = vadd.f32 1.0, %v10210_v12 }
 0x9a1   :  { %10211 = vrcp.f32 %v6295_v48  ;;  %v6382_v33 = vand.u32 2147483648, %v6295_v48  ;;  %v6380_v30 = vand.u32 2147483647, %v6295_v48  ;;  %vm6376_vm10 = vweird.f32 %v6295_v48 }
 0x9a3   :  { %v6383_v52 = vor.u32 1.1754944e-38, %v6382_v33  ;;  %vm6381_vm12 = vcmp.eq.f32.partialorder %v6380_v30, 8.507059e+37 }
 0x9a7   :  { %v10212_v20 = vpop.eup %10211 }
 0x9a8   :  { %v6372_v47 = vmul.f32 %v10212_v20, %v6295_v48  ;;  %vm6377_vm9 = vweird.f32 %v10212_v20 }
 0x9a9   :  { %vm6378_vm11 = vmor %vm6376_vm10, %vm6377_vm9 }
 0x9aa   :  { %v6373_v32 = vsub.f32 1.0, %v6372_v47 }
 0x9ac   :  { %v6374_v51 = vmul.f32 %v10212_v20, %v6373_v32 }
 0x9ae   :  { %v6375_v17 = vadd.f32 %v10212_v20, %v6374_v51 }
 0x9b0   :  { %v6379_v39 = vsel %vm6378_vm11, %v10212_v20, %v6375_v17 }
 0x9b1   :  { %v6384_v55 = vsel %vm6381_vm12, %v6383_v52, %v6379_v39 }
 0x9b2   :  { %v6395_v34 = vrot.slane %v6384_v55, 6  ;;  %v6430_v53 = vsub.f32 %v6384_v55, %v6418_v2 }
 0x9b4   :  { %v6401_v35 = vsel %vm404_vm0, %v6369_v43, %v6395_v34  ;;  %v6436_v23 = vand.u32 2147483647, %v6430_v53 }
 0x9b5   :  { %6405 = vst [vmem:[%s11354_s20 + $0x8] sm:$0xf] %v6401_v35  ;;  %s10712_s20 = smov [#allocation31]  }
 0x9b6   :  { %v6446_v13 = vsel %vm404_vm0, %v6436_v23, 0.0 }
 0x9b7   :  { %v6447_v41 = vadd.f32 %v6446_v13, %v6445_v37 }
 0x9b9   :  { %6448 = vadd.xlane.f32.xlu2 %v6447_v41 }
 0xa2c   :  { %v6449_v49 = vpop.xlane.xlu2 %6448 }
 0xa2d   :  { %v6450_v45 = vrot.slane %v6449_v49, 4 }
 0xa2f   :  { %v6451_v11 = vadd.f32 %v6450_v45, %v6449_v49 }
 0xa31   :  { %v6452_v38 = vrot.slane %v6451_v11, 2 }
 0xa33   :  { %v6453_v54 = vadd.f32 %v6452_v38, %v6451_v11 }
 0xa35   :  { %v6454_v63 = vrot.slane %v6453_v54, 1 }
 0xa37   :  { %v6455_v56 = vadd.f32 %v6454_v63, %v6453_v54 }
 0xa39   :  { %10135 = vpush %v6455_v56 }
 0xa6a   :  { %s10136_s0 = spop %10135 }
 0xa6b   :  { %s6457_s4 = smul.f32 0.0006510417, %s10136_s0 }
 0xa6d   :  { %6459 = sst [smem:[#allocation31]] %s6457_s4 }
 0xa6e   :  { %6470 = dma.smem_to_hbm %s10712_s20, 16, %s6468_s29, [#allocation4]  }
 0xa6f   :  { %10678 = dma.done.wait [#allocation4], 16  }
 0xa70   :  { %10679 = vsyncadd [#allocation4], 4294967280 }
 0xa71   :  { %6477 = sfence }
 0xa72   :  { %6478 = vsyncpa [#allocation3], 1 }
 0xa73   :  { %6479 = vsyncpa [#allocation6], 1 }
 0xa74   :  { %6480 = vsyncpa [#allocation9], 1 }
 0xa75   :  { %6481 = vsyncpa [#allocation12], 1 }
 0xa76   :  { %6482 = vsyncpa [#allocation15], 1 }
 0xa77   :  { %6483 = vsyncpa [#allocation18], 1 }
 0xa78   :  { %6484 = vsyncpa [#allocation21], 1 }
 0xa79   :  { %6485 = vsyncpa [#allocation24], 1 }
 0xa7a   :  { %6486 = vsyncpa [#allocation27], 1 }
 0xa7b   :  { %6487 = vsyncpa [#allocation30], 1 }
 0xa7c   :  { %6488 = vsyncpa [#allocation4], 1 }

</bundles_post_ra>
